<compile_context>
chip_gen: v6e
topology: v6e:2x2x1
jax: 0.10.0
libtpu: 0.0.40
codegen_flags: <defaults>
</compile_context>

<pallas_src>
import math
import functools

import jax
import jax.numpy as jnp
from jax.experimental import pallas as pl
from jax.experimental.pallas import tpu as pltpu

# ----------------------------------------------------------------------------
# Model configuration (small synthetic sizes; real FLUX uses 3072 / 24 / 128)
# ----------------------------------------------------------------------------
num_single_transformer_blocks = 38
num_transformer_blocks = 19

HIDDEN = 256          # lane-dense (multiple of 128)
HEADS = 2
HEAD_DIM = HIDDEN // HEADS   # 128 — full MXU / vreg lane width
MLP_RATIO = 4
DTYPE = jnp.bfloat16
LN_EPS = 1e-6
RMS_EPS = 1e-6

# Tiling targets (fall back to full extent when the dim is not divisible —
# always legal).  256-multiples in M/N feed the 256-wide MXU on v6e/v7x;
# K tiles of 512 keep double-buffered VMEM use well under the 32 MiB default.
TOK_TILE = 256
TN_T = 256
TK_T = 512
Q_TILE = 256
KV_TILE = 512


def _tile(dim, target):
    return target if dim % target == 0 else dim


# ----------------------------------------------------------------------------
# Pallas kernels
# ----------------------------------------------------------------------------
# ---- generic tiled linear (optional silu prologue / gelu epilogue) ----------
def _linear_kernel(x_ref, w_ref, b_ref, o_ref, acc_ref, *, x_act, out_act):
    kk = pl.program_id(2)

    @pl.when(kk == 0)
    def _():
        acc_ref[...] = jnp.zeros(acc_ref.shape, acc_ref.dtype)

    x = x_ref[...]
    if x_act == "silu":
        x = jax.nn.silu(x.astype(jnp.float32)).astype(x_ref.dtype)
    acc_ref[...] += jnp.dot(x, w_ref[...], preferred_element_type=jnp.float32)

    @pl.when(kk == pl.num_programs(2) - 1)
    def _():
        y = acc_ref[...] + b_ref[...].astype(jnp.float32)
        if out_act == "gelu":
            y = jax.nn.gelu(y, approximate=True)
        o_ref[...] = y.astype(o_ref.dtype)


def linear(x2d, w, b, *, x_act="none", out_act="none"):
    """(M, K) @ (K, N) + b, K-tiled with an f32 accumulator."""
    M, K = x2d.shape
    N = w.shape[1]
    tm, tn, tk = _tile(M, TOK_TILE), _tile(N, TN_T), _tile(K, TK_T)
    grid = (M // tm, N // tn, K // tk)
    kernel = functools.partial(_linear_kernel, x_act=x_act, out_act=out_act)
    return pl.pallas_call(
        kernel,
        out_shape=jax.ShapeDtypeStruct((M, N), x2d.dtype),
        grid=grid,
        in_specs=[
            pl.BlockSpec((tm, tk), lambda i, j, kk: (i, kk)),
            pl.BlockSpec((tk, tn), lambda i, j, kk: (kk, j)),
            pl.BlockSpec((1, tn), lambda i, j, kk: (0, j)),
        ],
        out_specs=pl.BlockSpec((tm, tn), lambda i, j, kk: (i, j)),
        scratch_shapes=[pltpu.VMEM((tm, tn), jnp.float32)],
        compiler_params=pltpu.CompilerParams(
            dimension_semantics=("parallel", "parallel", "arbitrary")),
    )(x2d, w, b.reshape(1, N))


# ---- fused adaLN (LN + modulation) + linear (+ optional gelu) ---------------
def _adaln_linear_kernel(x_ref, sc_ref, sh_ref, w_ref, b_ref, o_ref, *, act):
    x = x_ref[0].astype(jnp.float32)                         # (ts, D)
    mu = jnp.mean(x, axis=-1, keepdims=True)
    var = jnp.mean(jnp.square(x - mu), axis=-1, keepdims=True)
    xn = (x - mu) * jax.lax.rsqrt(var + LN_EPS)
    y = xn * (1.0 + sc_ref[0].astype(jnp.float32)) + sh_ref[0].astype(jnp.float32)
    acc = jnp.dot(y.astype(w_ref.dtype), w_ref[...],
                  preferred_element_type=jnp.float32)
    acc = acc + b_ref[...].astype(jnp.float32)
    if act == "gelu":
        acc = jax.nn.gelu(acc, approximate=True)
    o_ref[0] = acc.astype(o_ref.dtype)


def adaln_linear(x, scale, shift, w, b, *, act="none"):
    """y = (LN(x)*(1+scale)+shift) @ w + b, optional GELU, fused in one kernel.

    LN is over the full channel dim, so K stays resident (D tile) while the
    token and output-channel dims are tiled.
    """
    B, S, D = x.shape
    N = w.shape[1]
    ts, tn = _tile(S, TOK_TILE), _tile(N, TN_T)
    grid = (B, S // ts, N // tn)
    kernel = functools.partial(_adaln_linear_kernel, act=act)
    return pl.pallas_call(
        kernel,
        out_shape=jax.ShapeDtypeStruct((B, S, N), x.dtype),
        grid=grid,
        in_specs=[
            pl.BlockSpec((1, ts, D), lambda bi, si, ni: (bi, si, 0)),
            pl.BlockSpec((1, 1, D), lambda bi, si, ni: (bi, 0, 0)),
            pl.BlockSpec((1, 1, D), lambda bi, si, ni: (bi, 0, 0)),
            pl.BlockSpec((D, tn), lambda bi, si, ni: (0, ni)),
            pl.BlockSpec((1, tn), lambda bi, si, ni: (0, ni)),
        ],
        out_specs=pl.BlockSpec((1, ts, tn), lambda bi, si, ni: (bi, si, ni)),
        compiler_params=pltpu.CompilerParams(
            dimension_semantics=("parallel", "parallel", "parallel")),
    )(x, scale.reshape(B, 1, D), shift.reshape(B, 1, D), w, b.reshape(1, N))


# ---- linear with fused gate * y + residual epilogue -------------------------
def _linear_gate_res_kernel(x_ref, w_ref, b_ref, g_ref, r_ref, o_ref, acc_ref):
    kk = pl.program_id(3)

    @pl.when(kk == 0)
    def _():
        acc_ref[...] = jnp.zeros(acc_ref.shape, acc_ref.dtype)

    acc_ref[...] += jnp.dot(x_ref[0], w_ref[...], preferred_element_type=jnp.float32)

    @pl.when(kk == pl.num_programs(3) - 1)
    def _():
        y = acc_ref[...] + b_ref[...].astype(jnp.float32)
        o_ref[0] = (r_ref[0].astype(jnp.float32)
                    + g_ref[0].astype(jnp.float32) * y).astype(o_ref.dtype)


def linear_gate_residual(x, w, b, gate, residual):
    """out = residual + gate[:, None, :] * (x @ w + b)."""
    B, S, K = x.shape
    N = w.shape[1]
    ts, tn, tk = _tile(S, TOK_TILE), _tile(N, TN_T), _tile(K, TK_T)
    grid = (B, S // ts, N // tn, K // tk)
    return pl.pallas_call(
        _linear_gate_res_kernel,
        out_shape=jax.ShapeDtypeStruct((B, S, N), residual.dtype),
        grid=grid,
        in_specs=[
            pl.BlockSpec((1, ts, tk), lambda bi, si, ni, ki: (bi, si, ki)),
            pl.BlockSpec((tk, tn), lambda bi, si, ni, ki: (ki, ni)),
            pl.BlockSpec((1, tn), lambda bi, si, ni, ki: (0, ni)),
            pl.BlockSpec((1, 1, tn), lambda bi, si, ni, ki: (bi, 0, ni)),
            pl.BlockSpec((1, ts, tn), lambda bi, si, ni, ki: (bi, si, ni)),
        ],
        out_specs=pl.BlockSpec((1, ts, tn), lambda bi, si, ni, ki: (bi, si, ni)),
        scratch_shapes=[pltpu.VMEM((ts, tn), jnp.float32)],
        compiler_params=pltpu.CompilerParams(
            dimension_semantics=("parallel", "parallel", "parallel", "arbitrary")),
    )(x, w, b.reshape(1, N), gate.reshape(B, 1, N), residual)


# ---- dual-input linear with gate+residual (replaces cat([attn, mlp])@W) ----
def _dual_linear_gate_res_kernel(x1_ref, w1_ref, x2_ref, w2_ref, b_ref, g_ref,
                                 r_ref, o_ref, acc_ref, *, nk1):
    kk = pl.program_id(3)

    @pl.when(kk == 0)
    def _():
        acc_ref[...] = jnp.zeros(acc_ref.shape, acc_ref.dtype)

    @pl.when(kk < nk1)
    def _():
        acc_ref[...] += jnp.dot(x1_ref[0], w1_ref[...],
                                preferred_element_type=jnp.float32)

    @pl.when(kk >= nk1)
    def _():
        acc_ref[...] += jnp.dot(x2_ref[0], w2_ref[...],
                                preferred_element_type=jnp.float32)

    @pl.when(kk == pl.num_programs(3) - 1)
    def _():
        y = acc_ref[...] + b_ref[...].astype(jnp.float32)
        o_ref[0] = (r_ref[0].astype(jnp.float32)
                    + g_ref[0].astype(jnp.float32) * y).astype(o_ref.dtype)


def dual_linear_gate_residual(x1, w1, x2, w2, b, gate, residual):
    """out = residual + gate * (x1 @ w1 + x2 @ w2 + b)   (no HBM concat)."""
    B, S, K1 = x1.shape
    K2 = x2.shape[-1]
    N = w1.shape[1]
    ts, tn = _tile(S, TOK_TILE), _tile(N, TN_T)
    tk1, tk2 = _tile(K1, TK_T), _tile(K2, TK_T)
    nk1, nk2 = K1 // tk1, K2 // tk2
    grid = (B, S // ts, N // tn, nk1 + nk2)
    kernel = functools.partial(_dual_linear_gate_res_kernel, nk1=nk1)
    return pl.pallas_call(
        kernel,
        out_shape=jax.ShapeDtypeStruct((B, S, N), residual.dtype),
        grid=grid,
        in_specs=[
            pl.BlockSpec((1, ts, tk1),
                         lambda bi, si, ni, ki: (bi, si, jnp.minimum(ki, nk1 - 1))),
            pl.BlockSpec((tk1, tn),
                         lambda bi, si, ni, ki: (jnp.minimum(ki, nk1 - 1), ni)),
            pl.BlockSpec((1, ts, tk2),
                         lambda bi, si, ni, ki: (bi, si, jnp.maximum(ki - nk1, 0))),
            pl.BlockSpec((tk2, tn),
                         lambda bi, si, ni, ki: (jnp.maximum(ki - nk1, 0), ni)),
            pl.BlockSpec((1, tn), lambda bi, si, ni, ki: (0, ni)),
            pl.BlockSpec((1, 1, tn), lambda bi, si, ni, ki: (bi, 0, ni)),
            pl.BlockSpec((1, ts, tn), lambda bi, si, ni, ki: (bi, si, ni)),
        ],
        out_specs=pl.BlockSpec((1, ts, tn), lambda bi, si, ni, ki: (bi, si, ni)),
        scratch_shapes=[pltpu.VMEM((ts, tn), jnp.float32)],
        compiler_params=pltpu.CompilerParams(
            dimension_semantics=("parallel", "parallel", "parallel", "arbitrary")),
    )(x1, w1, x2, w2, b.reshape(1, N), gate.reshape(B, 1, N), residual)


# ---- fused RMSNorm(q/k) + rotary embedding ----------------------------------
def _qk_norm_rope_kernel(q_ref, k_ref, a_ref, b_ref, qw_ref, kw_ref, qo_ref, ko_ref):
    a = a_ref[0]                                   # (ts, Dh) f32  (cos-like)
    bc = b_ref[0]                                  # (ts, Dh) f32  (sin-like)
    lane = jax.lax.broadcasted_iota(jnp.int32, a.shape, 1)
    is_even = (lane % 2) == 0
    d = a.shape[-1]

    def _prep(x_ref, w_ref, o_ref):
        x = x_ref[0, 0].astype(jnp.float32)        # (ts, Dh)
        var = jnp.mean(x * x, axis=-1, keepdims=True)
        xn = x * jax.lax.rsqrt(var + RMS_EPS) * w_ref[...].astype(jnp.float32)
        # swap adjacent lanes (x0,x1,x2,x3,...) -> (x1,x0,x3,x2,...) via XLU rolls
        swapped = jnp.where(is_even,
                            pltpu.roll(xn, shift=d - 1, axis=1),
                            pltpu.roll(xn, shift=1, axis=1))
        o_ref[0, 0] = (a * xn + bc * swapped).astype(o_ref.dtype)

    _prep(q_ref, qw_ref, qo_ref)
    _prep(k_ref, kw_ref, ko_ref)


def qk_norm_rope(q, k, q_w, k_w, a, b):
    """q, k: (B, H, S, Dh); a, b: (B, S, Dh) rotary coefficients (f32)."""
    B, H, S, Dh = q.shape
    ts = _tile(S, TOK_TILE)
    grid = (B, H, S // ts)
    qk_spec = pl.BlockSpec((1, 1, ts, Dh), lambda bi, hi, si: (bi, hi, si, 0))
    ab_spec = pl.BlockSpec((1, ts, Dh), lambda bi, hi, si: (bi, si, 0))
    w_spec = pl.BlockSpec((1, Dh), lambda bi, hi, si: (0, 0))
    qo, ko = pl.pallas_call(
        _qk_norm_rope_kernel,
        out_shape=(jax.ShapeDtypeStruct(q.shape, q.dtype),
                   jax.ShapeDtypeStruct(k.shape, k.dtype)),
        grid=grid,
        in_specs=[qk_spec, qk_spec, ab_spec, ab_spec, w_spec, w_spec],
        out_specs=(qk_spec, qk_spec),
        compiler_params=pltpu.CompilerParams(
            dimension_semantics=("parallel", "parallel", "parallel")),
    )(q, k, a, b, q_w.reshape(1, Dh), k_w.reshape(1, Dh))
    return qo, ko


# ---- flash attention (online softmax, KV-blocked) ---------------------------
def _flash_attn_kernel(q_ref, k_ref, v_ref, o_ref, m_sc, l_sc, acc_sc, *, scale):
    kv = pl.program_id(3)

    @pl.when(kv == 0)
    def _():
        m_sc[...] = jnp.full(m_sc.shape, -jnp.inf, m_sc.dtype)
        l_sc[...] = jnp.zeros(l_sc.shape, l_sc.dtype)
        acc_sc[...] = jnp.zeros(acc_sc.shape, acc_sc.dtype)

    q = q_ref[0, 0]                                   # (tq, Dh) bf16
    k = k_ref[0, 0]                                   # (tk, Dh) bf16
    v = v_ref[0, 0]                                   # (tk, Dh) bf16
    s = jax.lax.dot_general(q, k, (((1,), (1,)), ((), ())),
                            preferred_element_type=jnp.float32) * scale
    m_prev = m_sc[...]
    m_new = jnp.maximum(m_prev, jnp.max(s, axis=-1, keepdims=True))
    alpha = jnp.exp(m_prev - m_new)
    p = jnp.exp(s - m_new)
    l_sc[...] = alpha * l_sc[...] + jnp.sum(p, axis=-1, keepdims=True)
    acc_sc[...] = alpha * acc_sc[...] + jnp.dot(p.astype(v.dtype), v,
                                                preferred_element_type=jnp.float32)
    m_sc[...] = m_new

    @pl.when(kv == pl.num_programs(3) - 1)
    def _():
        o_ref[0, 0] = (acc_sc[...]
                       * pl.reciprocal(l_sc[...], approx=True)).astype(o_ref.dtype)


def flash_attention(q, k, v):
    """q, k, v: (B, H, S, Dh) bf16 -> softmax(q k^T / sqrt(Dh)) v."""
    B, H, S, Dh = q.shape
    tq, tk = _tile(S, Q_TILE), _tile(S, KV_TILE)
    grid = (B, H, S // tq, S // tk)
    kernel = functools.partial(_flash_attn_kernel, scale=1.0 / math.sqrt(Dh))
    return pl.pallas_call(
        kernel,
        out_shape=jax.ShapeDtypeStruct(q.shape, q.dtype),
        grid=grid,
        in_specs=[
            pl.BlockSpec((1, 1, tq, Dh), lambda bi, hi, qi, ki: (bi, hi, qi, 0)),
            pl.BlockSpec((1, 1, tk, Dh), lambda bi, hi, qi, ki: (bi, hi, ki, 0)),
            pl.BlockSpec((1, 1, tk, Dh), lambda bi, hi, qi, ki: (bi, hi, ki, 0)),
        ],
        out_specs=pl.BlockSpec((1, 1, tq, Dh), lambda bi, hi, qi, ki: (bi, hi, qi, 0)),
        scratch_shapes=[pltpu.VMEM((tq, 1), jnp.float32),
                        pltpu.VMEM((tq, 1), jnp.float32),
                        pltpu.VMEM((tq, Dh), jnp.float32)],
        compiler_params=pltpu.CompilerParams(
            dimension_semantics=("parallel", "parallel", "parallel", "arbitrary")),
    )(q, k, v)


# ----------------------------------------------------------------------------
# Non-kernel helpers (glue)
# ----------------------------------------------------------------------------
def split_heads(qkv, B, S):
    q, k, v = jnp.split(qkv, 3, axis=-1)

    def r(t):
        return t.reshape(B, S, HEADS, HEAD_DIM).transpose(0, 2, 1, 3)

    return r(q), r(k), r(v)


def rope_coeffs(rot, seq_len):
    """rot: (B, S_pad, Dh//2, 2, 2) rotation matrices -> lane-wise (A, B) coeffs
    such that rope(x) = A * x + B * pair_swap(x)."""
    rot = rot[:, :seq_len].astype(jnp.float32)
    B, S, half = rot.shape[0], rot.shape[1], rot.shape[2]
    a = jnp.stack([rot[..., 0, 0], rot[..., 1, 1]], axis=-1).reshape(B, S, 2 * half)
    b = jnp.stack([rot[..., 0, 1], rot[..., 1, 0]], axis=-1).reshape(B, S, 2 * half)
    return a, b


def pad_tensor(x, multiple, dim):
    if x is None:
        return None
    size = x.shape[dim]
    pad = (-size) % multiple
    if pad == 0:
        return x
    widths = [(0, 0)] * x.ndim
    widths[dim] = (0, pad)
    return jnp.pad(x, widths)


# ----------------------------------------------------------------------------
# Caching buffers (para-attn style first-block residual cache)
# ----------------------------------------------------------------------------
_BUFFERS = {}


def set_buffer(name, value):
    _BUFFERS[name] = value


def get_buffer(name):
    return _BUFFERS.get(name)


def get_can_use_cache(first_hidden_states_residual, threshold, parallelized=False):
    prev = get_buffer("first_hidden_states_residual")
    if prev is None or prev.shape != first_hidden_states_residual.shape:
        return False
    a = prev.astype(jnp.float32)
    b = first_hidden_states_residual.astype(jnp.float32)
    rel = jnp.mean(jnp.abs(a - b)) / jnp.mean(jnp.abs(a))
    # TODO(synk): this bool() forces a device->host sync (matches the dynamic
    # Python branch of the PyTorch reference; only hit when a cache exists).
    return bool(rel < threshold)


def apply_prev_hidden_states_residual(hidden_states, encoder_hidden_states):
    hidden_states = hidden_states + get_buffer("hidden_states_residual")
    encoder_hidden_states = encoder_hidden_states + get_buffer("encoder_hidden_states_residual")
    return hidden_states, encoder_hidden_states


# ----------------------------------------------------------------------------
# Parameter initialization (deterministic, in-script)
# ----------------------------------------------------------------------------
def _init_linear(key, in_dim, out_dim, scale=0.02):
    w = (jax.random.normal(key, (in_dim, out_dim), jnp.float32) * scale).astype(DTYPE)
    b = jnp.zeros((out_dim,), DTYPE)
    return w, b


def init_dual_block(key):
    ks = jax.random.split(key, 10)
    p = {}
    p["norm1_w"], p["norm1_b"] = _init_linear(ks[0], HIDDEN, 6 * HIDDEN)
    p["norm1_ctx_w"], p["norm1_ctx_b"] = _init_linear(ks[1], HIDDEN, 6 * HIDDEN)
    p["qkv_w"], p["qkv_b"] = _init_linear(ks[2], HIDDEN, 3 * HIDDEN)
    p["qkv_ctx_w"], p["qkv_ctx_b"] = _init_linear(ks[3], HIDDEN, 3 * HIDDEN)
    p["to_out_w"], p["to_out_b"] = _init_linear(ks[4], HIDDEN, HIDDEN)
    p["to_add_out_w"], p["to_add_out_b"] = _init_linear(ks[5], HIDDEN, HIDDEN)
    p["ff1_w"], p["ff1_b"] = _init_linear(ks[6], HIDDEN, MLP_RATIO * HIDDEN)
    p["ff2_w"], p["ff2_b"] = _init_linear(ks[7], MLP_RATIO * HIDDEN, HIDDEN)
    p["ffc1_w"], p["ffc1_b"] = _init_linear(ks[8], HIDDEN, MLP_RATIO * HIDDEN)
    p["ffc2_w"], p["ffc2_b"] = _init_linear(ks[9], MLP_RATIO * HIDDEN, HIDDEN)
    p["q_norm"] = jnp.ones((HEAD_DIM,), DTYPE)
    p["k_norm"] = jnp.ones((HEAD_DIM,), DTYPE)
    p["q_norm_ctx"] = jnp.ones((HEAD_DIM,), DTYPE)
    p["k_norm_ctx"] = jnp.ones((HEAD_DIM,), DTYPE)
    return p


def init_single_block(key):
    ks = jax.random.split(key, 4)
    p = {}
    p["norm_w"], p["norm_b"] = _init_linear(ks[0], HIDDEN, 3 * HIDDEN)
    p["qkv_w"], p["qkv_b"] = _init_linear(ks[1], HIDDEN, 3 * HIDDEN)
    p["mlp_w"], p["mlp_b"] = _init_linear(ks[2], HIDDEN, MLP_RATIO * HIDDEN)
    w_full, b_full = _init_linear(ks[3], HIDDEN + MLP_RATIO * HIDDEN, HIDDEN)
    p["proj_attn_w"] = w_full[:HIDDEN]          # pre-split: no concat at runtime
    p["proj_mlp_w"] = w_full[HIDDEN:]
    p["proj_out_b"] = b_full
    p["q_norm"] = jnp.ones((HEAD_DIM,), DTYPE)
    p["k_norm"] = jnp.ones((HEAD_DIM,), DTYPE)
    return p


# ----------------------------------------------------------------------------
# Block forward functions (jitted once per block *type*, params as args)
# ----------------------------------------------------------------------------
def _dual_block_forward(p, hidden_states, encoder_hidden_states, temb,
                        rotary_emb_img, rotary_emb_txt):
    B, I, D = hidden_states.shape
    T = encoder_hidden_states.shape[1]

    # adaLN modulation (silu fused as matmul prologue)
    mod = linear(temb, p["norm1_w"], p["norm1_b"], x_act="silu")
    (shift_msa, scale_msa, gate_msa,
     shift_mlp, scale_mlp, gate_mlp) = jnp.split(mod, 6, axis=-1)
    mod_c = linear(temb, p["norm1_ctx_w"], p["norm1_ctx_b"], x_act="silu")
    (c_shift_msa, c_scale_msa, c_gate_msa,
     c_shift_mlp, c_scale_mlp, c_gate_mlp) = jnp.split(mod_c, 6, axis=-1)

    # fused adaLN + QKV projections
    qkv_h = adaln_linear(hidden_states, scale_msa, shift_msa, p["qkv_w"], p["qkv_b"])
    qkv_e = adaln_linear(encoder_hidden_states, c_scale_msa, c_shift_msa,
                         p["qkv_ctx_w"], p["qkv_ctx_b"])
    qh, kh, vh = split_heads(qkv_h, B, I)
    qe, ke, ve = split_heads(qkv_e, B, T)

    a_img, b_img = rope_coeffs(rotary_emb_img, I)
    a_txt, b_txt = rope_coeffs(rotary_emb_txt, T)

    qh, kh = qk_norm_rope(qh, kh, p["q_norm"], p["k_norm"], a_img, b_img)
    qe, ke = qk_norm_rope(qe, ke, p["q_norm_ctx"], p["k_norm_ctx"], a_txt, b_txt)

    q = jnp.concatenate([qe, qh], axis=2)
    k = jnp.concatenate([ke, kh], axis=2)
    v = jnp.concatenate([ve, vh], axis=2)

    attn = flash_attention(q, k, v)                        # (B, H, T+I, Dh)
    attn = attn.transpose(0, 2, 1, 3).reshape(B, T + I, D)
    ctx_attn, img_attn = attn[:, :T], attn[:, T:]

    # attention out-proj with fused gate * y + residual
    hidden_states = linear_gate_residual(
        img_attn, p["to_out_w"], p["to_out_b"], gate_msa, hidden_states)
    encoder_hidden_states = linear_gate_residual(
        ctx_attn, p["to_add_out_w"], p["to_add_out_b"], c_gate_msa, encoder_hidden_states)

    # MLP: fused adaLN + ff1 + gelu, then ff2 with fused gate + residual
    ff = adaln_linear(hidden_states, scale_mlp, shift_mlp,
                      p["ff1_w"], p["ff1_b"], act="gelu")
    hidden_states = linear_gate_residual(ff, p["ff2_w"], p["ff2_b"],
                                         gate_mlp, hidden_states)

    ffc = adaln_linear(encoder_hidden_states, c_scale_mlp, c_shift_mlp,
                       p["ffc1_w"], p["ffc1_b"], act="gelu")
    encoder_hidden_states = linear_gate_residual(ffc, p["ffc2_w"], p["ffc2_b"],
                                                 c_gate_mlp, encoder_hidden_states)

    return hidden_states, encoder_hidden_states


def _single_block_forward(p, x, temb, rotary_emb_single):
    B, S, D = x.shape
    residual = x

    mod = linear(temb, p["norm_w"], p["norm_b"], x_act="silu")
    shift_msa, scale_msa, gate_msa = jnp.split(mod, 3, axis=-1)

    qkv = adaln_linear(x, scale_msa, shift_msa, p["qkv_w"], p["qkv_b"])
    mlp = adaln_linear(x, scale_msa, shift_msa, p["mlp_w"], p["mlp_b"], act="gelu")

    q, k, v = split_heads(qkv, B, S)
    a_s, b_s = rope_coeffs(rotary_emb_single, S)
    q, k = qk_norm_rope(q, k, p["q_norm"], p["k_norm"], a_s, b_s)

    attn = flash_attention(q, k, v).transpose(0, 2, 1, 3).reshape(B, S, D)

    # out = residual + gate * (attn @ W_attn + mlp @ W_mlp + b)  — no concat
    return dual_linear_gate_residual(attn, p["proj_attn_w"], mlp, p["proj_mlp_w"],
                                     p["proj_out_b"], gate_msa, residual)


_dual_block_forward_jit = jax.jit(_dual_block_forward)
_single_block_forward_jit = jax.jit(_single_block_forward)


# ----------------------------------------------------------------------------
# Inner model `m` (replaces nunchaku quantized FLUX model)
# ----------------------------------------------------------------------------
class InnerFluxModel:
    def __init__(self, key):
        kd, ks = jax.random.split(key)
        self.blocks = [init_dual_block(jax.random.fold_in(kd, i))
                       for i in range(num_transformer_blocks)]
        self.single_blocks = [init_single_block(jax.random.fold_in(ks, i))
                              for i in range(num_single_transformer_blocks)]

    def forward_layer(self, idx, hidden_states, encoder_hidden_states, temb,
                      rotary_emb_img, rotary_emb_txt):
        return _dual_block_forward_jit(self.blocks[idx], hidden_states,
                                       encoder_hidden_states, temb,
                                       rotary_emb_img, rotary_emb_txt)

    def forward_single_layer(self, idx, hidden_states, temb, rotary_emb_single):
        return _single_block_forward_jit(self.single_blocks[idx], hidden_states,
                                         temb, rotary_emb_single)


# ----------------------------------------------------------------------------
# NunchakuFluxTransformerBlocks (JAX port of the PyTorch module's forward)
# ----------------------------------------------------------------------------
class NunchakuFluxTransformerBlocks:
    def __init__(self, m, residual_diff_threshold=0.06,
                 return_hidden_states_first=False, return_hidden_states_only=False):
        self.m = m
        self.dtype = DTYPE
        self.residual_diff_threshold = residual_diff_threshold
        self.return_hidden_states_first = return_hidden_states_first
        self.return_hidden_states_only = return_hidden_states_only

    def call_remaining_transformer_blocks(self, hidden_states, encoder_hidden_states,
                                          temb, rotary_emb_img, rotary_emb_txt,
                                          rotary_emb_single):
        original_hidden_states = hidden_states
        original_encoder_hidden_states = encoder_hidden_states
        for idx in range(1, num_transformer_blocks):
            hidden_states, encoder_hidden_states = self.m.forward_layer(
                idx, hidden_states, encoder_hidden_states, temb,
                rotary_emb_img, rotary_emb_txt)
        cat_hidden_states = jnp.concatenate([encoder_hidden_states, hidden_states], axis=1)
        for idx in range(num_single_transformer_blocks):
            cat_hidden_states = self.m.forward_single_layer(
                idx, cat_hidden_states, temb, rotary_emb_single)
        T = encoder_hidden_states.shape[1]
        final_encoder_hidden_states = cat_hidden_states[:, :T]
        final_hidden_states = cat_hidden_states[:, T:]
        hidden_states_residual = final_hidden_states - original_hidden_states
        encoder_hidden_states_residual = final_encoder_hidden_states - original_encoder_hidden_states
        return (final_hidden_states, final_encoder_hidden_states,
                hidden_states_residual, encoder_hidden_states_residual)

    def __call__(self, hidden_states, temb, encoder_hidden_states, image_rotary_emb,
                 joint_attention_kwargs=None):
        batch_size = hidden_states.shape[0]
        txt_tokens = encoder_hidden_states.shape[1]
        img_tokens = hidden_states.shape[1]
        original_dtype = hidden_states.dtype

        hidden_states = hidden_states.astype(self.dtype)
        encoder_hidden_states = encoder_hidden_states.astype(self.dtype)
        temb = temb.astype(self.dtype)

        assert image_rotary_emb.ndim == 6
        assert image_rotary_emb.shape[0] == 1
        assert image_rotary_emb.shape[1] == 1
        assert image_rotary_emb.shape[2] == batch_size * (txt_tokens + img_tokens)
        image_rotary_emb = image_rotary_emb.reshape(
            (batch_size, txt_tokens + img_tokens) + image_rotary_emb.shape[3:])
        rotary_emb_txt = image_rotary_emb[:, :txt_tokens]
        rotary_emb_img = image_rotary_emb[:, txt_tokens:]
        rotary_emb_single = image_rotary_emb
        rotary_emb_txt = pad_tensor(rotary_emb_txt, 256, dim=1)
        rotary_emb_img = pad_tensor(rotary_emb_img, 256, dim=1)
        rotary_emb_single = pad_tensor(rotary_emb_single, 256, dim=1)

        if self.residual_diff_threshold <= 0.0:
            for idx in range(num_transformer_blocks):
                hidden_states, encoder_hidden_states = self.m.forward_layer(
                    idx, hidden_states, encoder_hidden_states, temb,
                    rotary_emb_img, rotary_emb_txt)
            cat_hidden_states = jnp.concatenate(
                [encoder_hidden_states, hidden_states], axis=1)
            for idx in range(num_single_transformer_blocks):
                cat_hidden_states = self.m.forward_single_layer(
                    idx, cat_hidden_states, temb, rotary_emb_single)
            encoder_hidden_states = cat_hidden_states[:, :txt_tokens]
            hidden_states = cat_hidden_states[:, txt_tokens:]
        else:
            original_hidden_states = hidden_states
            hidden_states, encoder_hidden_states = self.m.forward_layer(
                0, hidden_states, encoder_hidden_states, temb,
                rotary_emb_img, rotary_emb_txt)
            first_hidden_states_residual = hidden_states - original_hidden_states

            parallelized = False
            can_use_cache = get_can_use_cache(
                first_hidden_states_residual,
                threshold=self.residual_diff_threshold,
                parallelized=parallelized)
            # TODO(synk): torch._dynamo.graph_break() has no JAX equivalent (no-op).
            if can_use_cache:
                hidden_states, encoder_hidden_states = apply_prev_hidden_states_residual(
                    hidden_states, encoder_hidden_states)
            else:
                set_buffer("first_hidden_states_residual", first_hidden_states_residual)
                (hidden_states, encoder_hidden_states,
                 hidden_states_residual, encoder_hidden_states_residual) = \
                    self.call_remaining_transformer_blocks(
                        hidden_states, encoder_hidden_states, temb,
                        rotary_emb_img, rotary_emb_txt, rotary_emb_single)
                set_buffer("hidden_states_residual", hidden_states_residual)
                set_buffer("encoder_hidden_states_residual", encoder_hidden_states_residual)

        encoder_hidden_states = encoder_hidden_states.astype(original_dtype)
        hidden_states = hidden_states.astype(original_dtype)

        if self.return_hidden_states_only:
            return hidden_states
        elif self.return_hidden_states_first:
            return (hidden_states, encoder_hidden_states)
        else:
            return (encoder_hidden_states, hidden_states)


# ----------------------------------------------------------------------------
# Main
# ----------------------------------------------------------------------------
if __name__ == "__main__":
    key = jax.random.PRNGKey(0)
    k_model, k_h, k_e, k_t = jax.random.split(key, 4)

    B, TXT, IMG = 2, 8, 16
    hidden_states = jax.random.normal(k_h, (B, IMG, HIDDEN), jnp.float32)
    encoder_hidden_states = jax.random.normal(k_e, (B, TXT, HIDDEN), jnp.float32)
    temb = jax.random.normal(k_t, (B, HIDDEN), jnp.float32)

    # FLUX-style rotary rotation matrices: (1, 1, B*(TXT+IMG), HEAD_DIM//2, 2, 2)
    total = B * (TXT + IMG)
    half = HEAD_DIM // 2
    pos = jnp.arange(total, dtype=jnp.float32)
    omega = 1.0 / (10000.0 ** (jnp.arange(half, dtype=jnp.float32) / half))
    ang = pos[:, None] * omega[None, :]
    rot = jnp.stack([jnp.cos(ang), -jnp.sin(ang), jnp.sin(ang), jnp.cos(ang)],
                    axis=-1).reshape(total, half, 2, 2)
    image_rotary_emb = rot[None, None].astype(jnp.float32)

    model = NunchakuFluxTransformerBlocks(InnerFluxModel(k_model))

    enc_out, hid_out = model(hidden_states, temb, encoder_hidden_states, image_rotary_emb)
    jax.block_until_ready((enc_out, hid_out))

    assert enc_out.shape == (B, TXT, HIDDEN) and hid_out.shape == (B, IMG, HIDDEN)
    assert enc_out.dtype == jnp.float32 and hid_out.dtype == jnp.float32
    assert bool(jnp.all(jnp.isfinite(enc_out))) and bool(jnp.all(jnp.isfinite(hid_out)))
    print("KERNEL_OK")
</pallas_src>

<mosaic_0001>
module attributes {stable_mosaic.version = 11 : i64} {
  func.func @_linear_kernel(%arg0: i32, %arg1: i32, %arg2: i32, %arg3: memref<2x256xbf16, #tpu.memory_space<vmem>>, %arg4: memref<256x256xbf16, #tpu.memory_space<vmem>>, %arg5: memref<1x256xbf16, #tpu.memory_space<vmem>>, %arg6: memref<2x256xbf16, #tpu.memory_space<vmem>>, %arg7: memref<2x256xf32, #tpu.memory_space<vmem>>) attributes {dimension_semantics = [#tpu.dimension_semantics<parallel>, #tpu.dimension_semantics<parallel>, #tpu.dimension_semantics<arbitrary>], iteration_bounds = array<i64: 1, 6, 1>, scalar_prefetch = 0 : i64, scratch_operands = 1 : i64, tpu.core_type = #tpu.core_type<tc>, window_params = [{transform_indices = @transform_0, window_bounds = array<i64: 2, 256>}, {transform_indices = @transform_1, window_bounds = array<i64: 256, 256>}, {transform_indices = @transform_2, window_bounds = array<i64: 1, 256>}, {transform_indices = @transform_3, window_bounds = array<i64: 2, 256>}]} {
    %c0_i32 = arith.constant 0 : i32
    %0 = arith.cmpi eq, %arg2, %c0_i32 : i32
    %1 = arith.extui %0 : i1 to i32
    %c0_i32_0 = arith.constant 0 : i32
    %2 = arith.cmpi ne, %1, %c0_i32_0 : i32
    scf.if %2 {
      %cst_11 = arith.constant 0.000000e+00 : f32
      %20 = vector.broadcast %cst_11 : f32 to vector<2x256xf32>
      %c0_12 = arith.constant 0 : index
      %c0_13 = arith.constant 0 : index
      %21 = vector.load %arg7[%c0_12, %c0_13] : memref<2x256xf32, #tpu.memory_space<vmem>>, vector<2x256xf32>
      tpu.vector_store %arg7[%c0_12, %c0_13], %20 {strides = array<i32>} : memref<2x256xf32, #tpu.memory_space<vmem>>, vector<2x256xf32>,
    } else {
    }
    %c0 = arith.constant 0 : index
    %c0_1 = arith.constant 0 : index
    %3 = vector.load %arg3[%c0, %c0_1] : memref<2x256xbf16, #tpu.memory_space<vmem>>, vector<2x256xbf16>
    %4 = arith.extf %3 : vector<2x256xbf16> to vector<2x256xf32>
    %5 = arith.negf %4 : vector<2x256xf32>
    %6 = math.exp %5 : vector<2x256xf32>
    %cst = arith.constant 1.000000e+00 : f32
    %7 = vector.broadcast %cst : f32 to vector<2x256xf32>
    %8 = arith.addf %7, %6 : vector<2x256xf32>
    %9 = arith.divf %7, %8 : vector<2x256xf32>
    %10 = arith.mulf %4, %9 : vector<2x256xf32>
    %11 = arith.truncf %10 : vector<2x256xf32> to vector<2x256xbf16>
    %c0_2 = arith.constant 0 : index
    %c0_3 = arith.constant 0 : index
    %12 = vector.load %arg7[%c0_2, %c0_3] : memref<2x256xf32, #tpu.memory_space<vmem>>, vector<2x256xf32>
    %c0_4 = arith.constant 0 : index
    %c0_5 = arith.constant 0 : index
    %13 = vector.load %arg4[%c0_4, %c0_5] : memref<256x256xbf16, #tpu.memory_space<vmem>>, vector<256x256xbf16>
    %cst_6 = arith.constant dense<0.000000e+00> : vector<2x256xf32>
    %14 = tpu.matmul %11, %13, %cst_6 {dimension_numbers = #tpu.dot_dimension_numbers<[1], [0], [0], [1], [0, 0, 1, 1], [], []>} : vector<2x256xbf16>, vector<256x256xbf16>, vector<2x256xf32> -> vector<2x256xf32>
    %15 = arith.addf %12, %14 : vector<2x256xf32>
    %c0_7 = arith.constant 0 : index
    %c0_8 = arith.constant 0 : index
    %16 = vector.load %arg7[%c0_7, %c0_8] : memref<2x256xf32, #tpu.memory_space<vmem>>, vector<2x256xf32>
    tpu.vector_store %arg7[%c0_7, %c0_8], %15 {strides = array<i32>} : memref<2x256xf32, #tpu.memory_space<vmem>>, vector<2x256xf32>,
    %c0_i32_9 = arith.constant 0 : i32
    %17 = arith.cmpi eq, %arg2, %c0_i32_9 : i32
    %18 = arith.extui %17 : i1 to i32
    %c0_i32_10 = arith.constant 0 : i32
    %19 = arith.cmpi ne, %18, %c0_i32_10 : i32
    scf.if %19 {
      %c0_11 = arith.constant 0 : index
      %c0_12 = arith.constant 0 : index
      %20 = vector.load %arg7[%c0_11, %c0_12] : memref<2x256xf32, #tpu.memory_space<vmem>>, vector<2x256xf32>
      %c0_13 = arith.constant 0 : index
      %c0_14 = arith.constant 0 : index
      %21 = vector.load %arg5[%c0_13, %c0_14] : memref<1x256xbf16, #tpu.memory_space<vmem>>, vector<1x256xbf16>
      %22 = arith.extf %21 : vector<1x256xbf16> to vector<1x256xf32>
      %23 = vector.broadcast %22 : vector<1x256xf32> to vector<2x256xf32>
      %24 = arith.addf %20, %23 : vector<2x256xf32>
      %25 = arith.truncf %24 : vector<2x256xf32> to vector<2x256xbf16>
      %c0_15 = arith.constant 0 : index
      %c0_16 = arith.constant 0 : index
      %26 = vector.load %arg6[%c0_15, %c0_16] : memref<2x256xbf16, #tpu.memory_space<vmem>>, vector<2x256xbf16>
      tpu.vector_store %arg6[%c0_15, %c0_16], %25 {strides = array<i32>} : memref<2x256xbf16, #tpu.memory_space<vmem>>, vector<2x256xbf16>,
    } else {
    }
    return
  }
  func.func @transform_0(%arg0: i32, %arg1: i32, %arg2: i32) -> (i32, i32) {
    %c0_i32 = arith.constant 0 : i32
    return %arg0, %arg2 : i32, i32
  }
  func.func @transform_1(%arg0: i32, %arg1: i32, %arg2: i32) -> (i32, i32) {
    %c0_i32 = arith.constant 0 : i32
    return %arg2, %arg1 : i32, i32
  }
  func.func @transform_2(%arg0: i32, %arg1: i32, %arg2: i32) -> (i32, i32) {
    %c0_i32 = arith.constant 0 : i32
    %c0_i32_0 = arith.constant 0 : i32
    return %c0_i32, %arg1 : i32, i32
  }
  func.func @transform_3(%arg0: i32, %arg1: i32, %arg2: i32) -> (i32, i32) {
    %c0_i32 = arith.constant 0 : i32
    return %arg0, %arg1 : i32, i32
  }
}

module attributes {stable_mosaic.version = 11 : i64} {
  func.func @_adaln_linear_kernel(%arg0: i32, %arg1: i32, %arg2: i32, %arg3: memref<1x16x256xbf16, #tpu.memory_space<vmem>>, %arg4: memref<1x1x256xbf16, #tpu.memory_space<vmem>>, %arg5: memref<1x1x256xbf16, #tpu.memory_space<vmem>>, %arg6: memref<256x256xbf16, #tpu.memory_space<vmem>>, %arg7: memref<1x256xbf16, #tpu.memory_space<vmem>>, %arg8: memref<1x16x256xbf16, #tpu.memory_space<vmem>>) attributes {dimension_semantics = [#tpu.dimension_semantics<parallel>, #tpu.dimension_semantics<parallel>, #tpu.dimension_semantics<parallel>], iteration_bounds = array<i64: 2, 1, 3>, scalar_prefetch = 0 : i64, scratch_operands = 0 : i64, tpu.core_type = #tpu.core_type<tc>, window_params = [{transform_indices = @transform_0, window_bounds = array<i64: 1, 16, 256>}, {transform_indices = @transform_1, window_bounds = array<i64: 1, 1, 256>}, {transform_indices = @transform_2, window_bounds = array<i64: 1, 1, 256>}, {transform_indices = @transform_3, window_bounds = array<i64: 256, 256>}, {transform_indices = @transform_4, window_bounds = array<i64: 1, 256>}, {transform_indices = @transform_5, window_bounds = array<i64: 1, 16, 256>}]} {
    %c0 = arith.constant 0 : index
    %c0_0 = arith.constant 0 : index
    %c0_1 = arith.constant 0 : index
    %0 = vector.load %arg3[%c0, %c0_0, %c0_1] : memref<1x16x256xbf16, #tpu.memory_space<vmem>>, vector<1x16x256xbf16>
    %1 = vector.shape_cast %0 : vector<1x16x256xbf16> to vector<16x256xbf16>
    %2 = arith.extf %1 : vector<16x256xbf16> to vector<16x256xf32>
    %cst = arith.constant dense<0.000000e+00> : vector<16xf32>
    %3 = vector.multi_reduction <add>, %2, %cst [1] : vector<16x256xf32> to vector<16xf32>
    %4 = vector.shape_cast %3 : vector<16xf32> to vector<16x1xf32>
    %cst_2 = arith.constant 2.560000e+02 : f32
    %5 = vector.broadcast %cst_2 : f32 to vector<16x1xf32>
    %6 = arith.divf %4, %5 : vector<16x1xf32>
    %7 = vector.broadcast %6 : vector<16x1xf32> to vector<16x256xf32>
    %8 = arith.subf %2, %7 : vector<16x256xf32>
    %9 = arith.mulf %8, %8 : vector<16x256xf32>
    %cst_3 = arith.constant dense<0.000000e+00> : vector<16xf32>
    %10 = vector.multi_reduction <add>, %9, %cst_3 [1] : vector<16x256xf32> to vector<16xf32>
    %11 = vector.shape_cast %10 : vector<16xf32> to vector<16x1xf32>
    %cst_4 = arith.constant 2.560000e+02 : f32
    %12 = vector.broadcast %cst_4 : f32 to vector<16x1xf32>
    %13 = arith.divf %11, %12 : vector<16x1xf32>
    %14 = vector.broadcast %6 : vector<16x1xf32> to vector<16x256xf32>
    %15 = arith.subf %2, %14 : vector<16x256xf32>
    %cst_5 = arith.constant 9.99999997E-7 : f32
    %16 = vector.broadcast %cst_5 : f32 to vector<16x1xf32>
    %17 = arith.addf %13, %16 : vector<16x1xf32>
    %18 = math.rsqrt %17 : vector<16x1xf32>
    %19 = vector.broadcast %18 : vector<16x1xf32> to vector<16x256xf32>
    %20 = arith.mulf %15, %19 : vector<16x256xf32>
    %c0_6 = arith.constant 0 : index
    %c0_7 = arith.constant 0 : index
    %c0_8 = arith.constant 0 : index
    %21 = vector.load %arg4[%c0_6, %c0_7, %c0_8] : memref<1x1x256xbf16, #tpu.memory_space<vmem>>, vector<1x1x256xbf16>
    %22 = vector.shape_cast %21 : vector<1x1x256xbf16> to vector<1x256xbf16>
    %23 = arith.extf %22 : vector<1x256xbf16> to vector<1x256xf32>
    %cst_9 = arith.constant 1.000000e+00 : f32
    %24 = vector.broadcast %cst_9 : f32 to vector<1x256xf32>
    %25 = arith.addf %24, %23 : vector<1x256xf32>
    %26 = vector.broadcast %25 : vector<1x256xf32> to vector<16x256xf32>
    %27 = arith.mulf %20, %26 : vector<16x256xf32>
    %c0_10 = arith.constant 0 : index
    %c0_11 = arith.constant 0 : index
    %c0_12 = arith.constant 0 : index
    %28 = vector.load %arg5[%c0_10, %c0_11, %c0_12] : memref<1x1x256xbf16, #tpu.memory_space<vmem>>, vector<1x1x256xbf16>
    %29 = vector.shape_cast %28 : vector<1x1x256xbf16> to vector<1x256xbf16>
    %30 = arith.extf %29 : vector<1x256xbf16> to vector<1x256xf32>
    %31 = vector.broadcast %30 : vector<1x256xf32> to vector<16x256xf32>
    %32 = arith.addf %27, %31 : vector<16x256xf32>
    %33 = arith.truncf %32 : vector<16x256xf32> to vector<16x256xbf16>
    %c0_13 = arith.constant 0 : index
    %c0_14 = arith.constant 0 : index
    %34 = vector.load %arg6[%c0_13, %c0_14] : memref<256x256xbf16, #tpu.memory_space<vmem>>, vector<256x256xbf16>
    %cst_15 = arith.constant dense<0.000000e+00> : vector<16x256xf32>
    %35 = tpu.matmul %33, %34, %cst_15 {dimension_numbers = #tpu.dot_dimension_numbers<[1], [0], [0], [1], [0, 0, 1, 1], [], []>} : vector<16x256xbf16>, vector<256x256xbf16>, vector<16x256xf32> -> vector<16x256xf32>
    %c0_16 = arith.constant 0 : index
    %c0_17 = arith.constant 0 : index
    %36 = vector.load %arg7[%c0_16, %c0_17] : memref<1x256xbf16, #tpu.memory_space<vmem>>, vector<1x256xbf16>
    %37 = arith.extf %36 : vector<1x256xbf16> to vector<1x256xf32>
    %38 = vector.broadcast %37 : vector<1x256xf32> to vector<16x256xf32>
    %39 = arith.addf %35, %38 : vector<16x256xf32>
    %40 = arith.truncf %39 : vector<16x256xf32> to vector<16x256xbf16>
    %c0_18 = arith.constant 0 : index
    %c0_19 = arith.constant 0 : index
    %c0_20 = arith.constant 0 : index
    %41 = vector.load %arg8[%c0_18, %c0_19, %c0_20] : memref<1x16x256xbf16, #tpu.memory_space<vmem>>, vector<1x16x256xbf16>
    %42 = vector.shape_cast %41 : vector<1x16x256xbf16> to vector<16x256xbf16>
    %43 = vector.shape_cast %40 : vector<16x256xbf16> to vector<1x16x256xbf16>
    tpu.vector_store %arg8[%c0_18, %c0_19, %c0_20], %43 {strides = array<i32>} : memref<1x16x256xbf16, #tpu.memory_space<vmem>>, vector<1x16x256xbf16>,
    return
  }
  func.func @transform_0(%arg0: i32, %arg1: i32, %arg2: i32) -> (i32, i32, i32) {
    %c0_i32 = arith.constant 0 : i32
    %c0_i32_0 = arith.constant 0 : i32
    return %arg0, %arg1, %c0_i32 : i32, i32, i32
  }
  func.func @transform_1(%arg0: i32, %arg1: i32, %arg2: i32) -> (i32, i32, i32) {
    %c0_i32 = arith.constant 0 : i32
    %c0_i32_0 = arith.constant 0 : i32
    %c0_i32_1 = arith.constant 0 : i32
    return %arg0, %c0_i32, %c0_i32_0 : i32, i32, i32
  }
  func.func @transform_2(%arg0: i32, %arg1: i32, %arg2: i32) -> (i32, i32, i32) {
    %c0_i32 = arith.constant 0 : i32
    %c0_i32_0 = arith.constant 0 : i32
    %c0_i32_1 = arith.constant 0 : i32
    return %arg0, %c0_i32, %c0_i32_0 : i32, i32, i32
  }
  func.func @transform_3(%arg0: i32, %arg1: i32, %arg2: i32) -> (i32, i32) {
    %c0_i32 = arith.constant 0 : i32
    %c0_i32_0 = arith.constant 0 : i32
    return %c0_i32, %arg2 : i32, i32
  }
  func.func @transform_4(%arg0: i32, %arg1: i32, %arg2: i32) -> (i32, i32) {
    %c0_i32 = arith.constant 0 : i32
    %c0_i32_0 = arith.constant 0 : i32
    return %c0_i32, %arg2 : i32, i32
  }
  func.func @transform_5(%arg0: i32, %arg1: i32, %arg2: i32) -> (i32, i32, i32) {
    %c0_i32 = arith.constant 0 : i32
    return %arg0, %arg1, %arg2 : i32, i32, i32
  }
}

module attributes {stable_mosaic.version = 11 : i64} {
  func.func @_qk_norm_rope_kernel(%arg0: i32, %arg1: i32, %arg2: i32, %arg3: memref<1x1x16x128xbf16, #tpu.memory_space<vmem>>, %arg4: memref<1x1x16x128xbf16, #tpu.memory_space<vmem>>, %arg5: memref<1x16x128xf32, #tpu.memory_space<vmem>>, %arg6: memref<1x16x128xf32, #tpu.memory_space<vmem>>, %arg7: memref<1x128xbf16, #tpu.memory_space<vmem>>, %arg8: memref<1x128xbf16, #tpu.memory_space<vmem>>, %arg9: memref<1x1x16x128xbf16, #tpu.memory_space<vmem>>, %arg10: memref<1x1x16x128xbf16, #tpu.memory_space<vmem>>) attributes {dimension_semantics = [#tpu.dimension_semantics<parallel>, #tpu.dimension_semantics<parallel>, #tpu.dimension_semantics<parallel>], iteration_bounds = array<i64: 2, 2, 1>, scalar_prefetch = 0 : i64, scratch_operands = 0 : i64, tpu.core_type = #tpu.core_type<tc>, window_params = [{transform_indices = @transform_0, window_bounds = array<i64: 1, 1, 16, 128>}, {transform_indices = @transform_1, window_bounds = array<i64: 1, 1, 16, 128>}, {transform_indices = @transform_2, window_bounds = array<i64: 1, 16, 128>}, {transform_indices = @transform_3, window_bounds = array<i64: 1, 16, 128>}, {pipeline_mode = #tpu.pipeline_mode<synchronous>, transform_indices = @transform_4, window_bounds = array<i64: 1, 128>}, {pipeline_mode = #tpu.pipeline_mode<synchronous>, transform_indices = @transform_5, window_bounds = array<i64: 1, 128>}, {transform_indices = @transform_6, window_bounds = array<i64: 1, 1, 16, 128>}, {transform_indices = @transform_7, window_bounds = array<i64: 1, 1, 16, 128>}]} {
    %c0 = arith.constant 0 : index
    %c0_0 = arith.constant 0 : index
    %c0_1 = arith.constant 0 : index
    %0 = vector.load %arg5[%c0, %c0_0, %c0_1] : memref<1x16x128xf32, #tpu.memory_space<vmem>>, vector<1x16x128xf32>
    %1 = vector.shape_cast %0 : vector<1x16x128xf32> to vector<16x128xf32>
    %c0_2 = arith.constant 0 : index
    %c0_3 = arith.constant 0 : index
    %c0_4 = arith.constant 0 : index
    %2 = vector.load %arg6[%c0_2, %c0_3, %c0_4] : memref<1x16x128xf32, #tpu.memory_space<vmem>>, vector<1x16x128xf32>
    %3 = vector.shape_cast %2 : vector<1x16x128xf32> to vector<16x128xf32>
    %4 = tpu.iota {dimensions = array<i32: 1>} : vector<16x128xi32>
    %c2_i32 = arith.constant 2 : i32
    %c0_i32 = arith.constant 0 : i32
    %5 = arith.cmpi eq, %c2_i32, %c0_i32 : i32
    %c1_i32 = arith.constant 1 : i32
    %6 = arith.select %5, %c1_i32, %c2_i32 : i32
    %7 = vector.broadcast %6 : i32 to vector<16x128xi32>
    %8 = arith.remsi %4, %7 : vector<16x128xi32>
    %c0_i32_5 = arith.constant 0 : i32
    %9 = vector.broadcast %c0_i32_5 : i32 to vector<16x128xi32>
    %10 = arith.cmpi ne, %8, %9 : vector<16x128xi32>
    %c0_i32_6 = arith.constant 0 : i32
    %11 = vector.broadcast %c0_i32_6 : i32 to vector<16x128xi32>
    %12 = arith.cmpi slt, %8, %11 : vector<16x128xi32>
    %c0_i32_7 = arith.constant 0 : i32
    %13 = arith.cmpi slt, %6, %c0_i32_7 : i32
    %14 = vector.broadcast %13 : i1 to vector<16x128xi1>
    %15 = vector.broadcast %14 : vector<16x128xi1> to vector<16x128xi1>
    %16 = arith.xori %12, %15 : vector<16x128xi1>
    %17 = arith.andi %16, %10 : vector<16x128xi1>
    %18 = vector.broadcast %6 : i32 to vector<16x128xi32>
    %19 = arith.addi %8, %18 : vector<16x128xi32>
    %20 = arith.select %17, %19, %8 : vector<16x128xi1>, vector<16x128xi32>
    %c0_i32_8 = arith.constant 0 : i32
    %21 = vector.broadcast %c0_i32_8 : i32 to vector<16x128xi32>
    %22 = arith.cmpi eq, %20, %21 : vector<16x128xi32>
    %c0_9 = arith.constant 0 : index
    %c0_10 = arith.constant 0 : index
    %c0_11 = arith.constant 0 : index
    %c0_12 = arith.constant 0 : index
    %23 = vector.load %arg3[%c0_9, %c0_10, %c0_11, %c0_12] : memref<1x1x16x128xbf16, #tpu.memory_space<vmem>>, vector<1x1x16x128xbf16>
    %24 = vector.shape_cast %23 : vector<1x1x16x128xbf16> to vector<16x128xbf16>
    %25 = arith.extf %24 : vector<16x128xbf16> to vector<16x128xf32>
    %26 = arith.mulf %25, %25 : vector<16x128xf32>
    %cst = arith.constant dense<0.000000e+00> : vector<16xf32>
    %27 = vector.multi_reduction <add>, %26, %cst [1] : vector<16x128xf32> to vector<16xf32>
    %28 = vector.shape_cast %27 : vector<16xf32> to vector<16x1xf32>
    %cst_13 = arith.constant 1.280000e+02 : f32
    %29 = vector.broadcast %cst_13 : f32 to vector<16x1xf32>
    %30 = arith.divf %28, %29 : vector<16x1xf32>
    %cst_14 = arith.constant 9.99999997E-7 : f32
    %31 = vector.broadcast %cst_14 : f32 to vector<16x1xf32>
    %32 = arith.addf %30, %31 : vector<16x1xf32>
    %33 = math.rsqrt %32 : vector<16x1xf32>
    %34 = vector.broadcast %33 : vector<16x1xf32> to vector<16x128xf32>
    %35 = arith.mulf %25, %34 : vector<16x128xf32>
    %c0_15 = arith.constant 0 : index
    %c0_16 = arith.constant 0 : index
    %36 = vector.load %arg7[%c0_15, %c0_16] : memref<1x128xbf16, #tpu.memory_space<vmem>>, vector<1x128xbf16>
    %37 = arith.extf %36 : vector<1x128xbf16> to vector<1x128xf32>
    %38 = vector.broadcast %37 : vector<1x128xf32> to vector<16x128xf32>
    %39 = arith.mulf %35, %38 : vector<16x128xf32>
    %c127_i32 = arith.constant 127 : i32
    %40 = tpu.dynamic_rotate %39 by %c127_i32 dim 1 : vector<16x128xf32>, i32 -> vector<16x128xf32>
    %c1_i32_17 = arith.constant 1 : i32
    %41 = tpu.dynamic_rotate %39 by %c1_i32_17 dim 1 : vector<16x128xf32>, i32 -> vector<16x128xf32>
    %42 = arith.select %22, %40, %41 : vector<16x128xi1>, vector<16x128xf32>
    %43 = arith.mulf %1, %39 : vector<16x128xf32>
    %44 = arith.mulf %3, %42 : vector<16x128xf32>
    %45 = arith.addf %43, %44 : vector<16x128xf32>
    %46 = arith.truncf %45 : vector<16x128xf32> to vector<16x128xbf16>
    %c0_18 = arith.constant 0 : index
    %c0_19 = arith.constant 0 : index
    %c0_20 = arith.constant 0 : index
    %c0_21 = arith.constant 0 : index
    %47 = vector.load %arg9[%c0_18, %c0_19, %c0_20, %c0_21] : memref<1x1x16x128xbf16, #tpu.memory_space<vmem>>, vector<1x1x16x128xbf16>
    %48 = vector.shape_cast %47 : vector<1x1x16x128xbf16> to vector<16x128xbf16>
    %49 = vector.shape_cast %46 : vector<16x128xbf16> to vector<1x1x16x128xbf16>
    tpu.vector_store %arg9[%c0_18, %c0_19, %c0_20, %c0_21], %49 {strides = array<i32>} : memref<1x1x16x128xbf16, #tpu.memory_space<vmem>>, vector<1x1x16x128xbf16>,
    %c0_22 = arith.constant 0 : index
    %c0_23 = arith.constant 0 : index
    %c0_24 = arith.constant 0 : index
    %c0_25 = arith.constant 0 : index
    %50 = vector.load %arg4[%c0_22, %c0_23, %c0_24, %c0_25] : memref<1x1x16x128xbf16, #tpu.memory_space<vmem>>, vector<1x1x16x128xbf16>
    %51 = vector.shape_cast %50 : vector<1x1x16x128xbf16> to vector<16x128xbf16>
    %52 = arith.extf %51 : vector<16x128xbf16> to vector<16x128xf32>
    %53 = arith.mulf %52, %52 : vector<16x128xf32>
    %cst_26 = arith.constant dense<0.000000e+00> : vector<16xf32>
    %54 = vector.multi_reduction <add>, %53, %cst_26 [1] : vector<16x128xf32> to vector<16xf32>
    %55 = vector.shape_cast %54 : vector<16xf32> to vector<16x1xf32>
    %cst_27 = arith.constant 1.280000e+02 : f32
    %56 = vector.broadcast %cst_27 : f32 to vector<16x1xf32>
    %57 = arith.divf %55, %56 : vector<16x1xf32>
    %cst_28 = arith.constant 9.99999997E-7 : f32
    %58 = vector.broadcast %cst_28 : f32 to vector<16x1xf32>
    %59 = arith.addf %57, %58 : vector<16x1xf32>
    %60 = math.rsqrt %59 : vector<16x1xf32>
    %61 = vector.broadcast %60 : vector<16x1xf32> to vector<16x128xf32>
    %62 = arith.mulf %52, %61 : vector<16x128xf32>
    %c0_29 = arith.constant 0 : index
    %c0_30 = arith.constant 0 : index
    %63 = vector.load %arg8[%c0_29, %c0_30] : memref<1x128xbf16, #tpu.memory_space<vmem>>, vector<1x128xbf16>
    %64 = arith.extf %63 : vector<1x128xbf16> to vector<1x128xf32>
    %65 = vector.broadcast %64 : vector<1x128xf32> to vector<16x128xf32>
    %66 = arith.mulf %62, %65 : vector<16x128xf32>
    %c127_i32_31 = arith.constant 127 : i32
    %67 = tpu.dynamic_rotate %66 by %c127_i32_31 dim 1 : vector<16x128xf32>, i32 -> vector<16x128xf32>
    %c1_i32_32 = arith.constant 1 : i32
    %68 = tpu.dynamic_rotate %66 by %c1_i32_32 dim 1 : vector<16x128xf32>, i32 -> vector<16x128xf32>
    %69 = arith.select %22, %67, %68 : vector<16x128xi1>, vector<16x128xf32>
    %70 = arith.mulf %1, %66 : vector<16x128xf32>
    %71 = arith.mulf %3, %69 : vector<16x128xf32>
    %72 = arith.addf %70, %71 : vector<16x128xf32>
    %73 = arith.truncf %72 : vector<16x128xf32> to vector<16x128xbf16>
    %c0_33 = arith.constant 0 : index
    %c0_34 = arith.constant 0 : index
    %c0_35 = arith.constant 0 : index
    %c0_36 = arith.constant 0 : index
    %74 = vector.load %arg10[%c0_33, %c0_34, %c0_35, %c0_36] : memref<1x1x16x128xbf16, #tpu.memory_space<vmem>>, vector<1x1x16x128xbf16>
    %75 = vector.shape_cast %74 : vector<1x1x16x128xbf16> to vector<16x128xbf16>
    %76 = vector.shape_cast %73 : vector<16x128xbf16> to vector<1x1x16x128xbf16>
    tpu.vector_store %arg10[%c0_33, %c0_34, %c0_35, %c0_36], %76 {strides = array<i32>} : memref<1x1x16x128xbf16, #tpu.memory_space<vmem>>, vector<1x1x16x128xbf16>,
    return
  }
  func.func @transform_0(%arg0: i32, %arg1: i32, %arg2: i32) -> (i32, i32, i32, i32) {
    %c0_i32 = arith.constant 0 : i32
    %c0_i32_0 = arith.constant 0 : i32
    return %arg0, %arg1, %arg2, %c0_i32 : i32, i32, i32, i32
  }
  func.func @transform_1(%arg0: i32, %arg1: i32, %arg2: i32) -> (i32, i32, i32, i32) {
    %c0_i32 = arith.constant 0 : i32
    %c0_i32_0 = arith.constant 0 : i32
    return %arg0, %arg1, %arg2, %c0_i32 : i32, i32, i32, i32
  }
  func.func @transform_2(%arg0: i32, %arg1: i32, %arg2: i32) -> (i32, i32, i32) {
    %c0_i32 = arith.constant 0 : i32
    %c0_i32_0 = arith.constant 0 : i32
    return %arg0, %arg2, %c0_i32 : i32, i32, i32
  }
  func.func @transform_3(%arg0: i32, %arg1: i32, %arg2: i32) -> (i32, i32, i32) {
    %c0_i32 = arith.constant 0 : i32
    %c0_i32_0 = arith.constant 0 : i32
    return %arg0, %arg2, %c0_i32 : i32, i32, i32
  }
  func.func @transform_4(%arg0: i32, %arg1: i32, %arg2: i32) -> (i32, i32) {
    %c0_i32 = arith.constant 0 : i32
    %c0_i32_0 = arith.constant 0 : i32
    %c0_i32_1 = arith.constant 0 : i32
    return %c0_i32, %c0_i32_0 : i32, i32
  }
  func.func @transform_5(%arg0: i32, %arg1: i32, %arg2: i32) -> (i32, i32) {
    %c0_i32 = arith.constant 0 : i32
    %c0_i32_0 = arith.constant 0 : i32
    %c0_i32_1 = arith.constant 0 : i32
    return %c0_i32, %c0_i32_0 : i32, i32
  }
  func.func @transform_6(%arg0: i32, %arg1: i32, %arg2: i32) -> (i32, i32, i32, i32) {
    %c0_i32 = arith.constant 0 : i32
    %c0_i32_0 = arith.constant 0 : i32
    return %arg0, %arg1, %arg2, %c0_i32 : i32, i32, i32, i32
  }
  func.func @transform_7(%arg0: i32, %arg1: i32, %arg2: i32) -> (i32, i32, i32, i32) {
    %c0_i32 = arith.constant 0 : i32
    %c0_i32_0 = arith.constant 0 : i32
    return %arg0, %arg1, %arg2, %c0_i32 : i32, i32, i32, i32
  }
}

module attributes {stable_mosaic.version = 11 : i64} {
  func.func @_adaln_linear_kernel(%arg0: i32, %arg1: i32, %arg2: i32, %arg3: memref<1x8x256xbf16, #tpu.memory_space<vmem>>, %arg4: memref<1x1x256xbf16, #tpu.memory_space<vmem>>, %arg5: memref<1x1x256xbf16, #tpu.memory_space<vmem>>, %arg6: memref<256x256xbf16, #tpu.memory_space<vmem>>, %arg7: memref<1x256xbf16, #tpu.memory_space<vmem>>, %arg8: memref<1x8x256xbf16, #tpu.memory_space<vmem>>) attributes {dimension_semantics = [#tpu.dimension_semantics<parallel>, #tpu.dimension_semantics<parallel>, #tpu.dimension_semantics<parallel>], iteration_bounds = array<i64: 2, 1, 3>, scalar_prefetch = 0 : i64, scratch_operands = 0 : i64, tpu.core_type = #tpu.core_type<tc>, window_params = [{transform_indices = @transform_0, window_bounds = array<i64: 1, 8, 256>}, {transform_indices = @transform_1, window_bounds = array<i64: 1, 1, 256>}, {transform_indices = @transform_2, window_bounds = array<i64: 1, 1, 256>}, {transform_indices = @transform_3, window_bounds = array<i64: 256, 256>}, {transform_indices = @transform_4, window_bounds = array<i64: 1, 256>}, {transform_indices = @transform_5, window_bounds = array<i64: 1, 8, 256>}]} {
    %c0 = arith.constant 0 : index
    %c0_0 = arith.constant 0 : index
    %c0_1 = arith.constant 0 : index
    %0 = vector.load %arg3[%c0, %c0_0, %c0_1] : memref<1x8x256xbf16, #tpu.memory_space<vmem>>, vector<1x8x256xbf16>
    %1 = vector.shape_cast %0 : vector<1x8x256xbf16> to vector<8x256xbf16>
    %2 = arith.extf %1 : vector<8x256xbf16> to vector<8x256xf32>
    %cst = arith.constant dense<0.000000e+00> : vector<8xf32>
    %3 = vector.multi_reduction <add>, %2, %cst [1] : vector<8x256xf32> to vector<8xf32>
    %4 = vector.shape_cast %3 : vector<8xf32> to vector<8x1xf32>
    %cst_2 = arith.constant 2.560000e+02 : f32
    %5 = vector.broadcast %cst_2 : f32 to vector<8x1xf32>
    %6 = arith.divf %4, %5 : vector<8x1xf32>
    %7 = vector.broadcast %6 : vector<8x1xf32> to vector<8x256xf32>
    %8 = arith.subf %2, %7 : vector<8x256xf32>
    %9 = arith.mulf %8, %8 : vector<8x256xf32>
    %cst_3 = arith.constant dense<0.000000e+00> : vector<8xf32>
    %10 = vector.multi_reduction <add>, %9, %cst_3 [1] : vector<8x256xf32> to vector<8xf32>
    %11 = vector.shape_cast %10 : vector<8xf32> to vector<8x1xf32>
    %cst_4 = arith.constant 2.560000e+02 : f32
    %12 = vector.broadcast %cst_4 : f32 to vector<8x1xf32>
    %13 = arith.divf %11, %12 : vector<8x1xf32>
    %14 = vector.broadcast %6 : vector<8x1xf32> to vector<8x256xf32>
    %15 = arith.subf %2, %14 : vector<8x256xf32>
    %cst_5 = arith.constant 9.99999997E-7 : f32
    %16 = vector.broadcast %cst_5 : f32 to vector<8x1xf32>
    %17 = arith.addf %13, %16 : vector<8x1xf32>
    %18 = math.rsqrt %17 : vector<8x1xf32>
    %19 = vector.broadcast %18 : vector<8x1xf32> to vector<8x256xf32>
    %20 = arith.mulf %15, %19 : vector<8x256xf32>
    %c0_6 = arith.constant 0 : index
    %c0_7 = arith.constant 0 : index
    %c0_8 = arith.constant 0 : index
    %21 = vector.load %arg4[%c0_6, %c0_7, %c0_8] : memref<1x1x256xbf16, #tpu.memory_space<vmem>>, vector<1x1x256xbf16>
    %22 = vector.shape_cast %21 : vector<1x1x256xbf16> to vector<1x256xbf16>
    %23 = arith.extf %22 : vector<1x256xbf16> to vector<1x256xf32>
    %cst_9 = arith.constant 1.000000e+00 : f32
    %24 = vector.broadcast %cst_9 : f32 to vector<1x256xf32>
    %25 = arith.addf %24, %23 : vector<1x256xf32>
    %26 = vector.broadcast %25 : vector<1x256xf32> to vector<8x256xf32>
    %27 = arith.mulf %20, %26 : vector<8x256xf32>
    %c0_10 = arith.constant 0 : index
    %c0_11 = arith.constant 0 : index
    %c0_12 = arith.constant 0 : index
    %28 = vector.load %arg5[%c0_10, %c0_11, %c0_12] : memref<1x1x256xbf16, #tpu.memory_space<vmem>>, vector<1x1x256xbf16>
    %29 = vector.shape_cast %28 : vector<1x1x256xbf16> to vector<1x256xbf16>
    %30 = arith.extf %29 : vector<1x256xbf16> to vector<1x256xf32>
    %31 = vector.broadcast %30 : vector<1x256xf32> to vector<8x256xf32>
    %32 = arith.addf %27, %31 : vector<8x256xf32>
    %33 = arith.truncf %32 : vector<8x256xf32> to vector<8x256xbf16>
    %c0_13 = arith.constant 0 : index
    %c0_14 = arith.constant 0 : index
    %34 = vector.load %arg6[%c0_13, %c0_14] : memref<256x256xbf16, #tpu.memory_space<vmem>>, vector<256x256xbf16>
    %cst_15 = arith.constant dense<0.000000e+00> : vector<8x256xf32>
    %35 = tpu.matmul %33, %34, %cst_15 {dimension_numbers = #tpu.dot_dimension_numbers<[1], [0], [0], [1], [0, 0, 1, 1], [], []>} : vector<8x256xbf16>, vector<256x256xbf16>, vector<8x256xf32> -> vector<8x256xf32>
    %c0_16 = arith.constant 0 : index
    %c0_17 = arith.constant 0 : index
    %36 = vector.load %arg7[%c0_16, %c0_17] : memref<1x256xbf16, #tpu.memory_space<vmem>>, vector<1x256xbf16>
    %37 = arith.extf %36 : vector<1x256xbf16> to vector<1x256xf32>
    %38 = vector.broadcast %37 : vector<1x256xf32> to vector<8x256xf32>
    %39 = arith.addf %35, %38 : vector<8x256xf32>
    %40 = arith.truncf %39 : vector<8x256xf32> to vector<8x256xbf16>
    %c0_18 = arith.constant 0 : index
    %c0_19 = arith.constant 0 : index
    %c0_20 = arith.constant 0 : index
    %41 = vector.load %arg8[%c0_18, %c0_19, %c0_20] : memref<1x8x256xbf16, #tpu.memory_space<vmem>>, vector<1x8x256xbf16>
    %42 = vector.shape_cast %41 : vector<1x8x256xbf16> to vector<8x256xbf16>
    %43 = vector.shape_cast %40 : vector<8x256xbf16> to vector<1x8x256xbf16>
    tpu.vector_store %arg8[%c0_18, %c0_19, %c0_20], %43 {strides = array<i32>} : memref<1x8x256xbf16, #tpu.memory_space<vmem>>, vector<1x8x256xbf16>,
    return
  }
  func.func @transform_0(%arg0: i32, %arg1: i32, %arg2: i32) -> (i32, i32, i32) {
    %c0_i32 = arith.constant 0 : i32
    %c0_i32_0 = arith.constant 0 : i32
    return %arg0, %arg1, %c0_i32 : i32, i32, i32
  }
  func.func @transform_1(%arg0: i32, %arg1: i32, %arg2: i32) -> (i32, i32, i32) {
    %c0_i32 = arith.constant 0 : i32
    %c0_i32_0 = arith.constant 0 : i32
    %c0_i32_1 = arith.constant 0 : i32
    return %arg0, %c0_i32, %c0_i32_0 : i32, i32, i32
  }
  func.func @transform_2(%arg0: i32, %arg1: i32, %arg2: i32) -> (i32, i32, i32) {
    %c0_i32 = arith.constant 0 : i32
    %c0_i32_0 = arith.constant 0 : i32
    %c0_i32_1 = arith.constant 0 : i32
    return %arg0, %c0_i32, %c0_i32_0 : i32, i32, i32
  }
  func.func @transform_3(%arg0: i32, %arg1: i32, %arg2: i32) -> (i32, i32) {
    %c0_i32 = arith.constant 0 : i32
    %c0_i32_0 = arith.constant 0 : i32
    return %c0_i32, %arg2 : i32, i32
  }
  func.func @transform_4(%arg0: i32, %arg1: i32, %arg2: i32) -> (i32, i32) {
    %c0_i32 = arith.constant 0 : i32
    %c0_i32_0 = arith.constant 0 : i32
    return %c0_i32, %arg2 : i32, i32
  }
  func.func @transform_5(%arg0: i32, %arg1: i32, %arg2: i32) -> (i32, i32, i32) {
    %c0_i32 = arith.constant 0 : i32
    return %arg0, %arg1, %arg2 : i32, i32, i32
  }
}

module attributes {stable_mosaic.version = 11 : i64} {
  func.func @_linear_kernel(%arg0: i32, %arg1: i32, %arg2: i32, %arg3: memref<2x256xbf16, #tpu.memory_space<vmem>>, %arg4: memref<256x256xbf16, #tpu.memory_space<vmem>>, %arg5: memref<1x256xbf16, #tpu.memory_space<vmem>>, %arg6: memref<2x256xbf16, #tpu.memory_space<vmem>>, %arg7: memref<2x256xf32, #tpu.memory_space<vmem>>) attributes {dimension_semantics = [#tpu.dimension_semantics<parallel>, #tpu.dimension_semantics<parallel>, #tpu.dimension_semantics<arbitrary>], iteration_bounds = array<i64: 1, 6, 1>, scalar_prefetch = 0 : i64, scratch_operands = 1 : i64, tpu.core_type = #tpu.core_type<tc>, window_params = [{transform_indices = @transform_0, window_bounds = array<i64: 2, 256>}, {transform_indices = @transform_1, window_bounds = array<i64: 256, 256>}, {transform_indices = @transform_2, window_bounds = array<i64: 1, 256>}, {transform_indices = @transform_3, window_bounds = array<i64: 2, 256>}]} {
    %c0_i32 = arith.constant 0 : i32
    %0 = arith.cmpi eq, %arg2, %c0_i32 : i32
    %1 = arith.extui %0 : i1 to i32
    %c0_i32_0 = arith.constant 0 : i32
    %2 = arith.cmpi ne, %1, %c0_i32_0 : i32
    scf.if %2 {
      %cst_11 = arith.constant 0.000000e+00 : f32
      %20 = vector.broadcast %cst_11 : f32 to vector<2x256xf32>
      %c0_12 = arith.constant 0 : index
      %c0_13 = arith.constant 0 : index
      %21 = vector.load %arg7[%c0_12, %c0_13] : memref<2x256xf32, #tpu.memory_space<vmem>>, vector<2x256xf32>
      tpu.vector_store %arg7[%c0_12, %c0_13], %20 {strides = array<i32>} : memref<2x256xf32, #tpu.memory_space<vmem>>, vector<2x256xf32>,
    } else {
    }
    %c0 = arith.constant 0 : index
    %c0_1 = arith.constant 0 : index
    %3 = vector.load %arg3[%c0, %c0_1] : memref<2x256xbf16, #tpu.memory_space<vmem>>, vector<2x256xbf16>
    %4 = arith.extf %3 : vector<2x256xbf16> to vector<2x256xf32>
    %5 = arith.negf %4 : vector<2x256xf32>
    %6 = math.exp %5 : vector<2x256xf32>
    %cst = arith.constant 1.000000e+00 : f32
    %7 = vector.broadcast %cst : f32 to vector<2x256xf32>
    %8 = arith.addf %7, %6 : vector<2x256xf32>
    %9 = arith.divf %7, %8 : vector<2x256xf32>
    %10 = arith.mulf %4, %9 : vector<2x256xf32>
    %11 = arith.truncf %10 : vector<2x256xf32> to vector<2x256xbf16>
    %c0_2 = arith.constant 0 : index
    %c0_3 = arith.constant 0 : index
    %12 = vector.load %arg7[%c0_2, %c0_3] : memref<2x256xf32, #tpu.memory_space<vmem>>, vector<2x256xf32>
    %c0_4 = arith.constant 0 : index
    %c0_5 = arith.constant 0 : index
    %13 = vector.load %arg4[%c0_4, %c0_5] : memref<256x256xbf16, #tpu.memory_space<vmem>>, vector<256x256xbf16>
    %cst_6 = arith.constant dense<0.000000e+00> : vector<2x256xf32>
    %14 = tpu.matmul %11, %13, %cst_6 {dimension_numbers = #tpu.dot_dimension_numbers<[1], [0], [0], [1], [0, 0, 1, 1], [], []>} : vector<2x256xbf16>, vector<256x256xbf16>, vector<2x256xf32> -> vector<2x256xf32>
    %15 = arith.addf %12, %14 : vector<2x256xf32>
    %c0_7 = arith.constant 0 : index
    %c0_8 = arith.constant 0 : index
    %16 = vector.load %arg7[%c0_7, %c0_8] : memref<2x256xf32, #tpu.memory_space<vmem>>, vector<2x256xf32>
    tpu.vector_store %arg7[%c0_7, %c0_8], %15 {strides = array<i32>} : memref<2x256xf32, #tpu.memory_space<vmem>>, vector<2x256xf32>,
    %c0_i32_9 = arith.constant 0 : i32
    %17 = arith.cmpi eq, %arg2, %c0_i32_9 : i32
    %18 = arith.extui %17 : i1 to i32
    %c0_i32_10 = arith.constant 0 : i32
    %19 = arith.cmpi ne, %18, %c0_i32_10 : i32
    scf.if %19 {
      %c0_11 = arith.constant 0 : index
      %c0_12 = arith.constant 0 : index
      %20 = vector.load %arg7[%c0_11, %c0_12] : memref<2x256xf32, #tpu.memory_space<vmem>>, vector<2x256xf32>
      %c0_13 = arith.constant 0 : index
      %c0_14 = arith.constant 0 : index
      %21 = vector.load %arg5[%c0_13, %c0_14] : memref<1x256xbf16, #tpu.memory_space<vmem>>, vector<1x256xbf16>
      %22 = arith.extf %21 : vector<1x256xbf16> to vector<1x256xf32>
      %23 = vector.broadcast %22 : vector<1x256xf32> to vector<2x256xf32>
      %24 = arith.addf %20, %23 : vector<2x256xf32>
      %25 = arith.truncf %24 : vector<2x256xf32> to vector<2x256xbf16>
      %c0_15 = arith.constant 0 : index
      %c0_16 = arith.constant 0 : index
      %26 = vector.load %arg6[%c0_15, %c0_16] : memref<2x256xbf16, #tpu.memory_space<vmem>>, vector<2x256xbf16>
      tpu.vector_store %arg6[%c0_15, %c0_16], %25 {strides = array<i32>} : memref<2x256xbf16, #tpu.memory_space<vmem>>, vector<2x256xbf16>,
    } else {
    }
    return
  }
  func.func @transform_0(%arg0: i32, %arg1: i32, %arg2: i32) -> (i32, i32) {
    %c0_i32 = arith.constant 0 : i32
    return %arg0, %arg2 : i32, i32
  }
  func.func @transform_1(%arg0: i32, %arg1: i32, %arg2: i32) -> (i32, i32) {
    %c0_i32 = arith.constant 0 : i32
    return %arg2, %arg1 : i32, i32
  }
  func.func @transform_2(%arg0: i32, %arg1: i32, %arg2: i32) -> (i32, i32) {
    %c0_i32 = arith.constant 0 : i32
    %c0_i32_0 = arith.constant 0 : i32
    return %c0_i32, %arg1 : i32, i32
  }
  func.func @transform_3(%arg0: i32, %arg1: i32, %arg2: i32) -> (i32, i32) {
    %c0_i32 = arith.constant 0 : i32
    return %arg0, %arg1 : i32, i32
  }
}

module attributes {stable_mosaic.version = 11 : i64} {
  func.func @_flash_attn_kernel(%arg0: i32, %arg1: i32, %arg2: i32, %arg3: i32, %arg4: memref<1x1x24x128xbf16, #tpu.memory_space<vmem>>, %arg5: memref<1x1x24x128xbf16, #tpu.memory_space<vmem>>, %arg6: memref<1x1x24x128xbf16, #tpu.memory_space<vmem>>, %arg7: memref<1x1x24x128xbf16, #tpu.memory_space<vmem>>, %arg8: memref<24x1xf32, #tpu.memory_space<vmem>>, %arg9: memref<24x1xf32, #tpu.memory_space<vmem>>, %arg10: memref<24x128xf32, #tpu.memory_space<vmem>>) attributes {dimension_semantics = [#tpu.dimension_semantics<parallel>, #tpu.dimension_semantics<parallel>, #tpu.dimension_semantics<parallel>, #tpu.dimension_semantics<arbitrary>], iteration_bounds = array<i64: 2, 2, 1, 1>, scalar_prefetch = 0 : i64, scratch_operands = 3 : i64, tpu.core_type = #tpu.core_type<tc>, window_params = [{transform_indices = @transform_0, window_bounds = array<i64: 1, 1, 24, 128>}, {transform_indices = @transform_1, window_bounds = array<i64: 1, 1, 24, 128>}, {transform_indices = @transform_2, window_bounds = array<i64: 1, 1, 24, 128>}, {transform_indices = @transform_3, window_bounds = array<i64: 1, 1, 24, 128>}]} {
    %c0_i32 = arith.constant 0 : i32
    %0 = arith.cmpi eq, %arg3, %c0_i32 : i32
    %1 = arith.extui %0 : i1 to i32
    %c0_i32_0 = arith.constant 0 : i32
    %2 = arith.cmpi ne, %1, %c0_i32_0 : i32
    scf.if %2 {
      %cst_30 = arith.constant 0xFF800000 : f32
      %38 = vector.broadcast %cst_30 : f32 to vector<24x1xf32>
      %c0_31 = arith.constant 0 : index
      %c0_32 = arith.constant 0 : index
      %39 = vector.load %arg8[%c0_31, %c0_32] : memref<24x1xf32, #tpu.memory_space<vmem>>, vector<24x1xf32>
      tpu.vector_store %arg8[%c0_31, %c0_32], %38 {strides = array<i32>} : memref<24x1xf32, #tpu.memory_space<vmem>>, vector<24x1xf32>,
      %cst_33 = arith.constant 0.000000e+00 : f32
      %40 = vector.broadcast %cst_33 : f32 to vector<24x1xf32>
      %c0_34 = arith.constant 0 : index
      %c0_35 = arith.constant 0 : index
      %41 = vector.load %arg9[%c0_34, %c0_35] : memref<24x1xf32, #tpu.memory_space<vmem>>, vector<24x1xf32>
      tpu.vector_store %arg9[%c0_34, %c0_35], %40 {strides = array<i32>} : memref<24x1xf32, #tpu.memory_space<vmem>>, vector<24x1xf32>,
      %cst_36 = arith.constant 0.000000e+00 : f32
      %42 = vector.broadcast %cst_36 : f32 to vector<24x128xf32>
      %c0_37 = arith.constant 0 : index
      %c0_38 = arith.constant 0 : index
      %43 = vector.load %arg10[%c0_37, %c0_38] : memref<24x128xf32, #tpu.memory_space<vmem>>, vector<24x128xf32>
      tpu.vector_store %arg10[%c0_37, %c0_38], %42 {strides = array<i32>} : memref<24x128xf32, #tpu.memory_space<vmem>>, vector<24x128xf32>,
    } else {
    }
    %c0 = arith.constant 0 : index
    %c0_1 = arith.constant 0 : index
    %c0_2 = arith.constant 0 : index
    %c0_3 = arith.constant 0 : index
    %3 = vector.load %arg4[%c0, %c0_1, %c0_2, %c0_3] : memref<1x1x24x128xbf16, #tpu.memory_space<vmem>>, vector<1x1x24x128xbf16>
    %4 = vector.shape_cast %3 : vector<1x1x24x128xbf16> to vector<24x128xbf16>
    %c0_4 = arith.constant 0 : index
    %c0_5 = arith.constant 0 : index
    %c0_6 = arith.constant 0 : index
    %c0_7 = arith.constant 0 : index
    %5 = vector.load %arg5[%c0_4, %c0_5, %c0_6, %c0_7] : memref<1x1x24x128xbf16, #tpu.memory_space<vmem>>, vector<1x1x24x128xbf16>
    %6 = vector.shape_cast %5 : vector<1x1x24x128xbf16> to vector<24x128xbf16>
    %c0_8 = arith.constant 0 : index
    %c0_9 = arith.constant 0 : index
    %c0_10 = arith.constant 0 : index
    %c0_11 = arith.constant 0 : index
    %7 = vector.load %arg6[%c0_8, %c0_9, %c0_10, %c0_11] : memref<1x1x24x128xbf16, #tpu.memory_space<vmem>>, vector<1x1x24x128xbf16>
    %8 = vector.shape_cast %7 : vector<1x1x24x128xbf16> to vector<24x128xbf16>
    %cst = arith.constant dense<0.000000e+00> : vector<24x24xf32>
    %9 = tpu.matmul %4, %6, %cst {dimension_numbers = #tpu.dot_dimension_numbers<[1], [1], [0], [0], [0, 0, 1, 0], [], []>} : vector<24x128xbf16>, vector<24x128xbf16>, vector<24x24xf32> -> vector<24x24xf32>
    %cst_12 = arith.constant 0.0883883461 : f32
    %10 = vector.broadcast %cst_12 : f32 to vector<24x24xf32>
    %11 = arith.mulf %9, %10 : vector<24x24xf32>
    %c0_13 = arith.constant 0 : index
    %c0_14 = arith.constant 0 : index
    %12 = vector.load %arg8[%c0_13, %c0_14] : memref<24x1xf32, #tpu.memory_space<vmem>>, vector<24x1xf32>
    %cst_15 = arith.constant dense<0xFF800000> : vector<24xf32>
    %13 = vector.multi_reduction <maximumf>, %11, %cst_15 [1] : vector<24x24xf32> to vector<24xf32>
    %14 = vector.shape_cast %13 : vector<24xf32> to vector<24x1xf32>
    %15 = arith.maximumf %12, %14 : vector<24x1xf32>
    %16 = arith.subf %12, %15 : vector<24x1xf32>
    %17 = math.exp %16 : vector<24x1xf32>
    %18 = vector.broadcast %15 : vector<24x1xf32> to vector<24x24xf32>
    %19 = arith.subf %11, %18 : vector<24x24xf32>
    %20 = math.exp %19 : vector<24x24xf32>
    %c0_16 = arith.constant 0 : index
    %c0_17 = arith.constant 0 : index
    %21 = vector.load %arg9[%c0_16, %c0_17] : memref<24x1xf32, #tpu.memory_space<vmem>>, vector<24x1xf32>
    %22 = arith.mulf %17, %21 : vector<24x1xf32>
    %cst_18 = arith.constant dense<0.000000e+00> : vector<24xf32>
    %23 = vector.multi_reduction <add>, %20, %cst_18 [1] : vector<24x24xf32> to vector<24xf32>
    %24 = vector.shape_cast %23 : vector<24xf32> to vector<24x1xf32>
    %25 = arith.addf %22, %24 : vector<24x1xf32>
    %c0_19 = arith.constant 0 : index
    %c0_20 = arith.constant 0 : index
    %26 = vector.load %arg9[%c0_19, %c0_20] : memref<24x1xf32, #tpu.memory_space<vmem>>, vector<24x1xf32>
    tpu.vector_store %arg9[%c0_19, %c0_20], %25 {strides = array<i32>} : memref<24x1xf32, #tpu.memory_space<vmem>>, vector<24x1xf32>,
    %c0_21 = arith.constant 0 : index
    %c0_22 = arith.constant 0 : index
    %27 = vector.load %arg10[%c0_21, %c0_22] : memref<24x128xf32, #tpu.memory_space<vmem>>, vector<24x128xf32>
    %28 = vector.broadcast %17 : vector<24x1xf32> to vector<24x128xf32>
    %29 = arith.mulf %28, %27 : vector<24x128xf32>
    %30 = arith.truncf %20 : vector<24x24xf32> to vector<24x24xbf16>
    %cst_23 = arith.constant dense<0.000000e+00> : vector<24x128xf32>
    %31 = tpu.matmul %30, %8, %cst_23 {dimension_numbers = #tpu.dot_dimension_numbers<[1], [0], [0], [1], [0, 0, 1, 1], [], []>} : vector<24x24xbf16>, vector<24x128xbf16>, vector<24x128xf32> -> vector<24x128xf32>
    %32 = arith.addf %29, %31 : vector<24x128xf32>
    %c0_24 = arith.constant 0 : index
    %c0_25 = arith.constant 0 : index
    %33 = vector.load %arg10[%c0_24, %c0_25] : memref<24x128xf32, #tpu.memory_space<vmem>>, vector<24x128xf32>
    tpu.vector_store %arg10[%c0_24, %c0_25], %32 {strides = array<i32>} : memref<24x128xf32, #tpu.memory_space<vmem>>, vector<24x128xf32>,
    %c0_26 = arith.constant 0 : index
    %c0_27 = arith.constant 0 : index
    %34 = vector.load %arg8[%c0_26, %c0_27] : memref<24x1xf32, #tpu.memory_space<vmem>>, vector<24x1xf32>
    tpu.vector_store %arg8[%c0_26, %c0_27], %15 {strides = array<i32>} : memref<24x1xf32, #tpu.memory_space<vmem>>, vector<24x1xf32>,
    %c0_i32_28 = arith.constant 0 : i32
    %35 = arith.cmpi eq, %arg3, %c0_i32_28 : i32
    %36 = arith.extui %35 : i1 to i32
    %c0_i32_29 = arith.constant 0 : i32
    %37 = arith.cmpi ne, %36, %c0_i32_29 : i32
    scf.if %37 {
      %c0_30 = arith.constant 0 : index
      %c0_31 = arith.constant 0 : index
      %38 = vector.load %arg10[%c0_30, %c0_31] : memref<24x128xf32, #tpu.memory_space<vmem>>, vector<24x128xf32>
      %c0_32 = arith.constant 0 : index
      %c0_33 = arith.constant 0 : index
      %39 = vector.load %arg9[%c0_32, %c0_33] : memref<24x1xf32, #tpu.memory_space<vmem>>, vector<24x1xf32>
      %40 = tpu.reciprocal %39 {approx = true} : vector<24x1xf32> -> vector<24x1xf32>
      %41 = vector.broadcast %40 : vector<24x1xf32> to vector<24x128xf32>
      %42 = arith.mulf %38, %41 : vector<24x128xf32>
      %43 = arith.truncf %42 : vector<24x128xf32> to vector<24x128xbf16>
      %c0_34 = arith.constant 0 : index
      %c0_35 = arith.constant 0 : index
      %c0_36 = arith.constant 0 : index
      %c0_37 = arith.constant 0 : index
      %44 = vector.load %arg7[%c0_34, %c0_35, %c0_36, %c0_37] : memref<1x1x24x128xbf16, #tpu.memory_space<vmem>>, vector<1x1x24x128xbf16>
      %45 = vector.shape_cast %44 : vector<1x1x24x128xbf16> to vector<24x128xbf16>
      %46 = vector.shape_cast %43 : vector<24x128xbf16> to vector<1x1x24x128xbf16>
      tpu.vector_store %arg7[%c0_34, %c0_35, %c0_36, %c0_37], %46 {strides = array<i32>} : memref<1x1x24x128xbf16, #tpu.memory_space<vmem>>, vector<1x1x24x128xbf16>,
    } else {
    }
    return
  }
  func.func @transform_0(%arg0: i32, %arg1: i32, %arg2: i32, %arg3: i32) -> (i32, i32, i32, i32) {
    %c0_i32 = arith.constant 0 : i32
    %c0_i32_0 = arith.constant 0 : i32
    return %arg0, %arg1, %arg2, %c0_i32 : i32, i32, i32, i32
  }
  func.func @transform_1(%arg0: i32, %arg1: i32, %arg2: i32, %arg3: i32) -> (i32, i32, i32, i32) {
    %c0_i32 = arith.constant 0 : i32
    %c0_i32_0 = arith.constant 0 : i32
    return %arg0, %arg1, %arg3, %c0_i32 : i32, i32, i32, i32
  }
  func.func @transform_2(%arg0: i32, %arg1: i32, %arg2: i32, %arg3: i32) -> (i32, i32, i32, i32) {
    %c0_i32 = arith.constant 0 : i32
    %c0_i32_0 = arith.constant 0 : i32
    return %arg0, %arg1, %arg3, %c0_i32 : i32, i32, i32, i32
  }
  func.func @transform_3(%arg0: i32, %arg1: i32, %arg2: i32, %arg3: i32) -> (i32, i32, i32, i32) {
    %c0_i32 = arith.constant 0 : i32
    %c0_i32_0 = arith.constant 0 : i32
    return %arg0, %arg1, %arg2, %c0_i32 : i32, i32, i32, i32
  }
}

module attributes {stable_mosaic.version = 11 : i64} {
  func.func @_qk_norm_rope_kernel(%arg0: i32, %arg1: i32, %arg2: i32, %arg3: memref<1x1x8x128xbf16, #tpu.memory_space<vmem>>, %arg4: memref<1x1x8x128xbf16, #tpu.memory_space<vmem>>, %arg5: memref<1x8x128xf32, #tpu.memory_space<vmem>>, %arg6: memref<1x8x128xf32, #tpu.memory_space<vmem>>, %arg7: memref<1x128xbf16, #tpu.memory_space<vmem>>, %arg8: memref<1x128xbf16, #tpu.memory_space<vmem>>, %arg9: memref<1x1x8x128xbf16, #tpu.memory_space<vmem>>, %arg10: memref<1x1x8x128xbf16, #tpu.memory_space<vmem>>) attributes {dimension_semantics = [#tpu.dimension_semantics<parallel>, #tpu.dimension_semantics<parallel>, #tpu.dimension_semantics<parallel>], iteration_bounds = array<i64: 2, 2, 1>, scalar_prefetch = 0 : i64, scratch_operands = 0 : i64, tpu.core_type = #tpu.core_type<tc>, window_params = [{transform_indices = @transform_0, window_bounds = array<i64: 1, 1, 8, 128>}, {transform_indices = @transform_1, window_bounds = array<i64: 1, 1, 8, 128>}, {transform_indices = @transform_2, window_bounds = array<i64: 1, 8, 128>}, {transform_indices = @transform_3, window_bounds = array<i64: 1, 8, 128>}, {pipeline_mode = #tpu.pipeline_mode<synchronous>, transform_indices = @transform_4, window_bounds = array<i64: 1, 128>}, {pipeline_mode = #tpu.pipeline_mode<synchronous>, transform_indices = @transform_5, window_bounds = array<i64: 1, 128>}, {transform_indices = @transform_6, window_bounds = array<i64: 1, 1, 8, 128>}, {transform_indices = @transform_7, window_bounds = array<i64: 1, 1, 8, 128>}]} {
    %c0 = arith.constant 0 : index
    %c0_0 = arith.constant 0 : index
    %c0_1 = arith.constant 0 : index
    %0 = vector.load %arg5[%c0, %c0_0, %c0_1] : memref<1x8x128xf32, #tpu.memory_space<vmem>>, vector<1x8x128xf32>
    %1 = vector.shape_cast %0 : vector<1x8x128xf32> to vector<8x128xf32>
    %c0_2 = arith.constant 0 : index
    %c0_3 = arith.constant 0 : index
    %c0_4 = arith.constant 0 : index
    %2 = vector.load %arg6[%c0_2, %c0_3, %c0_4] : memref<1x8x128xf32, #tpu.memory_space<vmem>>, vector<1x8x128xf32>
    %3 = vector.shape_cast %2 : vector<1x8x128xf32> to vector<8x128xf32>
    %4 = tpu.iota {dimensions = array<i32: 1>} : vector<8x128xi32>
    %c2_i32 = arith.constant 2 : i32
    %c0_i32 = arith.constant 0 : i32
    %5 = arith.cmpi eq, %c2_i32, %c0_i32 : i32
    %c1_i32 = arith.constant 1 : i32
    %6 = arith.select %5, %c1_i32, %c2_i32 : i32
    %7 = vector.broadcast %6 : i32 to vector<8x128xi32>
    %8 = arith.remsi %4, %7 : vector<8x128xi32>
    %c0_i32_5 = arith.constant 0 : i32
    %9 = vector.broadcast %c0_i32_5 : i32 to vector<8x128xi32>
    %10 = arith.cmpi ne, %8, %9 : vector<8x128xi32>
    %c0_i32_6 = arith.constant 0 : i32
    %11 = vector.broadcast %c0_i32_6 : i32 to vector<8x128xi32>
    %12 = arith.cmpi slt, %8, %11 : vector<8x128xi32>
    %c0_i32_7 = arith.constant 0 : i32
    %13 = arith.cmpi slt, %6, %c0_i32_7 : i32
    %14 = vector.broadcast %13 : i1 to vector<8x128xi1>
    %15 = vector.broadcast %14 : vector<8x128xi1> to vector<8x128xi1>
    %16 = arith.xori %12, %15 : vector<8x128xi1>
    %17 = arith.andi %16, %10 : vector<8x128xi1>
    %18 = vector.broadcast %6 : i32 to vector<8x128xi32>
    %19 = arith.addi %8, %18 : vector<8x128xi32>
    %20 = arith.select %17, %19, %8 : vector<8x128xi1>, vector<8x128xi32>
    %c0_i32_8 = arith.constant 0 : i32
    %21 = vector.broadcast %c0_i32_8 : i32 to vector<8x128xi32>
    %22 = arith.cmpi eq, %20, %21 : vector<8x128xi32>
    %c0_9 = arith.constant 0 : index
    %c0_10 = arith.constant 0 : index
    %c0_11 = arith.constant 0 : index
    %c0_12 = arith.constant 0 : index
    %23 = vector.load %arg3[%c0_9, %c0_10, %c0_11, %c0_12] : memref<1x1x8x128xbf16, #tpu.memory_space<vmem>>, vector<1x1x8x128xbf16>
    %24 = vector.shape_cast %23 : vector<1x1x8x128xbf16> to vector<8x128xbf16>
    %25 = arith.extf %24 : vector<8x128xbf16> to vector<8x128xf32>
    %26 = arith.mulf %25, %25 : vector<8x128xf32>
    %cst = arith.constant dense<0.000000e+00> : vector<8xf32>
    %27 = vector.multi_reduction <add>, %26, %cst [1] : vector<8x128xf32> to vector<8xf32>
    %28 = vector.shape_cast %27 : vector<8xf32> to vector<8x1xf32>
    %cst_13 = arith.constant 1.280000e+02 : f32
    %29 = vector.broadcast %cst_13 : f32 to vector<8x1xf32>
    %30 = arith.divf %28, %29 : vector<8x1xf32>
    %cst_14 = arith.constant 9.99999997E-7 : f32
    %31 = vector.broadcast %cst_14 : f32 to vector<8x1xf32>
    %32 = arith.addf %30, %31 : vector<8x1xf32>
    %33 = math.rsqrt %32 : vector<8x1xf32>
    %34 = vector.broadcast %33 : vector<8x1xf32> to vector<8x128xf32>
    %35 = arith.mulf %25, %34 : vector<8x128xf32>
    %c0_15 = arith.constant 0 : index
    %c0_16 = arith.constant 0 : index
    %36 = vector.load %arg7[%c0_15, %c0_16] : memref<1x128xbf16, #tpu.memory_space<vmem>>, vector<1x128xbf16>
    %37 = arith.extf %36 : vector<1x128xbf16> to vector<1x128xf32>
    %38 = vector.broadcast %37 : vector<1x128xf32> to vector<8x128xf32>
    %39 = arith.mulf %35, %38 : vector<8x128xf32>
    %c127_i32 = arith.constant 127 : i32
    %40 = tpu.dynamic_rotate %39 by %c127_i32 dim 1 : vector<8x128xf32>, i32 -> vector<8x128xf32>
    %c1_i32_17 = arith.constant 1 : i32
    %41 = tpu.dynamic_rotate %39 by %c1_i32_17 dim 1 : vector<8x128xf32>, i32 -> vector<8x128xf32>
    %42 = arith.select %22, %40, %41 : vector<8x128xi1>, vector<8x128xf32>
    %43 = arith.mulf %1, %39 : vector<8x128xf32>
    %44 = arith.mulf %3, %42 : vector<8x128xf32>
    %45 = arith.addf %43, %44 : vector<8x128xf32>
    %46 = arith.truncf %45 : vector<8x128xf32> to vector<8x128xbf16>
    %c0_18 = arith.constant 0 : index
    %c0_19 = arith.constant 0 : index
    %c0_20 = arith.constant 0 : index
    %c0_21 = arith.constant 0 : index
    %47 = vector.load %arg9[%c0_18, %c0_19, %c0_20, %c0_21] : memref<1x1x8x128xbf16, #tpu.memory_space<vmem>>, vector<1x1x8x128xbf16>
    %48 = vector.shape_cast %47 : vector<1x1x8x128xbf16> to vector<8x128xbf16>
    %49 = vector.shape_cast %46 : vector<8x128xbf16> to vector<1x1x8x128xbf16>
    tpu.vector_store %arg9[%c0_18, %c0_19, %c0_20, %c0_21], %49 {strides = array<i32>} : memref<1x1x8x128xbf16, #tpu.memory_space<vmem>>, vector<1x1x8x128xbf16>,
    %c0_22 = arith.constant 0 : index
    %c0_23 = arith.constant 0 : index
    %c0_24 = arith.constant 0 : index
    %c0_25 = arith.constant 0 : index
    %50 = vector.load %arg4[%c0_22, %c0_23, %c0_24, %c0_25] : memref<1x1x8x128xbf16, #tpu.memory_space<vmem>>, vector<1x1x8x128xbf16>
    %51 = vector.shape_cast %50 : vector<1x1x8x128xbf16> to vector<8x128xbf16>
    %52 = arith.extf %51 : vector<8x128xbf16> to vector<8x128xf32>
    %53 = arith.mulf %52, %52 : vector<8x128xf32>
    %cst_26 = arith.constant dense<0.000000e+00> : vector<8xf32>
    %54 = vector.multi_reduction <add>, %53, %cst_26 [1] : vector<8x128xf32> to vector<8xf32>
    %55 = vector.shape_cast %54 : vector<8xf32> to vector<8x1xf32>
    %cst_27 = arith.constant 1.280000e+02 : f32
    %56 = vector.broadcast %cst_27 : f32 to vector<8x1xf32>
    %57 = arith.divf %55, %56 : vector<8x1xf32>
    %cst_28 = arith.constant 9.99999997E-7 : f32
    %58 = vector.broadcast %cst_28 : f32 to vector<8x1xf32>
    %59 = arith.addf %57, %58 : vector<8x1xf32>
    %60 = math.rsqrt %59 : vector<8x1xf32>
    %61 = vector.broadcast %60 : vector<8x1xf32> to vector<8x128xf32>
    %62 = arith.mulf %52, %61 : vector<8x128xf32>
    %c0_29 = arith.constant 0 : index
    %c0_30 = arith.constant 0 : index
    %63 = vector.load %arg8[%c0_29, %c0_30] : memref<1x128xbf16, #tpu.memory_space<vmem>>, vector<1x128xbf16>
    %64 = arith.extf %63 : vector<1x128xbf16> to vector<1x128xf32>
    %65 = vector.broadcast %64 : vector<1x128xf32> to vector<8x128xf32>
    %66 = arith.mulf %62, %65 : vector<8x128xf32>
    %c127_i32_31 = arith.constant 127 : i32
    %67 = tpu.dynamic_rotate %66 by %c127_i32_31 dim 1 : vector<8x128xf32>, i32 -> vector<8x128xf32>
    %c1_i32_32 = arith.constant 1 : i32
    %68 = tpu.dynamic_rotate %66 by %c1_i32_32 dim 1 : vector<8x128xf32>, i32 -> vector<8x128xf32>
    %69 = arith.select %22, %67, %68 : vector<8x128xi1>, vector<8x128xf32>
    %70 = arith.mulf %1, %66 : vector<8x128xf32>
    %71 = arith.mulf %3, %69 : vector<8x128xf32>
    %72 = arith.addf %70, %71 : vector<8x128xf32>
    %73 = arith.truncf %72 : vector<8x128xf32> to vector<8x128xbf16>
    %c0_33 = arith.constant 0 : index
    %c0_34 = arith.constant 0 : index
    %c0_35 = arith.constant 0 : index
    %c0_36 = arith.constant 0 : index
    %74 = vector.load %arg10[%c0_33, %c0_34, %c0_35, %c0_36] : memref<1x1x8x128xbf16, #tpu.memory_space<vmem>>, vector<1x1x8x128xbf16>
    %75 = vector.shape_cast %74 : vector<1x1x8x128xbf16> to vector<8x128xbf16>
    %76 = vector.shape_cast %73 : vector<8x128xbf16> to vector<1x1x8x128xbf16>
    tpu.vector_store %arg10[%c0_33, %c0_34, %c0_35, %c0_36], %76 {strides = array<i32>} : memref<1x1x8x128xbf16, #tpu.memory_space<vmem>>, vector<1x1x8x128xbf16>,
    return
  }
  func.func @transform_0(%arg0: i32, %arg1: i32, %arg2: i32) -> (i32, i32, i32, i32) {
    %c0_i32 = arith.constant 0 : i32
    %c0_i32_0 = arith.constant 0 : i32
    return %arg0, %arg1, %arg2, %c0_i32 : i32, i32, i32, i32
  }
  func.func @transform_1(%arg0: i32, %arg1: i32, %arg2: i32) -> (i32, i32, i32, i32) {
    %c0_i32 = arith.constant 0 : i32
    %c0_i32_0 = arith.constant 0 : i32
    return %arg0, %arg1, %arg2, %c0_i32 : i32, i32, i32, i32
  }
  func.func @transform_2(%arg0: i32, %arg1: i32, %arg2: i32) -> (i32, i32, i32) {
    %c0_i32 = arith.constant 0 : i32
    %c0_i32_0 = arith.constant 0 : i32
    return %arg0, %arg2, %c0_i32 : i32, i32, i32
  }
  func.func @transform_3(%arg0: i32, %arg1: i32, %arg2: i32) -> (i32, i32, i32) {
    %c0_i32 = arith.constant 0 : i32
    %c0_i32_0 = arith.constant 0 : i32
    return %arg0, %arg2, %c0_i32 : i32, i32, i32
  }
  func.func @transform_4(%arg0: i32, %arg1: i32, %arg2: i32) -> (i32, i32) {
    %c0_i32 = arith.constant 0 : i32
    %c0_i32_0 = arith.constant 0 : i32
    %c0_i32_1 = arith.constant 0 : i32
    return %c0_i32, %c0_i32_0 : i32, i32
  }
  func.func @transform_5(%arg0: i32, %arg1: i32, %arg2: i32) -> (i32, i32) {
    %c0_i32 = arith.constant 0 : i32
    %c0_i32_0 = arith.constant 0 : i32
    %c0_i32_1 = arith.constant 0 : i32
    return %c0_i32, %c0_i32_0 : i32, i32
  }
  func.func @transform_6(%arg0: i32, %arg1: i32, %arg2: i32) -> (i32, i32, i32, i32) {
    %c0_i32 = arith.constant 0 : i32
    %c0_i32_0 = arith.constant 0 : i32
    return %arg0, %arg1, %arg2, %c0_i32 : i32, i32, i32, i32
  }
  func.func @transform_7(%arg0: i32, %arg1: i32, %arg2: i32) -> (i32, i32, i32, i32) {
    %c0_i32 = arith.constant 0 : i32
    %c0_i32_0 = arith.constant 0 : i32
    return %arg0, %arg1, %arg2, %c0_i32 : i32, i32, i32, i32
  }
}

module attributes {stable_mosaic.version = 11 : i64} {
  func.func @_linear_gate_res_kernel(%arg0: i32, %arg1: i32, %arg2: i32, %arg3: i32, %arg4: memref<1x8x256xbf16, #tpu.memory_space<vmem>>, %arg5: memref<256x256xbf16, #tpu.memory_space<vmem>>, %arg6: memref<1x256xbf16, #tpu.memory_space<vmem>>, %arg7: memref<1x1x256xbf16, #tpu.memory_space<vmem>>, %arg8: memref<1x8x256xbf16, #tpu.memory_space<vmem>>, %arg9: memref<1x8x256xbf16, #tpu.memory_space<vmem>>, %arg10: memref<8x256xf32, #tpu.memory_space<vmem>>) attributes {dimension_semantics = [#tpu.dimension_semantics<parallel>, #tpu.dimension_semantics<parallel>, #tpu.dimension_semantics<parallel>, #tpu.dimension_semantics<arbitrary>], iteration_bounds = array<i64: 2, 1, 1, 1>, scalar_prefetch = 0 : i64, scratch_operands = 1 : i64, tpu.core_type = #tpu.core_type<tc>, window_params = [{transform_indices = @transform_0, window_bounds = array<i64: 1, 8, 256>}, {transform_indices = @transform_1, window_bounds = array<i64: 256, 256>}, {transform_indices = @transform_2, window_bounds = array<i64: 1, 256>}, {transform_indices = @transform_3, window_bounds = array<i64: 1, 1, 256>}, {transform_indices = @transform_4, window_bounds = array<i64: 1, 8, 256>}, {transform_indices = @transform_5, window_bounds = array<i64: 1, 8, 256>}]} {
    %c0_i32 = arith.constant 0 : i32
    %0 = arith.cmpi eq, %arg3, %c0_i32 : i32
    %1 = arith.extui %0 : i1 to i32
    %c0_i32_0 = arith.constant 0 : i32
    %2 = arith.cmpi ne, %1, %c0_i32_0 : i32
    scf.if %2 {
      %cst_11 = arith.constant 0.000000e+00 : f32
      %13 = vector.broadcast %cst_11 : f32 to vector<8x256xf32>
      %c0_12 = arith.constant 0 : index
      %c0_13 = arith.constant 0 : index
      %14 = vector.load %arg10[%c0_12, %c0_13] : memref<8x256xf32, #tpu.memory_space<vmem>>, vector<8x256xf32>
      tpu.vector_store %arg10[%c0_12, %c0_13], %13 {strides = array<i32>} : memref<8x256xf32, #tpu.memory_space<vmem>>, vector<8x256xf32>,
    } else {
    }
    %c0 = arith.constant 0 : index
    %c0_1 = arith.constant 0 : index
    %3 = vector.load %arg10[%c0, %c0_1] : memref<8x256xf32, #tpu.memory_space<vmem>>, vector<8x256xf32>
    %c0_2 = arith.constant 0 : index
    %c0_3 = arith.constant 0 : index
    %c0_4 = arith.constant 0 : index
    %4 = vector.load %arg4[%c0_2, %c0_3, %c0_4] : memref<1x8x256xbf16, #tpu.memory_space<vmem>>, vector<1x8x256xbf16>
    %5 = vector.shape_cast %4 : vector<1x8x256xbf16> to vector<8x256xbf16>
    %c0_5 = arith.constant 0 : index
    %c0_6 = arith.constant 0 : index
    %6 = vector.load %arg5[%c0_5, %c0_6] : memref<256x256xbf16, #tpu.memory_space<vmem>>, vector<256x256xbf16>
    %cst = arith.constant dense<0.000000e+00> : vector<8x256xf32>
    %7 = tpu.matmul %5, %6, %cst {dimension_numbers = #tpu.dot_dimension_numbers<[1], [0], [0], [1], [0, 0, 1, 1], [], []>} : vector<8x256xbf16>, vector<256x256xbf16>, vector<8x256xf32> -> vector<8x256xf32>
    %8 = arith.addf %3, %7 : vector<8x256xf32>
    %c0_7 = arith.constant 0 : index
    %c0_8 = arith.constant 0 : index
    %9 = vector.load %arg10[%c0_7, %c0_8] : memref<8x256xf32, #tpu.memory_space<vmem>>, vector<8x256xf32>
    tpu.vector_store %arg10[%c0_7, %c0_8], %8 {strides = array<i32>} : memref<8x256xf32, #tpu.memory_space<vmem>>, vector<8x256xf32>,
    %c0_i32_9 = arith.constant 0 : i32
    %10 = arith.cmpi eq, %arg3, %c0_i32_9 : i32
    %11 = arith.extui %10 : i1 to i32
    %c0_i32_10 = arith.constant 0 : i32
    %12 = arith.cmpi ne, %11, %c0_i32_10 : i32
    scf.if %12 {
      %c0_11 = arith.constant 0 : index
      %c0_12 = arith.constant 0 : index
      %13 = vector.load %arg10[%c0_11, %c0_12] : memref<8x256xf32, #tpu.memory_space<vmem>>, vector<8x256xf32>
      %c0_13 = arith.constant 0 : index
      %c0_14 = arith.constant 0 : index
      %14 = vector.load %arg6[%c0_13, %c0_14] : memref<1x256xbf16, #tpu.memory_space<vmem>>, vector<1x256xbf16>
      %15 = arith.extf %14 : vector<1x256xbf16> to vector<1x256xf32>
      %16 = vector.broadcast %15 : vector<1x256xf32> to vector<8x256xf32>
      %17 = arith.addf %13, %16 : vector<8x256xf32>
      %c0_15 = arith.constant 0 : index
      %c0_16 = arith.constant 0 : index
      %c0_17 = arith.constant 0 : index
      %18 = vector.load %arg8[%c0_15, %c0_16, %c0_17] : memref<1x8x256xbf16, #tpu.memory_space<vmem>>, vector<1x8x256xbf16>
      %19 = vector.shape_cast %18 : vector<1x8x256xbf16> to vector<8x256xbf16>
      %20 = arith.extf %19 : vector<8x256xbf16> to vector<8x256xf32>
      %c0_18 = arith.constant 0 : index
      %c0_19 = arith.constant 0 : index
      %c0_20 = arith.constant 0 : index
      %21 = vector.load %arg7[%c0_18, %c0_19, %c0_20] : memref<1x1x256xbf16, #tpu.memory_space<vmem>>, vector<1x1x256xbf16>
      %22 = vector.shape_cast %21 : vector<1x1x256xbf16> to vector<1x256xbf16>
      %23 = arith.extf %22 : vector<1x256xbf16> to vector<1x256xf32>
      %24 = vector.broadcast %23 : vector<1x256xf32> to vector<8x256xf32>
      %25 = arith.mulf %24, %17 : vector<8x256xf32>
      %26 = arith.addf %20, %25 : vector<8x256xf32>
      %27 = arith.truncf %26 : vector<8x256xf32> to vector<8x256xbf16>
      %c0_21 = arith.constant 0 : index
      %c0_22 = arith.constant 0 : index
      %c0_23 = arith.constant 0 : index
      %28 = vector.load %arg9[%c0_21, %c0_22, %c0_23] : memref<1x8x256xbf16, #tpu.memory_space<vmem>>, vector<1x8x256xbf16>
      %29 = vector.shape_cast %28 : vector<1x8x256xbf16> to vector<8x256xbf16>
      %30 = vector.shape_cast %27 : vector<8x256xbf16> to vector<1x8x256xbf16>
      tpu.vector_store %arg9[%c0_21, %c0_22, %c0_23], %30 {strides = array<i32>} : memref<1x8x256xbf16, #tpu.memory_space<vmem>>, vector<1x8x256xbf16>,
    } else {
    }
    return
  }
  func.func @transform_0(%arg0: i32, %arg1: i32, %arg2: i32, %arg3: i32) -> (i32, i32, i32) {
    %c0_i32 = arith.constant 0 : i32
    return %arg0, %arg1, %arg3 : i32, i32, i32
  }
  func.func @transform_1(%arg0: i32, %arg1: i32, %arg2: i32, %arg3: i32) -> (i32, i32) {
    %c0_i32 = arith.constant 0 : i32
    return %arg3, %arg2 : i32, i32
  }
  func.func @transform_2(%arg0: i32, %arg1: i32, %arg2: i32, %arg3: i32) -> (i32, i32) {
    %c0_i32 = arith.constant 0 : i32
    %c0_i32_0 = arith.constant 0 : i32
    return %c0_i32, %arg2 : i32, i32
  }
  func.func @transform_3(%arg0: i32, %arg1: i32, %arg2: i32, %arg3: i32) -> (i32, i32, i32) {
    %c0_i32 = arith.constant 0 : i32
    %c0_i32_0 = arith.constant 0 : i32
    return %arg0, %c0_i32, %arg2 : i32, i32, i32
  }
  func.func @transform_4(%arg0: i32, %arg1: i32, %arg2: i32, %arg3: i32) -> (i32, i32, i32) {
    %c0_i32 = arith.constant 0 : i32
    return %arg0, %arg1, %arg2 : i32, i32, i32
  }
  func.func @transform_5(%arg0: i32, %arg1: i32, %arg2: i32, %arg3: i32) -> (i32, i32, i32) {
    %c0_i32 = arith.constant 0 : i32
    return %arg0, %arg1, %arg2 : i32, i32, i32
  }
}

module attributes {stable_mosaic.version = 11 : i64} {
  func.func @_linear_gate_res_kernel(%arg0: i32, %arg1: i32, %arg2: i32, %arg3: i32, %arg4: memref<1x8x512xbf16, #tpu.memory_space<vmem>>, %arg5: memref<512x256xbf16, #tpu.memory_space<vmem>>, %arg6: memref<1x256xbf16, #tpu.memory_space<vmem>>, %arg7: memref<1x1x256xbf16, #tpu.memory_space<vmem>>, %arg8: memref<1x8x256xbf16, #tpu.memory_space<vmem>>, %arg9: memref<1x8x256xbf16, #tpu.memory_space<vmem>>, %arg10: memref<8x256xf32, #tpu.memory_space<vmem>>) attributes {dimension_semantics = [#tpu.dimension_semantics<parallel>, #tpu.dimension_semantics<parallel>, #tpu.dimension_semantics<parallel>, #tpu.dimension_semantics<arbitrary>], iteration_bounds = array<i64: 2, 1, 1, 2>, scalar_prefetch = 0 : i64, scratch_operands = 1 : i64, tpu.core_type = #tpu.core_type<tc>, window_params = [{transform_indices = @transform_0, window_bounds = array<i64: 1, 8, 512>}, {transform_indices = @transform_1, window_bounds = array<i64: 512, 256>}, {transform_indices = @transform_2, window_bounds = array<i64: 1, 256>}, {transform_indices = @transform_3, window_bounds = array<i64: 1, 1, 256>}, {transform_indices = @transform_4, window_bounds = array<i64: 1, 8, 256>}, {transform_indices = @transform_5, window_bounds = array<i64: 1, 8, 256>}]} {
    %c0_i32 = arith.constant 0 : i32
    %0 = arith.cmpi eq, %arg3, %c0_i32 : i32
    %1 = arith.extui %0 : i1 to i32
    %c0_i32_0 = arith.constant 0 : i32
    %2 = arith.cmpi ne, %1, %c0_i32_0 : i32
    scf.if %2 {
      %cst_10 = arith.constant 0.000000e+00 : f32
      %13 = vector.broadcast %cst_10 : f32 to vector<8x256xf32>
      %c0_11 = arith.constant 0 : index
      %c0_12 = arith.constant 0 : index
      %14 = vector.load %arg10[%c0_11, %c0_12] : memref<8x256xf32, #tpu.memory_space<vmem>>, vector<8x256xf32>
      tpu.vector_store %arg10[%c0_11, %c0_12], %13 {strides = array<i32>} : memref<8x256xf32, #tpu.memory_space<vmem>>, vector<8x256xf32>,
    } else {
    }
    %c0 = arith.constant 0 : index
    %c0_1 = arith.constant 0 : index
    %3 = vector.load %arg10[%c0, %c0_1] : memref<8x256xf32, #tpu.memory_space<vmem>>, vector<8x256xf32>
    %c0_2 = arith.constant 0 : index
    %c0_3 = arith.constant 0 : index
    %c0_4 = arith.constant 0 : index
    %4 = vector.load %arg4[%c0_2, %c0_3, %c0_4] : memref<1x8x512xbf16, #tpu.memory_space<vmem>>, vector<1x8x512xbf16>
    %5 = vector.shape_cast %4 : vector<1x8x512xbf16> to vector<8x512xbf16>
    %c0_5 = arith.constant 0 : index
    %c0_6 = arith.constant 0 : index
    %6 = vector.load %arg5[%c0_5, %c0_6] : memref<512x256xbf16, #tpu.memory_space<vmem>>, vector<512x256xbf16>
    %cst = arith.constant dense<0.000000e+00> : vector<8x256xf32>
    %7 = tpu.matmul %5, %6, %cst {dimension_numbers = #tpu.dot_dimension_numbers<[1], [0], [0], [1], [0, 0, 1, 1], [], []>} : vector<8x512xbf16>, vector<512x256xbf16>, vector<8x256xf32> -> vector<8x256xf32>
    %8 = arith.addf %3, %7 : vector<8x256xf32>
    %c0_7 = arith.constant 0 : index
    %c0_8 = arith.constant 0 : index
    %9 = vector.load %arg10[%c0_7, %c0_8] : memref<8x256xf32, #tpu.memory_space<vmem>>, vector<8x256xf32>
    tpu.vector_store %arg10[%c0_7, %c0_8], %8 {strides = array<i32>} : memref<8x256xf32, #tpu.memory_space<vmem>>, vector<8x256xf32>,
    %c1_i32 = arith.constant 1 : i32
    %10 = arith.cmpi eq, %arg3, %c1_i32 : i32
    %11 = arith.extui %10 : i1 to i32
    %c0_i32_9 = arith.constant 0 : i32
    %12 = arith.cmpi ne, %11, %c0_i32_9 : i32
    scf.if %12 {
      %c0_10 = arith.constant 0 : index
      %c0_11 = arith.constant 0 : index
      %13 = vector.load %arg10[%c0_10, %c0_11] : memref<8x256xf32, #tpu.memory_space<vmem>>, vector<8x256xf32>
      %c0_12 = arith.constant 0 : index
      %c0_13 = arith.constant 0 : index
      %14 = vector.load %arg6[%c0_12, %c0_13] : memref<1x256xbf16, #tpu.memory_space<vmem>>, vector<1x256xbf16>
      %15 = arith.extf %14 : vector<1x256xbf16> to vector<1x256xf32>
      %16 = vector.broadcast %15 : vector<1x256xf32> to vector<8x256xf32>
      %17 = arith.addf %13, %16 : vector<8x256xf32>
      %c0_14 = arith.constant 0 : index
      %c0_15 = arith.constant 0 : index
      %c0_16 = arith.constant 0 : index
      %18 = vector.load %arg8[%c0_14, %c0_15, %c0_16] : memref<1x8x256xbf16, #tpu.memory_space<vmem>>, vector<1x8x256xbf16>
      %19 = vector.shape_cast %18 : vector<1x8x256xbf16> to vector<8x256xbf16>
      %20 = arith.extf %19 : vector<8x256xbf16> to vector<8x256xf32>
      %c0_17 = arith.constant 0 : index
      %c0_18 = arith.constant 0 : index
      %c0_19 = arith.constant 0 : index
      %21 = vector.load %arg7[%c0_17, %c0_18, %c0_19] : memref<1x1x256xbf16, #tpu.memory_space<vmem>>, vector<1x1x256xbf16>
      %22 = vector.shape_cast %21 : vector<1x1x256xbf16> to vector<1x256xbf16>
      %23 = arith.extf %22 : vector<1x256xbf16> to vector<1x256xf32>
      %24 = vector.broadcast %23 : vector<1x256xf32> to vector<8x256xf32>
      %25 = arith.mulf %24, %17 : vector<8x256xf32>
      %26 = arith.addf %20, %25 : vector<8x256xf32>
      %27 = arith.truncf %26 : vector<8x256xf32> to vector<8x256xbf16>
      %c0_20 = arith.constant 0 : index
      %c0_21 = arith.constant 0 : index
      %c0_22 = arith.constant 0 : index
      %28 = vector.load %arg9[%c0_20, %c0_21, %c0_22] : memref<1x8x256xbf16, #tpu.memory_space<vmem>>, vector<1x8x256xbf16>
      %29 = vector.shape_cast %28 : vector<1x8x256xbf16> to vector<8x256xbf16>
      %30 = vector.shape_cast %27 : vector<8x256xbf16> to vector<1x8x256xbf16>
      tpu.vector_store %arg9[%c0_20, %c0_21, %c0_22], %30 {strides = array<i32>} : memref<1x8x256xbf16, #tpu.memory_space<vmem>>, vector<1x8x256xbf16>,
    } else {
    }
    return
  }
  func.func @transform_0(%arg0: i32, %arg1: i32, %arg2: i32, %arg3: i32) -> (i32, i32, i32) {
    %c0_i32 = arith.constant 0 : i32
    return %arg0, %arg1, %arg3 : i32, i32, i32
  }
  func.func @transform_1(%arg0: i32, %arg1: i32, %arg2: i32, %arg3: i32) -> (i32, i32) {
    %c0_i32 = arith.constant 0 : i32
    return %arg3, %arg2 : i32, i32
  }
  func.func @transform_2(%arg0: i32, %arg1: i32, %arg2: i32, %arg3: i32) -> (i32, i32) {
    %c0_i32 = arith.constant 0 : i32
    %c0_i32_0 = arith.constant 0 : i32
    return %c0_i32, %arg2 : i32, i32
  }
  func.func @transform_3(%arg0: i32, %arg1: i32, %arg2: i32, %arg3: i32) -> (i32, i32, i32) {
    %c0_i32 = arith.constant 0 : i32
    %c0_i32_0 = arith.constant 0 : i32
    return %arg0, %c0_i32, %arg2 : i32, i32, i32
  }
  func.func @transform_4(%arg0: i32, %arg1: i32, %arg2: i32, %arg3: i32) -> (i32, i32, i32) {
    %c0_i32 = arith.constant 0 : i32
    return %arg0, %arg1, %arg2 : i32, i32, i32
  }
  func.func @transform_5(%arg0: i32, %arg1: i32, %arg2: i32, %arg3: i32) -> (i32, i32, i32) {
    %c0_i32 = arith.constant 0 : i32
    return %arg0, %arg1, %arg2 : i32, i32, i32
  }
}

module attributes {stable_mosaic.version = 11 : i64} {
  func.func @_adaln_linear_kernel(%arg0: i32, %arg1: i32, %arg2: i32, %arg3: memref<1x8x256xbf16, #tpu.memory_space<vmem>>, %arg4: memref<1x1x256xbf16, #tpu.memory_space<vmem>>, %arg5: memref<1x1x256xbf16, #tpu.memory_space<vmem>>, %arg6: memref<256x256xbf16, #tpu.memory_space<vmem>>, %arg7: memref<1x256xbf16, #tpu.memory_space<vmem>>, %arg8: memref<1x8x256xbf16, #tpu.memory_space<vmem>>) attributes {dimension_semantics = [#tpu.dimension_semantics<parallel>, #tpu.dimension_semantics<parallel>, #tpu.dimension_semantics<parallel>], iteration_bounds = array<i64: 2, 1, 4>, scalar_prefetch = 0 : i64, scratch_operands = 0 : i64, tpu.core_type = #tpu.core_type<tc>, window_params = [{transform_indices = @transform_0, window_bounds = array<i64: 1, 8, 256>}, {transform_indices = @transform_1, window_bounds = array<i64: 1, 1, 256>}, {transform_indices = @transform_2, window_bounds = array<i64: 1, 1, 256>}, {transform_indices = @transform_3, window_bounds = array<i64: 256, 256>}, {transform_indices = @transform_4, window_bounds = array<i64: 1, 256>}, {transform_indices = @transform_5, window_bounds = array<i64: 1, 8, 256>}]} {
    %c0 = arith.constant 0 : index
    %c0_0 = arith.constant 0 : index
    %c0_1 = arith.constant 0 : index
    %0 = vector.load %arg3[%c0, %c0_0, %c0_1] : memref<1x8x256xbf16, #tpu.memory_space<vmem>>, vector<1x8x256xbf16>
    %1 = vector.shape_cast %0 : vector<1x8x256xbf16> to vector<8x256xbf16>
    %2 = arith.extf %1 : vector<8x256xbf16> to vector<8x256xf32>
    %cst = arith.constant dense<0.000000e+00> : vector<8xf32>
    %3 = vector.multi_reduction <add>, %2, %cst [1] : vector<8x256xf32> to vector<8xf32>
    %4 = vector.shape_cast %3 : vector<8xf32> to vector<8x1xf32>
    %cst_2 = arith.constant 2.560000e+02 : f32
    %5 = vector.broadcast %cst_2 : f32 to vector<8x1xf32>
    %6 = arith.divf %4, %5 : vector<8x1xf32>
    %7 = vector.broadcast %6 : vector<8x1xf32> to vector<8x256xf32>
    %8 = arith.subf %2, %7 : vector<8x256xf32>
    %9 = arith.mulf %8, %8 : vector<8x256xf32>
    %cst_3 = arith.constant dense<0.000000e+00> : vector<8xf32>
    %10 = vector.multi_reduction <add>, %9, %cst_3 [1] : vector<8x256xf32> to vector<8xf32>
    %11 = vector.shape_cast %10 : vector<8xf32> to vector<8x1xf32>
    %cst_4 = arith.constant 2.560000e+02 : f32
    %12 = vector.broadcast %cst_4 : f32 to vector<8x1xf32>
    %13 = arith.divf %11, %12 : vector<8x1xf32>
    %14 = vector.broadcast %6 : vector<8x1xf32> to vector<8x256xf32>
    %15 = arith.subf %2, %14 : vector<8x256xf32>
    %cst_5 = arith.constant 9.99999997E-7 : f32
    %16 = vector.broadcast %cst_5 : f32 to vector<8x1xf32>
    %17 = arith.addf %13, %16 : vector<8x1xf32>
    %18 = math.rsqrt %17 : vector<8x1xf32>
    %19 = vector.broadcast %18 : vector<8x1xf32> to vector<8x256xf32>
    %20 = arith.mulf %15, %19 : vector<8x256xf32>
    %c0_6 = arith.constant 0 : index
    %c0_7 = arith.constant 0 : index
    %c0_8 = arith.constant 0 : index
    %21 = vector.load %arg4[%c0_6, %c0_7, %c0_8] : memref<1x1x256xbf16, #tpu.memory_space<vmem>>, vector<1x1x256xbf16>
    %22 = vector.shape_cast %21 : vector<1x1x256xbf16> to vector<1x256xbf16>
    %23 = arith.extf %22 : vector<1x256xbf16> to vector<1x256xf32>
    %cst_9 = arith.constant 1.000000e+00 : f32
    %24 = vector.broadcast %cst_9 : f32 to vector<1x256xf32>
    %25 = arith.addf %24, %23 : vector<1x256xf32>
    %26 = vector.broadcast %25 : vector<1x256xf32> to vector<8x256xf32>
    %27 = arith.mulf %20, %26 : vector<8x256xf32>
    %c0_10 = arith.constant 0 : index
    %c0_11 = arith.constant 0 : index
    %c0_12 = arith.constant 0 : index
    %28 = vector.load %arg5[%c0_10, %c0_11, %c0_12] : memref<1x1x256xbf16, #tpu.memory_space<vmem>>, vector<1x1x256xbf16>
    %29 = vector.shape_cast %28 : vector<1x1x256xbf16> to vector<1x256xbf16>
    %30 = arith.extf %29 : vector<1x256xbf16> to vector<1x256xf32>
    %31 = vector.broadcast %30 : vector<1x256xf32> to vector<8x256xf32>
    %32 = arith.addf %27, %31 : vector<8x256xf32>
    %33 = arith.truncf %32 : vector<8x256xf32> to vector<8x256xbf16>
    %c0_13 = arith.constant 0 : index
    %c0_14 = arith.constant 0 : index
    %34 = vector.load %arg6[%c0_13, %c0_14] : memref<256x256xbf16, #tpu.memory_space<vmem>>, vector<256x256xbf16>
    %cst_15 = arith.constant dense<0.000000e+00> : vector<8x256xf32>
    %35 = tpu.matmul %33, %34, %cst_15 {dimension_numbers = #tpu.dot_dimension_numbers<[1], [0], [0], [1], [0, 0, 1, 1], [], []>} : vector<8x256xbf16>, vector<256x256xbf16>, vector<8x256xf32> -> vector<8x256xf32>
    %c0_16 = arith.constant 0 : index
    %c0_17 = arith.constant 0 : index
    %36 = vector.load %arg7[%c0_16, %c0_17] : memref<1x256xbf16, #tpu.memory_space<vmem>>, vector<1x256xbf16>
    %37 = arith.extf %36 : vector<1x256xbf16> to vector<1x256xf32>
    %38 = vector.broadcast %37 : vector<1x256xf32> to vector<8x256xf32>
    %39 = arith.addf %35, %38 : vector<8x256xf32>
    %40 = arith.mulf %39, %39 : vector<8x256xf32>
    %41 = arith.mulf %39, %40 : vector<8x256xf32>
    %cst_18 = arith.constant 4.471500e-02 : f32
    %42 = vector.broadcast %cst_18 : f32 to vector<8x256xf32>
    %43 = arith.mulf %42, %41 : vector<8x256xf32>
    %44 = arith.addf %39, %43 : vector<8x256xf32>
    %cst_19 = arith.constant 0.797884583 : f32
    %45 = vector.broadcast %cst_19 : f32 to vector<8x256xf32>
    %46 = arith.mulf %45, %44 : vector<8x256xf32>
    %47 = math.tanh %46 : vector<8x256xf32>
    %cst_20 = arith.constant 1.000000e+00 : f32
    %48 = vector.broadcast %cst_20 : f32 to vector<8x256xf32>
    %49 = arith.addf %48, %47 : vector<8x256xf32>
    %cst_21 = arith.constant 5.000000e-01 : f32
    %50 = vector.broadcast %cst_21 : f32 to vector<8x256xf32>
    %51 = arith.mulf %50, %49 : vector<8x256xf32>
    %52 = arith.mulf %39, %51 : vector<8x256xf32>
    %53 = arith.truncf %52 : vector<8x256xf32> to vector<8x256xbf16>
    %c0_22 = arith.constant 0 : index
    %c0_23 = arith.constant 0 : index
    %c0_24 = arith.constant 0 : index
    %54 = vector.load %arg8[%c0_22, %c0_23, %c0_24] : memref<1x8x256xbf16, #tpu.memory_space<vmem>>, vector<1x8x256xbf16>
    %55 = vector.shape_cast %54 : vector<1x8x256xbf16> to vector<8x256xbf16>
    %56 = vector.shape_cast %53 : vector<8x256xbf16> to vector<1x8x256xbf16>
    tpu.vector_store %arg8[%c0_22, %c0_23, %c0_24], %56 {strides = array<i32>} : memref<1x8x256xbf16, #tpu.memory_space<vmem>>, vector<1x8x256xbf16>,
    return
  }
  func.func @transform_0(%arg0: i32, %arg1: i32, %arg2: i32) -> (i32, i32, i32) {
    %c0_i32 = arith.constant 0 : i32
    %c0_i32_0 = arith.constant 0 : i32
    return %arg0, %arg1, %c0_i32 : i32, i32, i32
  }
  func.func @transform_1(%arg0: i32, %arg1: i32, %arg2: i32) -> (i32, i32, i32) {
    %c0_i32 = arith.constant 0 : i32
    %c0_i32_0 = arith.constant 0 : i32
    %c0_i32_1 = arith.constant 0 : i32
    return %arg0, %c0_i32, %c0_i32_0 : i32, i32, i32
  }
  func.func @transform_2(%arg0: i32, %arg1: i32, %arg2: i32) -> (i32, i32, i32) {
    %c0_i32 = arith.constant 0 : i32
    %c0_i32_0 = arith.constant 0 : i32
    %c0_i32_1 = arith.constant 0 : i32
    return %arg0, %c0_i32, %c0_i32_0 : i32, i32, i32
  }
  func.func @transform_3(%arg0: i32, %arg1: i32, %arg2: i32) -> (i32, i32) {
    %c0_i32 = arith.constant 0 : i32
    %c0_i32_0 = arith.constant 0 : i32
    return %c0_i32, %arg2 : i32, i32
  }
  func.func @transform_4(%arg0: i32, %arg1: i32, %arg2: i32) -> (i32, i32) {
    %c0_i32 = arith.constant 0 : i32
    %c0_i32_0 = arith.constant 0 : i32
    return %c0_i32, %arg2 : i32, i32
  }
  func.func @transform_5(%arg0: i32, %arg1: i32, %arg2: i32) -> (i32, i32, i32) {
    %c0_i32 = arith.constant 0 : i32
    return %arg0, %arg1, %arg2 : i32, i32, i32
  }
}

module attributes {stable_mosaic.version = 11 : i64} {
  func.func @_linear_gate_res_kernel(%arg0: i32, %arg1: i32, %arg2: i32, %arg3: i32, %arg4: memref<1x16x256xbf16, #tpu.memory_space<vmem>>, %arg5: memref<256x256xbf16, #tpu.memory_space<vmem>>, %arg6: memref<1x256xbf16, #tpu.memory_space<vmem>>, %arg7: memref<1x1x256xbf16, #tpu.memory_space<vmem>>, %arg8: memref<1x16x256xbf16, #tpu.memory_space<vmem>>, %arg9: memref<1x16x256xbf16, #tpu.memory_space<vmem>>, %arg10: memref<16x256xf32, #tpu.memory_space<vmem>>) attributes {dimension_semantics = [#tpu.dimension_semantics<parallel>, #tpu.dimension_semantics<parallel>, #tpu.dimension_semantics<parallel>, #tpu.dimension_semantics<arbitrary>], iteration_bounds = array<i64: 2, 1, 1, 1>, scalar_prefetch = 0 : i64, scratch_operands = 1 : i64, tpu.core_type = #tpu.core_type<tc>, window_params = [{transform_indices = @transform_0, window_bounds = array<i64: 1, 16, 256>}, {transform_indices = @transform_1, window_bounds = array<i64: 256, 256>}, {transform_indices = @transform_2, window_bounds = array<i64: 1, 256>}, {transform_indices = @transform_3, window_bounds = array<i64: 1, 1, 256>}, {transform_indices = @transform_4, window_bounds = array<i64: 1, 16, 256>}, {transform_indices = @transform_5, window_bounds = array<i64: 1, 16, 256>}]} {
    %c0_i32 = arith.constant 0 : i32
    %0 = arith.cmpi eq, %arg3, %c0_i32 : i32
    %1 = arith.extui %0 : i1 to i32
    %c0_i32_0 = arith.constant 0 : i32
    %2 = arith.cmpi ne, %1, %c0_i32_0 : i32
    scf.if %2 {
      %cst_11 = arith.constant 0.000000e+00 : f32
      %13 = vector.broadcast %cst_11 : f32 to vector<16x256xf32>
      %c0_12 = arith.constant 0 : index
      %c0_13 = arith.constant 0 : index
      %14 = vector.load %arg10[%c0_12, %c0_13] : memref<16x256xf32, #tpu.memory_space<vmem>>, vector<16x256xf32>
      tpu.vector_store %arg10[%c0_12, %c0_13], %13 {strides = array<i32>} : memref<16x256xf32, #tpu.memory_space<vmem>>, vector<16x256xf32>,
    } else {
    }
    %c0 = arith.constant 0 : index
    %c0_1 = arith.constant 0 : index
    %3 = vector.load %arg10[%c0, %c0_1] : memref<16x256xf32, #tpu.memory_space<vmem>>, vector<16x256xf32>
    %c0_2 = arith.constant 0 : index
    %c0_3 = arith.constant 0 : index
    %c0_4 = arith.constant 0 : index
    %4 = vector.load %arg4[%c0_2, %c0_3, %c0_4] : memref<1x16x256xbf16, #tpu.memory_space<vmem>>, vector<1x16x256xbf16>
    %5 = vector.shape_cast %4 : vector<1x16x256xbf16> to vector<16x256xbf16>
    %c0_5 = arith.constant 0 : index
    %c0_6 = arith.constant 0 : index
    %6 = vector.load %arg5[%c0_5, %c0_6] : memref<256x256xbf16, #tpu.memory_space<vmem>>, vector<256x256xbf16>
    %cst = arith.constant dense<0.000000e+00> : vector<16x256xf32>
    %7 = tpu.matmul %5, %6, %cst {dimension_numbers = #tpu.dot_dimension_numbers<[1], [0], [0], [1], [0, 0, 1, 1], [], []>} : vector<16x256xbf16>, vector<256x256xbf16>, vector<16x256xf32> -> vector<16x256xf32>
    %8 = arith.addf %3, %7 : vector<16x256xf32>
    %c0_7 = arith.constant 0 : index
    %c0_8 = arith.constant 0 : index
    %9 = vector.load %arg10[%c0_7, %c0_8] : memref<16x256xf32, #tpu.memory_space<vmem>>, vector<16x256xf32>
    tpu.vector_store %arg10[%c0_7, %c0_8], %8 {strides = array<i32>} : memref<16x256xf32, #tpu.memory_space<vmem>>, vector<16x256xf32>,
    %c0_i32_9 = arith.constant 0 : i32
    %10 = arith.cmpi eq, %arg3, %c0_i32_9 : i32
    %11 = arith.extui %10 : i1 to i32
    %c0_i32_10 = arith.constant 0 : i32
    %12 = arith.cmpi ne, %11, %c0_i32_10 : i32
    scf.if %12 {
      %c0_11 = arith.constant 0 : index
      %c0_12 = arith.constant 0 : index
      %13 = vector.load %arg10[%c0_11, %c0_12] : memref<16x256xf32, #tpu.memory_space<vmem>>, vector<16x256xf32>
      %c0_13 = arith.constant 0 : index
      %c0_14 = arith.constant 0 : index
      %14 = vector.load %arg6[%c0_13, %c0_14] : memref<1x256xbf16, #tpu.memory_space<vmem>>, vector<1x256xbf16>
      %15 = arith.extf %14 : vector<1x256xbf16> to vector<1x256xf32>
      %16 = vector.broadcast %15 : vector<1x256xf32> to vector<16x256xf32>
      %17 = arith.addf %13, %16 : vector<16x256xf32>
      %c0_15 = arith.constant 0 : index
      %c0_16 = arith.constant 0 : index
      %c0_17 = arith.constant 0 : index
      %18 = vector.load %arg8[%c0_15, %c0_16, %c0_17] : memref<1x16x256xbf16, #tpu.memory_space<vmem>>, vector<1x16x256xbf16>
      %19 = vector.shape_cast %18 : vector<1x16x256xbf16> to vector<16x256xbf16>
      %20 = arith.extf %19 : vector<16x256xbf16> to vector<16x256xf32>
      %c0_18 = arith.constant 0 : index
      %c0_19 = arith.constant 0 : index
      %c0_20 = arith.constant 0 : index
      %21 = vector.load %arg7[%c0_18, %c0_19, %c0_20] : memref<1x1x256xbf16, #tpu.memory_space<vmem>>, vector<1x1x256xbf16>
      %22 = vector.shape_cast %21 : vector<1x1x256xbf16> to vector<1x256xbf16>
      %23 = arith.extf %22 : vector<1x256xbf16> to vector<1x256xf32>
      %24 = vector.broadcast %23 : vector<1x256xf32> to vector<16x256xf32>
      %25 = arith.mulf %24, %17 : vector<16x256xf32>
      %26 = arith.addf %20, %25 : vector<16x256xf32>
      %27 = arith.truncf %26 : vector<16x256xf32> to vector<16x256xbf16>
      %c0_21 = arith.constant 0 : index
      %c0_22 = arith.constant 0 : index
      %c0_23 = arith.constant 0 : index
      %28 = vector.load %arg9[%c0_21, %c0_22, %c0_23] : memref<1x16x256xbf16, #tpu.memory_space<vmem>>, vector<1x16x256xbf16>
      %29 = vector.shape_cast %28 : vector<1x16x256xbf16> to vector<16x256xbf16>
      %30 = vector.shape_cast %27 : vector<16x256xbf16> to vector<1x16x256xbf16>
      tpu.vector_store %arg9[%c0_21, %c0_22, %c0_23], %30 {strides = array<i32>} : memref<1x16x256xbf16, #tpu.memory_space<vmem>>, vector<1x16x256xbf16>,
    } else {
    }
    return
  }
  func.func @transform_0(%arg0: i32, %arg1: i32, %arg2: i32, %arg3: i32) -> (i32, i32, i32) {
    %c0_i32 = arith.constant 0 : i32
    return %arg0, %arg1, %arg3 : i32, i32, i32
  }
  func.func @transform_1(%arg0: i32, %arg1: i32, %arg2: i32, %arg3: i32) -> (i32, i32) {
    %c0_i32 = arith.constant 0 : i32
    return %arg3, %arg2 : i32, i32
  }
  func.func @transform_2(%arg0: i32, %arg1: i32, %arg2: i32, %arg3: i32) -> (i32, i32) {
    %c0_i32 = arith.constant 0 : i32
    %c0_i32_0 = arith.constant 0 : i32
    return %c0_i32, %arg2 : i32, i32
  }
  func.func @transform_3(%arg0: i32, %arg1: i32, %arg2: i32, %arg3: i32) -> (i32, i32, i32) {
    %c0_i32 = arith.constant 0 : i32
    %c0_i32_0 = arith.constant 0 : i32
    return %arg0, %c0_i32, %arg2 : i32, i32, i32
  }
  func.func @transform_4(%arg0: i32, %arg1: i32, %arg2: i32, %arg3: i32) -> (i32, i32, i32) {
    %c0_i32 = arith.constant 0 : i32
    return %arg0, %arg1, %arg2 : i32, i32, i32
  }
  func.func @transform_5(%arg0: i32, %arg1: i32, %arg2: i32, %arg3: i32) -> (i32, i32, i32) {
    %c0_i32 = arith.constant 0 : i32
    return %arg0, %arg1, %arg2 : i32, i32, i32
  }
}

module attributes {stable_mosaic.version = 11 : i64} {
  func.func @_adaln_linear_kernel(%arg0: i32, %arg1: i32, %arg2: i32, %arg3: memref<1x16x256xbf16, #tpu.memory_space<vmem>>, %arg4: memref<1x1x256xbf16, #tpu.memory_space<vmem>>, %arg5: memref<1x1x256xbf16, #tpu.memory_space<vmem>>, %arg6: memref<256x256xbf16, #tpu.memory_space<vmem>>, %arg7: memref<1x256xbf16, #tpu.memory_space<vmem>>, %arg8: memref<1x16x256xbf16, #tpu.memory_space<vmem>>) attributes {dimension_semantics = [#tpu.dimension_semantics<parallel>, #tpu.dimension_semantics<parallel>, #tpu.dimension_semantics<parallel>], iteration_bounds = array<i64: 2, 1, 4>, scalar_prefetch = 0 : i64, scratch_operands = 0 : i64, tpu.core_type = #tpu.core_type<tc>, window_params = [{transform_indices = @transform_0, window_bounds = array<i64: 1, 16, 256>}, {transform_indices = @transform_1, window_bounds = array<i64: 1, 1, 256>}, {transform_indices = @transform_2, window_bounds = array<i64: 1, 1, 256>}, {transform_indices = @transform_3, window_bounds = array<i64: 256, 256>}, {transform_indices = @transform_4, window_bounds = array<i64: 1, 256>}, {transform_indices = @transform_5, window_bounds = array<i64: 1, 16, 256>}]} {
    %c0 = arith.constant 0 : index
    %c0_0 = arith.constant 0 : index
    %c0_1 = arith.constant 0 : index
    %0 = vector.load %arg3[%c0, %c0_0, %c0_1] : memref<1x16x256xbf16, #tpu.memory_space<vmem>>, vector<1x16x256xbf16>
    %1 = vector.shape_cast %0 : vector<1x16x256xbf16> to vector<16x256xbf16>
    %2 = arith.extf %1 : vector<16x256xbf16> to vector<16x256xf32>
    %cst = arith.constant dense<0.000000e+00> : vector<16xf32>
    %3 = vector.multi_reduction <add>, %2, %cst [1] : vector<16x256xf32> to vector<16xf32>
    %4 = vector.shape_cast %3 : vector<16xf32> to vector<16x1xf32>
    %cst_2 = arith.constant 2.560000e+02 : f32
    %5 = vector.broadcast %cst_2 : f32 to vector<16x1xf32>
    %6 = arith.divf %4, %5 : vector<16x1xf32>
    %7 = vector.broadcast %6 : vector<16x1xf32> to vector<16x256xf32>
    %8 = arith.subf %2, %7 : vector<16x256xf32>
    %9 = arith.mulf %8, %8 : vector<16x256xf32>
    %cst_3 = arith.constant dense<0.000000e+00> : vector<16xf32>
    %10 = vector.multi_reduction <add>, %9, %cst_3 [1] : vector<16x256xf32> to vector<16xf32>
    %11 = vector.shape_cast %10 : vector<16xf32> to vector<16x1xf32>
    %cst_4 = arith.constant 2.560000e+02 : f32
    %12 = vector.broadcast %cst_4 : f32 to vector<16x1xf32>
    %13 = arith.divf %11, %12 : vector<16x1xf32>
    %14 = vector.broadcast %6 : vector<16x1xf32> to vector<16x256xf32>
    %15 = arith.subf %2, %14 : vector<16x256xf32>
    %cst_5 = arith.constant 9.99999997E-7 : f32
    %16 = vector.broadcast %cst_5 : f32 to vector<16x1xf32>
    %17 = arith.addf %13, %16 : vector<16x1xf32>
    %18 = math.rsqrt %17 : vector<16x1xf32>
    %19 = vector.broadcast %18 : vector<16x1xf32> to vector<16x256xf32>
    %20 = arith.mulf %15, %19 : vector<16x256xf32>
    %c0_6 = arith.constant 0 : index
    %c0_7 = arith.constant 0 : index
    %c0_8 = arith.constant 0 : index
    %21 = vector.load %arg4[%c0_6, %c0_7, %c0_8] : memref<1x1x256xbf16, #tpu.memory_space<vmem>>, vector<1x1x256xbf16>
    %22 = vector.shape_cast %21 : vector<1x1x256xbf16> to vector<1x256xbf16>
    %23 = arith.extf %22 : vector<1x256xbf16> to vector<1x256xf32>
    %cst_9 = arith.constant 1.000000e+00 : f32
    %24 = vector.broadcast %cst_9 : f32 to vector<1x256xf32>
    %25 = arith.addf %24, %23 : vector<1x256xf32>
    %26 = vector.broadcast %25 : vector<1x256xf32> to vector<16x256xf32>
    %27 = arith.mulf %20, %26 : vector<16x256xf32>
    %c0_10 = arith.constant 0 : index
    %c0_11 = arith.constant 0 : index
    %c0_12 = arith.constant 0 : index
    %28 = vector.load %arg5[%c0_10, %c0_11, %c0_12] : memref<1x1x256xbf16, #tpu.memory_space<vmem>>, vector<1x1x256xbf16>
    %29 = vector.shape_cast %28 : vector<1x1x256xbf16> to vector<1x256xbf16>
    %30 = arith.extf %29 : vector<1x256xbf16> to vector<1x256xf32>
    %31 = vector.broadcast %30 : vector<1x256xf32> to vector<16x256xf32>
    %32 = arith.addf %27, %31 : vector<16x256xf32>
    %33 = arith.truncf %32 : vector<16x256xf32> to vector<16x256xbf16>
    %c0_13 = arith.constant 0 : index
    %c0_14 = arith.constant 0 : index
    %34 = vector.load %arg6[%c0_13, %c0_14] : memref<256x256xbf16, #tpu.memory_space<vmem>>, vector<256x256xbf16>
    %cst_15 = arith.constant dense<0.000000e+00> : vector<16x256xf32>
    %35 = tpu.matmul %33, %34, %cst_15 {dimension_numbers = #tpu.dot_dimension_numbers<[1], [0], [0], [1], [0, 0, 1, 1], [], []>} : vector<16x256xbf16>, vector<256x256xbf16>, vector<16x256xf32> -> vector<16x256xf32>
    %c0_16 = arith.constant 0 : index
    %c0_17 = arith.constant 0 : index
    %36 = vector.load %arg7[%c0_16, %c0_17] : memref<1x256xbf16, #tpu.memory_space<vmem>>, vector<1x256xbf16>
    %37 = arith.extf %36 : vector<1x256xbf16> to vector<1x256xf32>
    %38 = vector.broadcast %37 : vector<1x256xf32> to vector<16x256xf32>
    %39 = arith.addf %35, %38 : vector<16x256xf32>
    %40 = arith.mulf %39, %39 : vector<16x256xf32>
    %41 = arith.mulf %39, %40 : vector<16x256xf32>
    %cst_18 = arith.constant 4.471500e-02 : f32
    %42 = vector.broadcast %cst_18 : f32 to vector<16x256xf32>
    %43 = arith.mulf %42, %41 : vector<16x256xf32>
    %44 = arith.addf %39, %43 : vector<16x256xf32>
    %cst_19 = arith.constant 0.797884583 : f32
    %45 = vector.broadcast %cst_19 : f32 to vector<16x256xf32>
    %46 = arith.mulf %45, %44 : vector<16x256xf32>
    %47 = math.tanh %46 : vector<16x256xf32>
    %cst_20 = arith.constant 1.000000e+00 : f32
    %48 = vector.broadcast %cst_20 : f32 to vector<16x256xf32>
    %49 = arith.addf %48, %47 : vector<16x256xf32>
    %cst_21 = arith.constant 5.000000e-01 : f32
    %50 = vector.broadcast %cst_21 : f32 to vector<16x256xf32>
    %51 = arith.mulf %50, %49 : vector<16x256xf32>
    %52 = arith.mulf %39, %51 : vector<16x256xf32>
    %53 = arith.truncf %52 : vector<16x256xf32> to vector<16x256xbf16>
    %c0_22 = arith.constant 0 : index
    %c0_23 = arith.constant 0 : index
    %c0_24 = arith.constant 0 : index
    %54 = vector.load %arg8[%c0_22, %c0_23, %c0_24] : memref<1x16x256xbf16, #tpu.memory_space<vmem>>, vector<1x16x256xbf16>
    %55 = vector.shape_cast %54 : vector<1x16x256xbf16> to vector<16x256xbf16>
    %56 = vector.shape_cast %53 : vector<16x256xbf16> to vector<1x16x256xbf16>
    tpu.vector_store %arg8[%c0_22, %c0_23, %c0_24], %56 {strides = array<i32>} : memref<1x16x256xbf16, #tpu.memory_space<vmem>>, vector<1x16x256xbf16>,
    return
  }
  func.func @transform_0(%arg0: i32, %arg1: i32, %arg2: i32) -> (i32, i32, i32) {
    %c0_i32 = arith.constant 0 : i32
    %c0_i32_0 = arith.constant 0 : i32
    return %arg0, %arg1, %c0_i32 : i32, i32, i32
  }
  func.func @transform_1(%arg0: i32, %arg1: i32, %arg2: i32) -> (i32, i32, i32) {
    %c0_i32 = arith.constant 0 : i32
    %c0_i32_0 = arith.constant 0 : i32
    %c0_i32_1 = arith.constant 0 : i32
    return %arg0, %c0_i32, %c0_i32_0 : i32, i32, i32
  }
  func.func @transform_2(%arg0: i32, %arg1: i32, %arg2: i32) -> (i32, i32, i32) {
    %c0_i32 = arith.constant 0 : i32
    %c0_i32_0 = arith.constant 0 : i32
    %c0_i32_1 = arith.constant 0 : i32
    return %arg0, %c0_i32, %c0_i32_0 : i32, i32, i32
  }
  func.func @transform_3(%arg0: i32, %arg1: i32, %arg2: i32) -> (i32, i32) {
    %c0_i32 = arith.constant 0 : i32
    %c0_i32_0 = arith.constant 0 : i32
    return %c0_i32, %arg2 : i32, i32
  }
  func.func @transform_4(%arg0: i32, %arg1: i32, %arg2: i32) -> (i32, i32) {
    %c0_i32 = arith.constant 0 : i32
    %c0_i32_0 = arith.constant 0 : i32
    return %c0_i32, %arg2 : i32, i32
  }
  func.func @transform_5(%arg0: i32, %arg1: i32, %arg2: i32) -> (i32, i32, i32) {
    %c0_i32 = arith.constant 0 : i32
    return %arg0, %arg1, %arg2 : i32, i32, i32
  }
}

module attributes {stable_mosaic.version = 11 : i64} {
  func.func @_linear_gate_res_kernel(%arg0: i32, %arg1: i32, %arg2: i32, %arg3: i32, %arg4: memref<1x16x512xbf16, #tpu.memory_space<vmem>>, %arg5: memref<512x256xbf16, #tpu.memory_space<vmem>>, %arg6: memref<1x256xbf16, #tpu.memory_space<vmem>>, %arg7: memref<1x1x256xbf16, #tpu.memory_space<vmem>>, %arg8: memref<1x16x256xbf16, #tpu.memory_space<vmem>>, %arg9: memref<1x16x256xbf16, #tpu.memory_space<vmem>>, %arg10: memref<16x256xf32, #tpu.memory_space<vmem>>) attributes {dimension_semantics = [#tpu.dimension_semantics<parallel>, #tpu.dimension_semantics<parallel>, #tpu.dimension_semantics<parallel>, #tpu.dimension_semantics<arbitrary>], iteration_bounds = array<i64: 2, 1, 1, 2>, scalar_prefetch = 0 : i64, scratch_operands = 1 : i64, tpu.core_type = #tpu.core_type<tc>, window_params = [{transform_indices = @transform_0, window_bounds = array<i64: 1, 16, 512>}, {transform_indices = @transform_1, window_bounds = array<i64: 512, 256>}, {transform_indices = @transform_2, window_bounds = array<i64: 1, 256>}, {transform_indices = @transform_3, window_bounds = array<i64: 1, 1, 256>}, {transform_indices = @transform_4, window_bounds = array<i64: 1, 16, 256>}, {transform_indices = @transform_5, window_bounds = array<i64: 1, 16, 256>}]} {
    %c0_i32 = arith.constant 0 : i32
    %0 = arith.cmpi eq, %arg3, %c0_i32 : i32
    %1 = arith.extui %0 : i1 to i32
    %c0_i32_0 = arith.constant 0 : i32
    %2 = arith.cmpi ne, %1, %c0_i32_0 : i32
    scf.if %2 {
      %cst_10 = arith.constant 0.000000e+00 : f32
      %13 = vector.broadcast %cst_10 : f32 to vector<16x256xf32>
      %c0_11 = arith.constant 0 : index
      %c0_12 = arith.constant 0 : index
      %14 = vector.load %arg10[%c0_11, %c0_12] : memref<16x256xf32, #tpu.memory_space<vmem>>, vector<16x256xf32>
      tpu.vector_store %arg10[%c0_11, %c0_12], %13 {strides = array<i32>} : memref<16x256xf32, #tpu.memory_space<vmem>>, vector<16x256xf32>,
    } else {
    }
    %c0 = arith.constant 0 : index
    %c0_1 = arith.constant 0 : index
    %3 = vector.load %arg10[%c0, %c0_1] : memref<16x256xf32, #tpu.memory_space<vmem>>, vector<16x256xf32>
    %c0_2 = arith.constant 0 : index
    %c0_3 = arith.constant 0 : index
    %c0_4 = arith.constant 0 : index
    %4 = vector.load %arg4[%c0_2, %c0_3, %c0_4] : memref<1x16x512xbf16, #tpu.memory_space<vmem>>, vector<1x16x512xbf16>
    %5 = vector.shape_cast %4 : vector<1x16x512xbf16> to vector<16x512xbf16>
    %c0_5 = arith.constant 0 : index
    %c0_6 = arith.constant 0 : index
    %6 = vector.load %arg5[%c0_5, %c0_6] : memref<512x256xbf16, #tpu.memory_space<vmem>>, vector<512x256xbf16>
    %cst = arith.constant dense<0.000000e+00> : vector<16x256xf32>
    %7 = tpu.matmul %5, %6, %cst {dimension_numbers = #tpu.dot_dimension_numbers<[1], [0], [0], [1], [0, 0, 1, 1], [], []>} : vector<16x512xbf16>, vector<512x256xbf16>, vector<16x256xf32> -> vector<16x256xf32>
    %8 = arith.addf %3, %7 : vector<16x256xf32>
    %c0_7 = arith.constant 0 : index
    %c0_8 = arith.constant 0 : index
    %9 = vector.load %arg10[%c0_7, %c0_8] : memref<16x256xf32, #tpu.memory_space<vmem>>, vector<16x256xf32>
    tpu.vector_store %arg10[%c0_7, %c0_8], %8 {strides = array<i32>} : memref<16x256xf32, #tpu.memory_space<vmem>>, vector<16x256xf32>,
    %c1_i32 = arith.constant 1 : i32
    %10 = arith.cmpi eq, %arg3, %c1_i32 : i32
    %11 = arith.extui %10 : i1 to i32
    %c0_i32_9 = arith.constant 0 : i32
    %12 = arith.cmpi ne, %11, %c0_i32_9 : i32
    scf.if %12 {
      %c0_10 = arith.constant 0 : index
      %c0_11 = arith.constant 0 : index
      %13 = vector.load %arg10[%c0_10, %c0_11] : memref<16x256xf32, #tpu.memory_space<vmem>>, vector<16x256xf32>
      %c0_12 = arith.constant 0 : index
      %c0_13 = arith.constant 0 : index
      %14 = vector.load %arg6[%c0_12, %c0_13] : memref<1x256xbf16, #tpu.memory_space<vmem>>, vector<1x256xbf16>
      %15 = arith.extf %14 : vector<1x256xbf16> to vector<1x256xf32>
      %16 = vector.broadcast %15 : vector<1x256xf32> to vector<16x256xf32>
      %17 = arith.addf %13, %16 : vector<16x256xf32>
      %c0_14 = arith.constant 0 : index
      %c0_15 = arith.constant 0 : index
      %c0_16 = arith.constant 0 : index
      %18 = vector.load %arg8[%c0_14, %c0_15, %c0_16] : memref<1x16x256xbf16, #tpu.memory_space<vmem>>, vector<1x16x256xbf16>
      %19 = vector.shape_cast %18 : vector<1x16x256xbf16> to vector<16x256xbf16>
      %20 = arith.extf %19 : vector<16x256xbf16> to vector<16x256xf32>
      %c0_17 = arith.constant 0 : index
      %c0_18 = arith.constant 0 : index
      %c0_19 = arith.constant 0 : index
      %21 = vector.load %arg7[%c0_17, %c0_18, %c0_19] : memref<1x1x256xbf16, #tpu.memory_space<vmem>>, vector<1x1x256xbf16>
      %22 = vector.shape_cast %21 : vector<1x1x256xbf16> to vector<1x256xbf16>
      %23 = arith.extf %22 : vector<1x256xbf16> to vector<1x256xf32>
      %24 = vector.broadcast %23 : vector<1x256xf32> to vector<16x256xf32>
      %25 = arith.mulf %24, %17 : vector<16x256xf32>
      %26 = arith.addf %20, %25 : vector<16x256xf32>
      %27 = arith.truncf %26 : vector<16x256xf32> to vector<16x256xbf16>
      %c0_20 = arith.constant 0 : index
      %c0_21 = arith.constant 0 : index
      %c0_22 = arith.constant 0 : index
      %28 = vector.load %arg9[%c0_20, %c0_21, %c0_22] : memref<1x16x256xbf16, #tpu.memory_space<vmem>>, vector<1x16x256xbf16>
      %29 = vector.shape_cast %28 : vector<1x16x256xbf16> to vector<16x256xbf16>
      %30 = vector.shape_cast %27 : vector<16x256xbf16> to vector<1x16x256xbf16>
      tpu.vector_store %arg9[%c0_20, %c0_21, %c0_22], %30 {strides = array<i32>} : memref<1x16x256xbf16, #tpu.memory_space<vmem>>, vector<1x16x256xbf16>,
    } else {
    }
    return
  }
  func.func @transform_0(%arg0: i32, %arg1: i32, %arg2: i32, %arg3: i32) -> (i32, i32, i32) {
    %c0_i32 = arith.constant 0 : i32
    return %arg0, %arg1, %arg3 : i32, i32, i32
  }
  func.func @transform_1(%arg0: i32, %arg1: i32, %arg2: i32, %arg3: i32) -> (i32, i32) {
    %c0_i32 = arith.constant 0 : i32
    return %arg3, %arg2 : i32, i32
  }
  func.func @transform_2(%arg0: i32, %arg1: i32, %arg2: i32, %arg3: i32) -> (i32, i32) {
    %c0_i32 = arith.constant 0 : i32
    %c0_i32_0 = arith.constant 0 : i32
    return %c0_i32, %arg2 : i32, i32
  }
  func.func @transform_3(%arg0: i32, %arg1: i32, %arg2: i32, %arg3: i32) -> (i32, i32, i32) {
    %c0_i32 = arith.constant 0 : i32
    %c0_i32_0 = arith.constant 0 : i32
    return %arg0, %c0_i32, %arg2 : i32, i32, i32
  }
  func.func @transform_4(%arg0: i32, %arg1: i32, %arg2: i32, %arg3: i32) -> (i32, i32, i32) {
    %c0_i32 = arith.constant 0 : i32
    return %arg0, %arg1, %arg2 : i32, i32, i32
  }
  func.func @transform_5(%arg0: i32, %arg1: i32, %arg2: i32, %arg3: i32) -> (i32, i32, i32) {
    %c0_i32 = arith.constant 0 : i32
    return %arg0, %arg1, %arg2 : i32, i32, i32
  }
}

</mosaic_0001>

<bundles_post_ra>
// kernel: _dual_block_forward.15
= control target key start
LH: loop header
LB: loop body
LE: loop exit
PB: predicated region body
PF: predicated region fallthrough
CT: control target
= control target key end

     0   :  { %s1326_s18 = smov 0   ;;  %s1328_s19 = smov 0   ;;  %s1584_s0 = inlined_call_operand.vmem [shape: bf16[2,16,256], index: 0, kind: input, shape index: {}]   ;;  %s1585_s1 = inlined_call_operand.vmem [shape: bf16[2,1,256], index: 1, kind: input, shape index: {}]   ;;  %s1586_s2 = inlined_call_operand.vmem [shape: bf16[2,1,256], index: 2, kind: input, shape index: {}]   ;;  %s1587_s3 = inlined_call_operand.vmem [shape: bf16[256,768], index: 3, kind: input, shape index: {}]   ;;  %s1588_s4 = inlined_call_operand.vmem [shape: bf16[1,768], index: 4, kind: input, shape index: {}]   ;;  %s1589_s5 = inlined_call_operand.vmem [shape: bf16[2,16,768], index: 5, kind: output, shape index: {}]  }
   0x1   :  { %s1330_s20 = smov 0   ;;  %s1332_s21 = smov 0  }
   0x2   :  { %s1334_s22 = smov 0   ;;  %s1336_s23 = smov 0  }
   0x3   :  { %s1338_s24 = smov 0   ;;  %s1340_s25 = smov 0  }
   0x4   :  { %s1342_s26 = smov 0  }
   0x5 LB: > { %s1041_s27 = sadd.s32 4294967295, %s1294_s26   ;;  %s27_s28 = sadd.s32 1, %s1286_s24  ;;  %s1294_s26 = sphi %s1342_s26, %s15_s26   ;;  %s1290_s25 = sphi %s1340_s25, %s1598_s25   ;;  %s1286_s24 = sphi %s1338_s24, %s1597_s24   ;;  %s1282_s23 = sphi %s1336_s23, %s1596_s23   ;;  %s1278_s22 = sphi %s1334_s22, %s1595_s22   ;;  %s1274_s21 = sphi %s1332_s21, %s1594_s21   ;;  %s1270_s20 = sphi %s1330_s20, %s1593_s20   ;;  %s1266_s19 = sphi %s1328_s19, %s1592_s19   ;;  %s1262_s18 = sphi %s1326_s18, %s1591_s18  }
   0x6   : > { %p28_p0 = scmp.ge.s32.totalorder %s27_s28, 3  ;;  %s34_s29 = sadd.s32 1, %s1290_s25 }
   0x7   : > { %s121_s30 = sadd.s32 1, %s1274_s21  ;;  %p128_p1 = scmp.ne.s32.totalorder %s1274_s21, %s1270_s20 }
   0x8   : > { %s1600_s28 = smov (%p28_p0, %s27_s28), 0  ;;  %s1602_s29 = smov (!%p28_p0, %s34_s29), %s1290_s25 }
   0x9   : > { %s118_s6 = ssub.s32 %s1286_s24, %s1600_s28  ;;  %p129_p2 = scmp.eq.s32.totalorder %s1294_s26, 0 }
   0xa   : > { %p36_p3 = scmp.ge.s32.totalorder %s1602_s29, 2  ;;  %p119_p4 = scmp.eq.s32.totalorder %s118_s6, 0 }
   0xb   : > { %p130_p5 = por %p129_p2, %p128_p1  ;;  %s177_s7 = sadd.s32 1, %s1266_s19 }
   0xc   : > { %s1604_s29 = smov (%p36_p3, %s1602_s29), 0  ;;  %p187_p6 = scmp.ne.s32.totalorder %s1266_s19, %s1262_s18 }
   0xd   : > { %s1387_s8 = scalar_select %p119_p4, %s1274_s21, %s121_s30  }
   0xe   : > { %s170_s9 = ssub.s32 %s1290_s25, %s1604_s29  ;;  %p188_p7 = scmp.eq.s32.totalorder %s1041_s27, 5 }
   0xf   : > { %s174_s10 = sor.u32 %s170_s9, %s118_s6  ;;  %p1044_p10 = scmp.ge.s32.totalorder %s1294_s26, 6 }
  0x10   : > { %p175_p8 = scmp.eq.s32.totalorder %s174_s10, 0  ;;  %p1393_p9 = por %p188_p7, %p187_p6 }
  0x11   : > { %210 = sbr.rel (%p1044_p10) target bundleno = 42 (0x2a), region = 16 }
  0x12   : > { %s1398_s12 = scalar_select %p175_p8, %s1266_s19, %s177_s7  }
  0x16   : > { %241 = sbr.rel (!%p130_p5) target bundleno = 42 (0x2a), region = 32  ;;  %s243_s13 = sand.u32 (%p130_p5), 1, %s1274_s21  }
  0x17   : > { %s1095_s14 = sshll.u32 (%p130_p5), %s1286_s24, 3  ;;  %s1045_s15 = sshll.u32 (%p130_p5), %s243_s13, 8 }
  0x18   : > { %s1406_s27 = scalar_lea.vmem (%p130_p5), %s1587_s3, %s1095_s14  ;;  %s1411_s30 = scalar_lea.vmem (%p130_p5), [#allocation2], %s1045_s15 }
  0x19   : > { %v339_v0 = vld [vmem:[%s1406_s27] sm:$0xff] (%p130_p5)  ;;  %v341_v1 = vld [vmem:[%s1406_s27 + $0x18] sm:$0xff] (%p130_p5)  ;;  %v343_v2 = vld [vmem:[%s1406_s27 + $0x30] sm:$0xff] (%p130_p5) }
  0x1a   : > { %340 = vst [vmem:[%s1411_s30] sm:$0xff] (%p130_p5), %v339_v0  ;;  %342 = vst [vmem:[%s1411_s30 + $0x8] sm:$0xff] (%p130_p5), %v341_v1  ;;  %v345_v3 = vld [vmem:[%s1406_s27 + $0x48] sm:$0xff] (%p130_p5)  ;;  %v347_v4 = vld [vmem:[%s1406_s27 + $0x60] sm:$0xff] (%p130_p5) }
  0x1b   : > { %344 = vst [vmem:[%s1411_s30 + $0x10] sm:$0xff] %v343_v2  ;;  %v349_v5 = vld [vmem:[%s1406_s27 + $0x78] sm:$0xff]  ;;  %346 = vst [vmem:[%s1411_s30 + $0x18] sm:$0xff] %v345_v3  ;;  %v351_v6 = vld [vmem:[%s1406_s27 + $0x90] sm:$0xff] }
  0x1c   : > { %348 = vst [vmem:[%s1411_s30 + $0x20] sm:$0xff] %v347_v4  ;;  %350 = vst [vmem:[%s1411_s30 + $0x28] sm:$0xff] %v349_v5  ;;  %v353_v7 = vld [vmem:[%s1406_s27 + $0xa8] sm:$0xff]  ;;  %v355_v8 = vld [vmem:[%s1406_s27 + $0xc0] sm:$0xff] }
  0x1d   : > { %352 = vst [vmem:[%s1411_s30 + $0x30] sm:$0xff] %v351_v6  ;;  %354 = vst [vmem:[%s1411_s30 + $0x38] sm:$0xff] %v353_v7  ;;  %v357_v9 = vld [vmem:[%s1406_s27 + $0xd8] sm:$0xff]  ;;  %v359_v10 = vld [vmem:[%s1406_s27 + $0xf0] sm:$0xff] }
  0x1e   : > { %356 = vst [vmem:[%s1411_s30 + $0x40] sm:$0xff] %v355_v8  ;;  %v361_v11 = vld [vmem:[%s1406_s27 + $0x108] sm:$0xff]  ;;  %358 = vst [vmem:[%s1411_s30 + $0x48] sm:$0xff] %v357_v9  ;;  %v363_v12 = vld [vmem:[%s1406_s27 + $0x120] sm:$0xff] }
  0x1f   : > { %360 = vst [vmem:[%s1411_s30 + $0x50] sm:$0xff] %v359_v10  ;;  %362 = vst [vmem:[%s1411_s30 + $0x58] sm:$0xff] %v361_v11  ;;  %v365_v13 = vld [vmem:[%s1406_s27 + $0x138] sm:$0xff]  ;;  %v367_v14 = vld [vmem:[%s1406_s27 + $0x150] sm:$0xff] }
  0x20   : > { %364 = vst [vmem:[%s1411_s30 + $0x60] sm:$0xff] %v363_v12  ;;  %366 = vst [vmem:[%s1411_s30 + $0x68] sm:$0xff] %v365_v13  ;;  %v369_v15 = vld [vmem:[%s1406_s27 + $0x168] sm:$0xff]  ;;  %v371_v16 = vld [vmem:[%s1406_s27 + $0x180] sm:$0xff] }
  0x21   : > { %368 = vst [vmem:[%s1411_s30 + $0x70] sm:$0xff] %v367_v14  ;;  %v373_v17 = vld [vmem:[%s1406_s27 + $0x198] sm:$0xff]  ;;  %370 = vst [vmem:[%s1411_s30 + $0x78] sm:$0xff] %v369_v15  ;;  %v375_v18 = vld [vmem:[%s1406_s27 + $0x1b0] sm:$0xff] }
  0x22   : > { %372 = vst [vmem:[%s1411_s30 + $0x80] sm:$0xff] %v371_v16  ;;  %374 = vst [vmem:[%s1411_s30 + $0x88] sm:$0xff] %v373_v17  ;;  %v377_v19 = vld [vmem:[%s1406_s27 + $0x1c8] sm:$0xff]  ;;  %v379_v20 = vld [vmem:[%s1406_s27 + $0x1e0] sm:$0xff] }
  0x23   : > { %376 = vst [vmem:[%s1411_s30 + $0x90] sm:$0xff] %v375_v18  ;;  %378 = vst [vmem:[%s1411_s30 + $0x98] sm:$0xff] %v377_v19  ;;  %v381_v21 = vld [vmem:[%s1406_s27 + $0x1f8] sm:$0xff]  ;;  %v383_v22 = vld [vmem:[%s1406_s27 + $0x210] sm:$0xff] }
  0x24   : > { %380 = vst [vmem:[%s1411_s30 + $0xa0] sm:$0xff] %v379_v20  ;;  %v385_v23 = vld [vmem:[%s1406_s27 + $0x228] sm:$0xff]  ;;  %382 = vst [vmem:[%s1411_s30 + $0xa8] sm:$0xff] %v381_v21  ;;  %v387_v24 = vld [vmem:[%s1406_s27 + $0x240] sm:$0xff] }
  0x25   : > { %384 = vst [vmem:[%s1411_s30 + $0xb0] sm:$0xff] %v383_v22  ;;  %386 = vst [vmem:[%s1411_s30 + $0xb8] sm:$0xff] %v385_v23  ;;  %v389_v25 = vld [vmem:[%s1406_s27 + $0x258] sm:$0xff]  ;;  %v391_v26 = vld [vmem:[%s1406_s27 + $0x270] sm:$0xff] }
  0x26   : > { %388 = vst [vmem:[%s1411_s30 + $0xc0] sm:$0xff] %v387_v24  ;;  %390 = vst [vmem:[%s1411_s30 + $0xc8] sm:$0xff] %v389_v25  ;;  %v393_v27 = vld [vmem:[%s1406_s27 + $0x288] sm:$0xff]  ;;  %v395_v28 = vld [vmem:[%s1406_s27 + $0x2a0] sm:$0xff] }
  0x27   : > { %392 = vst [vmem:[%s1411_s30 + $0xd0] sm:$0xff] %v391_v26  ;;  %v397_v29 = vld [vmem:[%s1406_s27 + $0x2b8] sm:$0xff]  ;;  %394 = vst [vmem:[%s1411_s30 + $0xd8] sm:$0xff] %v393_v27  ;;  %v399_v30 = vld [vmem:[%s1406_s27 + $0x2d0] sm:$0xff] }
  0x28   : > { %396 = vst [vmem:[%s1411_s30 + $0xe0] sm:$0xff] %v395_v28  ;;  %398 = vst [vmem:[%s1411_s30 + $0xe8] sm:$0xff] %v397_v29  ;;  %v401_v31 = vld [vmem:[%s1406_s27 + $0x2e8] sm:$0xff] }
  0x29   : > { %400 = vst [vmem:[%s1411_s30 + $0xf0] sm:$0xff] %v399_v30  ;;  %402 = vst [vmem:[%s1411_s30 + $0xf8] sm:$0xff] %v401_v31 }
  0x2a PF: > { %p1048_p11 = scmp.ge.s32.totalorder %s1294_s26, 1  ;;  %p415_p12 = scmp.lt.s32.totalorder %s1294_s26, 7 }
  0x2c   : > { %p416_p13 = pnand %p1048_p11, %p415_p12 }
  0x2d   : > { %p471_p0 = scmp.lt.s32.totalorder (!%p416_p13), %s1282_s23, 1  ;;  %s422_s14 = sand.u32 (!%p416_p13), 1, %s1270_s20  }
  0x2e   : > { %419 = sbr.rel (%p416_p13) target bundleno = 587 (0x24b), region = 74  ;;  %s1049_s15 = sshll.u32 (!%p416_p13), %s422_s14, 8 }
  0x2f   : > { %s1485_s16 = scalar_lea.vmem (!%p416_p13), [#allocation2], %s1049_s15 }
  0x33   : > { %s1478_s6 = scalar_select %p471_p0, %s1282_s23, 1  ;;  %v1172_v40 = vld [vmem:[%s1485_s16 + $0x74] ss:$8 sps:$4 sm:$0xff]   ;;  %v1174_v41 = vld [vmem:[%s1485_s16 + $0x70] ss:$8 sps:$4 sm:$0xff]   ;;  %v540_v25 = vlaneseq }
  0x34   : > { %802 = vmatprep.subr.bf16.mxu0 %v1172_v40  ;;  %v1175_v42 = vld [vmem:[%s1485_s16 + $0x64] ss:$8 sps:$4 sm:$0xff]   ;;  %v1177_v43 = vld [vmem:[%s1485_s16 + $0x60] ss:$8 sps:$4 sm:$0xff]   ;;  %v1178_v44 = vld [vmem:[%s1485_s16 + $0x54] ss:$8 sps:$4 sm:$0xff]  }
  0x35   : > { %s1096_s7 = sshll.u32 %s1478_s6, 4  ;;  %803 = vmatpush1.bf16.msra.mxu0 %v1174_v41  ;;  %v1180_v45 = vld [vmem:[%s1485_s16 + $0x50] ss:$8 sps:$4 sm:$0xff]   ;;  %v1181_v46 = vld [vmem:[%s1485_s16 + $0x44] ss:$8 sps:$4 sm:$0xff]   ;;  %s1053_s20 = sshll.u32 %s1478_s6, 1 }
  0x36   : > { %s479_s13 = scalar_lea.vmem %s1584_s0, %s1096_s7  ;;  %804 = vmatprep.subr.bf16.mxu0 %v1175_v42  ;;  %v1183_v47 = vld [vmem:[%s1485_s16 + $0x40] ss:$8 sps:$4 sm:$0xff]   ;;  %v1184_v48 = vld [vmem:[%s1485_s16 + $0x34] ss:$8 sps:$4 sm:$0xff]   ;;  %v1186_v49 = vld [vmem:[%s1485_s16 + $0x30] ss:$8 sps:$4 sm:$0xff]   ;;  %s484_s30 = scalar_lea.vmem %s1585_s1, %s1053_s20 }
  0x37   : > { %v497_v32 = vld [vmem:[%s479_s13] sm:$0xff]  ;;  %v498_v33 = vld [vmem:[%s479_s13 + $0x8] sm:$0xff]  ;;  %v1190_v52 = vld [vmem:[%s1485_s16 + $0x14] ss:$8 sps:$4 sm:$0xff]   ;;  %v541_v31 = vshrl.u32 %v540_v25, 7  ;;  %s488_s10 = scalar_lea.vmem %s1586_s2, %s1053_s20  ;;  %s1055_s6 = sshll.u32 %s1278_s22, 1 }
  0x38   : > { %v499_v34 = vunpack.c.l.bf16 %v497_v32  ;;  %v500_v35 = vunpack.c.h.bf16 %v497_v32  ;;  %v501_v36 = vunpack.c.l.bf16 %v498_v33  ;;  %v502_v37 = vunpack.c.h.bf16 %v498_v33  ;;  %v1187_v50 = vld [vmem:[%s1485_s16 + $0x24] ss:$8 sps:$4 sm:$0xff]   ;;  %v1189_v51 = vld [vmem:[%s1485_s16 + $0x20] ss:$8 sps:$4 sm:$0xff]   ;;  %v1192_v53 = vld [vmem:[%s1485_s16 + $0x10] ss:$8 sps:$4 sm:$0xff]  }
  0x39   : > { %805 = vmatpush1.bf16.msra.mxu0 %v1177_v43  ;;  %v1193_v54 = vld [vmem:[%s1485_s16 + $0x4] ss:$8 sps:$4 sm:$0xff]   ;;  %v1195_v55 = vld [vmem:[%s1485_s16] ss:$8 sps:$4 sm:$0xff]   ;;  %v1196_v6 = vld [vmem:[%s1485_s16 + $0xf4] ss:$8 sps:$4 sm:$0xff]  }
  0x3a   : > { %v503_v38 = vadd.f32 %v500_v35, %v499_v34  ;;  %v506_v39 = vadd.f32 %v502_v37, %v501_v36  ;;  %806 = vmatprep.subr.bf16.mxu0 %v1178_v44  ;;  %v1198_v7 = vld [vmem:[%s1485_s16 + $0xf0] ss:$8 sps:$4 sm:$0xff]   ;;  %v1199_v8 = vld [vmem:[%s1485_s16 + $0xe4] ss:$8 sps:$4 sm:$0xff]   ;;  %v1201_v9 = vld [vmem:[%s1485_s16 + $0xe0] ss:$8 sps:$4 sm:$0xff]  }
  0x3b   : > { %v1202_v10 = vld [vmem:[%s1485_s16 + $0xd4] ss:$8 sps:$4 sm:$0xff]   ;;  %v1204_v11 = vld [vmem:[%s1485_s16 + $0xd0] ss:$8 sps:$4 sm:$0xff]   ;;  %v1205_v12 = vld [vmem:[%s1485_s16 + $0xc4] ss:$8 sps:$4 sm:$0xff]  }
  0x3c   : > { %504 = vadd.xlane.f32.xlu0 %v503_v38  ;;  %v1207_v13 = vld [vmem:[%s1485_s16 + $0xc0] ss:$8 sps:$4 sm:$0xff]   ;;  %v1208_v14 = vld [vmem:[%s1485_s16 + $0xb4] ss:$8 sps:$4 sm:$0xff]   ;;  %v1210_v15 = vld [vmem:[%s1485_s16 + $0xb0] ss:$8 sps:$4 sm:$0xff]  }
  0x3d   : > { %807 = vmatpush1.bf16.msra.mxu0 %v1180_v45  ;;  %v1211_v16 = vld [vmem:[%s1485_s16 + $0xa4] ss:$8 sps:$4 sm:$0xff]   ;;  %v1213_v17 = vld [vmem:[%s1485_s16 + $0xa0] ss:$8 sps:$4 sm:$0xff]   ;;  %v1214_v18 = vld [vmem:[%s1485_s16 + $0x94] ss:$8 sps:$4 sm:$0xff]  }
  0x3e   : > { %808 = vmatprep.subr.bf16.mxu0 %v1181_v46  ;;  %v1216_v19 = vld [vmem:[%s1485_s16 + $0x90] ss:$8 sps:$4 sm:$0xff]   ;;  %v1217_v20 = vld [vmem:[%s1485_s16 + $0x84] ss:$8 sps:$4 sm:$0xff]   ;;  %v1219_v21 = vld [vmem:[%s1485_s16 + $0x80] ss:$8 sps:$4 sm:$0xff]  }
  0x3f   : > { %v536_v26 = vld [vmem:[%s484_s30] sm:$0x3]  ;;  %v542_v33 = vsub.s32 0, %v541_v31  ;;  %p491_p1 = scmp.lt.s32.totalorder %s1055_s6, 5  ;;  %s467_s20 = sand.u32 1, %s1262_s18  }
  0x40   : > { %507 = vadd.xlane.f32.xlu0 %v506_v39  ;;  %v537_v29 = vunpack.c.l.bf16 %v536_v26  ;;  %s1050_s17 = sshll.u32 %s467_s20, 4  ;;  %s1099_s18 = smul.u32 (%p1393_p9), 12, %s1282_s23 }
  0x41   : > { %809 = vmatpush1.bf16.msra.mxu0 %v1183_v47  ;;  %s492_s13 = scalar_select %p491_p1, %s1055_s6, 5 }
  0x42   : > { %810 = vmatprep.subr.bf16.mxu0 %v1184_v48  ;;  %v538_v32 = vadd.f32 1.0, %v537_v29  ;;  %s469_s22 = scalar_lea.vmem [#allocation3], %s1050_s17  ;;  %s871_s27 = sadd.s32 (%p1393_p9), %s1099_s18, %s1055_s6 }
  0x43   : > { %s493_s16 = scalar_lea.vmem %s1588_s4, %s492_s13  ;;  %s1092_s30 = sshll.u32 (%p1393_p9), %s871_s27, 2 }
  0x44   : > { %v543_v38 = vrot.slane %v538_v32, %v542_v33 }
  0x45   : > { %811 = vmatpush1.bf16.msra.mxu0 %v1186_v49 }
  0x46   : > { %812 = vmatprep.subr.bf16.mxu0 %v1187_v50  ;;  %v553_v45 = vrot.slane %v543_v38, %v542_v33 }
  0x49   : > { %813 = vmatpush1.bf16.msra.mxu0 %v1189_v51 }
  0x4a   : > { %814 = vmatprep.subr.bf16.mxu0 %v1190_v52 }
  0x4d   : > { %815 = vmatpush1.bf16.msra.mxu0 %v1192_v53 }
  0x4e   : > { %816 = vmatprep.subr.bf16.mxu0 %v1193_v54 }
  0x51   : > { %817 = vmatpush1.bf16.msra.mxu0 %v1195_v55 }
  0x52   : > { %818 = vmatprep.subr.bf16.mxu0 %v1196_v6 }
  0x55   : > { %819 = vmatpush2.bf16.msra.mxu0 %v1198_v7 }
  0x56   : > { %820 = vmatprep.subr.bf16.mxu0 %v1199_v8 }
  0x59   : > { %821 = vmatpush2.bf16.msra.mxu0 %v1201_v9 }
  0x5a   : > { %822 = vmatprep.subr.bf16.mxu0 %v1202_v10 }
  0x5d   : > { %823 = vmatpush2.bf16.msra.mxu0 %v1204_v11 }
  0x5e   : > { %824 = vmatprep.subr.bf16.mxu0 %v1205_v12 }
  0x61   : > { %825 = vmatpush2.bf16.msra.mxu0 %v1207_v13 }
  0x62   : > { %826 = vmatprep.subr.bf16.mxu0 %v1208_v14 }
  0x65   : > { %827 = vmatpush2.bf16.msra.mxu0 %v1210_v15 }
  0x66   : > { %828 = vmatprep.subr.bf16.mxu0 %v1211_v16 }
  0x69   : > { %829 = vmatpush2.bf16.msra.mxu0 %v1213_v17 }
  0x6a   : > { %830 = vmatprep.subr.bf16.mxu0 %v1214_v18 }
  0x6d   : > { %831 = vmatpush2.bf16.msra.mxu0 %v1216_v19 }
  0x6e   : > { %832 = vmatprep.subr.bf16.mxu0 %v1217_v20 }
  0x71   : > { %833 = vmatpush2.bf16.msra.mxu0 %v1219_v21 }
  0xc5   : > { %v505_v56 = vpop.xlane.xlu0 %504 }
  0xc6   : > { %v510_v57 = vmul.f32 0.00390625, %v505_v56 }
  0xc8   : > { %v1503_v58 = vsub.f32 %v499_v34, %v510_v57  ;;  %v1505_v59 = vsub.f32 %v500_v35, %v510_v57  ;;  %v546_v34 = vsub.s32 2, %v541_v31  ;;  %v562_v35 = vld [vmem:[%s488_s10] sm:$0x3]  ;;  %s873_s10 = scalar_lea.vmem (%p1393_p9), %s1589_s5, %s1092_s30 }
  0xc9   : > { %v508_v60 = vpop.xlane.xlu0 %507 }
  0xca   : > { %v511_v61 = vmul.f32 0.00390625, %v508_v60  ;;  %v516_v62 = vmul.f32 %v1503_v58, %v1503_v58  ;;  %v517_v63 = vmul.f32 %v1505_v59, %v1505_v59 }
  0xcc   : > { %v1511_v0 = vsub.f32 %v501_v36, %v511_v61  ;;  %v1513_v1 = vsub.f32 %v502_v37, %v511_v61  ;;  %v520_v2 = vadd.f32 %v517_v63, %v516_v62  ;;  %v563_v36 = vunpack.c.l.bf16 %v562_v35  ;;  %v621_v61 = vld [vmem:[%s493_s16] sm:$0x3] }
  0xcd   : > { %v547_v37 = vrot.slane %v538_v32, %v546_v34  ;;  %v622_v62 = vunpack.c.l.bf16 %v621_v61 }
  0xce   : > { %521 = vadd.xlane.f32.xlu1 %v520_v2  ;;  %v518_v3 = vmul.f32 %v1511_v0, %v1511_v0  ;;  %v519_v4 = vmul.f32 %v1513_v1, %v1513_v1  ;;  %v572_v40 = vrot.slane %v563_v36, %v546_v34  ;;  %v568_v41 = vrot.slane %v563_v36, %v542_v33 }
  0xcf   : > { %v557_v43 = vrot.slane %v547_v37, %v542_v33  ;;  %v627_v63 = vrot.slane %v622_v62, %v542_v33 }
  0xd0   : > { %v523_v5 = vadd.f32 %v519_v4, %v518_v3  ;;  %v582_v47 = vrot.slane %v572_v40, %v542_v33  ;;  %v578_v48 = vrot.slane %v568_v41, %v542_v33 }
  0xd2   : > { %524 = vadd.xlane.f32.xlu1 %v523_v5 }
 0x157   : > { %v522_v22 = vpop.xlane.xlu1 %521 }
 0x158   : > { %v526_v23 = vmul.f32 0.00390625, %v522_v22 }
 0x15a   : > { %v528_v24 = vadd.f32 1e-06, %v526_v23 }
 0x15b   : > { %v525_v27 = vpop.xlane.xlu1 %524 }
 0x15c   : > { %1220 = vrsqrt.f32 %v528_v24  ;;  %v527_v28 = vmul.f32 0.00390625, %v525_v27 }
 0x15e   : > { %v529_v30 = vadd.f32 1e-06, %v527_v28 }
 0x160   : > { %1222 = vrsqrt.f32 %v529_v30 }
 0x169   : > { %v1221_v39 = vpop.eup %1220 }
 0x16a   : > { %v533_v42 = vmul.f32 %v1221_v39, %v1505_v59  ;;  %v532_v44 = vmul.f32 %v1221_v39, %v1503_v58 }
 0x16c   : > { %v559_v50 = vmul.f32 %v557_v43, %v533_v42  ;;  %v558_v52 = vmul.f32 %v553_v45, %v532_v44 }
 0x16d   : > { %v1223_v46 = vpop.eup %1222 }
 0x16e   : > { %v535_v49 = vmul.f32 %v1223_v46, %v1513_v1  ;;  %v534_v51 = vmul.f32 %v1223_v46, %v1511_v0  ;;  %v584_v55 = vadd.f32 %v582_v47, %v559_v50  ;;  %v583_v57 = vadd.f32 %v578_v48, %v558_v52 }
 0x16f   : > { %v631_v0 = vrot.slane %v622_v62, %v546_v34  ;;  %v637_v1 = vrot.slane %v627_v63, %v542_v33 }
 0x170   : > { %v561_v53 = vmul.f32 %v557_v43, %v535_v49  ;;  %v560_v54 = vmul.f32 %v553_v45, %v534_v51 }
 0x171   : > { %v641_v2 = vrot.slane %v631_v0, %v542_v33 }
 0x172   : > { %v586_v56 = vadd.f32 %v582_v47, %v561_v53  ;;  %v585_v59 = vadd.f32 %v578_v48, %v560_v54 }
 0x174   : > { %v588_v60 = vpack.c.bf16 %v586_v56, %v584_v55  ;;  %v587_v58 = vpack.c.bf16 %v585_v59, %v583_v57 }
 0x176   : > { %834 = vmatprep.mubr.bf16.mxu0 %v588_v60 }
 0x177   : > { %835 = vmatmul.mubr.bf16.vlgmr.msra.gmra.mxu0 %v587_v58 }
 0x237   : > { %v836_v3 = vpop.f32.mrf.mxu0 }
 0x238   : > { %v837_v5 = vadd.f32 %v836_v3, %v637_v1 }
 0x239   : > { %v838_v4 = vpop.f32.mrf.mxu0 }
 0x23a   : > { %v839_v6 = vadd.f32 %v838_v4, %v641_v2 }
 0x23b   : > { %v840_v7 = vpop.f32.mrf.mxu0 }
 0x23c   : > { %v1097_v8 = vpack.c.bf16 %v839_v6, %v837_v5  ;;  %v841_v10 = vadd.f32 %v840_v7, %v637_v1 }
 0x23d   : > { %v842_v9 = vpop.f32.mrf.mxu0 }
 0x23e   : > { %857 = vst [vmem:[%s469_s22] sm:$0xff] %v1097_v8  ;;  %v843_v11 = vadd.f32 %v842_v9, %v641_v2  ;;  %865 = sbr.rel (!%p1393_p9) target bundleno = 587 (0x24b), region = 82 }
 0x240   : > { %v1098_v12 = vpack.c.bf16 %v843_v11, %v841_v10 }
 0x242   : > { %858 = vst [vmem:[%s469_s22 + $0x8] sm:$0xff] %v1098_v12 }
 0x245   : > { %v904_v13 = vld [vmem:[%s469_s22] sm:$0xff] }
 0x246   : > { %905 = vst [vmem:[%s873_s10] sm:$0xff] %v904_v13 }
 0x249   : > { %v906_v14 = vld [vmem:[%s469_s22 + $0x8] sm:$0xff] }
 0x24a   : > { %907 = vst [vmem:[%s873_s10 + $0x18] sm:$0xff] %v906_v14 }
 0x24b PF: > { %s15_s26 = sadd.s32 1, %s1294_s26   ;;  %s1591_s18 = smov %s1266_s19 }
 0x24c   : > { %p12_p2 = scmp.ge.s32.totalorder %s15_s26, 8   ;;  %s1592_s19 = smov %s1398_s12 }
 0x24d   : > { %s1593_s20 = smov %s1274_s21  ;;  %s1594_s21 = smov %s1387_s8 }
 0x24e   : > { %s1595_s22 = smov %s1286_s24  ;;  %s1596_s23 = smov %s1290_s25 }
 0x24f   : > { %s1597_s24 = smov %s1600_s28  ;;  %s1598_s25 = smov %s1604_s29 }
 0x250   :  { %14 = sbr.rel (!%p12_p2) target bundleno = 5 (0x5), region = 163 }

// kernel: _dual_block_forward.13
= control target key start
LH: loop header
LB: loop body
LE: loop exit
PB: predicated region body
PF: predicated region fallthrough
CT: control target
= control target key end

     0   :  { %8 = vsyncpa [#allocation4], 0  ;;  %s1151_s0 = inlined_call_operand.vmem [shape: bf16[2,256], index: 0, kind: input, shape index: {}]   ;;  %s1152_s1 = inlined_call_operand.hbm [shape: bf16[256,1536], index: 1, kind: input, shape index: {}]   ;;  %s1153_s2 = inlined_call_operand.vmem [shape: bf16[1,1536], index: 2, kind: input, shape index: {}]   ;;  %s1154_s3 = inlined_call_operand.vmem [shape: bf16[2,1536], index: 3, kind: output, shape index: {}]  }
   0x1   :  { %10 = vsyncpa [#allocation4 + $0x1], 0  ;;  %s1010_s12 = smov 0   ;;  %s1012_s13 = smov 0  }
   0x2   :  { %s1014_s14 = smov 0   ;;  %s1016_s15 = smov 0  }
   0x3   :  { %s1018_s16 = smov 0   ;;  %s1020_s17 = smov 0  }
   0x4 LB: > { %s740_s18 = sadd.s32 4294967295, %s981_s17   ;;  %s31_s19 = sadd.s32 1, %s977_s16  ;;  %s981_s17 = sphi %s1020_s17, %s16_s17   ;;  %s977_s16 = sphi %s1018_s16, %s1162_s16   ;;  %s973_s15 = sphi %s1016_s15, %s1161_s15   ;;  %s969_s14 = sphi %s1014_s14, %s1160_s14   ;;  %s965_s13 = sphi %s1012_s13, %s1159_s13   ;;  %s961_s12 = sphi %s1010_s12, %s1158_s12  }
   0x5   : > { %p33_p0 = scmp.ge.s32.totalorder %s31_s19, 6  ;;  %s72_s20 = sadd.s32 1, %s969_s14 }
   0x6   : > { %p79_p1 = scmp.ne.s32.totalorder %s969_s14, %s965_s13  ;;  %p80_p2 = scmp.eq.s32.totalorder %s981_s17, 0 }
   0x7   : > { %s1164_s19 = smov (%p33_p0, %s31_s19), 0  ;;  %p85_p4 = scmp.ne.s32.totalorder %s965_s13, %s961_s12 }
   0x8   : > { %p1046_p3 = por %p80_p2, %p79_p1  ;;  %s68_s22 = ssub.s32 %s977_s16, %s1164_s19 }
   0x9   : > { %p86_p5 = scmp.eq.s32.totalorder %s740_s18, 0  ;;  %p70_p6 = scmp.eq.s32.totalorder %s68_s22, 0 }
   0xa   : > { %p796_p8 = scmp.lt.s32.totalorder %s981_s17, 6  ;;  %s175_s25 = sand.u32 1, %s969_s14  }
   0xb   : > { %p1053_p7 = por %p86_p5, %p85_p4  ;;  %s789_s26 = sshll.u32 %s977_s16, 7 }
   0xc   : > { %s1059_s24 = scalar_select %p70_p6, %s969_s14, %s72_s20  }
   0xd   : > { %s745_s27 = sshll.u32 %s175_s25, 8  ;;  %s188_s30 = scalar_lea.hbm %s1152_s1, %s789_s26 }
   0xe   : > { %s179_s4 = scalar_lea.vmem [#allocation3], %s745_s27  ;;  %p1068_p9 = pnand %p796_p8, %p1046_p3 }
   0xf   : > { %s189_s5 = sshll.u32 %s179_s4, 4  ;;  %p748_p10 = scmp.ge.s32.totalorder %s981_s17, 1  ;;  %s190_s5 = int_to_ptr.vmem [resolvable:$true] %s189_s5 }
  0x10   : > { %s176_s7 = scalar_lea.sflag [#allocation4], %s175_s25  ;;  %p905_p11 = pneg %p1068_p9 }
  0x11   : > { %s916_s8 = scalar_lea.vmem %s190_s5, 4096  ;;  %s983_s9 = smov [#allocation3]  }
  0x12   : > { %p917_p12 = scmp.ne.s32.totalorder %s190_s5, %s916_s8  ;;  %s921_s10 = sshll.u32 %s983_s9, 4  ;;  %s922_s10 = int_to_ptr.vmem [resolvable:$false] %s921_s10 }
  0x13   : > { %s923_s11 = scalar_lea.vmem %s922_s10, 8192  ;;  %p924_p1 = scmp.lt.s32.totalorder %s190_s5, %s922_s10 }
  0x14   : > { %p919_p13 = pnand %p917_p12, %p905_p11  ;;  %p925_p2 = scmp.lt.s32.totalorder %s923_s11, %s916_s8 }
  0x16   : > { %p920_p0 = pneg %p919_p13  ;;  %p926_p3 = por %p925_p2, %p924_p1 }
  0x18   : > { %p927_p4 = pnand %p926_p3, %p920_p0 }
  0x1a   : > { %930 = shalt.err (!%p927_p4)
}
  0x1b   : > { %s984_s12 = smov 768   ;;  %s985_s18 = smov 128  }
  0x1c   : > { %s986_s20 = smov 8   ;;  %p205_p5 = scmp.lt.s32.totalorder %s981_s17, 7 }
  0x1d   : > { %795 = dma.hbm_to_vmem [thread:$0]  (!%p1068_p9), %s188_s30, 4096, %s190_s5, %s176_s7, %s984_s12, %s985_s18, %s986_s20  }
  0x1e   : > { %p206_p6 = pnand %p748_p10, %p205_p5 }
  0x1f   : > { %s211_s21 = sand.u32 (!%p206_p6), 1, %s965_s13  }
  0x20   : > { %209 = sbr.rel (%p206_p6) target bundleno = 323 (0x143), region = 32  ;;  %s749_s22 = sshll.u32 (!%p206_p6), %s211_s21, 8 }
  0x21   : > { %s212_s25 = scalar_lea.sflag (!%p206_p6), [#allocation4], %s211_s21  ;;  %s1081_s26 = scalar_lea.vmem (!%p206_p6), [#allocation3], %s749_s22 }
  0x25   : > { %956 = dma.done.wait (%p1053_p7), %s212_s25, 4096  }
  0x26   : > { %958 = vsyncadd (%p1053_p7), %s212_s25, 4294963200  ;;  %v851_v0 = vld [vmem:[%s1081_s26 + $0x74] ss:$8 sps:$4 sm:$0xff]   ;;  %v853_v1 = vld [vmem:[%s1081_s26 + $0x70] ss:$8 sps:$4 sm:$0xff]   ;;  %v296_v32 = vlaneseq  ;;  %v988_v49 = vmov 0.0  }
  0x27   : > { %498 = vmatprep.subr.bf16.mxu0 %v851_v0  ;;  %v854_v2 = vld [vmem:[%s1081_s26 + $0x64] ss:$8 sps:$4 sm:$0xff]   ;;  %v856_v3 = vld [vmem:[%s1081_s26 + $0x60] ss:$8 sps:$4 sm:$0xff]   ;;  %v857_v4 = vld [vmem:[%s1081_s26 + $0x54] ss:$8 sps:$4 sm:$0xff]  }
  0x28   : > { %499 = vmatpush1.bf16.msra.mxu0 %v853_v1  ;;  %v859_v5 = vld [vmem:[%s1081_s26 + $0x50] ss:$8 sps:$4 sm:$0xff]   ;;  %v860_v6 = vld [vmem:[%s1081_s26 + $0x44] ss:$8 sps:$4 sm:$0xff]   ;;  %v862_v7 = vld [vmem:[%s1081_s26 + $0x40] ss:$8 sps:$4 sm:$0xff]  }
  0x29   : > { %500 = vmatprep.subr.bf16.mxu0 %v854_v2  ;;  %v863_v8 = vld [vmem:[%s1081_s26 + $0x34] ss:$8 sps:$4 sm:$0xff]   ;;  %v865_v9 = vld [vmem:[%s1081_s26 + $0x30] ss:$8 sps:$4 sm:$0xff]   ;;  %v866_v10 = vld [vmem:[%s1081_s26 + $0x24] ss:$8 sps:$4 sm:$0xff]  }
  0x2a   : > { %v868_v11 = vld [vmem:[%s1081_s26 + $0x20] ss:$8 sps:$4 sm:$0xff]   ;;  %v869_v12 = vld [vmem:[%s1081_s26 + $0x14] ss:$8 sps:$4 sm:$0xff]   ;;  %v871_v15 = vld [vmem:[%s1081_s26 + $0x10] ss:$8 sps:$4 sm:$0xff]  }
  0x2b   : > { %v283_v13 = vld [vmem:[%s1151_s0] sm:$0x3]  ;;  %v872_v16 = vld [vmem:[%s1081_s26 + $0x4] ss:$8 sps:$4 sm:$0xff]   ;;  %v874_v18 = vld [vmem:[%s1081_s26] ss:$8 sps:$4 sm:$0xff]  }
  0x2c   : > { %501 = vmatpush1.bf16.msra.mxu0 %v856_v3  ;;  %v284_v14 = vunpack.c.l.bf16 %v283_v13  ;;  %v875_v19 = vld [vmem:[%s1081_s26 + $0xf4] ss:$8 sps:$4 sm:$0xff]   ;;  %v877_v20 = vld [vmem:[%s1081_s26 + $0xf0] ss:$8 sps:$4 sm:$0xff]   ;;  %v878_v21 = vld [vmem:[%s1081_s26 + $0xe4] ss:$8 sps:$4 sm:$0xff]  }
  0x2d   : > { %502 = vmatprep.subr.bf16.mxu0 %v857_v4  ;;  %v880_v22 = vld [vmem:[%s1081_s26 + $0xe0] ss:$8 sps:$4 sm:$0xff]   ;;  %v881_v23 = vld [vmem:[%s1081_s26 + $0xd4] ss:$8 sps:$4 sm:$0xff]   ;;  %v883_v25 = vld [vmem:[%s1081_s26 + $0xd0] ss:$8 sps:$4 sm:$0xff]  }
  0x2e   : > { %v752_v17 = vmul.f32 -1.442695, %v284_v14  ;;  %v884_v26 = vld [vmem:[%s1081_s26 + $0xc4] ss:$8 sps:$4 sm:$0xff]   ;;  %v886_v28 = vld [vmem:[%s1081_s26 + $0xc0] ss:$8 sps:$4 sm:$0xff]  }
  0x2f   : > { %v887_v29 = vld [vmem:[%s1081_s26 + $0xb4] ss:$8 sps:$4 sm:$0xff]   ;;  %v987_v30 = vmov 1983009808   ;;  %v889_v33 = vld [vmem:[%s1081_s26 + $0xb0] ss:$8 sps:$4 sm:$0xff]  }
  0x30   : > { %503 = vmatpush1.bf16.msra.mxu0 %v859_v5  ;;  %899 = vpow2.f32 %v752_v17  ;;  %v294_v31 = vunpack.c.l.s4 %v987_v30  ;;  %v890_v34 = vld [vmem:[%s1081_s26 + $0xa4] ss:$8 sps:$4 sm:$0xff]   ;;  %v297_v36 = vshrl.u32 %v296_v32, 7  ;;  %v892_v37 = vld [vmem:[%s1081_s26 + $0xa0] ss:$8 sps:$4 sm:$0xff]   ;;  %s750_s28 = sshll.u32 %s973_s15, 1 }
  0x31   : > { %504 = vmatprep.subr.bf16.mxu0 %v860_v6  ;;  %v893_v38 = vld [vmem:[%s1081_s26 + $0x94] ss:$8 sps:$4 sm:$0xff]   ;;  %v895_v41 = vld [vmem:[%s1081_s26 + $0x90] ss:$8 sps:$4 sm:$0xff]   ;;  %v896_v42 = vld [vmem:[%s1081_s26 + $0x84] ss:$8 sps:$4 sm:$0xff]  }
  0x32   : > { %v295_v35 = vunpack.c.0.s8 %v294_v31  ;;  %v898_v45 = vld [vmem:[%s1081_s26 + $0x80] ss:$8 sps:$4 sm:$0xff]   ;;  %282 = vst [vmem:[#allocation2] sm:$0xf] %v988_v49  ;;  %p265_p7 = scmp.lt.s32.totalorder %s750_s28, 11  ;;  %v561_v52 = vsub.s32 0, %v297_v36 }
  0x33   : > { %v565_v53 = vsub.s32 2, %v297_v36  ;;  %v989_v4 = vmov 1966171168  }
  0x34   : > { %505 = vmatpush1.bf16.msra.mxu0 %v862_v7  ;;  %v298_v39 = vsub.s32 %v295_v35, %v297_v36  ;;  %s1166_s28 = smov (!%p265_p7, %s750_s28), 11  ;;  %v606_v5 = vunpack.c.l.s4 %v989_v4 }
  0x35   : > { %506 = vmatprep.subr.bf16.mxu0 %v863_v8  ;;  %s267_s4 = scalar_lea.vmem %s1153_s2, %s1166_s28  ;;  %s276_s6 = scalar_lea.vmem %s1154_s3, %s1166_s28 }
  0x36   : > { %v556_v50 = vld [vmem:[%s267_s4] sm:$0x3]  ;;  %v607_v7 = vunpack.c.0.s8 %v606_v5 }
  0x37   : > { %v557_v51 = vunpack.c.l.bf16 %v556_v50 }
  0x38   : > { %507 = vmatpush1.bf16.msra.mxu0 %v865_v9 }
  0x39   : > { %508 = vmatprep.subr.bf16.mxu0 %v866_v10  ;;  %v562_v55 = vrot.slane %v557_v51, %v561_v52  ;;  %v566_v56 = vrot.slane %v557_v51, %v565_v53  ;;  %v305_v59 = vld [vmem:[#allocation2] sm:$0xf]  ;;  %v610_v10 = vsub.s32 %v607_v7, %v297_v36 }
  0x3b   : > { %v572_v61 = vrot.slane %v562_v55, %v561_v52  ;;  %v576_v62 = vrot.slane %v566_v56, %v561_v52 }
  0x3c   : > { %509 = vmatpush1.bf16.msra.mxu0 %v868_v11 }
  0x3d   : > { %510 = vmatprep.subr.bf16.mxu0 %v869_v12  ;;  %v900_v24 = vpop.eup %899  ;;  %v579_v2 = vcombine.low %v572_v61, %v576_v62 }
  0x3e   : > { %v288_v27 = vadd.f32 1.0, %v900_v24 }
  0x3f   : > { %v586_v3 = vrot.slane %v579_v2, %v298_v39 }
  0x40   : > { %511 = vmatpush1.bf16.msra.mxu0 %v871_v15  ;;  %901 = vrcp.f32 %v288_v27 }
  0x41   : > { %512 = vmatprep.subr.bf16.mxu0 %v872_v16 }
  0x44   : > { %513 = vmatpush1.bf16.msra.mxu0 %v874_v18 }
  0x45   : > { %514 = vmatprep.subr.bf16.mxu0 %v875_v19 }
  0x48   : > { %515 = vmatpush2.bf16.msra.mxu0 %v877_v20 }
  0x49   : > { %516 = vmatprep.subr.bf16.mxu0 %v878_v21 }
  0x4c   : > { %517 = vmatpush2.bf16.msra.mxu0 %v880_v22 }
  0x4d   : > { %518 = vmatprep.subr.bf16.mxu0 %v881_v23  ;;  %v902_v40 = vpop.eup %901 }
  0x4e   : > { %v291_v43 = vmul.f32 %v902_v40, %v284_v14 }
  0x50   : > { %519 = vmatpush2.bf16.msra.mxu0 %v883_v25  ;;  %v299_v44 = vrot.slane %v291_v43, %v298_v39 }
  0x51   : > { %520 = vmatprep.subr.bf16.mxu0 %v884_v26 }
  0x52   : > { %v300_v46 = vcombine.high %v299_v44, %v299_v44  ;;  %v303_v48 = vpack.c.bf16 %v299_v44, %v299_v44 }
  0x54   : > { %521 = vmatpush2.bf16.msra.mxu0 %v886_v28  ;;  %v304_v47 = vpack.c.bf16 %v300_v46, %v300_v46 }
  0x55   : > { %522 = vmatprep.subr.bf16.mxu0 %v887_v29 }
  0x56   : > { %530 = vmatprep.mubr.bf16.mxu0 %v304_v47 }
  0x58   : > { %523 = vmatpush2.bf16.msra.mxu0 %v889_v33 }
  0x59   : > { %524 = vmatprep.subr.bf16.mxu0 %v890_v34 }
  0x5c   : > { %525 = vmatpush2.bf16.msra.mxu0 %v892_v37 }
  0x5d   : > { %526 = vmatprep.subr.bf16.mxu0 %v893_v38 }
  0x60   : > { %527 = vmatpush2.bf16.msra.mxu0 %v895_v41 }
  0x61   : > { %528 = vmatprep.subr.bf16.mxu0 %v896_v42 }
  0x64   : > { %529 = vmatpush2.bf16.msra.mxu0 %v898_v45 }
  0x67   : > { %531 = vmatmul.mubr.bf16.vlgmr.msra.gmra.mxu0 %v303_v48 }
 0x127   : > { %v532_v54 = vpop.f32.mrf.mxu0 }
 0x129   : > { %v534_v57 = vpop.f32.mrf.mxu0 }
 0x12a   : > { %v541_v58 = vcombine.low %v532_v54, %v534_v57 }
 0x12b   : > { %v536_v60 = vpop.f32.mrf.mxu0 }
 0x12c   : > { %v548_v63 = vrot.slane %v541_v58, %v298_v39 }
 0x12d   : > { %v537_v0 = vpop.f32.mrf.mxu0 }
 0x12e   : > { %v550_v1 = vadd.f32 %v548_v63, %v305_v59 }
 0x130   : > { %551 = vst [vmem:[#allocation2] sm:$0xf] %v550_v1 }
 0x137   : > { %v555_v6 = vld [vmem:[#allocation2] sm:$0xf] }
 0x138   : > { %v588_v8 = vadd.f32 %v586_v3, %v555_v6 }
 0x13a   : > { %v596_v9 = vrot.slane %v588_v8, %v298_v39 }
 0x13c   : > { %v597_v11 = vcombine.high %v596_v9, %v596_v9 }
 0x13e   : > { %v785_v12 = vpack.c.bf16 %v597_v11, %v596_v9 }
 0x140   : > { %v611_v13 = vrot.slane %v785_v12, %v610_v10 }
 0x142   : > { %786 = vst.sshfl [vmem:[%s276_s6] sm:$0x5 pattern:$0x73625140] %v611_v13 }
 0x143 PF: > { %s16_s17 = sadd.s32 1, %s981_s17   ;;  %s1158_s12 = smov %s965_s13 }
 0x144   : > { %p13_p8 = scmp.ge.s32.totalorder %s16_s17, 8   ;;  %s1159_s13 = smov %s969_s14 }
 0x145   : > { %s1160_s14 = smov %s1059_s24  ;;  %s1161_s15 = smov %s977_s16 }
 0x146   : > { %s1162_s16 = smov %s1164_s19  ;;  %15 = sbr.rel (!%p13_p8) target bundleno = 4 (0x4), region = 86 }
 0x14b   :  { %649 = vsyncpa [#allocation4], 1 }
 0x14c   :  { %651 = vsyncpa [#allocation4 + $0x1], 1 }

// kernel: _dual_block_forward.17
= control target key start
LH: loop header
LB: loop body
LE: loop exit
PB: predicated region body
PF: predicated region fallthrough
CT: control target
= control target key end

     0   :  { %s1053_s24 = smov 0   ;;  %s1055_s25 = smov 0   ;;  %s1148_s0 = inlined_call_operand.vmem [shape: bf16[2,2,16,128], index: 0, kind: input, shape index: {}]   ;;  %s1149_s1 = inlined_call_operand.vmem [shape: bf16[2,2,16,128], index: 1, kind: input, shape index: {}]   ;;  %s1150_s2 = inlined_call_operand.vmem [shape: f32[2,16,128], index: 2, kind: input, shape index: {}]   ;;  %s1151_s3 = inlined_call_operand.vmem [shape: f32[2,16,128], index: 3, kind: input, shape index: {}]   ;;  %s1152_s4 = inlined_call_operand.vmem [shape: bf16[1,128], index: 4, kind: input, shape index: {}]   ;;  %s1153_s5 = inlined_call_operand.vmem [shape: bf16[1,128], index: 5, kind: input, shape index: {}]   ;;  %s1154_s6 = inlined_call_operand.vmem [shape: bf16[2,2,16,128], index: 6, kind: output, shape index: {0}]   ;;  %s1155_s7 = inlined_call_operand.vmem [shape: bf16[2,2,16,128], index: 7, kind: output, shape index: {1}]  }
   0x1   :  { %s1057_s26 = smov 0   ;;  %s1059_s27 = smov 0  }
   0x2   :  { %s1061_s28 = smov 0  }
   0x3 LB: > { %s33_s29 = sadd.s32 1, %s1001_s26  ;;  %s37_s30 = sadd.s32 1, %s1005_s27  ;;  %s1009_s28 = sphi %s1061_s28, %s18_s28   ;;  %s1005_s27 = sphi %s1059_s27, %s1161_s27   ;;  %s1001_s26 = sphi %s1057_s26, %s1160_s26   ;;  %s997_s25 = sphi %s1055_s25, %s1159_s25   ;;  %s993_s24 = sphi %s1053_s24, %s1158_s24  }
   0x4   : > { %p35_p0 = scmp.ge.s32.totalorder %s33_s29, 2  ;;  %p874_p1 = scmp.ge.s32.totalorder %s1009_s28, 1 }
   0x5   : > { %p337_p2 = scmp.lt.s32.totalorder %s1009_s28, 5 }
   0x6   : > { %s1163_s29 = smov (%p35_p0, %s33_s29), 0  ;;  %s1165_s30 = smov (!%p35_p0, %s37_s30), %s1005_s27 }
   0x7   : > { %p338_p3 = pnand %p874_p1, %p337_p2  ;;  %p39_p4 = scmp.ge.s32.totalorder %s1165_s30, 2 }
   0x8   : > { %p430_p5 = scmp.lt.s32.totalorder (!%p338_p3), %s997_s25, 1  ;;  %p432_p6 = scmp.lt.s32.totalorder (!%p338_p3), %s993_s24, 1 }
   0x9   : > { %s1167_s30 = smov (%p39_p4, %s1165_s30), 0  ;;  %341 = sbr.rel (%p338_p3) target bundleno = 327 (0x147), region = 44 }
   0xe   : > { %s1169_s25 = smov (!%p430_p5, %s997_s25), 1  ;;  %s1171_s24 = smov (!%p432_p6, %s993_s24), 1  ;;  %v509_v20 = vlaneseq  ;;  %v543_v24 = vld [vmem:[%s1152_s4] sm:$0x1] }
   0xf   : > { %s876_s8 = sshll.u32 %s1169_s25, 2  ;;  %s875_s9 = sshll.u32 %s1171_s24, 1  ;;  %v595_v25 = vld [vmem:[%s1153_s5] sm:$0x1]  ;;  %v544_v26 = vunpack.c.l.bf16 %v543_v24 }
  0x10   : > { %s439_s10 = sadd.s32 %s876_s8, %s875_s9  ;;  %v546_v23 = vshrl.u32 %v509_v20, 7  ;;  %v596_v28 = vunpack.c.l.bf16 %v595_v25  ;;  %s897_s22 = sshll.u32 %s1169_s25, 4  ;;  %v510_v49 = vand.u32 127, %v509_v20 }
  0x11   : > { %s1086_s11 = sshll.u32 %s439_s10, 2  ;;  %s465_s8 = scalar_lea.vmem %s1150_s2, %s897_s22 }
  0x12   : > { %s441_s14 = scalar_lea.vmem %s1148_s0, %s1086_s11  ;;  %s455_s17 = scalar_lea.vmem %s1149_s1, %s1086_s11  ;;  %v547_v27 = vsub.s32 0, %v546_v23  ;;  %v505_v35 = vld [vmem:[%s465_s8] sm:$0xff]  ;;  %v506_v44 = vld [vmem:[%s465_s8 + $0x8] sm:$0xff]  ;;  %v515_v51 = vand.u32 1, %v510_v49 }
  0x13   : > { %v904_v0 = vld [vmem:[%s441_s14] sm:$0xff]   ;;  %s1011_s9 = smov 127   ;;  %s1012_s10 = smov 1  }
  0x14   : > { %v913_v1 = vld [vmem:[%s455_s17] sm:$0xff]   ;;  %v905_v2 = vunpack.c.l.bf16 %v904_v0  ;;  %v906_v4 = vunpack.c.h.bf16 %v904_v0  ;;  %v548_v29 = vrot.slane %v544_v26, %v547_v27  ;;  %v600_v31 = vrot.slane %v596_v28, %v547_v27  ;;  %s475_s14 = scalar_lea.vmem %s1151_s3, %s897_s22  ;;  %s489_s16 = scalar_lea.vmem %s1154_s6, %s1086_s11 }
  0x15   : > { %v914_v3 = vunpack.c.l.bf16 %v913_v1  ;;  %v915_v5 = vunpack.c.h.bf16 %v913_v1  ;;  %vm1113_vm0 = vcmp.eq.s32.totalorder %v515_v51, 0  ;;  %v507_v55 = vld [vmem:[%s475_s14] sm:$0xff]  ;;  %v508_v62 = vld [vmem:[%s475_s14 + $0x8] sm:$0xff]  ;;  %s503_s19 = scalar_lea.vmem %s1155_s7, %s1086_s11 }
  0x16   : > { %v528_v6 = vmul.f32 %v905_v2, %v905_v2  ;;  %v529_v8 = vmul.f32 %v906_v4, %v906_v4 }
  0x17   : > { %v581_v7 = vmul.f32 %v914_v3, %v914_v3  ;;  %v582_v9 = vmul.f32 %v915_v5, %v915_v5 }
  0x18   : > { %530 = vadd.xlane.f32.xlu0 %v528_v6 }
  0x19   : > { %583 = vadd.xlane.f32.xlu1 %v581_v7 }
  0x1c   : > { %532 = vadd.xlane.f32.xlu0 %v529_v8 }
  0x1d   : > { %585 = vadd.xlane.f32.xlu1 %v582_v9 }
  0xa1   : > { %v531_v10 = vpop.xlane.xlu0 %530 }
  0xa2   : > { %v584_v11 = vpop.xlane.xlu1 %583  ;;  %v535_v12 = vmul.f32 0.0078125, %v531_v10 }
  0xa3   : > { %v587_v13 = vmul.f32 0.0078125, %v584_v11 }
  0xa4   : > { %v537_v14 = vadd.f32 1e-06, %v535_v12 }
  0xa5   : > { %v589_v15 = vadd.f32 1e-06, %v587_v13  ;;  %v533_v16 = vpop.xlane.xlu0 %532 }
  0xa6   : > { %v586_v17 = vpop.xlane.xlu1 %585  ;;  %963 = vrsqrt.f32 %v537_v14  ;;  %v536_v18 = vmul.f32 0.0078125, %v533_v16 }
  0xa7   : > { %v588_v19 = vmul.f32 0.0078125, %v586_v17  ;;  %965 = vrsqrt.f32 %v589_v15 }
  0xa8   : > { %v538_v21 = vadd.f32 1e-06, %v536_v18 }
  0xa9   : > { %v590_v22 = vadd.f32 1e-06, %v588_v19 }
  0xaa   : > { %967 = vrsqrt.f32 %v538_v21 }
  0xab   : > { %969 = vrsqrt.f32 %v590_v22 }
  0xb3   : > { %v964_v30 = vpop.eup %963 }
  0xb4   : > { %v966_v32 = vpop.eup %965  ;;  %v541_v33 = vmul.f32 %v964_v30, %v905_v2 }
  0xb5   : > { %v593_v34 = vmul.f32 %v966_v32, %v914_v3 }
  0xb6   : > { %v549_v36 = vmul.f32 %v548_v29, %v541_v33 }
  0xb7   : > { %v968_v37 = vpop.eup %967  ;;  %v601_v38 = vmul.f32 %v600_v31, %v593_v34 }
  0xb8   : > { %v970_v39 = vpop.eup %969  ;;  %551 = vrot.lane.b32.xlu0 %v549_v36, %s1011_s9  ;;  %v542_v40 = vmul.f32 %v968_v37, %v906_v4  ;;  %v561_v41 = vmul.f32 %v549_v36, %v505_v35 }
  0xb9   : > { %v594_v42 = vmul.f32 %v970_v39, %v915_v5  ;;  %v613_v43 = vmul.f32 %v601_v38, %v505_v35 }
  0xba   : > { %v550_v45 = vmul.f32 %v548_v29, %v542_v40 }
  0xbb   : > { %v602_v46 = vmul.f32 %v600_v31, %v594_v42 }
  0xbc   : > { %603 = vrot.lane.b32.xlu0 %v601_v38, %s1011_s9  ;;  %553 = vrot.lane.b32.xlu1 %v550_v45, %s1011_s9  ;;  %v562_v47 = vmul.f32 %v550_v45, %v506_v44 }
  0xbd   : > { %v614_v48 = vmul.f32 %v602_v46, %v506_v44 }
  0xc0   : > { %607 = vrot.lane.b32.xlu0 %v601_v38, %s1012_s10  ;;  %555 = vrot.lane.b32.xlu1 %v549_v36, %s1012_s10 }
  0xc4   : > { %557 = vrot.lane.b32.xlu1 %v550_v45, %s1012_s10 }
  0xc8   : > { %605 = vrot.lane.b32.xlu1 %v602_v46, %s1011_s9 }
  0xcc   : > { %609 = vrot.lane.b32.xlu1 %v602_v46, %s1012_s10 }
 0x12a   : > { %v552_v50 = vpop.permute.xlu0 %551 }
 0x12e   : > { %v554_v52 = vpop.permute.xlu1 %553  ;;  %v604_v53 = vpop.permute.xlu0 %603 }
 0x132   : > { %v556_v56 = vpop.permute.xlu1 %555  ;;  %v608_v57 = vpop.permute.xlu0 %607 }
 0x133   : > { %v559_v58 = vsel %vm1113_vm0, %v552_v50, %v556_v56  ;;  %v611_v59 = vsel %vm1113_vm0, %v604_v53, %v608_v57 }
 0x134   : > { %v563_v60 = vmul.f32 %v559_v58, %v507_v55  ;;  %v615_v61 = vmul.f32 %v611_v59, %v507_v55 }
 0x136   : > { %v565_v63 = vadd.f32 %v563_v60, %v561_v41  ;;  %v617_v0 = vadd.f32 %v615_v61, %v613_v43  ;;  %v558_v1 = vpop.permute.xlu1 %557 }
 0x137   : > { %v560_v2 = vsel %vm1113_vm0, %v554_v52, %v558_v1 }
 0x138   : > { %v564_v3 = vmul.f32 %v560_v2, %v508_v62 }
 0x13a   : > { %v566_v4 = vadd.f32 %v564_v3, %v562_v47  ;;  %v606_v5 = vpop.permute.xlu1 %605 }
 0x13c   : > { %v910_v6 = vpack.c.bf16 %v566_v4, %v565_v63 }
 0x13e   : > { %911 = vst [vmem:[%s489_s16] sm:$0xff] %v910_v6   ;;  %v610_v7 = vpop.permute.xlu1 %609 }
 0x13f   : > { %v612_v8 = vsel %vm1113_vm0, %v606_v5, %v610_v7 }
 0x140   : > { %v616_v9 = vmul.f32 %v612_v8, %v508_v62 }
 0x142   : > { %v618_v10 = vadd.f32 %v616_v9, %v614_v48 }
 0x144   : > { %v919_v11 = vpack.c.bf16 %v618_v10, %v617_v0 }
 0x146   : > { %920 = vst [vmem:[%s503_s19] sm:$0xff] %v919_v11  }
 0x147 PF: > { %s18_s28 = sadd.s32 1, %s1009_s28   ;;  %s1158_s24 = smov %s1001_s26 }
 0x148   : > { %p15_p7 = scmp.ge.s32.totalorder %s18_s28, 6   ;;  %s1159_s25 = smov %s1005_s27 }
 0x149   : > { %s1160_s26 = smov %s1163_s29  ;;  %s1161_s27 = smov %s1167_s30 }
 0x14a   :  { %17 = sbr.rel (!%p15_p7) target bundleno = 3 (0x3), region = 95 }

// kernel: _dual_block_forward.16
= control target key start
LH: loop header
LB: loop body
LE: loop exit
PB: predicated region body
PF: predicated region fallthrough
CT: control target
= control target key end

     0   :  { %s1255_s18 = smov 0   ;;  %s1257_s19 = smov 0   ;;  %s1461_s0 = inlined_call_operand.vmem [shape: bf16[2,8,256], index: 0, kind: input, shape index: {}]   ;;  %s1462_s1 = inlined_call_operand.vmem [shape: bf16[2,1,256], index: 1, kind: input, shape index: {}]   ;;  %s1463_s2 = inlined_call_operand.vmem [shape: bf16[2,1,256], index: 2, kind: input, shape index: {}]   ;;  %s1464_s3 = inlined_call_operand.vmem [shape: bf16[256,768], index: 3, kind: input, shape index: {}]   ;;  %s1465_s4 = inlined_call_operand.vmem [shape: bf16[1,768], index: 4, kind: input, shape index: {}]   ;;  %s1466_s5 = inlined_call_operand.vmem [shape: bf16[2,8,768], index: 5, kind: output, shape index: {}]  }
   0x1   :  { %s1259_s20 = smov 0   ;;  %s1261_s21 = smov 0  }
   0x2   :  { %s1263_s22 = smov 0   ;;  %s1265_s23 = smov 0  }
   0x3   :  { %s1267_s24 = smov 0  }
   0x4 LB: > { %s27_s25 = sadd.s32 1, %s1215_s22  ;;  %s34_s26 = sadd.s32 1, %s1219_s23  ;;  %s1223_s24 = sphi %s1267_s24, %s15_s24   ;;  %s1219_s23 = sphi %s1265_s23, %s1472_s23   ;;  %s1215_s22 = sphi %s1263_s22, %s1471_s22   ;;  %s1211_s21 = sphi %s1261_s21, %s1470_s21   ;;  %s1207_s20 = sphi %s1259_s20, %s1469_s20   ;;  %s1203_s19 = sphi %s1257_s19, %s1468_s19   ;;  %s1199_s18 = sphi %s1255_s18, %s1467_s18  }
   0x5   : > { %p28_p0 = scmp.ge.s32.totalorder %s27_s25, 3  ;;  %s121_s27 = sadd.s32 1, %s1203_s19 }
   0x6   : > { %p128_p1 = scmp.ne.s32.totalorder %s1203_s19, %s1199_s18  ;;  %p129_p2 = scmp.eq.s32.totalorder %s1223_s24, 0 }
   0x7   : > { %s1474_s25 = smov (%p28_p0, %s27_s25), 0  ;;  %s1476_s26 = smov (!%p28_p0, %s34_s26), %s1219_s23 }
   0x8   : > { %s118_s28 = ssub.s32 %s1215_s22, %s1474_s25  ;;  %p130_p3 = por %p129_p2, %p128_p1 }
   0x9   : > { %p36_p4 = scmp.ge.s32.totalorder %s1476_s26, 2  ;;  %p119_p5 = scmp.eq.s32.totalorder %s118_s28, 0 }
   0xa   : > { %p1011_p6 = scmp.ge.s32.totalorder %s1223_s24, 6 }
   0xb   : > { %s1478_s26 = smov (%p36_p4, %s1476_s26), 0 }
   0xc   : > { %s1304_s29 = scalar_select %p119_p5, %s1203_s19, %s121_s27  }
   0xd   : > { %210 = sbr.rel (%p1011_p6) target bundleno = 38 (0x26), region = 16 }
  0x12   : > { %239 = sbr.rel (!%p130_p3) target bundleno = 38 (0x26), region = 32  ;;  %s241_s30 = sand.u32 (%p130_p3), 1, %s1203_s19  }
  0x13   : > { %s1059_s6 = sshll.u32 (%p130_p3), %s1215_s22, 3  ;;  %s1012_s7 = sshll.u32 (%p130_p3), %s241_s30, 8 }
  0x14   : > { %s1312_s10 = scalar_lea.vmem (%p130_p3), %s1464_s3, %s1059_s6  ;;  %s1317_s11 = scalar_lea.vmem (%p130_p3), [#allocation2], %s1012_s7 }
  0x15   : > { %v337_v0 = vld [vmem:[%s1312_s10] sm:$0xff] (%p130_p3)  ;;  %v339_v1 = vld [vmem:[%s1312_s10 + $0x18] sm:$0xff] (%p130_p3)  ;;  %v341_v2 = vld [vmem:[%s1312_s10 + $0x30] sm:$0xff] (%p130_p3) }
  0x16   : > { %338 = vst [vmem:[%s1317_s11] sm:$0xff] (%p130_p3), %v337_v0  ;;  %340 = vst [vmem:[%s1317_s11 + $0x8] sm:$0xff] (%p130_p3), %v339_v1  ;;  %v343_v3 = vld [vmem:[%s1312_s10 + $0x48] sm:$0xff] (%p130_p3)  ;;  %v345_v4 = vld [vmem:[%s1312_s10 + $0x60] sm:$0xff] (%p130_p3) }
  0x17   : > { %342 = vst [vmem:[%s1317_s11 + $0x10] sm:$0xff] %v341_v2  ;;  %v347_v5 = vld [vmem:[%s1312_s10 + $0x78] sm:$0xff]  ;;  %344 = vst [vmem:[%s1317_s11 + $0x18] sm:$0xff] %v343_v3  ;;  %v349_v6 = vld [vmem:[%s1312_s10 + $0x90] sm:$0xff] }
  0x18   : > { %346 = vst [vmem:[%s1317_s11 + $0x20] sm:$0xff] %v345_v4  ;;  %348 = vst [vmem:[%s1317_s11 + $0x28] sm:$0xff] %v347_v5  ;;  %v351_v7 = vld [vmem:[%s1312_s10 + $0xa8] sm:$0xff]  ;;  %v353_v8 = vld [vmem:[%s1312_s10 + $0xc0] sm:$0xff] }
  0x19   : > { %350 = vst [vmem:[%s1317_s11 + $0x30] sm:$0xff] %v349_v6  ;;  %352 = vst [vmem:[%s1317_s11 + $0x38] sm:$0xff] %v351_v7  ;;  %v355_v9 = vld [vmem:[%s1312_s10 + $0xd8] sm:$0xff]  ;;  %v357_v10 = vld [vmem:[%s1312_s10 + $0xf0] sm:$0xff] }
  0x1a   : > { %354 = vst [vmem:[%s1317_s11 + $0x40] sm:$0xff] %v353_v8  ;;  %v359_v11 = vld [vmem:[%s1312_s10 + $0x108] sm:$0xff]  ;;  %356 = vst [vmem:[%s1317_s11 + $0x48] sm:$0xff] %v355_v9  ;;  %v361_v12 = vld [vmem:[%s1312_s10 + $0x120] sm:$0xff] }
  0x1b   : > { %358 = vst [vmem:[%s1317_s11 + $0x50] sm:$0xff] %v357_v10  ;;  %360 = vst [vmem:[%s1317_s11 + $0x58] sm:$0xff] %v359_v11  ;;  %v363_v13 = vld [vmem:[%s1312_s10 + $0x138] sm:$0xff]  ;;  %v365_v14 = vld [vmem:[%s1312_s10 + $0x150] sm:$0xff] }
  0x1c   : > { %362 = vst [vmem:[%s1317_s11 + $0x60] sm:$0xff] %v361_v12  ;;  %364 = vst [vmem:[%s1317_s11 + $0x68] sm:$0xff] %v363_v13  ;;  %v367_v15 = vld [vmem:[%s1312_s10 + $0x168] sm:$0xff]  ;;  %v369_v16 = vld [vmem:[%s1312_s10 + $0x180] sm:$0xff] }
  0x1d   : > { %366 = vst [vmem:[%s1317_s11 + $0x70] sm:$0xff] %v365_v14  ;;  %v371_v17 = vld [vmem:[%s1312_s10 + $0x198] sm:$0xff]  ;;  %368 = vst [vmem:[%s1317_s11 + $0x78] sm:$0xff] %v367_v15  ;;  %v373_v18 = vld [vmem:[%s1312_s10 + $0x1b0] sm:$0xff] }
  0x1e   : > { %370 = vst [vmem:[%s1317_s11 + $0x80] sm:$0xff] %v369_v16  ;;  %372 = vst [vmem:[%s1317_s11 + $0x88] sm:$0xff] %v371_v17  ;;  %v375_v19 = vld [vmem:[%s1312_s10 + $0x1c8] sm:$0xff]  ;;  %v377_v20 = vld [vmem:[%s1312_s10 + $0x1e0] sm:$0xff] }
  0x1f   : > { %374 = vst [vmem:[%s1317_s11 + $0x90] sm:$0xff] %v373_v18  ;;  %376 = vst [vmem:[%s1317_s11 + $0x98] sm:$0xff] %v375_v19  ;;  %v379_v21 = vld [vmem:[%s1312_s10 + $0x1f8] sm:$0xff]  ;;  %v381_v22 = vld [vmem:[%s1312_s10 + $0x210] sm:$0xff] }
  0x20   : > { %378 = vst [vmem:[%s1317_s11 + $0xa0] sm:$0xff] %v377_v20  ;;  %v383_v23 = vld [vmem:[%s1312_s10 + $0x228] sm:$0xff]  ;;  %380 = vst [vmem:[%s1317_s11 + $0xa8] sm:$0xff] %v379_v21  ;;  %v385_v24 = vld [vmem:[%s1312_s10 + $0x240] sm:$0xff] }
  0x21   : > { %382 = vst [vmem:[%s1317_s11 + $0xb0] sm:$0xff] %v381_v22  ;;  %384 = vst [vmem:[%s1317_s11 + $0xb8] sm:$0xff] %v383_v23  ;;  %v387_v25 = vld [vmem:[%s1312_s10 + $0x258] sm:$0xff]  ;;  %v389_v26 = vld [vmem:[%s1312_s10 + $0x270] sm:$0xff] }
  0x22   : > { %386 = vst [vmem:[%s1317_s11 + $0xc0] sm:$0xff] %v385_v24  ;;  %388 = vst [vmem:[%s1317_s11 + $0xc8] sm:$0xff] %v387_v25  ;;  %v391_v27 = vld [vmem:[%s1312_s10 + $0x288] sm:$0xff]  ;;  %v393_v28 = vld [vmem:[%s1312_s10 + $0x2a0] sm:$0xff] }
  0x23   : > { %390 = vst [vmem:[%s1317_s11 + $0xd0] sm:$0xff] %v389_v26  ;;  %v395_v29 = vld [vmem:[%s1312_s10 + $0x2b8] sm:$0xff]  ;;  %392 = vst [vmem:[%s1317_s11 + $0xd8] sm:$0xff] %v391_v27  ;;  %v397_v30 = vld [vmem:[%s1312_s10 + $0x2d0] sm:$0xff] }
  0x24   : > { %394 = vst [vmem:[%s1317_s11 + $0xe0] sm:$0xff] %v393_v28  ;;  %396 = vst [vmem:[%s1317_s11 + $0xe8] sm:$0xff] %v395_v29  ;;  %v399_v31 = vld [vmem:[%s1312_s10 + $0x2e8] sm:$0xff] }
  0x25   : > { %398 = vst [vmem:[%s1317_s11 + $0xf0] sm:$0xff] %v397_v30  ;;  %400 = vst [vmem:[%s1317_s11 + $0xf8] sm:$0xff] %v399_v31 }
  0x26 PF: > { %p1015_p7 = scmp.ge.s32.totalorder %s1223_s24, 1  ;;  %p413_p8 = scmp.lt.s32.totalorder %s1223_s24, 7 }
  0x28   : > { %p414_p9 = pnand %p1015_p7, %p413_p8 }
  0x29   : > { %p476_p10 = scmp.lt.s32.totalorder (!%p414_p9), %s1211_s21, 1  ;;  %s420_s16 = sand.u32 (!%p414_p9), 1, %s1199_s18  }
  0x2a   : > { %417 = sbr.rel (%p414_p9) target bundleno = 566 (0x236), region = 74  ;;  %s1016_s17 = sshll.u32 (!%p414_p9), %s420_s16, 8 }
  0x2b   : > { %s1391_s27 = scalar_lea.vmem (!%p414_p9), [#allocation2], %s1016_s17  ;;  %s1021_s10 = sshll.u32 (!%p414_p9), %s1207_s20, 1 }
  0x2c   : > { %p495_p11 = scmp.lt.s32.totalorder (!%p414_p9), %s1021_s10, 5 }
  0x2f   : > { %s1480_s21 = smov (!%p476_p10, %s1211_s21), 1  ;;  %v1119_v36 = vld [vmem:[%s1391_s27 + $0x74] ss:$8 sps:$4 sm:$0xff]   ;;  %v1121_v37 = vld [vmem:[%s1391_s27 + $0x70] ss:$8 sps:$4 sm:$0xff]   ;;  %v537_v13 = vlaneseq  ;;  %s1482_s10 = smov (!%p495_p11, %s1021_s10), 5 }
  0x30   : > { %s1060_s12 = sshll.u32 %s1480_s21, 3  ;;  %795 = vmatprep.subr.bf16.mxu0 %v1119_v36  ;;  %v1122_v38 = vld [vmem:[%s1391_s27 + $0x64] ss:$8 sps:$4 sm:$0xff]   ;;  %v1124_v39 = vld [vmem:[%s1391_s27 + $0x60] ss:$8 sps:$4 sm:$0xff]   ;;  %s1019_s18 = sshll.u32 %s1480_s21, 1 }
  0x31   : > { %s484_s15 = scalar_lea.vmem %s1461_s0, %s1060_s12  ;;  %796 = vmatpush1.bf16.msra.mxu0 %v1121_v37  ;;  %v1125_v40 = vld [vmem:[%s1391_s27 + $0x54] ss:$8 sps:$4 sm:$0xff]   ;;  %v1127_v41 = vld [vmem:[%s1391_s27 + $0x50] ss:$8 sps:$4 sm:$0xff]   ;;  %v1128_v42 = vld [vmem:[%s1391_s27 + $0x44] ss:$8 sps:$4 sm:$0xff]   ;;  %s488_s6 = scalar_lea.vmem %s1462_s1, %s1019_s18 }
  0x32   : > { %v513_v32 = vld [vmem:[%s484_s15] sm:$0xff]  ;;  %797 = vmatprep.subr.bf16.mxu0 %v1122_v38  ;;  %v1131_v44 = vld [vmem:[%s1391_s27 + $0x34] ss:$8 sps:$4 sm:$0xff]   ;;  %v1133_v45 = vld [vmem:[%s1391_s27 + $0x30] ss:$8 sps:$4 sm:$0xff]   ;;  %s492_s9 = scalar_lea.vmem %s1463_s2, %s1019_s18  ;;  %v538_v17 = vshrl.u32 %v537_v13, 7  ;;  %s497_s13 = scalar_lea.vmem %s1465_s4, %s1482_s10 }
  0x33   : > { %v514_v33 = vunpack.c.l.bf16 %v513_v32  ;;  %v515_v34 = vunpack.c.h.bf16 %v513_v32  ;;  %v1130_v43 = vld [vmem:[%s1391_s27 + $0x40] ss:$8 sps:$4 sm:$0xff]   ;;  %v1134_v46 = vld [vmem:[%s1391_s27 + $0x24] ss:$8 sps:$4 sm:$0xff]   ;;  %v1137_v48 = vld [vmem:[%s1391_s27 + $0x14] ss:$8 sps:$4 sm:$0xff]  }
  0x34   : > { %v1136_v47 = vld [vmem:[%s1391_s27 + $0x20] ss:$8 sps:$4 sm:$0xff]   ;;  %v1139_v49 = vld [vmem:[%s1391_s27 + $0x10] ss:$8 sps:$4 sm:$0xff]   ;;  %v1140_v50 = vld [vmem:[%s1391_s27 + $0x4] ss:$8 sps:$4 sm:$0xff]  }
  0x35   : > { %v516_v35 = vadd.f32 %v515_v34, %v514_v33  ;;  %798 = vmatpush1.bf16.msra.mxu0 %v1124_v39  ;;  %v1142_v51 = vld [vmem:[%s1391_s27] ss:$8 sps:$4 sm:$0xff]   ;;  %v1143_v52 = vld [vmem:[%s1391_s27 + $0xf4] ss:$8 sps:$4 sm:$0xff]   ;;  %v1145_v53 = vld [vmem:[%s1391_s27 + $0xf0] ss:$8 sps:$4 sm:$0xff]  }
  0x36   : > { %799 = vmatprep.subr.bf16.mxu0 %v1125_v40  ;;  %v1146_v61 = vld [vmem:[%s1391_s27 + $0xe4] ss:$8 sps:$4 sm:$0xff]   ;;  %v1148_v62 = vld [vmem:[%s1391_s27 + $0xe0] ss:$8 sps:$4 sm:$0xff]   ;;  %v1149_v63 = vld [vmem:[%s1391_s27 + $0xd4] ss:$8 sps:$4 sm:$0xff]  }
  0x37   : > { %517 = vadd.xlane.f32.xlu0 %v516_v35  ;;  %v1151_v0 = vld [vmem:[%s1391_s27 + $0xd0] ss:$8 sps:$4 sm:$0xff]   ;;  %v1152_v1 = vld [vmem:[%s1391_s27 + $0xc4] ss:$8 sps:$4 sm:$0xff]   ;;  %v1154_v2 = vld [vmem:[%s1391_s27 + $0xc0] ss:$8 sps:$4 sm:$0xff]  }
  0x38   : > { %v1155_v3 = vld [vmem:[%s1391_s27 + $0xb4] ss:$8 sps:$4 sm:$0xff]   ;;  %v1157_v4 = vld [vmem:[%s1391_s27 + $0xb0] ss:$8 sps:$4 sm:$0xff]   ;;  %v1158_v5 = vld [vmem:[%s1391_s27 + $0xa4] ss:$8 sps:$4 sm:$0xff]  }
  0x39   : > { %800 = vmatpush1.bf16.msra.mxu0 %v1127_v41  ;;  %v1160_v6 = vld [vmem:[%s1391_s27 + $0xa0] ss:$8 sps:$4 sm:$0xff]   ;;  %v1161_v7 = vld [vmem:[%s1391_s27 + $0x94] ss:$8 sps:$4 sm:$0xff]   ;;  %v1163_v8 = vld [vmem:[%s1391_s27 + $0x90] ss:$8 sps:$4 sm:$0xff]  }
  0x3a   : > { %801 = vmatprep.subr.bf16.mxu0 %v1128_v42  ;;  %v1164_v9 = vld [vmem:[%s1391_s27 + $0x84] ss:$8 sps:$4 sm:$0xff]   ;;  %v1166_v10 = vld [vmem:[%s1391_s27 + $0x80] ss:$8 sps:$4 sm:$0xff]   ;;  %v539_v20 = vsub.s32 0, %v538_v17  ;;  %v543_v21 = vsub.s32 2, %v538_v17 }
  0x3b   : > { %v533_v14 = vld [vmem:[%s488_s6] sm:$0x3]  ;;  %s1062_s14 = smul.u32 6, %s1480_s21 }
  0x3c   : > { %v534_v16 = vunpack.c.l.bf16 %v533_v14  ;;  %v557_v18 = vld [vmem:[%s492_s9] sm:$0x3] }
  0x3d   : > { %802 = vmatpush1.bf16.msra.mxu0 %v1130_v43  ;;  %v558_v22 = vunpack.c.l.bf16 %v557_v18  ;;  %v614_v40 = vld [vmem:[%s497_s13] sm:$0x3]  ;;  %s509_s15 = sadd.s32 %s1062_s14, %s1482_s10 }
  0x3e   : > { %803 = vmatprep.subr.bf16.mxu0 %v1131_v44  ;;  %v535_v19 = vadd.f32 1.0, %v534_v16  ;;  %v615_v41 = vunpack.c.l.bf16 %v614_v40  ;;  %s1023_s16 = sshll.u32 %s509_s15, 2 }
  0x3f   : > { %v567_v25 = vrot.slane %v558_v22, %v543_v21  ;;  %v563_v26 = vrot.slane %v558_v22, %v539_v20  ;;  %s511_s27 = scalar_lea.vmem %s1466_s5, %s1023_s16 }
  0x40   : > { %v544_v23 = vrot.slane %v535_v19, %v543_v21  ;;  %v540_v24 = vrot.slane %v535_v19, %v539_v20  ;;  %v620_v42 = vrot.slane %v615_v41, %v539_v20  ;;  %v624_v43 = vrot.slane %v615_v41, %v543_v21 }
  0x41   : > { %804 = vmatpush1.bf16.msra.mxu0 %v1133_v45  ;;  %v577_v31 = vrot.slane %v567_v25, %v539_v20 }
  0x42   : > { %805 = vmatprep.subr.bf16.mxu0 %v1134_v46  ;;  %v554_v27 = vrot.slane %v544_v23, %v539_v20  ;;  %v550_v28 = vrot.slane %v540_v24, %v539_v20  ;;  %v630_v44 = vrot.slane %v620_v42, %v539_v20  ;;  %v634_v45 = vrot.slane %v624_v43, %v539_v20 }
  0x45   : > { %806 = vmatpush1.bf16.msra.mxu0 %v1136_v47 }
  0x46   : > { %807 = vmatprep.subr.bf16.mxu0 %v1137_v48 }
  0x49   : > { %808 = vmatpush1.bf16.msra.mxu0 %v1139_v49 }
  0x4a   : > { %809 = vmatprep.subr.bf16.mxu0 %v1140_v50 }
  0x4d   : > { %810 = vmatpush1.bf16.msra.mxu0 %v1142_v51 }
  0x4e   : > { %811 = vmatprep.subr.bf16.mxu0 %v1143_v52 }
  0x51   : > { %812 = vmatpush2.bf16.msra.mxu0 %v1145_v53 }
  0x52   : > { %813 = vmatprep.subr.bf16.mxu0 %v1146_v61 }
  0x55   : > { %814 = vmatpush2.bf16.msra.mxu0 %v1148_v62 }
  0x56   : > { %815 = vmatprep.subr.bf16.mxu0 %v1149_v63 }
  0x59   : > { %816 = vmatpush2.bf16.msra.mxu0 %v1151_v0 }
  0x5a   : > { %817 = vmatprep.subr.bf16.mxu0 %v1152_v1 }
  0x5d   : > { %818 = vmatpush2.bf16.msra.mxu0 %v1154_v2 }
  0x5e   : > { %819 = vmatprep.subr.bf16.mxu0 %v1155_v3 }
  0x61   : > { %820 = vmatpush2.bf16.msra.mxu0 %v1157_v4 }
  0x62   : > { %821 = vmatprep.subr.bf16.mxu0 %v1158_v5 }
  0x65   : > { %822 = vmatpush2.bf16.msra.mxu0 %v1160_v6 }
  0x66   : > { %823 = vmatprep.subr.bf16.mxu0 %v1161_v7 }
  0x69   : > { %824 = vmatpush2.bf16.msra.mxu0 %v1163_v8 }
  0x6a   : > { %825 = vmatprep.subr.bf16.mxu0 %v1164_v9 }
  0x6d   : > { %826 = vmatpush2.bf16.msra.mxu0 %v1166_v10 }
  0xc0   : > { %v518_v54 = vpop.xlane.xlu0 %517 }
  0xc1   : > { %v520_v55 = vmul.f32 0.00390625, %v518_v54 }
  0xc3   : > { %v521_v56 = vsub.f32 %v514_v33, %v520_v55  ;;  %v522_v57 = vsub.f32 %v515_v34, %v520_v55  ;;  %v573_v33 = vrot.slane %v563_v26, %v539_v20 }
  0xc5   : > { %v523_v58 = vmul.f32 %v521_v56, %v521_v56  ;;  %v524_v59 = vmul.f32 %v522_v57, %v522_v57 }
  0xc7   : > { %v525_v60 = vadd.f32 %v524_v59, %v523_v58 }
  0xc9   : > { %526 = vadd.xlane.f32.xlu0 %v525_v60 }
 0x152   : > { %v527_v11 = vpop.xlane.xlu0 %526 }
 0x153   : > { %v528_v12 = vmul.f32 0.00390625, %v527_v11 }
 0x155   : > { %v529_v15 = vadd.f32 1e-06, %v528_v12 }
 0x157   : > { %1167 = vrsqrt.f32 %v529_v15 }
 0x164   : > { %v1168_v29 = vpop.eup %1167 }
 0x165   : > { %v532_v30 = vmul.f32 %v1168_v29, %v522_v57  ;;  %v531_v32 = vmul.f32 %v1168_v29, %v521_v56 }
 0x167   : > { %v556_v34 = vmul.f32 %v554_v27, %v532_v30  ;;  %v555_v35 = vmul.f32 %v550_v28, %v531_v32 }
 0x169   : > { %v579_v36 = vadd.f32 %v577_v31, %v556_v34  ;;  %v578_v37 = vadd.f32 %v573_v33, %v555_v35 }
 0x16b   : > { %v581_v38 = vpack.c.bf16 %v579_v36, %v579_v36  ;;  %v580_v39 = vpack.c.bf16 %v578_v37, %v578_v37 }
 0x16d   : > { %827 = vmatprep.mubr.bf16.mxu0 %v581_v38 }
 0x16e   : > { %828 = vmatmul.mubr.bf16.vlgmr.msra.gmra.mxu0 %v580_v39 }
 0x22e   : > { %v829_v46 = vpop.f32.mrf.mxu0 }
 0x22f   : > { %v830_v48 = vadd.f32 %v829_v46, %v630_v44 }
 0x230   : > { %v831_v47 = vpop.f32.mrf.mxu0 }
 0x231   : > { %v832_v49 = vadd.f32 %v831_v47, %v634_v45 }
 0x232   : > { %v833_v50 = vpop.f32.mrf.mxu0 }
 0x233   : > { %v1061_v51 = vpack.c.bf16 %v832_v49, %v830_v48 }
 0x234   : > { %v834_v52 = vpop.f32.mrf.mxu0 }
 0x235   : > { %844 = vst [vmem:[%s511_s27] sm:$0xff] %v1061_v51 }
 0x236 PF: > { %s15_s24 = sadd.s32 1, %s1223_s24   ;;  %s1467_s18 = smov %s1203_s19 }
 0x237   : > { %p12_p12 = scmp.ge.s32.totalorder %s15_s24, 8   ;;  %s1468_s19 = smov %s1304_s29 }
 0x238   : > { %s1469_s20 = smov %s1215_s22  ;;  %s1470_s21 = smov %s1219_s23 }
 0x239   : > { %s1471_s22 = smov %s1474_s25  ;;  %s1472_s23 = smov %s1478_s26 }
 0x23a   :  { %14 = sbr.rel (!%p12_p12) target bundleno = 4 (0x4), region = 125 }

// kernel: _dual_block_forward.14
= control target key start
LH: loop header
LB: loop body
LE: loop exit
PB: predicated region body
PF: predicated region fallthrough
CT: control target
= control target key end

     0   :  { %s1083_s12 = smov 0   ;;  %s1085_s13 = smov 0   ;;  %s1272_s0 = inlined_call_operand.vmem [shape: bf16[2,256], index: 0, kind: input, shape index: {}]   ;;  %s1273_s1 = inlined_call_operand.vmem [shape: bf16[256,1536], index: 1, kind: input, shape index: {}]   ;;  %s1274_s2 = inlined_call_operand.vmem [shape: bf16[1,1536], index: 2, kind: input, shape index: {}]   ;;  %s1275_s3 = inlined_call_operand.vmem [shape: bf16[2,1536], index: 3, kind: output, shape index: {}]  }
   0x1   :  { %s1087_s14 = smov 0   ;;  %s1089_s15 = smov 0  }
   0x2   :  { %s1091_s16 = smov 0  }
   0x3 LB: > { %s28_s17 = sadd.s32 1, %s1054_s15  ;;  %p76_p1 = scmp.ne.s32.totalorder %s1046_s13, %s1042_s12  ;;  %s1058_s16 = sphi %s1091_s16, %s13_s16   ;;  %s1054_s15 = sphi %s1089_s15, %s1279_s15   ;;  %s1050_s14 = sphi %s1087_s14, %s1278_s14   ;;  %s1046_s13 = sphi %s1085_s13, %s1277_s13   ;;  %s1042_s12 = sphi %s1083_s12, %s1276_s12  }
   0x4   : > { %p30_p0 = scmp.ge.s32.totalorder %s28_s17, 6  ;;  %p77_p2 = scmp.eq.s32.totalorder %s1058_s16, 0 }
   0x5   : > { %s69_s19 = sadd.s32 1, %s1046_s13  ;;  %p879_p5 = scmp.ge.s32.totalorder %s1058_s16, 6 }
   0x6   : > { %s1281_s17 = smov (%p30_p0, %s28_s17), 0  ;;  %p78_p3 = por %p77_p2, %p76_p1 }
   0x7   : > { %s65_s18 = ssub.s32 %s1054_s15, %s1281_s17  ;;  %168 = sbr.rel (%p879_p5) target bundleno = 32 (0x20), region = 20 }
   0x8   : > { %p67_p4 = scmp.eq.s32.totalorder %s65_s18, 0 }
   0xa   : > { %s1118_s20 = scalar_select %p67_p4, %s1046_s13, %s69_s19  }
   0xc   : > { %171 = sbr.rel (!%p78_p3) target bundleno = 32 (0x20), region = 24  ;;  %s173_s21 = sand.u32 (%p78_p3), 1, %s1046_s13  }
   0xd   : > { %s924_s22 = sshll.u32 (%p78_p3), %s1054_s15, 3  ;;  %s880_s23 = sshll.u32 (%p78_p3), %s173_s21, 8 }
   0xe   : > { %s1126_s26 = scalar_lea.vmem (%p78_p3), %s1273_s1, %s924_s22  ;;  %s1131_s27 = scalar_lea.vmem (%p78_p3), [#allocation3], %s880_s23 }
   0xf   : > { %v272_v0 = vld [vmem:[%s1126_s26] sm:$0xff] (%p78_p3)  ;;  %v274_v1 = vld [vmem:[%s1126_s26 + $0x30] sm:$0xff] (%p78_p3) }
  0x10   : > { %v276_v2 = vld [vmem:[%s1126_s26 + $0x60] sm:$0xff] (%p78_p3)  ;;  %273 = vst [vmem:[%s1131_s27] sm:$0xff] (%p78_p3), %v272_v0  ;;  %275 = vst [vmem:[%s1131_s27 + $0x8] sm:$0xff] (%p78_p3), %v274_v1  ;;  %v278_v3 = vld [vmem:[%s1126_s26 + $0x90] sm:$0xff] (%p78_p3) }
  0x11   : > { %277 = vst [vmem:[%s1131_s27 + $0x10] sm:$0xff] %v276_v2  ;;  %v280_v4 = vld [vmem:[%s1126_s26 + $0xc0] sm:$0xff]  ;;  %v282_v5 = vld [vmem:[%s1126_s26 + $0xf0] sm:$0xff]  ;;  %279 = vst [vmem:[%s1131_s27 + $0x18] sm:$0xff] %v278_v3 }
  0x12   : > { %281 = vst [vmem:[%s1131_s27 + $0x20] sm:$0xff] %v280_v4  ;;  %283 = vst [vmem:[%s1131_s27 + $0x28] sm:$0xff] %v282_v5  ;;  %v284_v6 = vld [vmem:[%s1126_s26 + $0x120] sm:$0xff]  ;;  %v286_v7 = vld [vmem:[%s1126_s26 + $0x150] sm:$0xff] }
  0x13   : > { %v288_v8 = vld [vmem:[%s1126_s26 + $0x180] sm:$0xff]  ;;  %285 = vst [vmem:[%s1131_s27 + $0x30] sm:$0xff] %v284_v6  ;;  %287 = vst [vmem:[%s1131_s27 + $0x38] sm:$0xff] %v286_v7  ;;  %v290_v9 = vld [vmem:[%s1126_s26 + $0x1b0] sm:$0xff] }
  0x14   : > { %289 = vst [vmem:[%s1131_s27 + $0x40] sm:$0xff] %v288_v8  ;;  %v292_v10 = vld [vmem:[%s1126_s26 + $0x1e0] sm:$0xff]  ;;  %v294_v11 = vld [vmem:[%s1126_s26 + $0x210] sm:$0xff]  ;;  %291 = vst [vmem:[%s1131_s27 + $0x48] sm:$0xff] %v290_v9 }
  0x15   : > { %293 = vst [vmem:[%s1131_s27 + $0x50] sm:$0xff] %v292_v10  ;;  %295 = vst [vmem:[%s1131_s27 + $0x58] sm:$0xff] %v294_v11  ;;  %v296_v12 = vld [vmem:[%s1126_s26 + $0x240] sm:$0xff]  ;;  %v298_v13 = vld [vmem:[%s1126_s26 + $0x270] sm:$0xff] }
  0x16   : > { %v300_v14 = vld [vmem:[%s1126_s26 + $0x2a0] sm:$0xff]  ;;  %297 = vst [vmem:[%s1131_s27 + $0x60] sm:$0xff] %v296_v12  ;;  %299 = vst [vmem:[%s1131_s27 + $0x68] sm:$0xff] %v298_v13  ;;  %v302_v15 = vld [vmem:[%s1126_s26 + $0x2d0] sm:$0xff] }
  0x17   : > { %301 = vst [vmem:[%s1131_s27 + $0x70] sm:$0xff] %v300_v14  ;;  %v304_v16 = vld [vmem:[%s1126_s26 + $0x300] sm:$0xff]  ;;  %v306_v17 = vld [vmem:[%s1126_s26 + $0x330] sm:$0xff]  ;;  %303 = vst [vmem:[%s1131_s27 + $0x78] sm:$0xff] %v302_v15 }
  0x18   : > { %305 = vst [vmem:[%s1131_s27 + $0x80] sm:$0xff] %v304_v16  ;;  %307 = vst [vmem:[%s1131_s27 + $0x88] sm:$0xff] %v306_v17  ;;  %v308_v18 = vld [vmem:[%s1126_s26 + $0x360] sm:$0xff]  ;;  %v310_v19 = vld [vmem:[%s1126_s26 + $0x390] sm:$0xff] }
  0x19   : > { %v312_v20 = vld [vmem:[%s1126_s26 + $0x3c0] sm:$0xff]  ;;  %309 = vst [vmem:[%s1131_s27 + $0x90] sm:$0xff] %v308_v18  ;;  %311 = vst [vmem:[%s1131_s27 + $0x98] sm:$0xff] %v310_v19  ;;  %v314_v21 = vld [vmem:[%s1126_s26 + $0x3f0] sm:$0xff] }
  0x1a   : > { %313 = vst [vmem:[%s1131_s27 + $0xa0] sm:$0xff] %v312_v20  ;;  %v316_v22 = vld [vmem:[%s1126_s26 + $0x420] sm:$0xff]  ;;  %v318_v23 = vld [vmem:[%s1126_s26 + $0x450] sm:$0xff]  ;;  %315 = vst [vmem:[%s1131_s27 + $0xa8] sm:$0xff] %v314_v21 }
  0x1b   : > { %317 = vst [vmem:[%s1131_s27 + $0xb0] sm:$0xff] %v316_v22  ;;  %319 = vst [vmem:[%s1131_s27 + $0xb8] sm:$0xff] %v318_v23  ;;  %v320_v24 = vld [vmem:[%s1126_s26 + $0x480] sm:$0xff]  ;;  %v322_v25 = vld [vmem:[%s1126_s26 + $0x4b0] sm:$0xff] }
  0x1c   : > { %v324_v26 = vld [vmem:[%s1126_s26 + $0x4e0] sm:$0xff]  ;;  %321 = vst [vmem:[%s1131_s27 + $0xc0] sm:$0xff] %v320_v24  ;;  %323 = vst [vmem:[%s1131_s27 + $0xc8] sm:$0xff] %v322_v25  ;;  %v326_v27 = vld [vmem:[%s1126_s26 + $0x510] sm:$0xff] }
  0x1d   : > { %325 = vst [vmem:[%s1131_s27 + $0xd0] sm:$0xff] %v324_v26  ;;  %v328_v28 = vld [vmem:[%s1126_s26 + $0x540] sm:$0xff]  ;;  %v330_v29 = vld [vmem:[%s1126_s26 + $0x570] sm:$0xff]  ;;  %327 = vst [vmem:[%s1131_s27 + $0xd8] sm:$0xff] %v326_v27 }
  0x1e   : > { %329 = vst [vmem:[%s1131_s27 + $0xe0] sm:$0xff] %v328_v28  ;;  %331 = vst [vmem:[%s1131_s27 + $0xe8] sm:$0xff] %v330_v29  ;;  %v332_v30 = vld [vmem:[%s1126_s26 + $0x5a0] sm:$0xff]  ;;  %v334_v31 = vld [vmem:[%s1126_s26 + $0x5d0] sm:$0xff] }
  0x1f   : > { %333 = vst [vmem:[%s1131_s27 + $0xf0] sm:$0xff] %v332_v30  ;;  %335 = vst [vmem:[%s1131_s27 + $0xf8] sm:$0xff] %v334_v31 }
  0x20 PF: > { %p883_p6 = scmp.ge.s32.totalorder %s1058_s16, 1  ;;  %p348_p7 = scmp.lt.s32.totalorder %s1058_s16, 7 }
  0x22   : > { %p349_p8 = pnand %p883_p6, %p348_p7 }
  0x23   : > { %s355_s28 = sand.u32 (!%p349_p8), 1, %s1042_s12   ;;  %s885_s6 = sshll.u32 (!%p349_p8), %s1050_s14, 1 }
  0x24   : > { %352 = sbr.rel (%p349_p8) target bundleno = 327 (0x147), region = 66  ;;  %s884_s4 = sshll.u32 (!%p349_p8), %s355_s28, 8 }
  0x25   : > { %s1200_s5 = scalar_lea.vmem (!%p349_p8), [#allocation3], %s884_s4  ;;  %p405_p9 = scmp.lt.s32.totalorder (!%p349_p8), %s885_s6, 11 }
  0x29   : > { %v423_v32 = vld [vmem:[%s1272_s0] sm:$0x3]  ;;  %v970_v35 = vld [vmem:[%s1200_s5 + $0x70] ss:$8 sps:$4 sm:$0xff]   ;;  %v971_v37 = vld [vmem:[%s1200_s5 + $0x64] ss:$8 sps:$4 sm:$0xff]   ;;  %v436_v53 = vlaneseq }
  0x2a   : > { %v424_v33 = vunpack.c.l.bf16 %v423_v32  ;;  %v968_v34 = vld [vmem:[%s1200_s5 + $0x74] ss:$8 sps:$4 sm:$0xff]   ;;  %v973_v38 = vld [vmem:[%s1200_s5 + $0x60] ss:$8 sps:$4 sm:$0xff]   ;;  %v976_v40 = vld [vmem:[%s1200_s5 + $0x50] ss:$8 sps:$4 sm:$0xff]  }
  0x2b   : > { %638 = vmatprep.subr.bf16.mxu0 %v968_v34  ;;  %v974_v39 = vld [vmem:[%s1200_s5 + $0x54] ss:$8 sps:$4 sm:$0xff]   ;;  %v977_v41 = vld [vmem:[%s1200_s5 + $0x44] ss:$8 sps:$4 sm:$0xff]   ;;  %v979_v42 = vld [vmem:[%s1200_s5 + $0x40] ss:$8 sps:$4 sm:$0xff]  }
  0x2c   : > { %v887_v36 = vmul.f32 -1.442695, %v424_v33  ;;  %639 = vmatpush1.bf16.msra.mxu0 %v970_v35  ;;  %v980_v43 = vld [vmem:[%s1200_s5 + $0x34] ss:$8 sps:$4 sm:$0xff]   ;;  %v982_v44 = vld [vmem:[%s1200_s5 + $0x30] ss:$8 sps:$4 sm:$0xff]  }
  0x2d   : > { %640 = vmatprep.subr.bf16.mxu0 %v971_v37  ;;  %v983_v46 = vld [vmem:[%s1200_s5 + $0x24] ss:$8 sps:$4 sm:$0xff]   ;;  %v985_v48 = vld [vmem:[%s1200_s5 + $0x20] ss:$8 sps:$4 sm:$0xff]   ;;  %v986_v49 = vld [vmem:[%s1200_s5 + $0x14] ss:$8 sps:$4 sm:$0xff]  }
  0x2e   : > { %1016 = vpow2.f32 %v887_v36  ;;  %v988_v50 = vld [vmem:[%s1200_s5 + $0x10] ss:$8 sps:$4 sm:$0xff]   ;;  %v1060_v51 = vmov 1983009808   ;;  %v989_v54 = vld [vmem:[%s1200_s5 + $0x4] ss:$8 sps:$4 sm:$0xff]  }
  0x2f   : > { %v434_v52 = vunpack.c.l.s4 %v1060_v51  ;;  %v991_v55 = vld [vmem:[%s1200_s5] ss:$8 sps:$4 sm:$0xff]   ;;  %v1218_v57 = vshrl.u32 %v436_v53, 7  ;;  %v992_v58 = vld [vmem:[%s1200_s5 + $0xf4] ss:$8 sps:$4 sm:$0xff]   ;;  %v1061_v17 = vmov 0.0  }
  0x30   : > { %641 = vmatpush1.bf16.msra.mxu0 %v973_v38  ;;  %v994_v59 = vld [vmem:[%s1200_s5 + $0xf0] ss:$8 sps:$4 sm:$0xff]   ;;  %v995_v62 = vld [vmem:[%s1200_s5 + $0xe4] ss:$8 sps:$4 sm:$0xff]   ;;  %v997_v0 = vld [vmem:[%s1200_s5 + $0xe0] ss:$8 sps:$4 sm:$0xff]  }
  0x31   : > { %642 = vmatprep.subr.bf16.mxu0 %v974_v39  ;;  %v435_v56 = vunpack.c.0.s8 %v434_v52  ;;  %v998_v2 = vld [vmem:[%s1200_s5 + $0xd4] ss:$8 sps:$4 sm:$0xff]   ;;  %v1000_v4 = vld [vmem:[%s1200_s5 + $0xd0] ss:$8 sps:$4 sm:$0xff]   ;;  %v1001_v6 = vld [vmem:[%s1200_s5 + $0xc4] ss:$8 sps:$4 sm:$0xff]  }
  0x32   : > { %v1003_v7 = vld [vmem:[%s1200_s5 + $0xc0] ss:$8 sps:$4 sm:$0xff]   ;;  %v1004_v8 = vld [vmem:[%s1200_s5 + $0xb4] ss:$8 sps:$4 sm:$0xff]   ;;  %v1006_v9 = vld [vmem:[%s1200_s5 + $0xb0] ss:$8 sps:$4 sm:$0xff]  }
  0x33   : > { %v1223_v60 = vsub.s32 %v435_v56, %v1218_v57  ;;  %v1007_v10 = vld [vmem:[%s1200_s5 + $0xa4] ss:$8 sps:$4 sm:$0xff]   ;;  %v1009_v11 = vld [vmem:[%s1200_s5 + $0xa0] ss:$8 sps:$4 sm:$0xff]   ;;  %v1010_v12 = vld [vmem:[%s1200_s5 + $0x94] ss:$8 sps:$4 sm:$0xff]  }
  0x34   : > { %643 = vmatpush1.bf16.msra.mxu0 %v976_v40  ;;  %v1012_v13 = vld [vmem:[%s1200_s5 + $0x90] ss:$8 sps:$4 sm:$0xff]   ;;  %v1013_v14 = vld [vmem:[%s1200_s5 + $0x84] ss:$8 sps:$4 sm:$0xff]   ;;  %v1015_v15 = vld [vmem:[%s1200_s5 + $0x80] ss:$8 sps:$4 sm:$0xff]  }
  0x35   : > { %644 = vmatprep.subr.bf16.mxu0 %v977_v41  ;;  %422 = vst [vmem:[#allocation2] sm:$0xf] %v1061_v17  ;;  %s1283_s6 = smov (!%p405_p9, %s885_s6), 11  ;;  %v701_v20 = vsub.s32 0, %v1218_v57  ;;  %v705_v21 = vsub.s32 2, %v1218_v57 }
  0x36   : > { %s407_s9 = scalar_lea.vmem %s1274_s2, %s1283_s6  ;;  %v1062_v36 = vmov 1966171168   ;;  %s416_s12 = scalar_lea.vmem %s1275_s3, %s1283_s6 }
  0x37   : > { %v696_v18 = vld [vmem:[%s407_s9] sm:$0x3]  ;;  %v746_v37 = vunpack.c.l.s4 %v1062_v36 }
  0x38   : > { %645 = vmatpush1.bf16.msra.mxu0 %v979_v42  ;;  %v697_v19 = vunpack.c.l.bf16 %v696_v18 }
  0x39   : > { %646 = vmatprep.subr.bf16.mxu0 %v980_v43  ;;  %v747_v39 = vunpack.c.0.s8 %v746_v37 }
  0x3a   : > { %v702_v23 = vrot.slane %v697_v19, %v701_v20  ;;  %v706_v24 = vrot.slane %v697_v19, %v705_v21 }
  0x3b   : > { %v1017_v45 = vpop.eup %1016  ;;  %v750_v42 = vsub.s32 %v747_v39, %v1218_v57 }
  0x3c   : > { %v428_v47 = vadd.f32 1.0, %v1017_v45  ;;  %647 = vmatpush1.bf16.msra.mxu0 %v982_v44  ;;  %v445_v27 = vld [vmem:[#allocation2] sm:$0xf]  ;;  %v712_v29 = vrot.slane %v702_v23, %v701_v20  ;;  %v716_v30 = vrot.slane %v706_v24, %v701_v20 }
  0x3d   : > { %648 = vmatprep.subr.bf16.mxu0 %v983_v46 }
  0x3e   : > { %1018 = vrcp.f32 %v428_v47  ;;  %v719_v34 = vcombine.low %v712_v29, %v716_v30 }
  0x40   : > { %649 = vmatpush1.bf16.msra.mxu0 %v985_v48  ;;  %v726_v35 = vrot.slane %v719_v34, %v1223_v60 }
  0x41   : > { %650 = vmatprep.subr.bf16.mxu0 %v986_v49 }
  0x44   : > { %651 = vmatpush1.bf16.msra.mxu0 %v988_v50 }
  0x45   : > { %652 = vmatprep.subr.bf16.mxu0 %v989_v54 }
  0x48   : > { %653 = vmatpush1.bf16.msra.mxu0 %v991_v55 }
  0x49   : > { %654 = vmatprep.subr.bf16.mxu0 %v992_v58 }
  0x4b   : > { %v1019_v61 = vpop.eup %1018 }
  0x4c   : > { %v431_v63 = vmul.f32 %v1019_v61, %v424_v33  ;;  %655 = vmatpush2.bf16.msra.mxu0 %v994_v59 }
  0x4d   : > { %656 = vmatprep.subr.bf16.mxu0 %v995_v62 }
  0x4e   : > { %v439_v1 = vrot.slane %v431_v63, %v1223_v60 }
  0x50   : > { %v440_v3 = vcombine.high %v439_v1, %v439_v1  ;;  %657 = vmatpush2.bf16.msra.mxu0 %v997_v0  ;;  %v443_v16 = vpack.c.bf16 %v439_v1, %v439_v1 }
  0x51   : > { %658 = vmatprep.subr.bf16.mxu0 %v998_v2 }
  0x52   : > { %v444_v5 = vpack.c.bf16 %v440_v3, %v440_v3 }
  0x54   : > { %670 = vmatprep.mubr.bf16.mxu0 %v444_v5  ;;  %659 = vmatpush2.bf16.msra.mxu0 %v1000_v4 }
  0x55   : > { %660 = vmatprep.subr.bf16.mxu0 %v1001_v6 }
  0x58   : > { %661 = vmatpush2.bf16.msra.mxu0 %v1003_v7 }
  0x59   : > { %662 = vmatprep.subr.bf16.mxu0 %v1004_v8 }
  0x5c   : > { %663 = vmatpush2.bf16.msra.mxu0 %v1006_v9 }
  0x5d   : > { %664 = vmatprep.subr.bf16.mxu0 %v1007_v10 }
  0x60   : > { %665 = vmatpush2.bf16.msra.mxu0 %v1009_v11 }
  0x61   : > { %666 = vmatprep.subr.bf16.mxu0 %v1010_v12 }
  0x64   : > { %667 = vmatpush2.bf16.msra.mxu0 %v1012_v13 }
  0x65   : > { %668 = vmatprep.subr.bf16.mxu0 %v1013_v14 }
  0x68   : > { %669 = vmatpush2.bf16.msra.mxu0 %v1015_v15 }
  0x6b   : > { %671 = vmatmul.mubr.bf16.vlgmr.msra.gmra.mxu0 %v443_v16 }
 0x12b   : > { %v672_v22 = vpop.f32.mrf.mxu0 }
 0x12d   : > { %v674_v25 = vpop.f32.mrf.mxu0 }
 0x12e   : > { %v681_v26 = vcombine.low %v672_v22, %v674_v25 }
 0x12f   : > { %v676_v28 = vpop.f32.mrf.mxu0 }
 0x130   : > { %v688_v31 = vrot.slane %v681_v26, %v1223_v60 }
 0x131   : > { %v677_v32 = vpop.f32.mrf.mxu0 }
 0x132   : > { %v690_v33 = vadd.f32 %v688_v31, %v445_v27 }
 0x134   : > { %691 = vst [vmem:[#allocation2] sm:$0xf] %v690_v33 }
 0x13b   : > { %v695_v38 = vld [vmem:[#allocation2] sm:$0xf] }
 0x13c   : > { %v728_v40 = vadd.f32 %v726_v35, %v695_v38 }
 0x13e   : > { %v736_v41 = vrot.slane %v728_v40, %v1223_v60 }
 0x140   : > { %v737_v43 = vcombine.high %v736_v41, %v736_v41 }
 0x142   : > { %v920_v44 = vpack.c.bf16 %v737_v43, %v736_v41 }
 0x144   : > { %v751_v45 = vrot.slane %v920_v44, %v750_v42 }
 0x146   : > { %921 = vst.sshfl [vmem:[%s416_s12] sm:$0x5 pattern:$0x73625140] %v751_v45 }
 0x147 PF: > { %s13_s16 = sadd.s32 1, %s1058_s16   ;;  %s1276_s12 = smov %s1046_s13 }
 0x148   : > { %p10_p10 = scmp.ge.s32.totalorder %s13_s16, 8   ;;  %s1277_s13 = smov %s1118_s20 }
 0x149   : > { %s1278_s14 = smov %s1054_s15  ;;  %s1279_s15 = smov %s1281_s17 }
 0x14a   :  { %12 = sbr.rel (!%p10_p10) target bundleno = 3 (0x3), region = 119 }

// kernel: _dual_block_forward.18
= control target key start
LH: loop header
LB: loop body
LE: loop exit
PB: predicated region body
PF: predicated region fallthrough
CT: control target
= control target key end

     0   :  { %s888_s24 = smov 0   ;;  %s890_s25 = smov 0   ;;  %s967_s0 = inlined_call_operand.vmem [shape: bf16[2,2,8,128], index: 0, kind: input, shape index: {}]   ;;  %s968_s1 = inlined_call_operand.vmem [shape: bf16[2,2,8,128], index: 1, kind: input, shape index: {}]   ;;  %s969_s2 = inlined_call_operand.vmem [shape: f32[2,8,128], index: 2, kind: input, shape index: {}]   ;;  %s970_s3 = inlined_call_operand.vmem [shape: f32[2,8,128], index: 3, kind: input, shape index: {}]   ;;  %s971_s4 = inlined_call_operand.vmem [shape: bf16[1,128], index: 4, kind: input, shape index: {}]   ;;  %s972_s5 = inlined_call_operand.vmem [shape: bf16[1,128], index: 5, kind: input, shape index: {}]   ;;  %s973_s6 = inlined_call_operand.vmem [shape: bf16[2,2,8,128], index: 6, kind: output, shape index: {0}]   ;;  %s974_s7 = inlined_call_operand.vmem [shape: bf16[2,2,8,128], index: 7, kind: output, shape index: {1}]  }
   0x1   :  { %s892_s26 = smov 0   ;;  %s894_s27 = smov 0  }
   0x2   :  { %s896_s28 = smov 0  }
   0x3 LB: > { %s33_s29 = sadd.s32 1, %s836_s26  ;;  %s37_s30 = sadd.s32 1, %s840_s27  ;;  %s844_s28 = sphi %s896_s28, %s18_s28   ;;  %s840_s27 = sphi %s894_s27, %s978_s27   ;;  %s836_s26 = sphi %s892_s26, %s977_s26   ;;  %s832_s25 = sphi %s890_s25, %s976_s25   ;;  %s828_s24 = sphi %s888_s24, %s975_s24  }
   0x4   : > { %p35_p0 = scmp.ge.s32.totalorder %s33_s29, 2  ;;  %p747_p1 = scmp.ge.s32.totalorder %s844_s28, 1 }
   0x5   : > { %p325_p2 = scmp.lt.s32.totalorder %s844_s28, 5 }
   0x6   : > { %s980_s29 = smov (%p35_p0, %s33_s29), 0  ;;  %s982_s30 = smov (!%p35_p0, %s37_s30), %s840_s27 }
   0x7   : > { %p326_p3 = pnand %p747_p1, %p325_p2  ;;  %p39_p4 = scmp.ge.s32.totalorder %s982_s30, 2 }
   0x8   : > { %p405_p5 = scmp.lt.s32.totalorder (!%p326_p3), %s832_s25, 1  ;;  %p407_p6 = scmp.lt.s32.totalorder (!%p326_p3), %s828_s24, 1 }
   0x9   : > { %s984_s30 = smov (%p39_p4, %s982_s30), 0  ;;  %329 = sbr.rel (%p326_p3) target bundleno = 315 (0x13b), region = 44 }
   0xe   : > { %s986_s25 = smov (!%p405_p5, %s832_s25), 1  ;;  %s988_s24 = smov (!%p407_p6, %s828_s24), 1  ;;  %v465_v11 = vlaneseq  ;;  %v490_v14 = vld [vmem:[%s971_s4] sm:$0x1] }
   0xf   : > { %s748_s8 = sshll.u32 %s986_s25, 1  ;;  %v491_v15 = vunpack.c.l.bf16 %v490_v14  ;;  %v516_v17 = vld [vmem:[%s972_s5] sm:$0x1]  ;;  %s752_s21 = sshll.u32 %s986_s25, 3 }
  0x10   : > { %s413_s9 = sadd.s32 %s748_s8, %s988_s24  ;;  %v493_v13 = vshrl.u32 %v465_v11, 7  ;;  %v517_v19 = vunpack.c.l.bf16 %v516_v17  ;;  %s433_s24 = scalar_lea.vmem %s969_s2, %s752_s21  ;;  %v466_v30 = vand.u32 127, %v465_v11 }
  0x11   : > { %s921_s10 = sshll.u32 %s413_s9, 2  ;;  %v463_v22 = vld [vmem:[%s433_s24] sm:$0xff]  ;;  %s846_s8 = smov 127  }
  0x12   : > { %s415_s13 = scalar_lea.vmem %s967_s0, %s921_s10  ;;  %s426_s16 = scalar_lea.vmem %s968_s1, %s921_s10  ;;  %v494_v16 = vsub.s32 0, %v493_v13  ;;  %v471_v31 = vand.u32 1, %v466_v30 }
  0x13   : > { %v480_v0 = vld [vmem:[%s415_s13] sm:$0xf]  ;;  %s847_s9 = smov 1   ;;  %s440_s12 = scalar_lea.vmem %s970_s3, %s752_s21 }
  0x14   : > { %v507_v1 = vld [vmem:[%s426_s16] sm:$0xf]  ;;  %v481_v2 = vunpack.c.l.bf16 %v480_v0  ;;  %v495_v18 = vrot.slane %v491_v15, %v494_v16  ;;  %v521_v24 = vrot.slane %v517_v19, %v494_v16  ;;  %vm479_vm0 = vcmp.eq.s32.totalorder %v471_v31, 0  ;;  %s451_s15 = scalar_lea.vmem %s973_s6, %s921_s10  ;;  %s462_s18 = scalar_lea.vmem %s974_s7, %s921_s10 }
  0x15   : > { %v508_v3 = vunpack.c.l.bf16 %v507_v1  ;;  %v464_v33 = vld [vmem:[%s440_s12] sm:$0xff] }
  0x16   : > { %v482_v4 = vmul.f32 %v481_v2, %v481_v2 }
  0x17   : > { %v509_v5 = vmul.f32 %v508_v3, %v508_v3 }
  0x18   : > { %483 = vadd.xlane.f32.xlu0 %v482_v4 }
  0x1c   : > { %510 = vadd.xlane.f32.xlu0 %v509_v5 }
  0xa1   : > { %v484_v6 = vpop.xlane.xlu0 %483 }
  0xa2   : > { %v486_v7 = vmul.f32 0.0078125, %v484_v6 }
  0xa4   : > { %v487_v8 = vadd.f32 1e-06, %v486_v7 }
  0xa5   : > { %v511_v9 = vpop.xlane.xlu0 %510 }
  0xa6   : > { %802 = vrsqrt.f32 %v487_v8  ;;  %v512_v10 = vmul.f32 0.0078125, %v511_v9 }
  0xa8   : > { %v513_v12 = vadd.f32 1e-06, %v512_v10 }
  0xaa   : > { %804 = vrsqrt.f32 %v513_v12 }
  0xb3   : > { %v803_v20 = vpop.eup %802 }
  0xb4   : > { %v489_v21 = vmul.f32 %v803_v20, %v481_v2 }
  0xb6   : > { %v496_v23 = vmul.f32 %v495_v18, %v489_v21 }
  0xb7   : > { %v805_v25 = vpop.eup %804 }
  0xb8   : > { %497 = vrot.lane.b32.xlu1 %v496_v23, %s846_s8  ;;  %v515_v26 = vmul.f32 %v805_v25, %v508_v3  ;;  %v502_v27 = vmul.f32 %v496_v23, %v463_v22 }
  0xba   : > { %v522_v28 = vmul.f32 %v521_v24, %v515_v26 }
  0xbc   : > { %499 = vrot.lane.b32.xlu1 %v496_v23, %s847_s9  ;;  %523 = vrot.lane.b32.xlu0 %v522_v28, %s846_s8  ;;  %v528_v29 = vmul.f32 %v522_v28, %v463_v22 }
  0xc0   : > { %525 = vrot.lane.b32.xlu1 %v522_v28, %s847_s9 }
 0x12a   : > { %v498_v32 = vpop.permute.xlu1 %497 }
 0x12e   : > { %v500_v34 = vpop.permute.xlu1 %499  ;;  %v524_v37 = vpop.permute.xlu0 %523 }
 0x12f   : > { %v501_v35 = vsel %vm479_vm0, %v498_v32, %v500_v34 }
 0x130   : > { %v503_v36 = vmul.f32 %v501_v35, %v464_v33 }
 0x132   : > { %v504_v38 = vadd.f32 %v503_v36, %v502_v27  ;;  %v526_v39 = vpop.permute.xlu1 %525 }
 0x133   : > { %v527_v40 = vsel %vm479_vm0, %v524_v37, %v526_v39 }
 0x134   : > { %v505_v41 = vpack.c.bf16 %v504_v38, %v504_v38  ;;  %v529_v42 = vmul.f32 %v527_v40, %v464_v33 }
 0x136   : > { %506 = vst [vmem:[%s451_s15] sm:$0xf] %v505_v41  ;;  %v530_v43 = vadd.f32 %v529_v42, %v528_v29 }
 0x138   : > { %v531_v44 = vpack.c.bf16 %v530_v43, %v530_v43 }
 0x13a   : > { %532 = vst [vmem:[%s462_s18] sm:$0xf] %v531_v44 }
 0x13b PF: > { %s18_s28 = sadd.s32 1, %s844_s28   ;;  %s975_s24 = smov %s836_s26 }
 0x13c   : > { %p15_p7 = scmp.ge.s32.totalorder %s18_s28, 6   ;;  %s976_s25 = smov %s840_s27 }
 0x13d   : > { %s977_s26 = smov %s980_s29  ;;  %s978_s27 = smov %s984_s30 }
 0x13e   :  { %17 = sbr.rel (!%p15_p7) target bundleno = 3 (0x3), region = 95 }

// kernel: _dual_block_forward.19
= control target key start
LH: loop header
LB: loop body
LE: loop exit
PB: predicated region body
PF: predicated region fallthrough
CT: control target
= control target key end

     0   :  { %s1014_s12 = smov 0   ;;  %s1016_s13 = smov 0   ;;  %s1097_s0 = inlined_call_operand.vmem [shape: bf16[2,2,24,128], index: 0, kind: input, shape index: {}]   ;;  %s1098_s1 = inlined_call_operand.vmem [shape: bf16[2,2,24,128], index: 1, kind: input, shape index: {}]   ;;  %s1099_s2 = inlined_call_operand.vmem [shape: bf16[2,2,24,128], index: 2, kind: input, shape index: {}]   ;;  %s1100_s3 = inlined_call_operand.vmem [shape: bf16[2,2,24,128], index: 3, kind: output, shape index: {}]  }
   0x1   :  { %s1018_s14 = smov 0   ;;  %s1020_s15 = smov 0  }
   0x2   :  { %s1022_s16 = smov 0  }
   0x3 LB: > { %s35_s17 = sadd.s32 1, %s981_s14  ;;  %s39_s18 = sadd.s32 1, %s985_s15  ;;  %s989_s16 = sphi %s1022_s16, %s13_s16   ;;  %s985_s15 = sphi %s1020_s15, %s1104_s15   ;;  %s981_s14 = sphi %s1018_s14, %s1103_s14   ;;  %s977_s13 = sphi %s1016_s13, %s1102_s13   ;;  %s973_s12 = sphi %s1014_s12, %s1101_s12  }
   0x4   : > { %p37_p0 = scmp.ge.s32.totalorder %s35_s17, 2  ;;  %p829_p1 = scmp.ge.s32.totalorder %s989_s16, 1 }
   0x5   : > { %p226_p2 = scmp.lt.s32.totalorder %s989_s16, 5 }
   0x6   : > { %s1106_s17 = smov (%p37_p0, %s35_s17), 0  ;;  %s1108_s18 = smov (!%p37_p0, %s39_s18), %s985_s15 }
   0x7   : > { %p227_p3 = pnand %p829_p1, %p226_p2  ;;  %p41_p4 = scmp.ge.s32.totalorder %s1108_s18, 2 }
   0x8   : > { %p293_p5 = scmp.lt.s32.totalorder (!%p227_p3), %s977_s13, 1  ;;  %p295_p6 = scmp.lt.s32.totalorder (!%p227_p3), %s973_s12, 1 }
   0x9   : > { %s1110_s18 = smov (%p41_p4, %s1108_s18), 0  ;;  %230 = sbr.rel (%p227_p3) target bundleno = 819 (0x333), region = 32 }
   0xe   : > { %s1112_s13 = smov (!%p293_p5, %s977_s13), 1  ;;  %s1114_s12 = smov (!%p295_p6, %s973_s12), 1  ;;  %vm353_vm0 = vcmask 7168   ;;  %v991_v4 = vmov -inf   ;;  %vm446_vm1 = vcmask 195584   ;;  %v992_v15 = vmov 0  }
   0xf   : > { %s881_s19 = smul.u32 6, %s1112_s13  ;;  %356 = vst.msk [vmem:[#allocation2 + $0x10] sm:$0xff] %vm353_vm0, %v991_v4  ;;  %354 = vst.msk [vmem:[#allocation2] sm:$0xff] %vm353_vm0, %v991_v4  ;;  %925 = vset.pattern.permute.xlu1 %v992_v15  ;;  %926 = vset.pattern.permute.xlu0 %v992_v15  ;;  %v993_v16 = vmov 0.0   ;;  %vm552_vm2 = vcmask 1043456  }
  0x10   : > { %s880_s20 = smul.u32 3, %s1114_s12  ;;  %355 = vst.msk [vmem:[#allocation2 + $0x8] sm:$0xff] %vm353_vm0, %v991_v4  ;;  %357 = vst.msk [vmem:[#allocation3] sm:$0xff] %vm353_vm0, %v993_v16 }
  0x11   : > { %358 = vst.msk [vmem:[#allocation3 + $0x8] sm:$0xff] %vm353_vm0, %v993_v16  ;;  %359 = vst.msk [vmem:[#allocation3 + $0x10] sm:$0xff] %vm353_vm0, %v993_v16 }
  0x12   : > { %s302_s21 = sadd.s32 %s881_s19, %s880_s20 }
  0x13   : > { %s1044_s22 = sshll.u32 %s302_s21, 2 }
  0x14   : > { %s318_s25 = scalar_lea.vmem %s1098_s1, %s1044_s22  ;;  %s304_s28 = scalar_lea.vmem %s1097_s0, %s1044_s22 }
  0x15   : > { %v927_v0 = vld [vmem:[%s318_s25 + $0x8] ss:$0 sps:$4 sm:$0xff]   ;;  %v928_v1 = vld [vmem:[%s318_s25] sm:$0xff]   ;;  %s332_s4 = scalar_lea.vmem %s1099_s2, %s1044_s22  ;;  %s346_s7 = scalar_lea.vmem %s1100_s3, %s1044_s22 }
  0x16   : > { %863 = vmatprep.subr.bf16.mxu0 %v927_v0  ;;  %v929_v2 = vld [vmem:[%s304_s28] sm:$0xff]   ;;  %v930_v3 = vld [vmem:[%s304_s28 + $0x8] ss:$0 sps:$4 sm:$0xff]   ;;  %v445_v17 = vld [vmem:[#allocation2 + $0x10] sm:$0xff] }
  0x17   : > { %864 = vmatpush3.bf16.xpose.msra.mxu0 %v927_v0  ;;  %867 = vmatprep.mubr.bf16.mxu0 %v929_v2  ;;  %v443_v19 = vld [vmem:[#allocation2] sm:$0xff]  ;;  %v444_v24 = vld [vmem:[#allocation2 + $0x8] sm:$0xff]  ;;  %v492_v55 = vld [vmem:[#allocation3] sm:$0xff] }
  0x18   : > { %865 = vmatprep.subr.bf16.mxu0 %v928_v1  ;;  %v931_v29 = vld [vmem:[%s332_s4 + $0x8] ss:$0 sps:$4 sm:$0xff]   ;;  %v932_v31 = vld [vmem:[%s332_s4] sm:$0xff]  }
  0x19   : > { %879 = vmatprep.subr.msk.bf16.mxu1 %vm552_vm2, %v931_v29  ;;  %v554_v30 = vsel %vm552_vm2, %v931_v29, 0  ;;  %v494_v58 = vld [vmem:[#allocation3 + $0x10] sm:$0xff]  ;;  %v493_v60 = vld [vmem:[#allocation3 + $0x8] sm:$0xff] }
  0x1a   : > { %872 = vmatpush3.bf16.msra.mxu1 %v554_v30 }
  0x1b   : > { %873 = vmatprep.subr.bf16.mxu1 %v932_v31 }
  0x1e   : > { %874 = vmatpush3.bf16.msra.mxu1 %v932_v31 }
  0x1f   : > { %866 = vmatpush3.bf16.xpose.msra.mxu0 %v928_v1 }
  0x26   : > { %868 = vmatmul.mubr.bf16.vlgmr.msra.gmra.mxu0 %v930_v3 }
  0xe6   : > { %v869_v5 = vpop.f32.mrf.mxu0 }
  0xe7   : > { %v442_v6 = vmul.f32 0.088388346, %v869_v5 }
  0xe8   : > { %v426_v7 = vpop.f32.mrf.mxu0 }
  0xe9   : > { %v440_v8 = vmul.f32 0.088388346, %v426_v7  ;;  %v453_v9 = vsel %vm446_vm1, %v442_v6, -inf }
  0xea   : > { %454 = vmax.xlane.f32.xlu1 %v453_v9  ;;  %v870_v10 = vpop.f32.mrf.mxu0 }
  0xeb   : > { %v447_v11 = vsel %vm446_vm1, %v440_v8, -inf }
  0xec   : > { %448 = vmax.xlane.f32.xlu0 %v447_v11  ;;  %v429_v12 = vpop.f32.mrf.mxu0 }
  0xed   : > { %v441_v13 = vmul.f32 0.088388346, %v429_v12 }
  0xef   : > { %v450_v14 = vsel %vm446_vm1, %v441_v13, -inf }
  0xf0   : > { %451 = vmax.xlane.f32.xlu0 %v450_v14 }
 0x173   : > { %v455_v18 = vpop.xlane.xlu1 %454 }
 0x174   : > { %v458_v20 = vmax.f32 %v445_v17, %v455_v18 }
 0x175   : > { %v449_v21 = vpop.xlane.xlu0 %448 }
 0x176   : > { %v461_v22 = vsub.f32 %v445_v17, %v458_v20  ;;  %612 = vst.msk [vmem:[#allocation2 + $0x10] sm:$0xff] %vm353_vm0, %v458_v20  ;;  %v456_v23 = vmax.f32 %v443_v19, %v449_v21 }
 0x178   : > { %v459_v25 = vsub.f32 %v443_v19, %v456_v23  ;;  %610 = vst.msk [vmem:[#allocation2] sm:$0xff] %vm353_vm0, %v456_v23  ;;  %470 = vperm.xlu1 %925, %v456_v23   ;;  %v466_v51 = vmul.f32 1.442695, %v461_v22 }
 0x179   : > { %v452_v26 = vpop.xlane.xlu0 %451 }
 0x17a   : > { %v457_v27 = vmax.f32 %v444_v24, %v452_v26  ;;  %v462_v45 = vmul.f32 1.442695, %v459_v25 }
 0x17c   : > { %v460_v28 = vsub.f32 %v444_v24, %v457_v27  ;;  %611 = vst.msk [vmem:[#allocation2 + $0x8] sm:$0xff] %vm353_vm0, %v457_v27  ;;  %480 = vperm.xlu1 %925, %v458_v20   ;;  %475 = vperm.xlu0 %926, %v457_v27  }
 0x17e   : > { %v464_v50 = vmul.f32 1.442695, %v460_v28 }
 0x1f3   : > { %v471_v32 = vpop.permute.xlu1 %470 }
 0x1f4   : > { %v483_v33 = vsub.f32 %v440_v8, %v471_v32 }
 0x1f6   : > { %v486_v34 = vmul.f32 1.442695, %v483_v33 }
 0x1f7   : > { %v481_v35 = vpop.permute.xlu1 %480  ;;  %v476_v36 = vpop.permute.xlu0 %475 }
 0x1f8   : > { %933 = vpow2.f32 %v486_v34  ;;  %v485_v37 = vsub.f32 %v442_v6, %v481_v35  ;;  %v484_v38 = vsub.f32 %v441_v13, %v476_v36 }
 0x1fa   : > { %v490_v39 = vmul.f32 1.442695, %v485_v37  ;;  %v488_v40 = vmul.f32 1.442695, %v484_v38 }
 0x1fc   : > { %935 = vpow2.f32 %v490_v39 }
 0x1fd   : > { %937 = vpow2.f32 %v488_v40 }
 0x1fe   : > { %939 = vpow2.f32 %v462_v45 }
 0x1ff   : > { %941 = vpow2.f32 %v464_v50 }
 0x200   : > { %943 = vpow2.f32 %v466_v51 }
 0x205   : > { %v934_v41 = vpop.eup %933 }
 0x206   : > { %v498_v42 = vsel %vm446_vm1, %v934_v41, 0.0 }
 0x207   : > { %499 = vadd.xlane.f32.xlu1 %v498_v42 }
 0x209   : > { %v936_v43 = vpop.eup %935 }
 0x20a   : > { %v938_v44 = vpop.eup %937  ;;  %v504_v46 = vsel %vm446_vm1, %v936_v43, 0.0  ;;  %v536_v47 = vpack.c.bf16 %v936_v43, %v936_v43 }
 0x20b   : > { %505 = vadd.xlane.f32.xlu1 %v504_v46  ;;  %v501_v48 = vsel %vm446_vm1, %v938_v44, 0.0  ;;  %v535_v49 = vpack.c.bf16 %v938_v44, %v934_v41  ;;  %v940_v52 = vpop.eup %939 }
 0x20c   : > { %502 = vadd.xlane.f32.xlu0 %v501_v48  ;;  %v942_v53 = vpop.eup %941  ;;  %v495_v56 = vmul.f32 %v940_v52, %v492_v55 }
 0x20d   : > { %875 = vmatprep.mubr.msk.bf16.mxu1 %vm446_vm1, %v535_v49  ;;  %v944_v54 = vpop.eup %943  ;;  %v496_v63 = vmul.f32 %v942_v53, %v493_v60 }
 0x20e   : > { %876 = vmatmul.mubr.msk.bf16.vlgmr.msra.gmra.mxu1 %vm446_vm1, %v536_v47  ;;  %v497_v61 = vmul.f32 %v944_v54, %v494_v58 }
 0x21c   : > { %519 = vperm.xlu1 %925, %v940_v52  }
 0x220   : > { %524 = vperm.xlu1 %925, %v942_v53  }
 0x222   : > { %529 = vperm.xlu0 %926, %v944_v54  }
 0x290   : > { %v500_v57 = vpop.xlane.xlu1 %499 }
 0x291   : > { %v507_v59 = vadd.f32 %v500_v57, %v495_v56 }
 0x293   : > { %511 = vst.msk [vmem:[#allocation3] sm:$0xff] %vm353_vm0, %v507_v59 }
 0x294   : > { %v506_v62 = vpop.xlane.xlu1 %505 }
 0x295   : > { %v509_v0 = vadd.f32 %v506_v62, %v497_v61  ;;  %v503_v1 = vpop.xlane.xlu0 %502 }
 0x296   : > { %v508_v2 = vadd.f32 %v503_v1, %v496_v63 }
 0x297   : > { %513 = vst.msk [vmem:[#allocation3 + $0x10] sm:$0xff] %vm353_vm0, %v509_v0 }
 0x298   : > { %512 = vst.msk [vmem:[#allocation3 + $0x8] sm:$0xff] %vm353_vm0, %v508_v2  ;;  %v520_v12 = vpop.permute.xlu1 %519 }
 0x299   : > { %v532_v16 = vmul.f32 0.0, %v520_v12 }
 0x29a   : > { %v619_v3 = vld [vmem:[#allocation3] sm:$0xff] }
 0x29b   : > { %945 = vrcp.f32 %v619_v3 }
 0x29c   : > { %v525_v13 = vpop.permute.xlu1 %524 }
 0x29d   : > { %v533_v17 = vmul.f32 0.0, %v525_v13  ;;  %v530_v18 = vpop.permute.xlu0 %529 }
 0x29e   : > { %v621_v5 = vld [vmem:[#allocation3 + $0x10] sm:$0xff]  ;;  %v534_v22 = vmul.f32 0.0, %v530_v18 }
 0x29f   : > { %v620_v4 = vld [vmem:[#allocation3 + $0x8] sm:$0xff] }
 0x2a0   : > { %947 = vrcp.f32 %v620_v4 }
 0x2a1   : > { %949 = vrcp.f32 %v621_v5 }
 0x2a8   : > { %v946_v6 = vpop.eup %945 }
 0x2a9   : > { %627 = vperm.xlu1 %925, %v946_v6  }
 0x2ad   : > { %v948_v7 = vpop.eup %947 }
 0x2ae   : > { %632 = vperm.xlu1 %925, %v948_v7   ;;  %v950_v8 = vpop.eup %949 }
 0x2b2   : > { %637 = vperm.xlu1 %925, %v950_v8  }
 0x2ce   : > { %v877_v9 = vpop.f32.mrf.mxu1 }
 0x2cf   : > { %v606_v25 = vadd.f32 %v877_v9, %v534_v22 }
 0x2d0   : > { %v590_v10 = vpop.f32.mrf.mxu1 }
 0x2d1   : > { %v604_v19 = vadd.f32 %v590_v10, %v532_v16 }
 0x2d2   : > { %v878_v11 = vpop.f32.mrf.mxu1 }
 0x2d4   : > { %v593_v15 = vpop.f32.mrf.mxu1 }
 0x2d5   : > { %v605_v20 = vadd.f32 %v593_v15, %v533_v17 }
 0x324   : > { %v628_v14 = vpop.permute.xlu1 %627 }
 0x325   : > { %v640_v23 = vmul.f32 %v628_v14, %v604_v19 }
 0x329   : > { %v633_v21 = vpop.permute.xlu1 %632 }
 0x32a   : > { %v641_v24 = vmul.f32 %v633_v21, %v605_v20 }
 0x32c   : > { %v853_v26 = vpack.c.bf16 %v641_v24, %v640_v23 }
 0x32d   : > { %v638_v27 = vpop.permute.xlu1 %637 }
 0x32e   : > { %854 = vst [vmem:[%s346_s7] sm:$0xff] %v853_v26   ;;  %v642_v28 = vmul.f32 %v638_v27, %v606_v25 }
 0x330   : > { %v849_v29 = vpack.c.bf16 %v642_v28, %v642_v28 }
 0x332   : > { %658 = vst [vmem:[%s346_s7 + $0x8] sm:$0xf] %v849_v29 }
 0x333 PF: > { %s13_s16 = sadd.s32 1, %s989_s16   ;;  %s1101_s12 = smov %s981_s14 }
 0x334   : > { %p10_p7 = scmp.ge.s32.totalorder %s13_s16, 6   ;;  %s1102_s13 = smov %s985_s15 }
 0x335   : > { %s1103_s14 = smov %s1106_s17  ;;  %s1104_s15 = smov %s1110_s18 }
 0x336   :  { %12 = sbr.rel (!%p10_p7) target bundleno = 3 (0x3), region = 76 }

// kernel: _dual_block_forward.21
= control target key start
LH: loop header
LB: loop body
LE: loop exit
PB: predicated region body
PF: predicated region fallthrough
CT: control target
= control target key end

     0   :  { %s1133_s18 = smov 0   ;;  %s1135_s19 = smov 0   ;;  %s1280_s0 = inlined_call_operand.vmem [shape: bf16[2,8,256], index: 0, kind: input, shape index: {}]   ;;  %s1281_s1 = inlined_call_operand.vmem [shape: bf16[256,256], index: 1, kind: input, shape index: {}]   ;;  %s1282_s2 = inlined_call_operand.vmem [shape: bf16[1,256], index: 2, kind: input, shape index: {}]   ;;  %s1283_s3 = inlined_call_operand.vmem [shape: bf16[2,1,256], index: 3, kind: input, shape index: {}]   ;;  %s1284_s4 = inlined_call_operand.vmem [shape: bf16[2,8,256], index: 4, kind: input, shape index: {}]   ;;  %s1285_s5 = inlined_call_operand.vmem [shape: bf16[2,8,256], index: 5, kind: output, shape index: {}]  }
   0x1   :  { %s1137_s20 = smov 0  }
   0x2 LB: > { %s41_s21 = sadd.s32 1, %s1097_s19  ;;  %p956_p0 = scmp.ge.s32.totalorder %s1101_s20, 1  ;;  %s1101_s20 = sphi %s1137_s20, %s15_s20   ;;  %s1097_s19 = sphi %s1135_s19, %s1287_s19   ;;  %s1093_s18 = sphi %s1133_s18, %s1286_s18  }
   0x3   : > { %p43_p1 = scmp.ge.s32.totalorder %s41_s21, 2  ;;  %p298_p2 = scmp.lt.s32.totalorder %s1101_s20, 3 }
   0x5   : > { %s1289_s21 = smov (%p43_p1, %s41_s21), 0  ;;  %p299_p3 = pnand %p956_p0, %p298_p2 }
   0x6   : > { %p378_p4 = scmp.lt.s32.totalorder (!%p299_p3), %s1093_s18, 1 }
   0x7   : > { %302 = sbr.rel (%p299_p3) target bundleno = 281 (0x119), region = 40 }
   0xc   : > { %v1029_v0 = vld [vmem:[%s1281_s1 + $0x74] ss:$8 sps:$4 sm:$0xff]   ;;  %v1031_v1 = vld [vmem:[%s1281_s1 + $0x70] ss:$8 sps:$4 sm:$0xff]   ;;  %v1032_v2 = vld [vmem:[%s1281_s1 + $0x64] ss:$8 sps:$4 sm:$0xff]   ;;  %v706_v35 = vlaneseq }
   0xd   : > { %653 = vmatprep.subr.bf16.mxu0 %v1029_v0  ;;  %v1034_v3 = vld [vmem:[%s1281_s1 + $0x60] ss:$8 sps:$4 sm:$0xff]   ;;  %v1035_v4 = vld [vmem:[%s1281_s1 + $0x54] ss:$8 sps:$4 sm:$0xff]   ;;  %v1037_v5 = vld [vmem:[%s1281_s1 + $0x50] ss:$8 sps:$4 sm:$0xff]  }
   0xe   : > { %654 = vmatpush1.bf16.msra.mxu0 %v1031_v1  ;;  %v1038_v6 = vld [vmem:[%s1281_s1 + $0x44] ss:$8 sps:$4 sm:$0xff]   ;;  %v1040_v7 = vld [vmem:[%s1281_s1 + $0x40] ss:$8 sps:$4 sm:$0xff]   ;;  %s1291_s18 = smov (!%p378_p4, %s1093_s18), 1  ;;  %v707_v36 = vshrl.u32 %v706_v35, 7 }
   0xf   : > { %655 = vmatprep.subr.bf16.mxu0 %v1032_v2  ;;  %v1041_v8 = vld [vmem:[%s1281_s1 + $0x34] ss:$8 sps:$4 sm:$0xff]   ;;  %v1043_v9 = vld [vmem:[%s1281_s1 + $0x30] ss:$8 sps:$4 sm:$0xff]   ;;  %s1184_s17 = sshll.u32 %s1291_s18, 3  ;;  %s959_s29 = sshll.u32 %s1291_s18, 1 }
  0x10   : > { %v1044_v10 = vld [vmem:[%s1281_s1 + $0x24] ss:$8 sps:$4 sm:$0xff]   ;;  %s389_s26 = scalar_lea.vmem %s1280_s0, %s1184_s17  ;;  %v1046_v11 = vld [vmem:[%s1281_s1 + $0x20] ss:$8 sps:$4 sm:$0xff]   ;;  %v1047_v12 = vld [vmem:[%s1281_s1 + $0x14] ss:$8 sps:$4 sm:$0xff]   ;;  %s415_s7 = scalar_lea.vmem %s1283_s3, %s959_s29 }
  0x11   : > { %v453_v13 = vld [vmem:[%s389_s26] sm:$0xff]  ;;  %v1049_v15 = vld [vmem:[%s1281_s1 + $0x10] ss:$8 sps:$4 sm:$0xff]   ;;  %v1053_v18 = vld [vmem:[%s1281_s1 + $0xf4] ss:$8 sps:$4 sm:$0xff]   ;;  %v708_v40 = vsub.s32 0, %v707_v36  ;;  %s429_s12 = scalar_lea.vmem %s1284_s4, %s1184_s17  ;;  %s443_s14 = scalar_lea.vmem %s1285_s5, %s1184_s17 }
  0x12   : > { %656 = vmatpush1.bf16.msra.mxu0 %v1034_v3  ;;  %v965_v14 = vcombine.high %v453_v13, %v453_v13  ;;  %v1050_v16 = vld [vmem:[%s1281_s1 + $0x4] ss:$8 sps:$4 sm:$0xff]   ;;  %v1052_v17 = vld [vmem:[%s1281_s1] ss:$8 sps:$4 sm:$0xff]   ;;  %v1055_v19 = vld [vmem:[%s1281_s1 + $0xf0] ss:$8 sps:$4 sm:$0xff]   ;;  %v964_v34 = vcombine.low %v453_v13, %v453_v13 }
  0x13   : > { %657 = vmatprep.subr.bf16.mxu0 %v1035_v4  ;;  %v1056_v20 = vld [vmem:[%s1281_s1 + $0xe4] ss:$8 sps:$4 sm:$0xff]   ;;  %v1058_v21 = vld [vmem:[%s1281_s1 + $0xe0] ss:$8 sps:$4 sm:$0xff]   ;;  %v1059_v22 = vld [vmem:[%s1281_s1 + $0xd4] ss:$8 sps:$4 sm:$0xff]  }
  0x14   : > { %685 = vmatprep.mubr.bf16.mxu0 %v965_v14  ;;  %v1061_v23 = vld [vmem:[%s1281_s1 + $0xd0] ss:$8 sps:$4 sm:$0xff]   ;;  %v1062_v24 = vld [vmem:[%s1281_s1 + $0xc4] ss:$8 sps:$4 sm:$0xff]   ;;  %v1064_v25 = vld [vmem:[%s1281_s1 + $0xc0] ss:$8 sps:$4 sm:$0xff]  }
  0x15   : > { %v1065_v26 = vld [vmem:[%s1281_s1 + $0xb4] ss:$8 sps:$4 sm:$0xff]   ;;  %v1067_v27 = vld [vmem:[%s1281_s1 + $0xb0] ss:$8 sps:$4 sm:$0xff]   ;;  %v1068_v28 = vld [vmem:[%s1281_s1 + $0xa4] ss:$8 sps:$4 sm:$0xff]  }
  0x16   : > { %658 = vmatpush1.bf16.msra.mxu0 %v1037_v5  ;;  %v1070_v29 = vld [vmem:[%s1281_s1 + $0xa0] ss:$8 sps:$4 sm:$0xff]   ;;  %v1071_v30 = vld [vmem:[%s1281_s1 + $0x94] ss:$8 sps:$4 sm:$0xff]   ;;  %v1073_v31 = vld [vmem:[%s1281_s1 + $0x90] ss:$8 sps:$4 sm:$0xff]  }
  0x17   : > { %659 = vmatprep.subr.bf16.mxu0 %v1038_v6  ;;  %v1074_v32 = vld [vmem:[%s1281_s1 + $0x84] ss:$8 sps:$4 sm:$0xff]   ;;  %v1076_v33 = vld [vmem:[%s1281_s1 + $0x80] ss:$8 sps:$4 sm:$0xff]   ;;  %v712_v42 = vsub.s32 2, %v707_v36 }
  0x18   : > { %v703_v37 = vld [vmem:[%s1282_s2] sm:$0x3] }
  0x19   : > { %v729_v38 = vld [vmem:[%s415_s7] sm:$0x3]  ;;  %v704_v39 = vunpack.c.l.bf16 %v703_v37 }
  0x1a   : > { %660 = vmatpush1.bf16.msra.mxu0 %v1040_v7  ;;  %v730_v41 = vunpack.c.l.bf16 %v729_v38  ;;  %v726_v48 = vld [vmem:[%s429_s12] sm:$0xff] }
  0x1b   : > { %661 = vmatprep.subr.bf16.mxu0 %v1041_v8  ;;  %v709_v43 = vrot.slane %v704_v39, %v708_v40  ;;  %v713_v45 = vrot.slane %v704_v39, %v712_v42  ;;  %v727_v53 = vunpack.c.l.bf16 %v726_v48  ;;  %v728_v58 = vunpack.c.h.bf16 %v726_v48 }
  0x1c   : > { %v735_v44 = vrot.slane %v730_v41, %v708_v40  ;;  %v739_v47 = vrot.slane %v730_v41, %v712_v42 }
  0x1d   : > { %v719_v46 = vrot.slane %v709_v43, %v708_v40  ;;  %v723_v50 = vrot.slane %v713_v45, %v708_v40 }
  0x1e   : > { %662 = vmatpush1.bf16.msra.mxu0 %v1043_v9  ;;  %v745_v49 = vrot.slane %v735_v44, %v708_v40  ;;  %v749_v54 = vrot.slane %v739_v47, %v708_v40 }
  0x1f   : > { %663 = vmatprep.subr.bf16.mxu0 %v1044_v10 }
  0x22   : > { %664 = vmatpush1.bf16.msra.mxu0 %v1046_v11 }
  0x23   : > { %665 = vmatprep.subr.bf16.mxu0 %v1047_v12 }
  0x26   : > { %666 = vmatpush1.bf16.msra.mxu0 %v1049_v15 }
  0x27   : > { %667 = vmatprep.subr.bf16.mxu0 %v1050_v16 }
  0x2a   : > { %668 = vmatpush1.bf16.msra.mxu0 %v1052_v17 }
  0x2b   : > { %669 = vmatprep.subr.bf16.mxu0 %v1053_v18 }
  0x2e   : > { %670 = vmatpush2.bf16.msra.mxu0 %v1055_v19 }
  0x2f   : > { %671 = vmatprep.subr.bf16.mxu0 %v1056_v20 }
  0x32   : > { %672 = vmatpush2.bf16.msra.mxu0 %v1058_v21 }
  0x33   : > { %673 = vmatprep.subr.bf16.mxu0 %v1059_v22 }
  0x36   : > { %674 = vmatpush2.bf16.msra.mxu0 %v1061_v23 }
  0x37   : > { %675 = vmatprep.subr.bf16.mxu0 %v1062_v24 }
  0x3a   : > { %676 = vmatpush2.bf16.msra.mxu0 %v1064_v25 }
  0x3b   : > { %677 = vmatprep.subr.bf16.mxu0 %v1065_v26 }
  0x3e   : > { %678 = vmatpush2.bf16.msra.mxu0 %v1067_v27 }
  0x3f   : > { %679 = vmatprep.subr.bf16.mxu0 %v1068_v28 }
  0x42   : > { %680 = vmatpush2.bf16.msra.mxu0 %v1070_v29 }
  0x43   : > { %681 = vmatprep.subr.bf16.mxu0 %v1071_v30 }
  0x46   : > { %682 = vmatpush2.bf16.msra.mxu0 %v1073_v31 }
  0x47   : > { %683 = vmatprep.subr.bf16.mxu0 %v1074_v32 }
  0x4a   : > { %684 = vmatpush2.bf16.msra.mxu0 %v1076_v33 }
  0x4d   : > { %686 = vmatmul.mubr.bf16.vlgmr.msra.gmra.mxu0 %v964_v34 }
 0x10d   : > { %v687_v51 = vpop.f32.mrf.mxu0 }
 0x10e   : > { %v724_v52 = vadd.f32 %v719_v46, %v687_v51 }
 0x10f   : > { %v689_v55 = vpop.f32.mrf.mxu0 }
 0x110   : > { %v750_v56 = vmul.f32 %v745_v49, %v724_v52  ;;  %v725_v57 = vadd.f32 %v723_v50, %v689_v55 }
 0x111   : > { %v691_v59 = vpop.f32.mrf.mxu0 }
 0x112   : > { %v752_v60 = vadd.f32 %v750_v56, %v727_v53  ;;  %v751_v61 = vmul.f32 %v749_v54, %v725_v57 }
 0x113   : > { %v692_v62 = vpop.f32.mrf.mxu0 }
 0x114   : > { %v753_v63 = vadd.f32 %v751_v61, %v728_v58 }
 0x116   : > { %v1004_v0 = vpack.c.bf16 %v753_v63, %v752_v60 }
 0x118   : > { %762 = vst [vmem:[%s443_s14] sm:$0xff] %v1004_v0 }
 0x119 PF: > { %s15_s20 = sadd.s32 1, %s1101_s20   ;;  %s1286_s18 = smov %s1097_s19 }
 0x11a   : > { %p12_p5 = scmp.ge.s32.totalorder %s15_s20, 4   ;;  %s1287_s19 = smov %s1289_s21 }
 0x11c   :  { %14 = sbr.rel (!%p12_p5) target bundleno = 2 (0x2), region = 90 }

// kernel: _dual_block_forward.24
= control target key start
LH: loop header
LB: loop body
LE: loop exit
PB: predicated region body
PF: predicated region fallthrough
CT: control target
= control target key end

     0   :  { %s1277_s18 = smov 0   ;;  %s1279_s19 = smov 0   ;;  %s1490_s0 = inlined_call_operand.vmem [shape: bf16[2,8,256], index: 0, kind: input, shape index: {}]   ;;  %s1491_s1 = inlined_call_operand.vmem [shape: bf16[2,1,256], index: 1, kind: input, shape index: {}]   ;;  %s1492_s2 = inlined_call_operand.vmem [shape: bf16[2,1,256], index: 2, kind: input, shape index: {}]   ;;  %s1493_s3 = inlined_call_operand.vmem [shape: bf16[256,1024], index: 3, kind: input, shape index: {}]   ;;  %s1494_s4 = inlined_call_operand.vmem [shape: bf16[1,1024], index: 4, kind: input, shape index: {}]   ;;  %s1495_s5 = inlined_call_operand.vmem [shape: bf16[2,8,1024], index: 5, kind: output, shape index: {}]  }
   0x1   :  { %s1281_s20 = smov 0   ;;  %s1283_s21 = smov 0  }
   0x2   :  { %s1285_s22 = smov 0   ;;  %s1287_s23 = smov 0  }
   0x3   :  { %s1289_s24 = smov 0  }
   0x4 LB: > { %s27_s25 = sadd.s32 1, %s1237_s22  ;;  %s34_s26 = sadd.s32 1, %s1241_s23  ;;  %s1245_s24 = sphi %s1289_s24, %s15_s24   ;;  %s1241_s23 = sphi %s1287_s23, %s1501_s23   ;;  %s1237_s22 = sphi %s1285_s22, %s1500_s22   ;;  %s1233_s21 = sphi %s1283_s21, %s1499_s21   ;;  %s1229_s20 = sphi %s1281_s20, %s1498_s20   ;;  %s1225_s19 = sphi %s1279_s19, %s1497_s19   ;;  %s1221_s18 = sphi %s1277_s18, %s1496_s18  }
   0x5   : > { %p28_p0 = scmp.ge.s32.totalorder %s27_s25, 4  ;;  %s121_s27 = sadd.s32 1, %s1225_s19 }
   0x6   : > { %p128_p1 = scmp.ne.s32.totalorder %s1225_s19, %s1221_s18  ;;  %p129_p2 = scmp.eq.s32.totalorder %s1245_s24, 0 }
   0x7   : > { %s1503_s25 = smov (%p28_p0, %s27_s25), 0  ;;  %s1505_s26 = smov (!%p28_p0, %s34_s26), %s1241_s23 }
   0x8   : > { %s118_s28 = ssub.s32 %s1237_s22, %s1503_s25  ;;  %p130_p3 = por %p129_p2, %p128_p1 }
   0x9   : > { %p36_p4 = scmp.ge.s32.totalorder %s1505_s26, 2  ;;  %p119_p5 = scmp.eq.s32.totalorder %s118_s28, 0 }
   0xa   : > { %p1029_p6 = scmp.ge.s32.totalorder %s1245_s24, 8 }
   0xb   : > { %s1507_s26 = smov (%p36_p4, %s1505_s26), 0 }
   0xc   : > { %s1326_s29 = scalar_select %p119_p5, %s1225_s19, %s121_s27  }
   0xd   : > { %210 = sbr.rel (%p1029_p6) target bundleno = 54 (0x36), region = 16 }
  0x12   : > { %239 = sbr.rel (!%p130_p3) target bundleno = 54 (0x36), region = 32  ;;  %s241_s30 = sand.u32 (%p130_p3), 1, %s1225_s19  }
  0x13   : > { %s1078_s6 = sshll.u32 (%p130_p3), %s1237_s22, 3  ;;  %s1030_s7 = sshll.u32 (%p130_p3), %s241_s30, 8 }
  0x14   : > { %s1334_s10 = scalar_lea.vmem (%p130_p3), %s1493_s3, %s1078_s6  ;;  %s1339_s11 = scalar_lea.vmem (%p130_p3), [#allocation2], %s1030_s7 }
  0x15   : > { %v337_v0 = vld [vmem:[%s1334_s10] sm:$0xff] (%p130_p3) }
  0x16   : > { %v339_v1 = vld [vmem:[%s1334_s10 + $0x20] sm:$0xff] (%p130_p3)  ;;  %338 = vst [vmem:[%s1339_s11] sm:$0xff] (%p130_p3), %v337_v0 }
  0x17   : > { %v341_v2 = vld [vmem:[%s1334_s10 + $0x40] sm:$0xff]  ;;  %340 = vst [vmem:[%s1339_s11 + $0x8] sm:$0xff] %v339_v1 }
  0x18   : > { %342 = vst [vmem:[%s1339_s11 + $0x10] sm:$0xff] %v341_v2  ;;  %v343_v3 = vld [vmem:[%s1334_s10 + $0x60] sm:$0xff] }
  0x19   : > { %v345_v4 = vld [vmem:[%s1334_s10 + $0x80] sm:$0xff]  ;;  %344 = vst [vmem:[%s1339_s11 + $0x18] sm:$0xff] %v343_v3 }
  0x1a   : > { %v347_v5 = vld [vmem:[%s1334_s10 + $0xa0] sm:$0xff]  ;;  %346 = vst [vmem:[%s1339_s11 + $0x20] sm:$0xff] %v345_v4 }
  0x1b   : > { %348 = vst [vmem:[%s1339_s11 + $0x28] sm:$0xff] %v347_v5  ;;  %v349_v6 = vld [vmem:[%s1334_s10 + $0xc0] sm:$0xff] }
  0x1c   : > { %v351_v7 = vld [vmem:[%s1334_s10 + $0xe0] sm:$0xff]  ;;  %350 = vst [vmem:[%s1339_s11 + $0x30] sm:$0xff] %v349_v6 }
  0x1d   : > { %v353_v8 = vld [vmem:[%s1334_s10 + $0x100] sm:$0xff]  ;;  %352 = vst [vmem:[%s1339_s11 + $0x38] sm:$0xff] %v351_v7 }
  0x1e   : > { %354 = vst [vmem:[%s1339_s11 + $0x40] sm:$0xff] %v353_v8  ;;  %v355_v9 = vld [vmem:[%s1334_s10 + $0x120] sm:$0xff] }
  0x1f   : > { %v357_v10 = vld [vmem:[%s1334_s10 + $0x140] sm:$0xff]  ;;  %356 = vst [vmem:[%s1339_s11 + $0x48] sm:$0xff] %v355_v9 }
  0x20   : > { %v359_v11 = vld [vmem:[%s1334_s10 + $0x160] sm:$0xff]  ;;  %358 = vst [vmem:[%s1339_s11 + $0x50] sm:$0xff] %v357_v10 }
  0x21   : > { %360 = vst [vmem:[%s1339_s11 + $0x58] sm:$0xff] %v359_v11  ;;  %v361_v12 = vld [vmem:[%s1334_s10 + $0x180] sm:$0xff] }
  0x22   : > { %v363_v13 = vld [vmem:[%s1334_s10 + $0x1a0] sm:$0xff]  ;;  %362 = vst [vmem:[%s1339_s11 + $0x60] sm:$0xff] %v361_v12 }
  0x23   : > { %v365_v14 = vld [vmem:[%s1334_s10 + $0x1c0] sm:$0xff]  ;;  %364 = vst [vmem:[%s1339_s11 + $0x68] sm:$0xff] %v363_v13 }
  0x24   : > { %366 = vst [vmem:[%s1339_s11 + $0x70] sm:$0xff] %v365_v14  ;;  %v367_v15 = vld [vmem:[%s1334_s10 + $0x1e0] sm:$0xff] }
  0x25   : > { %v369_v16 = vld [vmem:[%s1334_s10 + $0x200] sm:$0xff]  ;;  %368 = vst [vmem:[%s1339_s11 + $0x78] sm:$0xff] %v367_v15 }
  0x26   : > { %v371_v17 = vld [vmem:[%s1334_s10 + $0x220] sm:$0xff]  ;;  %370 = vst [vmem:[%s1339_s11 + $0x80] sm:$0xff] %v369_v16 }
  0x27   : > { %372 = vst [vmem:[%s1339_s11 + $0x88] sm:$0xff] %v371_v17  ;;  %v373_v18 = vld [vmem:[%s1334_s10 + $0x240] sm:$0xff] }
  0x28   : > { %v375_v19 = vld [vmem:[%s1334_s10 + $0x260] sm:$0xff]  ;;  %374 = vst [vmem:[%s1339_s11 + $0x90] sm:$0xff] %v373_v18 }
  0x29   : > { %v377_v20 = vld [vmem:[%s1334_s10 + $0x280] sm:$0xff]  ;;  %376 = vst [vmem:[%s1339_s11 + $0x98] sm:$0xff] %v375_v19 }
  0x2a   : > { %378 = vst [vmem:[%s1339_s11 + $0xa0] sm:$0xff] %v377_v20  ;;  %v379_v21 = vld [vmem:[%s1334_s10 + $0x2a0] sm:$0xff] }
  0x2b   : > { %v381_v22 = vld [vmem:[%s1334_s10 + $0x2c0] sm:$0xff]  ;;  %380 = vst [vmem:[%s1339_s11 + $0xa8] sm:$0xff] %v379_v21 }
  0x2c   : > { %v383_v23 = vld [vmem:[%s1334_s10 + $0x2e0] sm:$0xff]  ;;  %382 = vst [vmem:[%s1339_s11 + $0xb0] sm:$0xff] %v381_v22 }
  0x2d   : > { %384 = vst [vmem:[%s1339_s11 + $0xb8] sm:$0xff] %v383_v23  ;;  %v385_v24 = vld [vmem:[%s1334_s10 + $0x300] sm:$0xff] }
  0x2e   : > { %v387_v25 = vld [vmem:[%s1334_s10 + $0x320] sm:$0xff]  ;;  %386 = vst [vmem:[%s1339_s11 + $0xc0] sm:$0xff] %v385_v24 }
  0x2f   : > { %v389_v26 = vld [vmem:[%s1334_s10 + $0x340] sm:$0xff]  ;;  %388 = vst [vmem:[%s1339_s11 + $0xc8] sm:$0xff] %v387_v25 }
  0x30   : > { %390 = vst [vmem:[%s1339_s11 + $0xd0] sm:$0xff] %v389_v26  ;;  %v391_v27 = vld [vmem:[%s1334_s10 + $0x360] sm:$0xff] }
  0x31   : > { %v393_v28 = vld [vmem:[%s1334_s10 + $0x380] sm:$0xff]  ;;  %392 = vst [vmem:[%s1339_s11 + $0xd8] sm:$0xff] %v391_v27 }
  0x32   : > { %v395_v29 = vld [vmem:[%s1334_s10 + $0x3a0] sm:$0xff]  ;;  %394 = vst [vmem:[%s1339_s11 + $0xe0] sm:$0xff] %v393_v28 }
  0x33   : > { %396 = vst [vmem:[%s1339_s11 + $0xe8] sm:$0xff] %v395_v29  ;;  %v397_v30 = vld [vmem:[%s1334_s10 + $0x3c0] sm:$0xff] }
  0x34   : > { %v399_v31 = vld [vmem:[%s1334_s10 + $0x3e0] sm:$0xff]  ;;  %398 = vst [vmem:[%s1339_s11 + $0xf0] sm:$0xff] %v397_v30 }
  0x35   : > { %400 = vst [vmem:[%s1339_s11 + $0xf8] sm:$0xff] %v399_v31 }
  0x36 PF: > { %p1033_p7 = scmp.ge.s32.totalorder %s1245_s24, 1  ;;  %p413_p8 = scmp.lt.s32.totalorder %s1245_s24, 9 }
  0x38   : > { %p414_p9 = pnand %p1033_p7, %p413_p8 }
  0x39   : > { %p476_p10 = scmp.lt.s32.totalorder (!%p414_p9), %s1233_s21, 1  ;;  %s420_s16 = sand.u32 (!%p414_p9), 1, %s1221_s18  }
  0x3a   : > { %417 = sbr.rel (%p414_p9) target bundleno = 612 (0x264), region = 74  ;;  %s1034_s17 = sshll.u32 (!%p414_p9), %s420_s16, 8 }
  0x3b   : > { %s1415_s27 = scalar_lea.vmem (!%p414_p9), [#allocation2], %s1034_s17  ;;  %s1039_s10 = sshll.u32 (!%p414_p9), %s1229_s20, 1 }
  0x3c   : > { %p495_p11 = scmp.lt.s32.totalorder (!%p414_p9), %s1039_s10, 7 }
  0x3f   : > { %s1509_s21 = smov (!%p476_p10, %s1233_s21), 1  ;;  %v1137_v36 = vld [vmem:[%s1415_s27 + $0x74] ss:$8 sps:$4 sm:$0xff]   ;;  %v1139_v37 = vld [vmem:[%s1415_s27 + $0x70] ss:$8 sps:$4 sm:$0xff]   ;;  %v537_v13 = vlaneseq  ;;  %s1511_s10 = smov (!%p495_p11, %s1039_s10), 7 }
  0x40   : > { %s1079_s12 = sshll.u32 %s1509_s21, 3  ;;  %795 = vmatprep.subr.bf16.mxu0 %v1137_v36  ;;  %v1140_v38 = vld [vmem:[%s1415_s27 + $0x64] ss:$8 sps:$4 sm:$0xff]   ;;  %v1142_v39 = vld [vmem:[%s1415_s27 + $0x60] ss:$8 sps:$4 sm:$0xff]   ;;  %s1037_s18 = sshll.u32 %s1509_s21, 1 }
  0x41   : > { %s484_s15 = scalar_lea.vmem %s1490_s0, %s1079_s12  ;;  %796 = vmatpush1.bf16.msra.mxu0 %v1139_v37  ;;  %v1143_v40 = vld [vmem:[%s1415_s27 + $0x54] ss:$8 sps:$4 sm:$0xff]   ;;  %v1145_v41 = vld [vmem:[%s1415_s27 + $0x50] ss:$8 sps:$4 sm:$0xff]   ;;  %v1146_v42 = vld [vmem:[%s1415_s27 + $0x44] ss:$8 sps:$4 sm:$0xff]   ;;  %s488_s6 = scalar_lea.vmem %s1491_s1, %s1037_s18 }
  0x42   : > { %v513_v32 = vld [vmem:[%s484_s15] sm:$0xff]  ;;  %797 = vmatprep.subr.bf16.mxu0 %v1140_v38  ;;  %v1149_v44 = vld [vmem:[%s1415_s27 + $0x34] ss:$8 sps:$4 sm:$0xff]   ;;  %v1151_v45 = vld [vmem:[%s1415_s27 + $0x30] ss:$8 sps:$4 sm:$0xff]   ;;  %s492_s9 = scalar_lea.vmem %s1492_s2, %s1037_s18  ;;  %v538_v17 = vshrl.u32 %v537_v13, 7  ;;  %s497_s14 = scalar_lea.vmem %s1494_s4, %s1511_s10 }
  0x43   : > { %v514_v33 = vunpack.c.l.bf16 %v513_v32  ;;  %v515_v34 = vunpack.c.h.bf16 %v513_v32  ;;  %v1148_v43 = vld [vmem:[%s1415_s27 + $0x40] ss:$8 sps:$4 sm:$0xff]   ;;  %v1152_v46 = vld [vmem:[%s1415_s27 + $0x24] ss:$8 sps:$4 sm:$0xff]   ;;  %v1155_v48 = vld [vmem:[%s1415_s27 + $0x14] ss:$8 sps:$4 sm:$0xff]   ;;  %s509_s20 = sadd.s32 %s1079_s12, %s1511_s10 }
  0x44   : > { %v1154_v47 = vld [vmem:[%s1415_s27 + $0x20] ss:$8 sps:$4 sm:$0xff]   ;;  %v1157_v49 = vld [vmem:[%s1415_s27 + $0x10] ss:$8 sps:$4 sm:$0xff]   ;;  %v1158_v50 = vld [vmem:[%s1415_s27 + $0x4] ss:$8 sps:$4 sm:$0xff]  }
  0x45   : > { %v516_v35 = vadd.f32 %v515_v34, %v514_v33  ;;  %798 = vmatpush1.bf16.msra.mxu0 %v1142_v39  ;;  %v1160_v51 = vld [vmem:[%s1415_s27] ss:$8 sps:$4 sm:$0xff]   ;;  %v1161_v52 = vld [vmem:[%s1415_s27 + $0xf4] ss:$8 sps:$4 sm:$0xff]   ;;  %v1163_v53 = vld [vmem:[%s1415_s27 + $0xf0] ss:$8 sps:$4 sm:$0xff]  }
  0x46   : > { %799 = vmatprep.subr.bf16.mxu0 %v1143_v40  ;;  %v1164_v61 = vld [vmem:[%s1415_s27 + $0xe4] ss:$8 sps:$4 sm:$0xff]   ;;  %v1166_v62 = vld [vmem:[%s1415_s27 + $0xe0] ss:$8 sps:$4 sm:$0xff]   ;;  %v1167_v63 = vld [vmem:[%s1415_s27 + $0xd4] ss:$8 sps:$4 sm:$0xff]  }
  0x47   : > { %517 = vadd.xlane.f32.xlu0 %v516_v35  ;;  %v1169_v0 = vld [vmem:[%s1415_s27 + $0xd0] ss:$8 sps:$4 sm:$0xff]   ;;  %v1170_v1 = vld [vmem:[%s1415_s27 + $0xc4] ss:$8 sps:$4 sm:$0xff]   ;;  %v1172_v2 = vld [vmem:[%s1415_s27 + $0xc0] ss:$8 sps:$4 sm:$0xff]  }
  0x48   : > { %v1173_v3 = vld [vmem:[%s1415_s27 + $0xb4] ss:$8 sps:$4 sm:$0xff]   ;;  %v1175_v4 = vld [vmem:[%s1415_s27 + $0xb0] ss:$8 sps:$4 sm:$0xff]   ;;  %v1176_v5 = vld [vmem:[%s1415_s27 + $0xa4] ss:$8 sps:$4 sm:$0xff]  }
  0x49   : > { %800 = vmatpush1.bf16.msra.mxu0 %v1145_v41  ;;  %v1178_v6 = vld [vmem:[%s1415_s27 + $0xa0] ss:$8 sps:$4 sm:$0xff]   ;;  %v1179_v7 = vld [vmem:[%s1415_s27 + $0x94] ss:$8 sps:$4 sm:$0xff]   ;;  %v1181_v8 = vld [vmem:[%s1415_s27 + $0x90] ss:$8 sps:$4 sm:$0xff]  }
  0x4a   : > { %801 = vmatprep.subr.bf16.mxu0 %v1146_v42  ;;  %v1182_v9 = vld [vmem:[%s1415_s27 + $0x84] ss:$8 sps:$4 sm:$0xff]   ;;  %v1184_v10 = vld [vmem:[%s1415_s27 + $0x80] ss:$8 sps:$4 sm:$0xff]   ;;  %v539_v20 = vsub.s32 0, %v538_v17  ;;  %v543_v21 = vsub.s32 2, %v538_v17 }
  0x4b   : > { %v533_v14 = vld [vmem:[%s488_s6] sm:$0x3]  ;;  %s1042_s15 = sshll.u32 %s509_s20, 2 }
  0x4c   : > { %v534_v16 = vunpack.c.l.bf16 %v533_v14  ;;  %v557_v18 = vld [vmem:[%s492_s9] sm:$0x3]  ;;  %s511_s27 = scalar_lea.vmem %s1495_s5, %s1042_s15 }
  0x4d   : > { %802 = vmatpush1.bf16.msra.mxu0 %v1148_v43  ;;  %v558_v22 = vunpack.c.l.bf16 %v557_v18  ;;  %v614_v40 = vld [vmem:[%s497_s14] sm:$0x3] }
  0x4e   : > { %803 = vmatprep.subr.bf16.mxu0 %v1149_v44  ;;  %v535_v19 = vadd.f32 1.0, %v534_v16  ;;  %v615_v41 = vunpack.c.l.bf16 %v614_v40 }
  0x4f   : > { %v567_v25 = vrot.slane %v558_v22, %v543_v21  ;;  %v563_v26 = vrot.slane %v558_v22, %v539_v20 }
  0x50   : > { %v544_v23 = vrot.slane %v535_v19, %v543_v21  ;;  %v540_v24 = vrot.slane %v535_v19, %v539_v20  ;;  %v620_v42 = vrot.slane %v615_v41, %v539_v20  ;;  %v624_v43 = vrot.slane %v615_v41, %v543_v21 }
  0x51   : > { %804 = vmatpush1.bf16.msra.mxu0 %v1151_v45  ;;  %v577_v31 = vrot.slane %v567_v25, %v539_v20 }
  0x52   : > { %805 = vmatprep.subr.bf16.mxu0 %v1152_v46  ;;  %v554_v27 = vrot.slane %v544_v23, %v539_v20  ;;  %v550_v28 = vrot.slane %v540_v24, %v539_v20  ;;  %v630_v44 = vrot.slane %v620_v42, %v539_v20  ;;  %v634_v45 = vrot.slane %v624_v43, %v539_v20 }
  0x55   : > { %806 = vmatpush1.bf16.msra.mxu0 %v1154_v47 }
  0x56   : > { %807 = vmatprep.subr.bf16.mxu0 %v1155_v48 }
  0x59   : > { %808 = vmatpush1.bf16.msra.mxu0 %v1157_v49 }
  0x5a   : > { %809 = vmatprep.subr.bf16.mxu0 %v1158_v50 }
  0x5d   : > { %810 = vmatpush1.bf16.msra.mxu0 %v1160_v51 }
  0x5e   : > { %811 = vmatprep.subr.bf16.mxu0 %v1161_v52 }
  0x61   : > { %812 = vmatpush2.bf16.msra.mxu0 %v1163_v53 }
  0x62   : > { %813 = vmatprep.subr.bf16.mxu0 %v1164_v61 }
  0x65   : > { %814 = vmatpush2.bf16.msra.mxu0 %v1166_v62 }
  0x66   : > { %815 = vmatprep.subr.bf16.mxu0 %v1167_v63 }
  0x69   : > { %816 = vmatpush2.bf16.msra.mxu0 %v1169_v0 }
  0x6a   : > { %817 = vmatprep.subr.bf16.mxu0 %v1170_v1 }
  0x6d   : > { %818 = vmatpush2.bf16.msra.mxu0 %v1172_v2 }
  0x6e   : > { %819 = vmatprep.subr.bf16.mxu0 %v1173_v3 }
  0x71   : > { %820 = vmatpush2.bf16.msra.mxu0 %v1175_v4 }
  0x72   : > { %821 = vmatprep.subr.bf16.mxu0 %v1176_v5 }
  0x75   : > { %822 = vmatpush2.bf16.msra.mxu0 %v1178_v6 }
  0x76   : > { %823 = vmatprep.subr.bf16.mxu0 %v1179_v7 }
  0x79   : > { %824 = vmatpush2.bf16.msra.mxu0 %v1181_v8 }
  0x7a   : > { %825 = vmatprep.subr.bf16.mxu0 %v1182_v9 }
  0x7d   : > { %826 = vmatpush2.bf16.msra.mxu0 %v1184_v10 }
  0xd0   : > { %v518_v54 = vpop.xlane.xlu0 %517 }
  0xd1   : > { %v520_v55 = vmul.f32 0.00390625, %v518_v54 }
  0xd3   : > { %v521_v56 = vsub.f32 %v514_v33, %v520_v55  ;;  %v522_v57 = vsub.f32 %v515_v34, %v520_v55  ;;  %v573_v33 = vrot.slane %v563_v26, %v539_v20 }
  0xd5   : > { %v523_v58 = vmul.f32 %v521_v56, %v521_v56  ;;  %v524_v59 = vmul.f32 %v522_v57, %v522_v57 }
  0xd7   : > { %v525_v60 = vadd.f32 %v524_v59, %v523_v58 }
  0xd9   : > { %526 = vadd.xlane.f32.xlu0 %v525_v60 }
 0x162   : > { %v527_v11 = vpop.xlane.xlu0 %526 }
 0x163   : > { %v528_v12 = vmul.f32 0.00390625, %v527_v11 }
 0x165   : > { %v529_v15 = vadd.f32 1e-06, %v528_v12 }
 0x167   : > { %1185 = vrsqrt.f32 %v529_v15 }
 0x174   : > { %v1186_v29 = vpop.eup %1185 }
 0x175   : > { %v532_v30 = vmul.f32 %v1186_v29, %v522_v57  ;;  %v531_v32 = vmul.f32 %v1186_v29, %v521_v56 }
 0x177   : > { %v556_v34 = vmul.f32 %v554_v27, %v532_v30  ;;  %v555_v35 = vmul.f32 %v550_v28, %v531_v32 }
 0x179   : > { %v579_v36 = vadd.f32 %v577_v31, %v556_v34  ;;  %v578_v37 = vadd.f32 %v573_v33, %v555_v35 }
 0x17b   : > { %v581_v38 = vpack.c.bf16 %v579_v36, %v579_v36  ;;  %v580_v39 = vpack.c.bf16 %v578_v37, %v578_v37 }
 0x17d   : > { %827 = vmatprep.mubr.bf16.mxu0 %v581_v38 }
 0x17e   : > { %828 = vmatmul.mubr.bf16.vlgmr.msra.gmra.mxu0 %v580_v39 }
 0x23e   : > { %v829_v46 = vpop.f32.mrf.mxu0 }
 0x23f   : > { %v830_v47 = vadd.f32 %v829_v46, %v630_v44 }
 0x240   : > { %v831_v48 = vpop.f32.mrf.mxu0 }
 0x241   : > { %v836_v49 = vmul.f32 %v830_v47, %v830_v47  ;;  %v832_v50 = vadd.f32 %v831_v48, %v634_v45 }
 0x242   : > { %v833_v51 = vpop.f32.mrf.mxu0 }
 0x243   : > { %v838_v52 = vmul.f32 %v836_v49, %v830_v47  ;;  %v837_v53 = vmul.f32 %v832_v50, %v832_v50 }
 0x244   : > { %v834_v54 = vpop.f32.mrf.mxu0 }
 0x245   : > { %v840_v55 = vmul.f32 0.044715, %v838_v52  ;;  %v839_v56 = vmul.f32 %v837_v53, %v832_v50 }
 0x247   : > { %v842_v57 = vadd.f32 %v840_v55, %v830_v47  ;;  %v841_v58 = vmul.f32 0.044715, %v839_v56 }
 0x249   : > { %v844_v59 = vmul.f32 0.7978846, %v842_v57  ;;  %v843_v60 = vadd.f32 %v841_v58, %v832_v50 }
 0x24b   : > { %1187 = vtanh.f32 %v844_v59  ;;  %v845_v61 = vmul.f32 0.7978846, %v843_v60 }
 0x24d   : > { %1189 = vtanh.f32 %v845_v61 }
 0x258   : > { %v1188_v62 = vpop.eup %1187 }
 0x259   : > { %v848_v63 = vadd.f32 1.0, %v1188_v62 }
 0x25a   : > { %v1190_v0 = vpop.eup %1189 }
 0x25b   : > { %v850_v1 = vmul.f32 0.5, %v848_v63  ;;  %v849_v2 = vadd.f32 1.0, %v1190_v0 }
 0x25d   : > { %v851_v3 = vmul.f32 0.5, %v849_v2  ;;  %v852_v4 = vmul.f32 %v850_v1, %v830_v47 }
 0x25f   : > { %v853_v5 = vmul.f32 %v851_v3, %v832_v50 }
 0x261   : > { %v1080_v6 = vpack.c.bf16 %v853_v5, %v852_v4 }
 0x263   : > { %862 = vst [vmem:[%s511_s27] sm:$0xff] %v1080_v6 }
 0x264 PF: > { %s15_s24 = sadd.s32 1, %s1245_s24   ;;  %s1496_s18 = smov %s1225_s19 }
 0x265   : > { %p12_p12 = scmp.ge.s32.totalorder %s15_s24, 10   ;;  %s1497_s19 = smov %s1326_s29 }
 0x266   : > { %s1498_s20 = smov %s1237_s22  ;;  %s1499_s21 = smov %s1241_s23 }
 0x267   : > { %s1500_s22 = smov %s1503_s25  ;;  %s1501_s23 = smov %s1507_s26 }
 0x268   :  { %14 = sbr.rel (!%p12_p12) target bundleno = 4 (0x4), region = 125 }

// kernel: _dual_block_forward.25
= control target key start
LH: loop header
LB: loop body
LE: loop exit
PB: predicated region body
PF: predicated region fallthrough
CT: control target
= control target key end

     0   :  { %10 = vsyncpa [#allocation4], 0  ;;  %s1784_s0 = inlined_call_operand.vmem [shape: bf16[2,8,1024], index: 0, kind: input, shape index: {}]   ;;  %s1785_s1 = inlined_call_operand.vmem [shape: bf16[1024,256], index: 1, kind: input, shape index: {}]   ;;  %s1786_s2 = inlined_call_operand.vmem [shape: bf16[1,256], index: 2, kind: input, shape index: {}]   ;;  %s1787_s3 = inlined_call_operand.vmem [shape: bf16[2,1,256], index: 3, kind: input, shape index: {}]   ;;  %s1788_s4 = inlined_call_operand.vmem [shape: bf16[2,8,256], index: 4, kind: input, shape index: {}]   ;;  %s1789_s5 = inlined_call_operand.hbm [shape: bf16[2,8,256], index: 5, kind: output, shape index: {}]  }
   0x1   :  { %12 = vsyncpa [#allocation4 + $0x1], 0  ;;  %s1562_s18 = smov 0   ;;  %s1564_s19 = smov 0  }
   0x2   :  { %s1566_s20 = smov 0   ;;  %s1568_s21 = smov 0  }
   0x3   :  { %s1570_s22 = smov 0   ;;  %s1572_s23 = smov 0  }
   0x4   :  { %s1574_s24 = smov 0   ;;  %s1576_s25 = smov 0  }
   0x5 LB: > { %1795 = sst [smem:[#allocation6_spill]] %s1508_s20  ;;  %s1168_s26 = sadd.s32 4294967295, %s1528_s25   ;;  %s1528_s25 = sphi %s1576_s25, %s18_s25   ;;  %s1524_s24 = sphi %s1574_s24, %s1809_s24   ;;  %s1520_s23 = sphi %s1572_s23, %s1812_s23   ;;  %s1516_s22 = sphi %s1570_s22, %s1807_s22   ;;  %s1512_s21 = sphi %s1568_s21, %s1806_s21   ;;  %s1508_s20 = sphi %s1566_s20, %s1805_s20   ;;  %s1504_s19 = sphi %s1564_s19, %s1811_s19   ;;  %s1500_s18 = sphi %s1562_s18, %s1810_s18  }
   0x6   : > { %1796 = sst [smem:[#allocation7_spill]] %s1520_s23  ;;  %s1169_s27 = sadd.s32 4294967294, %s1528_s25  }
   0x7   : > { %1797 = sst [smem:[#allocation8_spill]] %s1524_s24  ;;  %s33_s28 = sadd.s32 1, %s1520_s23 }
   0x8   : > { %p34_p0 = scmp.ge.s32.totalorder %s33_s28, 2  ;;  %s44_s29 = sadd.s32 1, %s1524_s24 }
   0x9   : > { %p207_p1 = scmp.ne.s32.totalorder %s1508_s20, %s1504_s19  ;;  %p208_p2 = scmp.eq.s32.totalorder %s1168_s26, 3 }
   0xa   : > { %s1814_s28 = smov (%p34_p0, %s33_s28), 0  ;;  %s1816_s29 = smov (!%p34_p0, %s44_s29), %s1524_s24 }
   0xb   : > { %1798 = sst [smem:[#allocation9_spill]] %s1814_s28  ;;  %p1611_p3 = por %p208_p2, %p207_p1 }
   0xc   : > { %p213_p4 = scmp.ne.s32.totalorder %s1504_s19, %s1500_s18  ;;  %p46_p5 = scmp.ge.s32.totalorder %s1816_s29, 2 }
   0xd   : > { %p214_p6 = scmp.eq.s32.totalorder %s1169_s27, 3  ;;  %p1173_p7 = scmp.ge.s32.totalorder %s1528_s25, 1 }
   0xe   : > { %p301_p8 = scmp.lt.s32.totalorder %s1528_s25, 5  ;;  %s1818_s29 = smov (%p46_p5, %s1816_s29), 0 }
   0xf   : > { %1800 = sst [smem:[#allocation10_spill]] %s1818_s29  ;;  %p1621_p9 = por %p214_p6, %p213_p4 }
  0x10   : > { %p302_p10 = pnand %p1173_p7, %p301_p8  ;;  %s190_s7 = ssub.s32 %s1524_s24, %s1818_s29 }
  0x11   : > { %s197_s8 = sadd.s32 1, %s1508_s20  ;;  %p195_p11 = scmp.eq.s32.totalorder %s190_s7, 0 }
  0x12   : > { %305 = sbr.rel (%p302_p10) target bundleno = 348 (0x15c), region = 40  ;;  %s1791_s10 = sand.u32 (!%p302_p10), 1, %s1504_s19  }
  0x13   : > { %s1629_s9 = scalar_select %p195_p11, %s1508_s20, %s197_s8  }
  0x14   : > { %s1175_s11 = sshll.u32 (!%p302_p10), %s1512_s21, 2  ;;  %s1635_s12 = sshll.u32 (!%p302_p10), %s1791_s10, 3 }
  0x15   : > { %1802 = sst [smem:[#allocation11_spill]] %s1629_s9  ;;  %p373_p12 = scmp.lt.s32.totalorder (!%p302_p10), %s1516_s22, 1 }
  0x16   : > { %p377_p13 = scmp.lt.s32.totalorder (!%p302_p10), %s1175_s11, 7  ;;  %s1178_s15 = sshll.u32 (!%p302_p10), %s1512_s21, 6 }
  0x17   : > { %s374_s13 = scalar_select %p373_p12, %s1516_s22, 1 }
  0x18   : > { %s1820_s11 = smov (!%p377_p13, %s1175_s11), 7  ;;  %p388_p0 = scmp.lt.s32.totalorder %s1178_s15, 127 }
  0x19   : > { %s1176_s14 = sshll.u32 %s374_s13, 3  ;;  %s1181_s26 = sshll.u32 %s374_s13, 1 }
  0x1a   : > { %s382_s16 = sadd.s32 %s1176_s14, %s1820_s11  ;;  %s1648_s10 = scalar_lea.vmem %s1787_s3, %s1181_s26 }
  0x1b   : > { %s1177_s17 = sshll.u32 %s382_s16, 2  ;;  %s1822_s15 = smov (!%p388_p0, %s1178_s15), 127 }
  0x1c   : > { %s1643_s8 = scalar_lea.vmem %s1784_s0, %s1177_s17  ;;  %s1653_s9 = scalar_lea.vmem %s1788_s4, %s1176_s14 }
  0x1d   : > { %s1260_s11 = sshll.u32 %s1822_s15, 3  ;;  %s371_s27 = scalar_lea.vmem [#allocation3], %s1635_s12 }
  0x1e   : > { %s1658_s13 = scalar_lea.vmem %s1785_s1, %s1260_s11  ;;  %p1184_p1 = scmp.ne.s32.totalorder %s1512_s21, 0 }
  0x20   : > { %430 = sbr.rel (%p1184_p1) target bundleno = 39 (0x27), region = 44 }
  0x25   : > { %v1530_v0 = vmov 0.0  }
  0x26   : > { %431 = vst [vmem:[#allocation2] sm:$0xff] %v1530_v0  ;;  %432 = vst [vmem:[#allocation2 + $0x8] sm:$0xff] %v1530_v0 }
  0x27 PF: > { %v1336_v1 = vld [vmem:[%s1658_s13 + $0x74] ss:$8 sps:$4 sm:$0xff]   ;;  %v1340_v3 = vld [vmem:[%s1658_s13 + $0x70] ss:$8 sps:$4 sm:$0xff]   ;;  %v1342_v5 = vld [vmem:[%s1658_s13 + $0x64] ss:$8 sps:$4 sm:$0xff]  }
  0x28   : > { %v1338_v2 = vld [vmem:[%s1658_s13 + $0x174] ss:$8 sps:$4 sm:$0xff]   ;;  %835 = vmatprep.subr.bf16.mxu0 %v1336_v1  ;;  %v1341_v4 = vld [vmem:[%s1658_s13 + $0x170] ss:$8 sps:$4 sm:$0xff]   ;;  %v1344_v6 = vld [vmem:[%s1658_s13 + $0x164] ss:$8 sps:$4 sm:$0xff]  }
  0x29   : > { %876 = vmatprep.subr.bf16.mxu1 %v1338_v2  ;;  %836 = vmatpush1.bf16.msra.mxu0 %v1340_v3  ;;  %v1346_v7 = vld [vmem:[%s1658_s13 + $0x60] ss:$8 sps:$4 sm:$0xff]   ;;  %v1348_v9 = vld [vmem:[%s1658_s13 + $0x54] ss:$8 sps:$4 sm:$0xff]   ;;  %v1352_v11 = vld [vmem:[%s1658_s13 + $0x50] ss:$8 sps:$4 sm:$0xff]  }
  0x2a   : > { %877 = vmatpush1.bf16.msra.mxu1 %v1341_v4  ;;  %837 = vmatprep.subr.bf16.mxu0 %v1342_v5  ;;  %v1347_v8 = vld [vmem:[%s1658_s13 + $0x160] ss:$8 sps:$4 sm:$0xff]   ;;  %v1350_v10 = vld [vmem:[%s1658_s13 + $0x154] ss:$8 sps:$4 sm:$0xff]   ;;  %v1353_v12 = vld [vmem:[%s1658_s13 + $0x150] ss:$8 sps:$4 sm:$0xff]  }
  0x2b   : > { %878 = vmatprep.subr.bf16.mxu1 %v1344_v6  ;;  %v1354_v13 = vld [vmem:[%s1658_s13 + $0x44] ss:$8 sps:$4 sm:$0xff]   ;;  %v1358_v15 = vld [vmem:[%s1658_s13 + $0x40] ss:$8 sps:$4 sm:$0xff]   ;;  %v1360_v17 = vld [vmem:[%s1658_s13 + $0x34] ss:$8 sps:$4 sm:$0xff]  }
  0x2c   : > { %v1356_v14 = vld [vmem:[%s1658_s13 + $0x144] ss:$8 sps:$4 sm:$0xff]   ;;  %v1359_v16 = vld [vmem:[%s1658_s13 + $0x140] ss:$8 sps:$4 sm:$0xff]   ;;  %v1362_v18 = vld [vmem:[%s1658_s13 + $0x134] ss:$8 sps:$4 sm:$0xff]  }
  0x2d   : > { %838 = vmatpush1.bf16.msra.mxu0 %v1346_v7  ;;  %v1364_v19 = vld [vmem:[%s1658_s13 + $0x30] ss:$8 sps:$4 sm:$0xff]   ;;  %v1366_v21 = vld [vmem:[%s1658_s13 + $0x24] ss:$8 sps:$4 sm:$0xff]   ;;  %v1370_v23 = vld [vmem:[%s1658_s13 + $0x20] ss:$8 sps:$4 sm:$0xff]  }
  0x2e   : > { %879 = vmatpush1.bf16.msra.mxu1 %v1347_v8  ;;  %839 = vmatprep.subr.bf16.mxu0 %v1348_v9  ;;  %v1365_v20 = vld [vmem:[%s1658_s13 + $0x130] ss:$8 sps:$4 sm:$0xff]   ;;  %v1368_v22 = vld [vmem:[%s1658_s13 + $0x124] ss:$8 sps:$4 sm:$0xff]   ;;  %v1371_v24 = vld [vmem:[%s1658_s13 + $0x120] ss:$8 sps:$4 sm:$0xff]  }
  0x2f   : > { %880 = vmatprep.subr.bf16.mxu1 %v1350_v10  ;;  %v1372_v25 = vld [vmem:[%s1658_s13 + $0x14] ss:$8 sps:$4 sm:$0xff]   ;;  %v1376_v27 = vld [vmem:[%s1658_s13 + $0x10] ss:$8 sps:$4 sm:$0xff]   ;;  %v1378_v29 = vld [vmem:[%s1658_s13 + $0x4] ss:$8 sps:$4 sm:$0xff]  }
  0x30   : > { %v1374_v26 = vld [vmem:[%s1658_s13 + $0x114] ss:$8 sps:$4 sm:$0xff]   ;;  %v1377_v28 = vld [vmem:[%s1658_s13 + $0x110] ss:$8 sps:$4 sm:$0xff]   ;;  %v1380_v30 = vld [vmem:[%s1658_s13 + $0x104] ss:$8 sps:$4 sm:$0xff]  }
  0x31   : > { %840 = vmatpush1.bf16.msra.mxu0 %v1352_v11  ;;  %v1382_v31 = vld [vmem:[%s1658_s13] ss:$8 sps:$4 sm:$0xff]   ;;  %v1384_v33 = vld [vmem:[%s1658_s13 + $0xf4] ss:$8 sps:$4 sm:$0xff]   ;;  %v1388_v35 = vld [vmem:[%s1658_s13 + $0xf0] ss:$8 sps:$4 sm:$0xff]  }
  0x32   : > { %881 = vmatpush1.bf16.msra.mxu1 %v1353_v12  ;;  %841 = vmatprep.subr.bf16.mxu0 %v1354_v13  ;;  %v1383_v32 = vld [vmem:[%s1658_s13 + $0x100] ss:$8 sps:$4 sm:$0xff]   ;;  %v1386_v34 = vld [vmem:[%s1658_s13 + $0x1f4] ss:$8 sps:$4 sm:$0xff]   ;;  %v1389_v36 = vld [vmem:[%s1658_s13 + $0x1f0] ss:$8 sps:$4 sm:$0xff]  }
  0x33   : > { %882 = vmatprep.subr.bf16.mxu1 %v1356_v14  ;;  %v1390_v37 = vld [vmem:[%s1658_s13 + $0xe4] ss:$8 sps:$4 sm:$0xff]   ;;  %v1394_v39 = vld [vmem:[%s1658_s13 + $0xe0] ss:$8 sps:$4 sm:$0xff]   ;;  %v1396_v41 = vld [vmem:[%s1658_s13 + $0xd4] ss:$8 sps:$4 sm:$0xff]  }
  0x34   : > { %v1392_v38 = vld [vmem:[%s1658_s13 + $0x1e4] ss:$8 sps:$4 sm:$0xff]   ;;  %v1395_v40 = vld [vmem:[%s1658_s13 + $0x1e0] ss:$8 sps:$4 sm:$0xff]   ;;  %v1398_v42 = vld [vmem:[%s1658_s13 + $0x1d4] ss:$8 sps:$4 sm:$0xff]  }
  0x35   : > { %842 = vmatpush1.bf16.msra.mxu0 %v1358_v15  ;;  %v1400_v43 = vld [vmem:[%s1658_s13 + $0xd0] ss:$8 sps:$4 sm:$0xff]   ;;  %v1402_v45 = vld [vmem:[%s1658_s13 + $0xc4] ss:$8 sps:$4 sm:$0xff]   ;;  %v1406_v50 = vld [vmem:[%s1658_s13 + $0xc0] ss:$8 sps:$4 sm:$0xff]  }
  0x36   : > { %883 = vmatpush1.bf16.msra.mxu1 %v1359_v16  ;;  %843 = vmatprep.subr.bf16.mxu0 %v1360_v17  ;;  %v1401_v44 = vld [vmem:[%s1658_s13 + $0x1d0] ss:$8 sps:$4 sm:$0xff]   ;;  %v1404_v46 = vld [vmem:[%s1658_s13 + $0x1c4] ss:$8 sps:$4 sm:$0xff]   ;;  %v1407_v51 = vld [vmem:[%s1658_s13 + $0x1c0] ss:$8 sps:$4 sm:$0xff]  }
  0x37   : > { %884 = vmatprep.subr.bf16.mxu1 %v1362_v18  ;;  %v435_v47 = vld [vmem:[%s1643_s8] sm:$0xff]  ;;  %v436_v49 = vld [vmem:[%s1643_s8 + $0x8] sm:$0xff]  ;;  %v1408_v53 = vld [vmem:[%s1658_s13 + $0xb4] ss:$8 sps:$4 sm:$0xff]   ;;  %p1253_p2 = scmp.ne.s32.totalorder %s1512_s21, 1 }
  0x38   : > { %v1186_v48 = vcombine.high %v435_v47, %v435_v47  ;;  %v1188_v52 = vcombine.high %v436_v49, %v436_v49  ;;  %v1410_v54 = vld [vmem:[%s1658_s13 + $0x1b4] ss:$8 sps:$4 sm:$0xff]   ;;  %v1412_v55 = vld [vmem:[%s1658_s13 + $0xb0] ss:$8 sps:$4 sm:$0xff]   ;;  %v1414_v57 = vld [vmem:[%s1658_s13 + $0xa4] ss:$8 sps:$4 sm:$0xff]   ;;  %v1185_v5 = vcombine.low %v435_v47, %v435_v47  ;;  %v1187_v6 = vcombine.low %v436_v49, %v436_v49 }
  0x39   : > { %844 = vmatpush1.bf16.msra.mxu0 %v1364_v19  ;;  %v1413_v56 = vld [vmem:[%s1658_s13 + $0x1b0] ss:$8 sps:$4 sm:$0xff]   ;;  %v1416_v58 = vld [vmem:[%s1658_s13 + $0x1a4] ss:$8 sps:$4 sm:$0xff]   ;;  %v1418_v59 = vld [vmem:[%s1658_s13 + $0xa0] ss:$8 sps:$4 sm:$0xff]  }
  0x3a   : > { %885 = vmatpush1.bf16.msra.mxu1 %v1365_v20  ;;  %845 = vmatprep.subr.bf16.mxu0 %v1366_v21  ;;  %v1419_v60 = vld [vmem:[%s1658_s13 + $0x1a0] ss:$8 sps:$4 sm:$0xff]   ;;  %v1420_v61 = vld [vmem:[%s1658_s13 + $0x94] ss:$8 sps:$4 sm:$0xff]   ;;  %v1424_v63 = vld [vmem:[%s1658_s13 + $0x90] ss:$8 sps:$4 sm:$0xff]  }
  0x3b   : > { %886 = vmatprep.subr.bf16.mxu1 %v1368_v22  ;;  %867 = vmatprep.mubr.bf16.mxu0 %v1186_v48  ;;  %v1422_v62 = vld [vmem:[%s1658_s13 + $0x194] ss:$8 sps:$4 sm:$0xff]   ;;  %v1425_v0 = vld [vmem:[%s1658_s13 + $0x190] ss:$8 sps:$4 sm:$0xff]   ;;  %v1426_v1 = vld [vmem:[%s1658_s13 + $0x84] ss:$8 sps:$4 sm:$0xff]  }
  0x3c   : > { %908 = vmatprep.mubr.bf16.mxu1 %v1188_v52  ;;  %v1428_v2 = vld [vmem:[%s1658_s13 + $0x184] ss:$8 sps:$4 sm:$0xff]   ;;  %v1430_v3 = vld [vmem:[%s1658_s13 + $0x80] ss:$8 sps:$4 sm:$0xff]  }
  0x3d   : > { %846 = vmatpush1.bf16.msra.mxu0 %v1370_v23  ;;  %v1431_v4 = vld [vmem:[%s1658_s13 + $0x180] ss:$8 sps:$4 sm:$0xff]  }
  0x3e   : > { %887 = vmatpush1.bf16.msra.mxu1 %v1371_v24  ;;  %847 = vmatprep.subr.bf16.mxu0 %v1372_v25  ;;  %v433_v8 = vld [vmem:[#allocation2] sm:$0xff]  ;;  %v434_v12 = vld [vmem:[#allocation2 + $0x8] sm:$0xff] }
  0x3f   : > { %888 = vmatprep.subr.bf16.mxu1 %v1374_v26 }
  0x41   : > { %848 = vmatpush1.bf16.msra.mxu0 %v1376_v27 }
  0x42   : > { %889 = vmatpush1.bf16.msra.mxu1 %v1377_v28  ;;  %849 = vmatprep.subr.bf16.mxu0 %v1378_v29 }
  0x43   : > { %890 = vmatprep.subr.bf16.mxu1 %v1380_v30 }
  0x45   : > { %850 = vmatpush1.bf16.msra.mxu0 %v1382_v31 }
  0x46   : > { %891 = vmatpush1.bf16.msra.mxu1 %v1383_v32  ;;  %851 = vmatprep.subr.bf16.mxu0 %v1384_v33 }
  0x47   : > { %892 = vmatprep.subr.bf16.mxu1 %v1386_v34 }
  0x49   : > { %852 = vmatpush2.bf16.msra.mxu0 %v1388_v35 }
  0x4a   : > { %893 = vmatpush2.bf16.msra.mxu1 %v1389_v36  ;;  %853 = vmatprep.subr.bf16.mxu0 %v1390_v37 }
  0x4b   : > { %894 = vmatprep.subr.bf16.mxu1 %v1392_v38 }
  0x4d   : > { %854 = vmatpush2.bf16.msra.mxu0 %v1394_v39 }
  0x4e   : > { %895 = vmatpush2.bf16.msra.mxu1 %v1395_v40  ;;  %855 = vmatprep.subr.bf16.mxu0 %v1396_v41 }
  0x4f   : > { %896 = vmatprep.subr.bf16.mxu1 %v1398_v42 }
  0x51   : > { %856 = vmatpush2.bf16.msra.mxu0 %v1400_v43 }
  0x52   : > { %897 = vmatpush2.bf16.msra.mxu1 %v1401_v44  ;;  %857 = vmatprep.subr.bf16.mxu0 %v1402_v45 }
  0x53   : > { %898 = vmatprep.subr.bf16.mxu1 %v1404_v46 }
  0x55   : > { %858 = vmatpush2.bf16.msra.mxu0 %v1406_v50 }
  0x56   : > { %899 = vmatpush2.bf16.msra.mxu1 %v1407_v51  ;;  %859 = vmatprep.subr.bf16.mxu0 %v1408_v53 }
  0x57   : > { %900 = vmatprep.subr.bf16.mxu1 %v1410_v54 }
  0x59   : > { %860 = vmatpush2.bf16.msra.mxu0 %v1412_v55 }
  0x5a   : > { %901 = vmatpush2.bf16.msra.mxu1 %v1413_v56  ;;  %861 = vmatprep.subr.bf16.mxu0 %v1414_v57 }
  0x5b   : > { %902 = vmatprep.subr.bf16.mxu1 %v1416_v58 }
  0x5d   : > { %862 = vmatpush2.bf16.msra.mxu0 %v1418_v59 }
  0x5e   : > { %903 = vmatpush2.bf16.msra.mxu1 %v1419_v60  ;;  %863 = vmatprep.subr.bf16.mxu0 %v1420_v61 }
  0x5f   : > { %904 = vmatprep.subr.bf16.mxu1 %v1422_v62 }
  0x61   : > { %864 = vmatpush2.bf16.msra.mxu0 %v1424_v63 }
  0x62   : > { %905 = vmatpush2.bf16.msra.mxu1 %v1425_v0  ;;  %865 = vmatprep.subr.bf16.mxu0 %v1426_v1 }
  0x63   : > { %906 = vmatprep.subr.bf16.mxu1 %v1428_v2 }
  0x65   : > { %866 = vmatpush2.bf16.msra.mxu0 %v1430_v3 }
  0x66   : > { %907 = vmatpush2.bf16.msra.mxu1 %v1431_v4 }
  0x68   : > { %868 = vmatmul.mubr.bf16.vlgmr.msra.gmra.mxu0 %v1185_v5 }
  0x69   : > { %909 = vmatmul.mubr.bf16.vlgmr.msra.gmra.mxu1 %v1187_v6 }
 0x128   : > { %v869_v7 = vpop.f32.mrf.mxu0 }
 0x129   : > { %v910_v9 = vpop.f32.mrf.mxu1 }
 0x12a   : > { %v911_v10 = vadd.f32 %v910_v9, %v869_v7  ;;  %v871_v11 = vpop.f32.mrf.mxu0 }
 0x12b   : > { %v912_v13 = vpop.f32.mrf.mxu1 }
 0x12c   : > { %v917_v14 = vadd.f32 %v911_v10, %v433_v8  ;;  %v913_v15 = vadd.f32 %v912_v13, %v871_v11  ;;  %v873_v16 = vpop.f32.mrf.mxu0  ;;  %924 = sbr.rel (%p1253_p2) target bundleno = 324 (0x144), region = 48 }
 0x12d   : > { %v914_v17 = vpop.f32.mrf.mxu1 }
 0x12e   : > { %919 = vst [vmem:[#allocation2] sm:$0xff] %v917_v14  ;;  %v918_v18 = vadd.f32 %v913_v15, %v434_v12  ;;  %v874_v19 = vpop.f32.mrf.mxu0 }
 0x12f   : > { %v915_v20 = vpop.f32.mrf.mxu1 }
 0x130   : > { %920 = vst [vmem:[#allocation2 + $0x8] sm:$0xff] %v918_v18 }
 0x131   : > { %v927_v21 = vld [vmem:[%s1786_s2] sm:$0x3]  ;;  %v930_v22 = vlaneseq }
 0x132   : > { %v953_v23 = vld [vmem:[%s1648_s10] sm:$0x3]  ;;  %v928_v24 = vunpack.c.l.bf16 %v927_v21 }
 0x133   : > { %v931_v25 = vshrl.u32 %v930_v22, 7  ;;  %v954_v26 = vunpack.c.l.bf16 %v953_v23  ;;  %v950_v35 = vld [vmem:[%s1653_s9] sm:$0xff] }
 0x134   : > { %v951_v42 = vunpack.c.l.bf16 %v950_v35  ;;  %v952_v43 = vunpack.c.h.bf16 %v950_v35 }
 0x135   : > { %v932_v27 = vsub.s32 0, %v931_v25  ;;  %v936_v28 = vsub.s32 2, %v931_v25  ;;  %v925_v33 = vld [vmem:[#allocation2] sm:$0xff] }
 0x137   : > { %v933_v29 = vrot.slane %v928_v24, %v932_v27  ;;  %v937_v30 = vrot.slane %v928_v24, %v936_v28  ;;  %v959_v31 = vrot.slane %v954_v26, %v932_v27  ;;  %v963_v32 = vrot.slane %v954_v26, %v936_v28  ;;  %v926_v34 = vld [vmem:[#allocation2 + $0x8] sm:$0xff] }
 0x139   : > { %v943_v36 = vrot.slane %v933_v29, %v932_v27  ;;  %v947_v37 = vrot.slane %v937_v30, %v932_v27  ;;  %v969_v38 = vrot.slane %v959_v31, %v932_v27  ;;  %v973_v39 = vrot.slane %v963_v32, %v932_v27 }
 0x13b   : > { %v948_v40 = vadd.f32 %v943_v36, %v925_v33  ;;  %v949_v41 = vadd.f32 %v947_v37, %v926_v34 }
 0x13d   : > { %v974_v44 = vmul.f32 %v969_v38, %v948_v40  ;;  %v975_v45 = vmul.f32 %v973_v39, %v949_v41 }
 0x13f   : > { %v976_v46 = vadd.f32 %v974_v44, %v951_v42  ;;  %v977_v47 = vadd.f32 %v975_v45, %v952_v43 }
 0x141   : > { %v1262_v48 = vpack.c.bf16 %v977_v47, %v976_v46 }
 0x143   : > { %986 = vst [vmem:[%s371_s27] sm:$0xff] %v1262_v48 }
 0x144 PF: > { %s1263_s21 = sshll.u32 %s1516_s22, 7  ;;  %s1006_s9 = sshll.u32 %s371_s27, 4  ;;  %s1007_s9 = int_to_ptr.vmem [resolvable:$true] %s1006_s9 }
 0x145   : > { %s1004_s29 = scalar_lea.hbm %s1789_s5, %s1263_s21  ;;  %s1803_s10 = sand.u32 1, %s1504_s19  }
 0x146   : > { %s988_s14 = scalar_lea.sflag [#allocation4], %s1803_s10  ;;  %s1436_s15 = scalar_lea.vmem %s1007_s9, 128 }
 0x147   : > { %p1437_p4 = scmp.ne.s32.totalorder %s1007_s9, %s1436_s15  ;;  %s1531_s17 = smov [#allocation3]  }
 0x148   : > { %s1440_s26 = sshll.u32 %s1531_s17, 4  ;;  %s1441_s26 = int_to_ptr.vmem [resolvable:$false] %s1440_s26 }
 0x149   : > { %p1438_p5 = pnand %p1437_p4, %p1611_p3  ;;  %s1442_s7 = scalar_lea.vmem %s1441_s26, 256 }
 0x14a   : > { %p1443_p7 = scmp.lt.s32.totalorder %s1007_s9, %s1441_s26  ;;  %p1444_p8 = scmp.lt.s32.totalorder %s1442_s7, %s1436_s15 }
 0x14b   : > { %p1439_p6 = pneg %p1438_p5 }
 0x14c   : > { %p1445_p10 = por %p1444_p8, %p1443_p7 }
 0x14e   : > { %p1446_p11 = pnand %p1445_p10, %p1439_p6 }
 0x150   : > { %1449 = shalt.err (!%p1446_p11)
}
 0x151   : > { %s1450_s22 = scalar_lea.hbm %s1004_s29, 128  ;;  %s1454_s11 = scalar_lea.hbm %s1789_s5, 256 }
 0x152   : > { %p1451_p12 = scmp.ne.s32.totalorder %s1004_s29, %s1450_s22  ;;  %p1455_p1 = scmp.lt.s32.totalorder %s1004_s29, %s1789_s5 }
 0x153   : > { %p1456_p2 = scmp.lt.s32.totalorder %s1454_s11, %s1450_s22 }
 0x154   : > { %p1452_p13 = pnand %p1451_p12, %p1611_p3 }
 0x155   : > { %p1457_p4 = por %p1456_p2, %p1455_p1 }
 0x156   : > { %p1453_p0 = pneg %p1452_p13 }
 0x158   : > { %p1458_p5 = pnand %p1457_p4, %p1453_p0 }
 0x15a   : > { %1461 = shalt.err (!%p1458_p5)
}
 0x15b   : > { %1264 = dma.vmem_to_hbm [thread:$0]  (%p1611_p3), %s1007_s9, 128, %s1004_s29, %s988_s14  }
 0x15c PF: > { %p1270_p6 = scmp.ge.s32.totalorder %s1528_s25, 2  ;;  %s1018_s27 = sand.u32 1, %s1500_s18  }
 0x15d   : > { %s1019_s20 = scalar_lea.sflag [#allocation4], %s1018_s27 }
 0x15e   : > { %p1267_p7 = pnand %p1270_p6, %p1621_p9 }
 0x160   : > { %p1268_p8 = pneg %p1267_p7 }
 0x162   : > { %1495 = dma.done.wait (%p1268_p8), %s1019_s20, 128  }
 0x163   : > { %1497 = vsyncadd (%p1268_p8), %s1019_s20, 4294967168  ;;  %s18_s25 = sadd.s32 1, %s1528_s25   ;;  %s1804_s23 = sld [smem:[#allocation6_spill]] }
 0x164   : > { %p15_p10 = scmp.ge.s32.totalorder %s18_s25, 6   ;;  %s1805_s20 = sld [smem:[#allocation11_spill]] }
 0x165   : > { %s1806_s21 = sld [smem:[#allocation7_spill]]  ;;  %s1810_s18 = smov %s1504_s19 }
 0x166   : > { %s1807_s22 = sld [smem:[#allocation8_spill]] }
 0x167   : > { %s1808_s30 = sld [smem:[#allocation9_spill]] }
 0x168   : > { %s1809_s24 = sld [smem:[#allocation10_spill]] }
 0x169   : > { %s1811_s19 = smov %s1804_s23  ;;  %17 = sbr.rel (!%p15_p10) target bundleno = 5 (0x5), region = 95 }
 0x16d   : > { %s1812_s23 = smov %s1808_s30 }
 0x16e   :  { %1024 = vsyncpa [#allocation4], 1 }
 0x16f   :  { %1026 = vsyncpa [#allocation4 + $0x1], 1 }

// kernel: _dual_block_forward.20
= control target key start
LH: loop header
LB: loop body
LE: loop exit
PB: predicated region body
PF: predicated region fallthrough
CT: control target
= control target key end

     0   :  { %s1182_s18 = smov 0   ;;  %s1184_s19 = smov 0   ;;  %s1333_s0 = inlined_call_operand.vmem [shape: bf16[2,16,256], index: 0, kind: input, shape index: {}]   ;;  %s1334_s1 = inlined_call_operand.vmem [shape: bf16[256,256], index: 1, kind: input, shape index: {}]   ;;  %s1335_s2 = inlined_call_operand.vmem [shape: bf16[1,256], index: 2, kind: input, shape index: {}]   ;;  %s1336_s3 = inlined_call_operand.vmem [shape: bf16[2,1,256], index: 3, kind: input, shape index: {}]   ;;  %s1337_s4 = inlined_call_operand.vmem [shape: bf16[2,16,256], index: 4, kind: input, shape index: {}]   ;;  %s1338_s5 = inlined_call_operand.vmem [shape: bf16[2,16,256], index: 5, kind: output, shape index: {}]  }
   0x1   :  { %s1186_s20 = smov 0  }
   0x2 LB: > { %s41_s21 = sadd.s32 1, %s1146_s19  ;;  %p1002_p0 = scmp.ge.s32.totalorder %s1150_s20, 1  ;;  %s1150_s20 = sphi %s1186_s20, %s15_s20   ;;  %s1146_s19 = sphi %s1184_s19, %s1340_s19   ;;  %s1142_s18 = sphi %s1182_s18, %s1339_s18  }
   0x3   : > { %p43_p1 = scmp.ge.s32.totalorder %s41_s21, 2  ;;  %p302_p2 = scmp.lt.s32.totalorder %s1150_s20, 3 }
   0x5   : > { %s1342_s21 = smov (%p43_p1, %s41_s21), 0  ;;  %p303_p3 = pnand %p1002_p0, %p302_p2 }
   0x6   : > { %p386_p4 = scmp.lt.s32.totalorder (!%p303_p3), %s1142_s18, 1 }
   0x7   : > { %306 = sbr.rel (%p303_p3) target bundleno = 285 (0x11d), region = 40 }
   0xc   : > { %v1077_v0 = vld [vmem:[%s1334_s1 + $0x74] ss:$8 sps:$4 sm:$0xff]   ;;  %v1079_v1 = vld [vmem:[%s1334_s1 + $0x70] ss:$8 sps:$4 sm:$0xff]   ;;  %v1080_v2 = vld [vmem:[%s1334_s1 + $0x64] ss:$8 sps:$4 sm:$0xff]   ;;  %v735_v34 = vlaneseq }
   0xd   : > { %674 = vmatprep.subr.bf16.mxu0 %v1077_v0  ;;  %v1082_v3 = vld [vmem:[%s1334_s1 + $0x60] ss:$8 sps:$4 sm:$0xff]   ;;  %v1083_v4 = vld [vmem:[%s1334_s1 + $0x54] ss:$8 sps:$4 sm:$0xff]   ;;  %v1085_v5 = vld [vmem:[%s1334_s1 + $0x50] ss:$8 sps:$4 sm:$0xff]  }
   0xe   : > { %675 = vmatpush1.bf16.msra.mxu0 %v1079_v1  ;;  %v1086_v6 = vld [vmem:[%s1334_s1 + $0x44] ss:$8 sps:$4 sm:$0xff]   ;;  %v1088_v7 = vld [vmem:[%s1334_s1 + $0x40] ss:$8 sps:$4 sm:$0xff]   ;;  %v1089_v8 = vld [vmem:[%s1334_s1 + $0x34] ss:$8 sps:$4 sm:$0xff]  }
   0xf   : > { %676 = vmatprep.subr.bf16.mxu0 %v1080_v2  ;;  %s1344_s18 = smov (!%p386_p4, %s1142_s18), 1  ;;  %v1091_v9 = vld [vmem:[%s1334_s1 + $0x30] ss:$8 sps:$4 sm:$0xff]   ;;  %v1092_v10 = vld [vmem:[%s1334_s1 + $0x24] ss:$8 sps:$4 sm:$0xff]   ;;  %v736_v35 = vshrl.u32 %v735_v34, 7 }
  0x10   : > { %s1236_s23 = sshll.u32 %s1344_s18, 4  ;;  %v1094_v11 = vld [vmem:[%s1334_s1 + $0x20] ss:$8 sps:$4 sm:$0xff]   ;;  %v1095_v12 = vld [vmem:[%s1334_s1 + $0x14] ss:$8 sps:$4 sm:$0xff]   ;;  %s1005_s6 = sshll.u32 %s1344_s18, 1 }
  0x11   : > { %s1245_s28 = scalar_lea.vmem %s1333_s0, %s1236_s23  ;;  %v1097_v14 = vld [vmem:[%s1334_s1 + $0x10] ss:$8 sps:$4 sm:$0xff]   ;;  %v1098_v15 = vld [vmem:[%s1334_s1 + $0x4] ss:$8 sps:$4 sm:$0xff]   ;;  %v1100_v16 = vld [vmem:[%s1334_s1] ss:$8 sps:$4 sm:$0xff]   ;;  %s424_s9 = scalar_lea.vmem %s1336_s3, %s1005_s6 }
  0x12   : > { %677 = vmatpush1.bf16.msra.mxu0 %v1082_v3  ;;  %v1127_v13 = vld [vmem:[%s1245_s28 + $0x4] ss:$8 sps:$4 sm:$0xff]   ;;  %v1101_v17 = vld [vmem:[%s1334_s1 + $0xf4] ss:$8 sps:$4 sm:$0xff]   ;;  %v1103_v18 = vld [vmem:[%s1334_s1 + $0xf0] ss:$8 sps:$4 sm:$0xff]   ;;  %s439_s13 = scalar_lea.vmem %s1337_s4, %s1236_s23  ;;  %s455_s15 = scalar_lea.vmem %s1338_s5, %s1236_s23 }
  0x13   : > { %678 = vmatprep.subr.bf16.mxu0 %v1083_v4  ;;  %706 = vmatprep.mubr.bf16.mxu0 %v1127_v13  ;;  %v1104_v19 = vld [vmem:[%s1334_s1 + $0xe4] ss:$8 sps:$4 sm:$0xff]   ;;  %v1106_v20 = vld [vmem:[%s1334_s1 + $0xe0] ss:$8 sps:$4 sm:$0xff]   ;;  %v1107_v21 = vld [vmem:[%s1334_s1 + $0xd4] ss:$8 sps:$4 sm:$0xff]  }
  0x14   : > { %v1109_v22 = vld [vmem:[%s1334_s1 + $0xd0] ss:$8 sps:$4 sm:$0xff]   ;;  %v1110_v23 = vld [vmem:[%s1334_s1 + $0xc4] ss:$8 sps:$4 sm:$0xff]   ;;  %v1112_v24 = vld [vmem:[%s1334_s1 + $0xc0] ss:$8 sps:$4 sm:$0xff]  }
  0x15   : > { %v1113_v25 = vld [vmem:[%s1334_s1 + $0xb4] ss:$8 sps:$4 sm:$0xff]   ;;  %v1115_v26 = vld [vmem:[%s1334_s1 + $0xb0] ss:$8 sps:$4 sm:$0xff]   ;;  %v1116_v27 = vld [vmem:[%s1334_s1 + $0xa4] ss:$8 sps:$4 sm:$0xff]  }
  0x16   : > { %679 = vmatpush1.bf16.msra.mxu0 %v1085_v5  ;;  %v1118_v28 = vld [vmem:[%s1334_s1 + $0xa0] ss:$8 sps:$4 sm:$0xff]   ;;  %v1119_v29 = vld [vmem:[%s1334_s1 + $0x94] ss:$8 sps:$4 sm:$0xff]   ;;  %v1121_v30 = vld [vmem:[%s1334_s1 + $0x90] ss:$8 sps:$4 sm:$0xff]  }
  0x17   : > { %680 = vmatprep.subr.bf16.mxu0 %v1086_v6  ;;  %v1122_v31 = vld [vmem:[%s1334_s1 + $0x84] ss:$8 sps:$4 sm:$0xff]   ;;  %v1124_v32 = vld [vmem:[%s1334_s1 + $0x80] ss:$8 sps:$4 sm:$0xff]   ;;  %v737_v39 = vsub.s32 0, %v736_v35  ;;  %v741_v41 = vsub.s32 2, %v736_v35 }
  0x18   : > { %v1125_v33 = vld [vmem:[%s1245_s28] ss:$8 sps:$4 sm:$0xff]  }
  0x19   : > { %v732_v36 = vld [vmem:[%s1335_s2] sm:$0x3]  ;;  %v758_v55 = vld [vmem:[%s439_s13 + $0x8] sm:$0xff] }
  0x1a   : > { %681 = vmatpush1.bf16.msra.mxu0 %v1088_v7  ;;  %v763_v37 = vld [vmem:[%s424_s9] sm:$0x3]  ;;  %v733_v38 = vunpack.c.l.bf16 %v732_v36  ;;  %v761_v63 = vunpack.c.l.bf16 %v758_v55  ;;  %v762_v4 = vunpack.c.h.bf16 %v758_v55 }
  0x1b   : > { %682 = vmatprep.subr.bf16.mxu0 %v1089_v8  ;;  %v764_v40 = vunpack.c.l.bf16 %v763_v37  ;;  %v757_v47 = vld [vmem:[%s439_s13] sm:$0xff] }
  0x1c   : > { %v738_v42 = vrot.slane %v733_v38, %v737_v39  ;;  %v742_v44 = vrot.slane %v733_v38, %v741_v41  ;;  %v759_v52 = vunpack.c.l.bf16 %v757_v47  ;;  %v760_v58 = vunpack.c.h.bf16 %v757_v47 }
  0x1d   : > { %v769_v43 = vrot.slane %v764_v40, %v737_v39  ;;  %v773_v46 = vrot.slane %v764_v40, %v741_v41 }
  0x1e   : > { %683 = vmatpush1.bf16.msra.mxu0 %v1091_v9  ;;  %v748_v45 = vrot.slane %v738_v42, %v737_v39  ;;  %v752_v49 = vrot.slane %v742_v44, %v737_v39 }
  0x1f   : > { %684 = vmatprep.subr.bf16.mxu0 %v1092_v10  ;;  %v779_v48 = vrot.slane %v769_v43, %v737_v39  ;;  %v783_v53 = vrot.slane %v773_v46, %v737_v39 }
  0x22   : > { %685 = vmatpush1.bf16.msra.mxu0 %v1094_v11 }
  0x23   : > { %686 = vmatprep.subr.bf16.mxu0 %v1095_v12 }
  0x26   : > { %687 = vmatpush1.bf16.msra.mxu0 %v1097_v14 }
  0x27   : > { %688 = vmatprep.subr.bf16.mxu0 %v1098_v15 }
  0x2a   : > { %689 = vmatpush1.bf16.msra.mxu0 %v1100_v16 }
  0x2b   : > { %690 = vmatprep.subr.bf16.mxu0 %v1101_v17 }
  0x2e   : > { %691 = vmatpush2.bf16.msra.mxu0 %v1103_v18 }
  0x2f   : > { %692 = vmatprep.subr.bf16.mxu0 %v1104_v19 }
  0x32   : > { %693 = vmatpush2.bf16.msra.mxu0 %v1106_v20 }
  0x33   : > { %694 = vmatprep.subr.bf16.mxu0 %v1107_v21 }
  0x36   : > { %695 = vmatpush2.bf16.msra.mxu0 %v1109_v22 }
  0x37   : > { %696 = vmatprep.subr.bf16.mxu0 %v1110_v23 }
  0x3a   : > { %697 = vmatpush2.bf16.msra.mxu0 %v1112_v24 }
  0x3b   : > { %698 = vmatprep.subr.bf16.mxu0 %v1113_v25 }
  0x3e   : > { %699 = vmatpush2.bf16.msra.mxu0 %v1115_v26 }
  0x3f   : > { %700 = vmatprep.subr.bf16.mxu0 %v1116_v27 }
  0x42   : > { %701 = vmatpush2.bf16.msra.mxu0 %v1118_v28 }
  0x43   : > { %702 = vmatprep.subr.bf16.mxu0 %v1119_v29 }
  0x46   : > { %703 = vmatpush2.bf16.msra.mxu0 %v1121_v30 }
  0x47   : > { %704 = vmatprep.subr.bf16.mxu0 %v1122_v31 }
  0x4a   : > { %705 = vmatpush2.bf16.msra.mxu0 %v1124_v32 }
  0x4d   : > { %707 = vmatmul.mubr.bf16.vlgmr.msra.gmra.mxu0 %v1125_v33 }
 0x10d   : > { %v708_v50 = vpop.f32.mrf.mxu0 }
 0x10e   : > { %v753_v51 = vadd.f32 %v748_v45, %v708_v50 }
 0x10f   : > { %v710_v54 = vpop.f32.mrf.mxu0 }
 0x110   : > { %v784_v56 = vmul.f32 %v779_v48, %v753_v51  ;;  %v754_v57 = vadd.f32 %v752_v49, %v710_v54 }
 0x111   : > { %v712_v59 = vpop.f32.mrf.mxu0 }
 0x112   : > { %v788_v60 = vadd.f32 %v784_v56, %v759_v52  ;;  %v785_v61 = vmul.f32 %v783_v53, %v754_v57  ;;  %v755_v62 = vadd.f32 %v748_v45, %v712_v59 }
 0x113   : > { %v714_v0 = vpop.f32.mrf.mxu0 }
 0x114   : > { %v789_v1 = vadd.f32 %v785_v61, %v760_v58  ;;  %v786_v2 = vmul.f32 %v779_v48, %v755_v62  ;;  %v756_v3 = vadd.f32 %v752_v49, %v714_v0 }
 0x116   : > { %v1051_v5 = vpack.c.bf16 %v789_v1, %v788_v60  ;;  %v790_v6 = vadd.f32 %v786_v2, %v761_v63  ;;  %v787_v7 = vmul.f32 %v783_v53, %v756_v3 }
 0x118   : > { %804 = vst [vmem:[%s455_s15] sm:$0xff] %v1051_v5  ;;  %v791_v8 = vadd.f32 %v787_v7, %v762_v4 }
 0x11a   : > { %v1052_v9 = vpack.c.bf16 %v791_v8, %v790_v6 }
 0x11c   : > { %805 = vst [vmem:[%s455_s15 + $0x8] sm:$0xff] %v1052_v9 }
 0x11d PF: > { %s15_s20 = sadd.s32 1, %s1150_s20   ;;  %s1339_s18 = smov %s1146_s19 }
 0x11e   : > { %p12_p5 = scmp.ge.s32.totalorder %s15_s20, 4   ;;  %s1340_s19 = smov %s1342_s21 }
 0x120   :  { %14 = sbr.rel (!%p12_p5) target bundleno = 2 (0x2), region = 90 }

// kernel: _dual_block_forward.22
= control target key start
LH: loop header
LB: loop body
LE: loop exit
PB: predicated region body
PF: predicated region fallthrough
CT: control target
= control target key end

     0   :  { %s1370_s18 = smov 0   ;;  %s1372_s19 = smov 0   ;;  %s1633_s0 = inlined_call_operand.vmem [shape: bf16[2,16,256], index: 0, kind: input, shape index: {}]   ;;  %s1634_s1 = inlined_call_operand.vmem [shape: bf16[2,1,256], index: 1, kind: input, shape index: {}]   ;;  %s1635_s2 = inlined_call_operand.vmem [shape: bf16[2,1,256], index: 2, kind: input, shape index: {}]   ;;  %s1636_s3 = inlined_call_operand.vmem [shape: bf16[256,1024], index: 3, kind: input, shape index: {}]   ;;  %s1637_s4 = inlined_call_operand.vmem [shape: bf16[1,1024], index: 4, kind: input, shape index: {}]   ;;  %s1638_s5 = inlined_call_operand.vmem [shape: bf16[2,16,1024], index: 5, kind: output, shape index: {}]  }
   0x1   :  { %s1374_s20 = smov 0   ;;  %s1376_s21 = smov 0  }
   0x2   :  { %s1378_s22 = smov 0   ;;  %s1380_s23 = smov 0  }
   0x3   :  { %s1382_s24 = smov 0   ;;  %s1384_s25 = smov 0  }
   0x4   :  { %s1386_s26 = smov 0  }
   0x5 LB: > { %s1077_s27 = sadd.s32 4294967295, %s1338_s26   ;;  %s27_s28 = sadd.s32 1, %s1330_s24  ;;  %s1338_s26 = sphi %s1386_s26, %s15_s26   ;;  %s1334_s25 = sphi %s1384_s25, %s1647_s25   ;;  %s1330_s24 = sphi %s1382_s24, %s1646_s24   ;;  %s1326_s23 = sphi %s1380_s23, %s1645_s23   ;;  %s1322_s22 = sphi %s1378_s22, %s1644_s22   ;;  %s1318_s21 = sphi %s1376_s21, %s1643_s21   ;;  %s1314_s20 = sphi %s1374_s20, %s1642_s20   ;;  %s1310_s19 = sphi %s1372_s19, %s1641_s19   ;;  %s1306_s18 = sphi %s1370_s18, %s1640_s18  }
   0x6   : > { %p28_p0 = scmp.ge.s32.totalorder %s27_s28, 4  ;;  %s34_s29 = sadd.s32 1, %s1334_s25 }
   0x7   : > { %s121_s30 = sadd.s32 1, %s1318_s21  ;;  %p128_p1 = scmp.ne.s32.totalorder %s1318_s21, %s1314_s20 }
   0x8   : > { %s1649_s28 = smov (%p28_p0, %s27_s28), 0  ;;  %s1651_s29 = smov (!%p28_p0, %s34_s29), %s1334_s25 }
   0x9   : > { %s118_s6 = ssub.s32 %s1330_s24, %s1649_s28  ;;  %p129_p2 = scmp.eq.s32.totalorder %s1338_s26, 0 }
   0xa   : > { %p36_p3 = scmp.ge.s32.totalorder %s1651_s29, 2  ;;  %p119_p4 = scmp.eq.s32.totalorder %s118_s6, 0 }
   0xb   : > { %p130_p5 = por %p129_p2, %p128_p1  ;;  %s177_s7 = sadd.s32 1, %s1310_s19 }
   0xc   : > { %s1653_s29 = smov (%p36_p3, %s1651_s29), 0  ;;  %p187_p6 = scmp.ne.s32.totalorder %s1310_s19, %s1306_s18 }
   0xd   : > { %s1431_s8 = scalar_select %p119_p4, %s1318_s21, %s121_s30  }
   0xe   : > { %s170_s9 = ssub.s32 %s1334_s25, %s1653_s29  ;;  %p188_p7 = scmp.eq.s32.totalorder %s1077_s27, 7 }
   0xf   : > { %s174_s10 = sor.u32 %s170_s9, %s118_s6  ;;  %p1080_p10 = scmp.ge.s32.totalorder %s1338_s26, 8 }
  0x10   : > { %p175_p8 = scmp.eq.s32.totalorder %s174_s10, 0  ;;  %p1437_p9 = por %p188_p7, %p187_p6 }
  0x11   : > { %210 = sbr.rel (%p1080_p10) target bundleno = 58 (0x3a), region = 16 }
  0x12   : > { %s1442_s12 = scalar_select %p175_p8, %s1310_s19, %s177_s7  }
  0x16   : > { %241 = sbr.rel (!%p130_p5) target bundleno = 58 (0x3a), region = 32  ;;  %s243_s13 = sand.u32 (%p130_p5), 1, %s1318_s21  }
  0x17   : > { %s1132_s14 = sshll.u32 (%p130_p5), %s1330_s24, 3  ;;  %s1081_s15 = sshll.u32 (%p130_p5), %s243_s13, 8 }
  0x18   : > { %s1450_s27 = scalar_lea.vmem (%p130_p5), %s1636_s3, %s1132_s14  ;;  %s1455_s30 = scalar_lea.vmem (%p130_p5), [#allocation2], %s1081_s15 }
  0x19   : > { %v339_v0 = vld [vmem:[%s1450_s27] sm:$0xff] (%p130_p5) }
  0x1a   : > { %v341_v1 = vld [vmem:[%s1450_s27 + $0x20] sm:$0xff] (%p130_p5)  ;;  %340 = vst [vmem:[%s1455_s30] sm:$0xff] (%p130_p5), %v339_v0 }
  0x1b   : > { %v343_v2 = vld [vmem:[%s1450_s27 + $0x40] sm:$0xff]  ;;  %342 = vst [vmem:[%s1455_s30 + $0x8] sm:$0xff] %v341_v1 }
  0x1c   : > { %344 = vst [vmem:[%s1455_s30 + $0x10] sm:$0xff] %v343_v2  ;;  %v345_v3 = vld [vmem:[%s1450_s27 + $0x60] sm:$0xff] }
  0x1d   : > { %v347_v4 = vld [vmem:[%s1450_s27 + $0x80] sm:$0xff]  ;;  %346 = vst [vmem:[%s1455_s30 + $0x18] sm:$0xff] %v345_v3 }
  0x1e   : > { %v349_v5 = vld [vmem:[%s1450_s27 + $0xa0] sm:$0xff]  ;;  %348 = vst [vmem:[%s1455_s30 + $0x20] sm:$0xff] %v347_v4 }
  0x1f   : > { %350 = vst [vmem:[%s1455_s30 + $0x28] sm:$0xff] %v349_v5  ;;  %v351_v6 = vld [vmem:[%s1450_s27 + $0xc0] sm:$0xff] }
  0x20   : > { %v353_v7 = vld [vmem:[%s1450_s27 + $0xe0] sm:$0xff]  ;;  %352 = vst [vmem:[%s1455_s30 + $0x30] sm:$0xff] %v351_v6 }
  0x21   : > { %v355_v8 = vld [vmem:[%s1450_s27 + $0x100] sm:$0xff]  ;;  %354 = vst [vmem:[%s1455_s30 + $0x38] sm:$0xff] %v353_v7 }
  0x22   : > { %356 = vst [vmem:[%s1455_s30 + $0x40] sm:$0xff] %v355_v8  ;;  %v357_v9 = vld [vmem:[%s1450_s27 + $0x120] sm:$0xff] }
  0x23   : > { %v359_v10 = vld [vmem:[%s1450_s27 + $0x140] sm:$0xff]  ;;  %358 = vst [vmem:[%s1455_s30 + $0x48] sm:$0xff] %v357_v9 }
  0x24   : > { %v361_v11 = vld [vmem:[%s1450_s27 + $0x160] sm:$0xff]  ;;  %360 = vst [vmem:[%s1455_s30 + $0x50] sm:$0xff] %v359_v10 }
  0x25   : > { %362 = vst [vmem:[%s1455_s30 + $0x58] sm:$0xff] %v361_v11  ;;  %v363_v12 = vld [vmem:[%s1450_s27 + $0x180] sm:$0xff] }
  0x26   : > { %v365_v13 = vld [vmem:[%s1450_s27 + $0x1a0] sm:$0xff]  ;;  %364 = vst [vmem:[%s1455_s30 + $0x60] sm:$0xff] %v363_v12 }
  0x27   : > { %v367_v14 = vld [vmem:[%s1450_s27 + $0x1c0] sm:$0xff]  ;;  %366 = vst [vmem:[%s1455_s30 + $0x68] sm:$0xff] %v365_v13 }
  0x28   : > { %368 = vst [vmem:[%s1455_s30 + $0x70] sm:$0xff] %v367_v14  ;;  %v369_v15 = vld [vmem:[%s1450_s27 + $0x1e0] sm:$0xff] }
  0x29   : > { %v371_v16 = vld [vmem:[%s1450_s27 + $0x200] sm:$0xff]  ;;  %370 = vst [vmem:[%s1455_s30 + $0x78] sm:$0xff] %v369_v15 }
  0x2a   : > { %v373_v17 = vld [vmem:[%s1450_s27 + $0x220] sm:$0xff]  ;;  %372 = vst [vmem:[%s1455_s30 + $0x80] sm:$0xff] %v371_v16 }
  0x2b   : > { %374 = vst [vmem:[%s1455_s30 + $0x88] sm:$0xff] %v373_v17  ;;  %v375_v18 = vld [vmem:[%s1450_s27 + $0x240] sm:$0xff] }
  0x2c   : > { %v377_v19 = vld [vmem:[%s1450_s27 + $0x260] sm:$0xff]  ;;  %376 = vst [vmem:[%s1455_s30 + $0x90] sm:$0xff] %v375_v18 }
  0x2d   : > { %v379_v20 = vld [vmem:[%s1450_s27 + $0x280] sm:$0xff]  ;;  %378 = vst [vmem:[%s1455_s30 + $0x98] sm:$0xff] %v377_v19 }
  0x2e   : > { %380 = vst [vmem:[%s1455_s30 + $0xa0] sm:$0xff] %v379_v20  ;;  %v381_v21 = vld [vmem:[%s1450_s27 + $0x2a0] sm:$0xff] }
  0x2f   : > { %v383_v22 = vld [vmem:[%s1450_s27 + $0x2c0] sm:$0xff]  ;;  %382 = vst [vmem:[%s1455_s30 + $0xa8] sm:$0xff] %v381_v21 }
  0x30   : > { %v385_v23 = vld [vmem:[%s1450_s27 + $0x2e0] sm:$0xff]  ;;  %384 = vst [vmem:[%s1455_s30 + $0xb0] sm:$0xff] %v383_v22 }
  0x31   : > { %386 = vst [vmem:[%s1455_s30 + $0xb8] sm:$0xff] %v385_v23  ;;  %v387_v24 = vld [vmem:[%s1450_s27 + $0x300] sm:$0xff] }
  0x32   : > { %v389_v25 = vld [vmem:[%s1450_s27 + $0x320] sm:$0xff]  ;;  %388 = vst [vmem:[%s1455_s30 + $0xc0] sm:$0xff] %v387_v24 }
  0x33   : > { %v391_v26 = vld [vmem:[%s1450_s27 + $0x340] sm:$0xff]  ;;  %390 = vst [vmem:[%s1455_s30 + $0xc8] sm:$0xff] %v389_v25 }
  0x34   : > { %392 = vst [vmem:[%s1455_s30 + $0xd0] sm:$0xff] %v391_v26  ;;  %v393_v27 = vld [vmem:[%s1450_s27 + $0x360] sm:$0xff] }
  0x35   : > { %v395_v28 = vld [vmem:[%s1450_s27 + $0x380] sm:$0xff]  ;;  %394 = vst [vmem:[%s1455_s30 + $0xd8] sm:$0xff] %v393_v27 }
  0x36   : > { %v397_v29 = vld [vmem:[%s1450_s27 + $0x3a0] sm:$0xff]  ;;  %396 = vst [vmem:[%s1455_s30 + $0xe0] sm:$0xff] %v395_v28 }
  0x37   : > { %398 = vst [vmem:[%s1455_s30 + $0xe8] sm:$0xff] %v397_v29  ;;  %v399_v30 = vld [vmem:[%s1450_s27 + $0x3c0] sm:$0xff] }
  0x38   : > { %v401_v31 = vld [vmem:[%s1450_s27 + $0x3e0] sm:$0xff]  ;;  %400 = vst [vmem:[%s1455_s30 + $0xf0] sm:$0xff] %v399_v30 }
  0x39   : > { %402 = vst [vmem:[%s1455_s30 + $0xf8] sm:$0xff] %v401_v31 }
  0x3a PF: > { %p1084_p11 = scmp.ge.s32.totalorder %s1338_s26, 1  ;;  %p415_p12 = scmp.lt.s32.totalorder %s1338_s26, 9 }
  0x3c   : > { %p416_p13 = pnand %p1084_p11, %p415_p12 }
  0x3d   : > { %p471_p0 = scmp.lt.s32.totalorder (!%p416_p13), %s1326_s23, 1  ;;  %s422_s14 = sand.u32 (!%p416_p13), 1, %s1314_s20  }
  0x3e   : > { %419 = sbr.rel (%p416_p13) target bundleno = 633 (0x279), region = 74  ;;  %s1085_s15 = sshll.u32 (!%p416_p13), %s422_s14, 8 }
  0x3f   : > { %s1529_s16 = scalar_lea.vmem (!%p416_p13), [#allocation2], %s1085_s15 }
  0x43   : > { %s1522_s6 = scalar_select %p471_p0, %s1326_s23, 1  ;;  %v1208_v40 = vld [vmem:[%s1529_s16 + $0x74] ss:$8 sps:$4 sm:$0xff]   ;;  %v1210_v41 = vld [vmem:[%s1529_s16 + $0x70] ss:$8 sps:$4 sm:$0xff]   ;;  %v540_v25 = vlaneseq }
  0x44   : > { %802 = vmatprep.subr.bf16.mxu0 %v1208_v40  ;;  %v1211_v42 = vld [vmem:[%s1529_s16 + $0x64] ss:$8 sps:$4 sm:$0xff]   ;;  %v1213_v43 = vld [vmem:[%s1529_s16 + $0x60] ss:$8 sps:$4 sm:$0xff]   ;;  %v1214_v44 = vld [vmem:[%s1529_s16 + $0x54] ss:$8 sps:$4 sm:$0xff]  }
  0x45   : > { %s1133_s7 = sshll.u32 %s1522_s6, 4  ;;  %803 = vmatpush1.bf16.msra.mxu0 %v1210_v41  ;;  %v1216_v45 = vld [vmem:[%s1529_s16 + $0x50] ss:$8 sps:$4 sm:$0xff]   ;;  %v1217_v46 = vld [vmem:[%s1529_s16 + $0x44] ss:$8 sps:$4 sm:$0xff]   ;;  %s1089_s20 = sshll.u32 %s1522_s6, 1 }
  0x46   : > { %s479_s13 = scalar_lea.vmem %s1633_s0, %s1133_s7  ;;  %804 = vmatprep.subr.bf16.mxu0 %v1211_v42  ;;  %v1219_v47 = vld [vmem:[%s1529_s16 + $0x40] ss:$8 sps:$4 sm:$0xff]   ;;  %v1220_v48 = vld [vmem:[%s1529_s16 + $0x34] ss:$8 sps:$4 sm:$0xff]   ;;  %v1222_v49 = vld [vmem:[%s1529_s16 + $0x30] ss:$8 sps:$4 sm:$0xff]   ;;  %s484_s30 = scalar_lea.vmem %s1634_s1, %s1089_s20 }
  0x47   : > { %v497_v32 = vld [vmem:[%s479_s13] sm:$0xff]  ;;  %v498_v33 = vld [vmem:[%s479_s13 + $0x8] sm:$0xff]  ;;  %v1226_v52 = vld [vmem:[%s1529_s16 + $0x14] ss:$8 sps:$4 sm:$0xff]   ;;  %v541_v31 = vshrl.u32 %v540_v25, 7  ;;  %s488_s10 = scalar_lea.vmem %s1635_s2, %s1089_s20  ;;  %s1591_s6 = sshll.u32 %s1322_s22, 1 }
  0x48   : > { %v499_v34 = vunpack.c.l.bf16 %v497_v32  ;;  %v500_v35 = vunpack.c.h.bf16 %v497_v32  ;;  %v501_v36 = vunpack.c.l.bf16 %v498_v33  ;;  %v502_v37 = vunpack.c.h.bf16 %v498_v33  ;;  %v1223_v50 = vld [vmem:[%s1529_s16 + $0x24] ss:$8 sps:$4 sm:$0xff]   ;;  %v1225_v51 = vld [vmem:[%s1529_s16 + $0x20] ss:$8 sps:$4 sm:$0xff]   ;;  %v1228_v53 = vld [vmem:[%s1529_s16 + $0x10] ss:$8 sps:$4 sm:$0xff]  }
  0x49   : > { %805 = vmatpush1.bf16.msra.mxu0 %v1213_v43  ;;  %v1229_v54 = vld [vmem:[%s1529_s16 + $0x4] ss:$8 sps:$4 sm:$0xff]   ;;  %v1231_v55 = vld [vmem:[%s1529_s16] ss:$8 sps:$4 sm:$0xff]   ;;  %v1232_v6 = vld [vmem:[%s1529_s16 + $0xf4] ss:$8 sps:$4 sm:$0xff]  }
  0x4a   : > { %v503_v38 = vadd.f32 %v500_v35, %v499_v34  ;;  %v506_v39 = vadd.f32 %v502_v37, %v501_v36  ;;  %806 = vmatprep.subr.bf16.mxu0 %v1214_v44  ;;  %v1234_v7 = vld [vmem:[%s1529_s16 + $0xf0] ss:$8 sps:$4 sm:$0xff]   ;;  %v1235_v8 = vld [vmem:[%s1529_s16 + $0xe4] ss:$8 sps:$4 sm:$0xff]   ;;  %v1237_v9 = vld [vmem:[%s1529_s16 + $0xe0] ss:$8 sps:$4 sm:$0xff]  }
  0x4b   : > { %v1238_v10 = vld [vmem:[%s1529_s16 + $0xd4] ss:$8 sps:$4 sm:$0xff]   ;;  %v1240_v11 = vld [vmem:[%s1529_s16 + $0xd0] ss:$8 sps:$4 sm:$0xff]   ;;  %v1241_v12 = vld [vmem:[%s1529_s16 + $0xc4] ss:$8 sps:$4 sm:$0xff]  }
  0x4c   : > { %504 = vadd.xlane.f32.xlu0 %v503_v38  ;;  %v1243_v13 = vld [vmem:[%s1529_s16 + $0xc0] ss:$8 sps:$4 sm:$0xff]   ;;  %v1244_v14 = vld [vmem:[%s1529_s16 + $0xb4] ss:$8 sps:$4 sm:$0xff]   ;;  %v1246_v15 = vld [vmem:[%s1529_s16 + $0xb0] ss:$8 sps:$4 sm:$0xff]  }
  0x4d   : > { %807 = vmatpush1.bf16.msra.mxu0 %v1216_v45  ;;  %v1247_v16 = vld [vmem:[%s1529_s16 + $0xa4] ss:$8 sps:$4 sm:$0xff]   ;;  %v1249_v17 = vld [vmem:[%s1529_s16 + $0xa0] ss:$8 sps:$4 sm:$0xff]   ;;  %v1250_v18 = vld [vmem:[%s1529_s16 + $0x94] ss:$8 sps:$4 sm:$0xff]  }
  0x4e   : > { %808 = vmatprep.subr.bf16.mxu0 %v1217_v46  ;;  %v1252_v19 = vld [vmem:[%s1529_s16 + $0x90] ss:$8 sps:$4 sm:$0xff]   ;;  %v1253_v20 = vld [vmem:[%s1529_s16 + $0x84] ss:$8 sps:$4 sm:$0xff]   ;;  %v1255_v21 = vld [vmem:[%s1529_s16 + $0x80] ss:$8 sps:$4 sm:$0xff]  }
  0x4f   : > { %v536_v26 = vld [vmem:[%s484_s30] sm:$0x3]  ;;  %v542_v33 = vsub.s32 0, %v541_v31  ;;  %p491_p1 = scmp.lt.s32.totalorder %s1591_s6, 7  ;;  %s467_s22 = sand.u32 1, %s1306_s18  }
  0x50   : > { %507 = vadd.xlane.f32.xlu0 %v506_v39  ;;  %v537_v29 = vunpack.c.l.bf16 %v536_v26  ;;  %s1086_s20 = sshll.u32 %s467_s22, 4  ;;  %s1128_s18 = sshll.u32 (%p1437_p9), %s1326_s23, 4 }
  0x51   : > { %809 = vmatpush1.bf16.msra.mxu0 %v1219_v47  ;;  %s492_s13 = scalar_select %p491_p1, %s1591_s6, 7 }
  0x52   : > { %810 = vmatprep.subr.bf16.mxu0 %v1220_v48  ;;  %v538_v32 = vadd.f32 1.0, %v537_v29  ;;  %s469_s17 = scalar_lea.vmem [#allocation3], %s1086_s20  ;;  %s907_s27 = sadd.s32 (%p1437_p9), %s1128_s18, %s1591_s6 }
  0x53   : > { %s493_s16 = scalar_lea.vmem %s1637_s4, %s492_s13  ;;  %s1129_s30 = sshll.u32 (%p1437_p9), %s907_s27, 2 }
  0x54   : > { %v543_v38 = vrot.slane %v538_v32, %v542_v33 }
  0x55   : > { %811 = vmatpush1.bf16.msra.mxu0 %v1222_v49 }
  0x56   : > { %812 = vmatprep.subr.bf16.mxu0 %v1223_v50  ;;  %v553_v45 = vrot.slane %v543_v38, %v542_v33 }
  0x59   : > { %813 = vmatpush1.bf16.msra.mxu0 %v1225_v51 }
  0x5a   : > { %814 = vmatprep.subr.bf16.mxu0 %v1226_v52 }
  0x5d   : > { %815 = vmatpush1.bf16.msra.mxu0 %v1228_v53 }
  0x5e   : > { %816 = vmatprep.subr.bf16.mxu0 %v1229_v54 }
  0x61   : > { %817 = vmatpush1.bf16.msra.mxu0 %v1231_v55 }
  0x62   : > { %818 = vmatprep.subr.bf16.mxu0 %v1232_v6 }
  0x65   : > { %819 = vmatpush2.bf16.msra.mxu0 %v1234_v7 }
  0x66   : > { %820 = vmatprep.subr.bf16.mxu0 %v1235_v8 }
  0x69   : > { %821 = vmatpush2.bf16.msra.mxu0 %v1237_v9 }
  0x6a   : > { %822 = vmatprep.subr.bf16.mxu0 %v1238_v10 }
  0x6d   : > { %823 = vmatpush2.bf16.msra.mxu0 %v1240_v11 }
  0x6e   : > { %824 = vmatprep.subr.bf16.mxu0 %v1241_v12 }
  0x71   : > { %825 = vmatpush2.bf16.msra.mxu0 %v1243_v13 }
  0x72   : > { %826 = vmatprep.subr.bf16.mxu0 %v1244_v14 }
  0x75   : > { %827 = vmatpush2.bf16.msra.mxu0 %v1246_v15 }
  0x76   : > { %828 = vmatprep.subr.bf16.mxu0 %v1247_v16 }
  0x79   : > { %829 = vmatpush2.bf16.msra.mxu0 %v1249_v17 }
  0x7a   : > { %830 = vmatprep.subr.bf16.mxu0 %v1250_v18 }
  0x7d   : > { %831 = vmatpush2.bf16.msra.mxu0 %v1252_v19 }
  0x7e   : > { %832 = vmatprep.subr.bf16.mxu0 %v1253_v20 }
  0x81   : > { %833 = vmatpush2.bf16.msra.mxu0 %v1255_v21 }
  0xd5   : > { %v505_v56 = vpop.xlane.xlu0 %504 }
  0xd6   : > { %v510_v57 = vmul.f32 0.00390625, %v505_v56 }
  0xd8   : > { %v1547_v58 = vsub.f32 %v499_v34, %v510_v57  ;;  %v1549_v59 = vsub.f32 %v500_v35, %v510_v57  ;;  %v546_v34 = vsub.s32 2, %v541_v31  ;;  %v562_v35 = vld [vmem:[%s488_s10] sm:$0x3]  ;;  %s909_s10 = scalar_lea.vmem (%p1437_p9), %s1638_s5, %s1129_s30 }
  0xd9   : > { %v508_v60 = vpop.xlane.xlu0 %507 }
  0xda   : > { %v511_v61 = vmul.f32 0.00390625, %v508_v60  ;;  %v516_v62 = vmul.f32 %v1547_v58, %v1547_v58  ;;  %v517_v63 = vmul.f32 %v1549_v59, %v1549_v59 }
  0xdc   : > { %v1555_v0 = vsub.f32 %v501_v36, %v511_v61  ;;  %v1557_v1 = vsub.f32 %v502_v37, %v511_v61  ;;  %v520_v2 = vadd.f32 %v517_v63, %v516_v62  ;;  %v563_v36 = vunpack.c.l.bf16 %v562_v35 }
  0xdd   : > { %v547_v37 = vrot.slane %v538_v32, %v546_v34 }
  0xde   : > { %521 = vadd.xlane.f32.xlu1 %v520_v2  ;;  %v518_v3 = vmul.f32 %v1555_v0, %v1555_v0  ;;  %v519_v4 = vmul.f32 %v1557_v1, %v1557_v1  ;;  %v572_v40 = vrot.slane %v563_v36, %v546_v34  ;;  %v568_v41 = vrot.slane %v563_v36, %v542_v33 }
  0xdf   : > { %v557_v43 = vrot.slane %v547_v37, %v542_v33 }
  0xe0   : > { %v523_v5 = vadd.f32 %v519_v4, %v518_v3  ;;  %v582_v47 = vrot.slane %v572_v40, %v542_v33  ;;  %v578_v48 = vrot.slane %v568_v41, %v542_v33 }
  0xe2   : > { %524 = vadd.xlane.f32.xlu1 %v523_v5 }
 0x167   : > { %v522_v22 = vpop.xlane.xlu1 %521 }
 0x168   : > { %v526_v23 = vmul.f32 0.00390625, %v522_v22 }
 0x16a   : > { %v528_v24 = vadd.f32 1e-06, %v526_v23 }
 0x16b   : > { %v525_v27 = vpop.xlane.xlu1 %524 }
 0x16c   : > { %1256 = vrsqrt.f32 %v528_v24  ;;  %v527_v28 = vmul.f32 0.00390625, %v525_v27 }
 0x16e   : > { %v529_v30 = vadd.f32 1e-06, %v527_v28 }
 0x170   : > { %1258 = vrsqrt.f32 %v529_v30 }
 0x179   : > { %v1257_v39 = vpop.eup %1256 }
 0x17a   : > { %v533_v42 = vmul.f32 %v1257_v39, %v1549_v59  ;;  %v532_v44 = vmul.f32 %v1257_v39, %v1547_v58  ;;  %v621_v58 = vld [vmem:[%s493_s16] sm:$0x3] }
 0x17b   : > { %v622_v62 = vunpack.c.l.bf16 %v621_v58 }
 0x17c   : > { %v559_v50 = vmul.f32 %v557_v43, %v533_v42  ;;  %v558_v52 = vmul.f32 %v553_v45, %v532_v44 }
 0x17d   : > { %v1259_v46 = vpop.eup %1258  ;;  %v627_v63 = vrot.slane %v622_v62, %v542_v33 }
 0x17e   : > { %v535_v49 = vmul.f32 %v1259_v46, %v1557_v1  ;;  %v534_v51 = vmul.f32 %v1259_v46, %v1555_v0  ;;  %v584_v55 = vadd.f32 %v582_v47, %v559_v50  ;;  %v583_v57 = vadd.f32 %v578_v48, %v558_v52 }
 0x17f   : > { %v631_v0 = vrot.slane %v622_v62, %v546_v34  ;;  %v637_v1 = vrot.slane %v627_v63, %v542_v33 }
 0x180   : > { %v561_v53 = vmul.f32 %v557_v43, %v535_v49  ;;  %v560_v54 = vmul.f32 %v553_v45, %v534_v51 }
 0x181   : > { %v641_v2 = vrot.slane %v631_v0, %v542_v33 }
 0x182   : > { %v586_v56 = vadd.f32 %v582_v47, %v561_v53  ;;  %v585_v59 = vadd.f32 %v578_v48, %v560_v54 }
 0x184   : > { %v588_v60 = vpack.c.bf16 %v586_v56, %v584_v55  ;;  %v587_v61 = vpack.c.bf16 %v585_v59, %v583_v57 }
 0x186   : > { %834 = vmatprep.mubr.bf16.mxu0 %v588_v60 }
 0x187   : > { %835 = vmatmul.mubr.bf16.vlgmr.msra.gmra.mxu0 %v587_v61 }
 0x247   : > { %v836_v3 = vpop.f32.mrf.mxu0 }
 0x248   : > { %v837_v4 = vadd.f32 %v836_v3, %v637_v1 }
 0x249   : > { %v838_v5 = vpop.f32.mrf.mxu0 }
 0x24a   : > { %v845_v6 = vmul.f32 %v837_v4, %v837_v4  ;;  %v839_v7 = vadd.f32 %v838_v5, %v641_v2 }
 0x24b   : > { %v840_v8 = vpop.f32.mrf.mxu0 }
 0x24c   : > { %v849_v9 = vmul.f32 %v845_v6, %v837_v4  ;;  %v846_v10 = vmul.f32 %v839_v7, %v839_v7  ;;  %v841_v11 = vadd.f32 %v840_v8, %v637_v1 }
 0x24d   : > { %v842_v12 = vpop.f32.mrf.mxu0 }
 0x24e   : > { %v853_v13 = vmul.f32 0.044715, %v849_v9  ;;  %v850_v14 = vmul.f32 %v846_v10, %v839_v7  ;;  %v847_v15 = vmul.f32 %v841_v11, %v841_v11  ;;  %v843_v16 = vadd.f32 %v842_v12, %v641_v2 }
 0x250   : > { %v857_v17 = vadd.f32 %v853_v13, %v837_v4  ;;  %v854_v18 = vmul.f32 0.044715, %v850_v14  ;;  %v851_v19 = vmul.f32 %v847_v15, %v841_v11  ;;  %v848_v20 = vmul.f32 %v843_v16, %v843_v16 }
 0x252   : > { %v861_v21 = vmul.f32 0.7978846, %v857_v17  ;;  %v858_v22 = vadd.f32 %v854_v18, %v839_v7  ;;  %v855_v23 = vmul.f32 0.044715, %v851_v19  ;;  %v852_v24 = vmul.f32 %v848_v20, %v843_v16 }
 0x254   : > { %1260 = vtanh.f32 %v861_v21  ;;  %v862_v25 = vmul.f32 0.7978846, %v858_v22  ;;  %v859_v26 = vadd.f32 %v855_v23, %v841_v11  ;;  %v856_v27 = vmul.f32 0.044715, %v852_v24 }
 0x256   : > { %1262 = vtanh.f32 %v862_v25  ;;  %v863_v28 = vmul.f32 0.7978846, %v859_v26  ;;  %v860_v29 = vadd.f32 %v856_v27, %v843_v16 }
 0x258   : > { %1264 = vtanh.f32 %v863_v28  ;;  %v864_v30 = vmul.f32 0.7978846, %v860_v29 }
 0x25a   : > { %1266 = vtanh.f32 %v864_v30 }
 0x261   : > { %v1261_v31 = vpop.eup %1260 }
 0x262   : > { %v869_v32 = vadd.f32 1.0, %v1261_v31 }
 0x263   : > { %v1263_v33 = vpop.eup %1262 }
 0x264   : > { %v873_v34 = vmul.f32 0.5, %v869_v32  ;;  %v870_v35 = vadd.f32 1.0, %v1263_v33 }
 0x265   : > { %v1265_v36 = vpop.eup %1264 }
 0x266   : > { %v874_v37 = vmul.f32 0.5, %v870_v35  ;;  %v871_v38 = vadd.f32 1.0, %v1265_v36  ;;  %v877_v40 = vmul.f32 %v873_v34, %v837_v4 }
 0x267   : > { %v1267_v39 = vpop.eup %1266 }
 0x268   : > { %v878_v41 = vmul.f32 %v874_v37, %v839_v7  ;;  %v875_v42 = vmul.f32 0.5, %v871_v38  ;;  %v872_v43 = vadd.f32 1.0, %v1267_v39 }
 0x26a   : > { %v1134_v44 = vpack.c.bf16 %v878_v41, %v877_v40  ;;  %v876_v45 = vmul.f32 0.5, %v872_v43  ;;  %v879_v46 = vmul.f32 %v875_v42, %v841_v11 }
 0x26c   : > { %893 = vst [vmem:[%s469_s17] sm:$0xff] %v1134_v44  ;;  %v880_v47 = vmul.f32 %v876_v45, %v843_v16  ;;  %901 = sbr.rel (!%p1437_p9) target bundleno = 633 (0x279), region = 82 }
 0x26e   : > { %v1135_v48 = vpack.c.bf16 %v880_v47, %v879_v46 }
 0x270   : > { %894 = vst [vmem:[%s469_s17 + $0x8] sm:$0xff] %v1135_v48 }
 0x273   : > { %v940_v49 = vld [vmem:[%s469_s17] sm:$0xff] }
 0x274   : > { %941 = vst [vmem:[%s909_s10] sm:$0xff] %v940_v49 }
 0x277   : > { %v942_v50 = vld [vmem:[%s469_s17 + $0x8] sm:$0xff] }
 0x278   : > { %943 = vst [vmem:[%s909_s10 + $0x20] sm:$0xff] %v942_v50 }
 0x279 PF: > { %s15_s26 = sadd.s32 1, %s1338_s26   ;;  %s1640_s18 = smov %s1310_s19 }
 0x27a   : > { %p12_p2 = scmp.ge.s32.totalorder %s15_s26, 10   ;;  %s1641_s19 = smov %s1442_s12 }
 0x27b   : > { %s1642_s20 = smov %s1318_s21  ;;  %s1643_s21 = smov %s1431_s8 }
 0x27c   : > { %s1644_s22 = smov %s1330_s24  ;;  %s1645_s23 = smov %s1334_s25 }
 0x27d   : > { %s1646_s24 = smov %s1649_s28  ;;  %s1647_s25 = smov %s1653_s29 }
 0x27e   :  { %14 = sbr.rel (!%p12_p2) target bundleno = 5 (0x5), region = 163 }

// kernel: _dual_block_forward.23
= control target key start
LH: loop header
LB: loop body
LE: loop exit
PB: predicated region body
PF: predicated region fallthrough
CT: control target
= control target key end

     0   :  { %s1928_s0 = inlined_call_operand.vmem [shape: bf16[2,16,1024], index: 0, kind: input, shape index: {}]   ;;  %s1929_s1 = inlined_call_operand.vmem [shape: bf16[1024,256], index: 1, kind: input, shape index: {}]   ;;  %s1930_s2 = inlined_call_operand.vmem [shape: bf16[1,256], index: 2, kind: input, shape index: {}]   ;;  %s1931_s3 = inlined_call_operand.vmem [shape: bf16[2,1,256], index: 3, kind: input, shape index: {}]   ;;  %s1932_s4 = inlined_call_operand.vmem [shape: bf16[2,16,256], index: 4, kind: input, shape index: {}]   ;;  %s1933_s5 = inlined_call_operand.hbm [shape: bf16[2,16,256], index: 5, kind: output, shape index: {}]  }
   0x1   :  { %1940 = sst [smem:[#allocation14_spill]] %s1928_s0 }
   0x2   :  { %10 = vsyncpa [#allocation5], 0 }
   0x3   :  { %12 = vsyncpa [#allocation5 + $0x1], 0  ;;  %s1655_s18 = smov 0   ;;  %s1657_s19 = smov 0  }
   0x4   :  { %s1659_s20 = smov 0   ;;  %s1661_s21 = smov 0  }
   0x5   :  { %s1663_s22 = smov 0   ;;  %s1665_s23 = smov 0  }
   0x6   :  { %s1667_s24 = smov 0   ;;  %s1669_s25 = smov 0  }
   0x7   :  { %s1671_s26 = smov 0   ;;  %s1673_s27 = smov 0  }
   0x8 LB: > { %1941 = sst [smem:[#allocation7_spill]] %s1599_s22  ;;  %s1219_s28 = sadd.s32 4294967295, %s1619_s27   ;;  %s1619_s27 = sphi %s1673_s27, %s18_s27   ;;  %s1615_s26 = sphi %s1671_s26, %s1959_s26   ;;  %s1611_s25 = sphi %s1669_s25, %s1958_s25   ;;  %s1607_s24 = sphi %s1667_s24, %s1957_s24   ;;  %s1603_s23 = sphi %s1665_s23, %s1963_s23   ;;  %s1599_s22 = sphi %s1663_s22, %s1955_s22   ;;  %s1595_s21 = sphi %s1661_s21, %s1954_s21   ;;  %s1591_s20 = sphi %s1659_s20, %s1962_s20   ;;  %s1587_s19 = sphi %s1657_s19, %s1961_s19   ;;  %s1583_s18 = sphi %s1655_s18, %s1960_s18  }
   0x9   : > { %1942 = sst [smem:[#allocation8_spill]] %s1611_s25  ;;  %s1220_s29 = sadd.s32 4294967294, %s1619_s27  }
   0xa   : > { %1943 = sst [smem:[#allocation9_spill]] %s1615_s26  ;;  %s33_s30 = sadd.s32 1, %s1611_s25 }
   0xb   : > { %s44_s6 = sadd.s32 1, %s1615_s26  ;;  %p34_p0 = scmp.ge.s32.totalorder %s33_s30, 2 }
   0xc   : > { %s55_s7 = sadd.s32 1, %s1599_s22  ;;  %p62_p1 = scmp.ne.s32.totalorder %s1599_s22, %s1595_s21 }
   0xd   : > { %p63_p2 = scmp.eq.s32.totalorder %s1619_s27, 0  ;;  %s1965_s30 = smov (%p34_p0, %s33_s30), 0 }
   0xe   : > { %1944 = sst [smem:[#allocation10_spill]] %s1965_s30  ;;  %s1967_s6 = smov (!%p34_p0, %s44_s6), %s1615_s26 }
   0xf   : > { %s51_s8 = ssub.s32 %s1611_s25, %s1965_s30  ;;  %p1718_p3 = por %p63_p2, %p62_p1 }
  0x10   : > { %p46_p4 = scmp.ge.s32.totalorder %s1967_s6, 2  ;;  %s197_s10 = sadd.s32 1, %s1591_s20 }
  0x11   : > { %p207_p5 = scmp.ne.s32.totalorder %s1591_s20, %s1587_s19  ;;  %p208_p6 = scmp.eq.s32.totalorder %s1219_s28, 3 }
  0x12   : > { %s1969_s6 = smov (%p46_p4, %s1967_s6), 0  ;;  %p213_p8 = scmp.ne.s32.totalorder %s1587_s19, %s1583_s18 }
  0x13   : > { %1946 = sst [smem:[#allocation11_spill]] %s1969_s6  ;;  %p1727_p7 = por %p208_p6, %p207_p5 }
  0x14   : > { %s48_s12 = ssub.s32 %s1615_s26, %s1969_s6  ;;  %p214_p9 = scmp.eq.s32.totalorder %s1220_s29, 3 }
  0x15   : > { %s52_s13 = sor.u32 %s51_s8, %s48_s12  ;;  %p195_p10 = scmp.eq.s32.totalorder %s48_s12, 0 }
  0x16   : > { %p53_p11 = scmp.eq.s32.totalorder %s52_s13, 0  ;;  %p1735_p12 = por %p214_p9, %p213_p8 }
  0x17   : > { %s1740_s15 = scalar_select %p195_p10, %s1591_s20, %s197_s10  }
  0x18   : > { %s1743_s16 = scalar_select %p53_p11, %s1599_s22, %s55_s7  }
  0x19   : > { %1949 = sst [smem:[#allocation12_spill]] %s1740_s15  ;;  %p1223_p13 = scmp.ge.s32.totalorder %s1619_s27, 4 }
  0x1a   : > { %1950 = sst [smem:[#allocation13_spill]] %s1743_s16 }
  0x1b   : > { %238 = sbr.rel (%p1223_p13) target bundleno = 44 (0x2c), region = 20 }
  0x20   : > { %241 = sbr.rel (!%p1718_p3) target bundleno = 44 (0x2c), region = 24  ;;  %s243_s17 = sand.u32 (%p1718_p3), 1, %s1599_s22  }
  0x21   : > { %s1225_s28 = sshll.u32 (%p1718_p3), %s1611_s25, 2  ;;  %s1224_s29 = sshll.u32 (%p1718_p3), %s243_s17, 5 }
  0x22   : > { %s1226_s8 = sshll.u32 (%p1718_p3), %s1615_s26, 4  ;;  %s1951_s0 = sld [smem:[#allocation14_spill]] (%p1718_p3) }
  0x23   : > { %s251_s12 = sadd.s32 (%p1718_p3), %s1226_s8, %s1225_s28  ;;  %s245_s30 = scalar_lea.vmem (%p1718_p3), [#allocation3], %s1224_s29 }
  0x24   : > { %s1227_s13 = sshll.u32 (%p1718_p3), %s251_s12, 2 }
  0x28   : > { %s253_s7 = scalar_lea.vmem %s1951_s0, %s1227_s13 }
  0x29   : > { %v266_v0 = vld [vmem:[%s253_s7] sm:$0xff]  ;;  %v268_v1 = vld [vmem:[%s253_s7 + $0x8] sm:$0xff] }
  0x2a   : > { %v270_v2 = vld [vmem:[%s253_s7 + $0x20] sm:$0xff]  ;;  %267 = vst [vmem:[%s245_s30] sm:$0xff] %v266_v0  ;;  %269 = vst [vmem:[%s245_s30 + $0x8] sm:$0xff] %v268_v1  ;;  %v272_v3 = vld [vmem:[%s253_s7 + $0x28] sm:$0xff] }
  0x2b   : > { %271 = vst [vmem:[%s245_s30 + $0x10] sm:$0xff] %v270_v2  ;;  %273 = vst [vmem:[%s245_s30 + $0x18] sm:$0xff] %v272_v3 }
  0x2c PF: > { %p1228_p0 = scmp.ge.s32.totalorder %s1619_s27, 1  ;;  %p324_p1 = scmp.lt.s32.totalorder %s1619_s27, 5 }
  0x2e   : > { %p325_p2 = pnand %p1228_p0, %p324_p1 }
  0x2f   : > { %s331_s6 = sand.u32 (!%p325_p2), 1, %s1595_s21   ;;  %s1938_s9 = sand.u32 (!%p325_p2), 1, %s1587_s19  }
  0x30   : > { %328 = sbr.rel (%p325_p2) target bundleno = 376 (0x178), region = 59  ;;  %s1229_s17 = sshll.u32 (!%p325_p2), %s331_s6, 5 }
  0x31   : > { %s1230_s28 = sshll.u32 (!%p325_p2), %s1938_s9, 4  ;;  %s1231_s30 = sshll.u32 (!%p325_p2), %s1603_s23, 6 }
  0x32   : > { %p414_p3 = scmp.lt.s32.totalorder (!%p325_p2), %s1607_s24, 1  ;;  %p398_p4 = scmp.lt.s32.totalorder (!%p325_p2), %s1231_s30, 127 }
  0x33   : > { %s1778_s22 = scalar_lea.vmem (!%p325_p2), [#allocation3], %s1229_s17  ;;  %s1780_s15 = scalar_lea.vmem (!%p325_p2), [#allocation4], %s1230_s28 }
  0x34   : > { %p1237_p5 = scmp.ne.s32.totalorder (!%p325_p2), %s1603_s23, 0 }
  0x35   : > { %s415_s29 = scalar_select %p414_p3, %s1607_s24, 1 }
  0x36   : > { %s1971_s30 = smov (!%p398_p4, %s1231_s30), 127  ;;  %443 = sbr.rel (%p1237_p5) target bundleno = 62 (0x3e), region = 67 }
  0x37   : > { %s1234_s8 = sshll.u32 %s415_s29, 1  ;;  %s1315_s12 = sshll.u32 %s415_s29, 4 }
  0x38   : > { %s1314_s13 = sshll.u32 %s1971_s30, 3  ;;  %s1766_s0 = scalar_lea.vmem %s1931_s3, %s1234_s8 }
  0x39   : > { %s1771_s21 = scalar_lea.vmem %s1929_s1, %s1314_s13  ;;  %s1776_s16 = scalar_lea.vmem %s1932_s4, %s1315_s12 }
  0x3b   : > { %v1621_v4 = vmov 0.0  }
  0x3c   : > { %444 = vst [vmem:[#allocation2 + $0x10] sm:$0xff] %v1621_v4  ;;  %445 = vst [vmem:[#allocation2] sm:$0xff] %v1621_v4 }
  0x3d   : > { %446 = vst [vmem:[#allocation2 + $0x18] sm:$0xff] %v1621_v4  ;;  %447 = vst [vmem:[#allocation2 + $0x8] sm:$0xff] %v1621_v4 }
  0x3e PF: > { %v1409_v5 = vld [vmem:[%s1771_s21 + $0x74] ss:$8 sps:$4 sm:$0xff]   ;;  %v1413_v7 = vld [vmem:[%s1771_s21 + $0x70] ss:$8 sps:$4 sm:$0xff]   ;;  %v1415_v9 = vld [vmem:[%s1771_s21 + $0x64] ss:$8 sps:$4 sm:$0xff]  }
  0x3f   : > { %v1411_v6 = vld [vmem:[%s1771_s21 + $0x174] ss:$8 sps:$4 sm:$0xff]   ;;  %860 = vmatprep.subr.bf16.mxu0 %v1409_v5  ;;  %v1414_v8 = vld [vmem:[%s1771_s21 + $0x170] ss:$8 sps:$4 sm:$0xff]   ;;  %v1417_v10 = vld [vmem:[%s1771_s21 + $0x164] ss:$8 sps:$4 sm:$0xff]  }
  0x40   : > { %903 = vmatprep.subr.bf16.mxu1 %v1411_v6  ;;  %861 = vmatpush1.bf16.msra.mxu0 %v1413_v7  ;;  %v1419_v11 = vld [vmem:[%s1771_s21 + $0x60] ss:$8 sps:$4 sm:$0xff]   ;;  %v1421_v13 = vld [vmem:[%s1771_s21 + $0x54] ss:$8 sps:$4 sm:$0xff]   ;;  %v1425_v15 = vld [vmem:[%s1771_s21 + $0x50] ss:$8 sps:$4 sm:$0xff]  }
  0x41   : > { %904 = vmatpush1.bf16.msra.mxu1 %v1414_v8  ;;  %862 = vmatprep.subr.bf16.mxu0 %v1415_v9  ;;  %v1420_v12 = vld [vmem:[%s1771_s21 + $0x160] ss:$8 sps:$4 sm:$0xff]   ;;  %v1423_v14 = vld [vmem:[%s1771_s21 + $0x154] ss:$8 sps:$4 sm:$0xff]   ;;  %v1426_v16 = vld [vmem:[%s1771_s21 + $0x150] ss:$8 sps:$4 sm:$0xff]  }
  0x42   : > { %905 = vmatprep.subr.bf16.mxu1 %v1417_v10  ;;  %v1427_v17 = vld [vmem:[%s1771_s21 + $0x44] ss:$8 sps:$4 sm:$0xff]   ;;  %v1431_v19 = vld [vmem:[%s1771_s21 + $0x40] ss:$8 sps:$4 sm:$0xff]   ;;  %v1433_v21 = vld [vmem:[%s1771_s21 + $0x34] ss:$8 sps:$4 sm:$0xff]  }
  0x43   : > { %v1429_v18 = vld [vmem:[%s1771_s21 + $0x144] ss:$8 sps:$4 sm:$0xff]   ;;  %v1432_v20 = vld [vmem:[%s1771_s21 + $0x140] ss:$8 sps:$4 sm:$0xff]   ;;  %v1435_v22 = vld [vmem:[%s1771_s21 + $0x134] ss:$8 sps:$4 sm:$0xff]  }
  0x44   : > { %863 = vmatpush1.bf16.msra.mxu0 %v1419_v11  ;;  %v1437_v23 = vld [vmem:[%s1771_s21 + $0x30] ss:$8 sps:$4 sm:$0xff]   ;;  %v1439_v25 = vld [vmem:[%s1771_s21 + $0x24] ss:$8 sps:$4 sm:$0xff]   ;;  %v1443_v27 = vld [vmem:[%s1771_s21 + $0x20] ss:$8 sps:$4 sm:$0xff]  }
  0x45   : > { %906 = vmatpush1.bf16.msra.mxu1 %v1420_v12  ;;  %864 = vmatprep.subr.bf16.mxu0 %v1421_v13  ;;  %v1438_v24 = vld [vmem:[%s1771_s21 + $0x130] ss:$8 sps:$4 sm:$0xff]   ;;  %v1441_v26 = vld [vmem:[%s1771_s21 + $0x124] ss:$8 sps:$4 sm:$0xff]   ;;  %v1444_v28 = vld [vmem:[%s1771_s21 + $0x120] ss:$8 sps:$4 sm:$0xff]  }
  0x46   : > { %907 = vmatprep.subr.bf16.mxu1 %v1423_v14  ;;  %v1445_v29 = vld [vmem:[%s1771_s21 + $0x14] ss:$8 sps:$4 sm:$0xff]   ;;  %v1449_v31 = vld [vmem:[%s1771_s21 + $0x10] ss:$8 sps:$4 sm:$0xff]   ;;  %v1451_v33 = vld [vmem:[%s1771_s21 + $0x4] ss:$8 sps:$4 sm:$0xff]  }
  0x47   : > { %v1447_v30 = vld [vmem:[%s1771_s21 + $0x114] ss:$8 sps:$4 sm:$0xff]   ;;  %v1450_v32 = vld [vmem:[%s1771_s21 + $0x110] ss:$8 sps:$4 sm:$0xff]   ;;  %v1453_v34 = vld [vmem:[%s1771_s21 + $0x104] ss:$8 sps:$4 sm:$0xff]  }
  0x48   : > { %865 = vmatpush1.bf16.msra.mxu0 %v1425_v15  ;;  %v1455_v35 = vld [vmem:[%s1771_s21] ss:$8 sps:$4 sm:$0xff]   ;;  %v1457_v37 = vld [vmem:[%s1771_s21 + $0xf4] ss:$8 sps:$4 sm:$0xff]   ;;  %v1461_v39 = vld [vmem:[%s1771_s21 + $0xf0] ss:$8 sps:$4 sm:$0xff]  }
  0x49   : > { %908 = vmatpush1.bf16.msra.mxu1 %v1426_v16  ;;  %866 = vmatprep.subr.bf16.mxu0 %v1427_v17  ;;  %v1456_v36 = vld [vmem:[%s1771_s21 + $0x100] ss:$8 sps:$4 sm:$0xff]   ;;  %v1459_v38 = vld [vmem:[%s1771_s21 + $0x1f4] ss:$8 sps:$4 sm:$0xff]   ;;  %v1462_v40 = vld [vmem:[%s1771_s21 + $0x1f0] ss:$8 sps:$4 sm:$0xff]  }
  0x4a   : > { %909 = vmatprep.subr.bf16.mxu1 %v1429_v18  ;;  %v1463_v41 = vld [vmem:[%s1771_s21 + $0xe4] ss:$8 sps:$4 sm:$0xff]   ;;  %v1467_v43 = vld [vmem:[%s1771_s21 + $0xe0] ss:$8 sps:$4 sm:$0xff]   ;;  %v1469_v45 = vld [vmem:[%s1771_s21 + $0xd4] ss:$8 sps:$4 sm:$0xff]  }
  0x4b   : > { %v1465_v42 = vld [vmem:[%s1771_s21 + $0x1e4] ss:$8 sps:$4 sm:$0xff]   ;;  %v1468_v44 = vld [vmem:[%s1771_s21 + $0x1e0] ss:$8 sps:$4 sm:$0xff]   ;;  %v1471_v46 = vld [vmem:[%s1771_s21 + $0x1d4] ss:$8 sps:$4 sm:$0xff]  }
  0x4c   : > { %867 = vmatpush1.bf16.msra.mxu0 %v1431_v19  ;;  %v1473_v47 = vld [vmem:[%s1771_s21 + $0xd0] ss:$8 sps:$4 sm:$0xff]   ;;  %v1475_v49 = vld [vmem:[%s1771_s21 + $0xc4] ss:$8 sps:$4 sm:$0xff]   ;;  %v1479_v51 = vld [vmem:[%s1771_s21 + $0xc0] ss:$8 sps:$4 sm:$0xff]  }
  0x4d   : > { %910 = vmatpush1.bf16.msra.mxu1 %v1432_v20  ;;  %868 = vmatprep.subr.bf16.mxu0 %v1433_v21  ;;  %v1474_v48 = vld [vmem:[%s1771_s21 + $0x1d0] ss:$8 sps:$4 sm:$0xff]   ;;  %v1477_v50 = vld [vmem:[%s1771_s21 + $0x1c4] ss:$8 sps:$4 sm:$0xff]   ;;  %v1480_v53 = vld [vmem:[%s1771_s21 + $0x1c0] ss:$8 sps:$4 sm:$0xff]  }
  0x4e   : > { %911 = vmatprep.subr.bf16.mxu1 %v1435_v22  ;;  %v1507_v52 = vld [vmem:[%s1778_s22 + $0x4] ss:$16 sps:$4 sm:$0xff]   ;;  %v1510_v56 = vld [vmem:[%s1778_s22 + $0xc] ss:$16 sps:$4 sm:$0xff]   ;;  %v1485_v57 = vld [vmem:[%s1771_s21 + $0xb0] ss:$8 sps:$4 sm:$0xff]  }
  0x4f   : > { %v1481_v54 = vld [vmem:[%s1771_s21 + $0xb4] ss:$8 sps:$4 sm:$0xff]   ;;  %892 = vmatprep.mubr.bf16.mxu0 %v1507_v52  ;;  %935 = vmatprep.mubr.bf16.mxu1 %v1510_v56  ;;  %v1486_v58 = vld [vmem:[%s1771_s21 + $0x1b0] ss:$8 sps:$4 sm:$0xff]   ;;  %v1487_v59 = vld [vmem:[%s1771_s21 + $0xa4] ss:$8 sps:$4 sm:$0xff]  }
  0x50   : > { %869 = vmatpush1.bf16.msra.mxu0 %v1437_v23  ;;  %v1483_v55 = vld [vmem:[%s1771_s21 + $0x1b4] ss:$8 sps:$4 sm:$0xff]   ;;  %v1489_v60 = vld [vmem:[%s1771_s21 + $0x1a4] ss:$8 sps:$4 sm:$0xff]   ;;  %v1491_v61 = vld [vmem:[%s1771_s21 + $0xa0] ss:$8 sps:$4 sm:$0xff]  }
  0x51   : > { %912 = vmatpush1.bf16.msra.mxu1 %v1438_v24  ;;  %870 = vmatprep.subr.bf16.mxu0 %v1439_v25  ;;  %v1492_v62 = vld [vmem:[%s1771_s21 + $0x1a0] ss:$8 sps:$4 sm:$0xff]   ;;  %v1493_v63 = vld [vmem:[%s1771_s21 + $0x94] ss:$8 sps:$4 sm:$0xff]   ;;  %v1497_v1 = vld [vmem:[%s1771_s21 + $0x90] ss:$8 sps:$4 sm:$0xff]  }
  0x52   : > { %913 = vmatprep.subr.bf16.mxu1 %v1441_v26  ;;  %v1495_v0 = vld [vmem:[%s1771_s21 + $0x194] ss:$8 sps:$4 sm:$0xff]   ;;  %v1498_v2 = vld [vmem:[%s1771_s21 + $0x190] ss:$8 sps:$4 sm:$0xff]   ;;  %v1499_v3 = vld [vmem:[%s1771_s21 + $0x84] ss:$8 sps:$4 sm:$0xff]  }
  0x53   : > { %v1501_v4 = vld [vmem:[%s1771_s21 + $0x184] ss:$8 sps:$4 sm:$0xff]   ;;  %v1503_v5 = vld [vmem:[%s1771_s21 + $0x80] ss:$8 sps:$4 sm:$0xff]   ;;  %v448_v10 = vld [vmem:[#allocation2 + $0x10] sm:$0xff]  ;;  %p1306_p6 = scmp.ne.s32.totalorder %s1603_s23, 1 }
  0x54   : > { %871 = vmatpush1.bf16.msra.mxu0 %v1443_v27  ;;  %v1504_v6 = vld [vmem:[%s1771_s21 + $0x180] ss:$8 sps:$4 sm:$0xff]   ;;  %v450_v19 = vld [vmem:[#allocation2 + $0x18] sm:$0xff] }
  0x55   : > { %914 = vmatpush1.bf16.msra.mxu1 %v1444_v28  ;;  %872 = vmatprep.subr.bf16.mxu0 %v1445_v29  ;;  %v1505_v7 = vld [vmem:[%s1778_s22] ss:$16 sps:$4 sm:$0xff]   ;;  %v1508_v8 = vld [vmem:[%s1778_s22 + $0x8] ss:$16 sps:$4 sm:$0xff]  }
  0x56   : > { %915 = vmatprep.subr.bf16.mxu1 %v1447_v30  ;;  %v449_v14 = vld [vmem:[#allocation2] sm:$0xff]  ;;  %v451_v24 = vld [vmem:[#allocation2 + $0x8] sm:$0xff] }
  0x58   : > { %873 = vmatpush1.bf16.msra.mxu0 %v1449_v31 }
  0x59   : > { %916 = vmatpush1.bf16.msra.mxu1 %v1450_v32  ;;  %874 = vmatprep.subr.bf16.mxu0 %v1451_v33 }
  0x5a   : > { %917 = vmatprep.subr.bf16.mxu1 %v1453_v34 }
  0x5c   : > { %875 = vmatpush1.bf16.msra.mxu0 %v1455_v35 }
  0x5d   : > { %918 = vmatpush1.bf16.msra.mxu1 %v1456_v36  ;;  %876 = vmatprep.subr.bf16.mxu0 %v1457_v37 }
  0x5e   : > { %919 = vmatprep.subr.bf16.mxu1 %v1459_v38 }
  0x60   : > { %877 = vmatpush2.bf16.msra.mxu0 %v1461_v39 }
  0x61   : > { %920 = vmatpush2.bf16.msra.mxu1 %v1462_v40  ;;  %878 = vmatprep.subr.bf16.mxu0 %v1463_v41 }
  0x62   : > { %921 = vmatprep.subr.bf16.mxu1 %v1465_v42 }
  0x64   : > { %879 = vmatpush2.bf16.msra.mxu0 %v1467_v43 }
  0x65   : > { %922 = vmatpush2.bf16.msra.mxu1 %v1468_v44  ;;  %880 = vmatprep.subr.bf16.mxu0 %v1469_v45 }
  0x66   : > { %923 = vmatprep.subr.bf16.mxu1 %v1471_v46 }
  0x68   : > { %881 = vmatpush2.bf16.msra.mxu0 %v1473_v47 }
  0x69   : > { %924 = vmatpush2.bf16.msra.mxu1 %v1474_v48  ;;  %882 = vmatprep.subr.bf16.mxu0 %v1475_v49 }
  0x6a   : > { %925 = vmatprep.subr.bf16.mxu1 %v1477_v50 }
  0x6c   : > { %883 = vmatpush2.bf16.msra.mxu0 %v1479_v51 }
  0x6d   : > { %926 = vmatpush2.bf16.msra.mxu1 %v1480_v53  ;;  %884 = vmatprep.subr.bf16.mxu0 %v1481_v54 }
  0x6e   : > { %927 = vmatprep.subr.bf16.mxu1 %v1483_v55 }
  0x70   : > { %885 = vmatpush2.bf16.msra.mxu0 %v1485_v57 }
  0x71   : > { %928 = vmatpush2.bf16.msra.mxu1 %v1486_v58  ;;  %886 = vmatprep.subr.bf16.mxu0 %v1487_v59 }
  0x72   : > { %929 = vmatprep.subr.bf16.mxu1 %v1489_v60 }
  0x74   : > { %887 = vmatpush2.bf16.msra.mxu0 %v1491_v61 }
  0x75   : > { %930 = vmatpush2.bf16.msra.mxu1 %v1492_v62  ;;  %888 = vmatprep.subr.bf16.mxu0 %v1493_v63 }
  0x76   : > { %931 = vmatprep.subr.bf16.mxu1 %v1495_v0 }
  0x78   : > { %889 = vmatpush2.bf16.msra.mxu0 %v1497_v1 }
  0x79   : > { %932 = vmatpush2.bf16.msra.mxu1 %v1498_v2  ;;  %890 = vmatprep.subr.bf16.mxu0 %v1499_v3 }
  0x7a   : > { %933 = vmatprep.subr.bf16.mxu1 %v1501_v4 }
  0x7c   : > { %891 = vmatpush2.bf16.msra.mxu0 %v1503_v5 }
  0x7d   : > { %934 = vmatpush2.bf16.msra.mxu1 %v1504_v6 }
  0x7f   : > { %893 = vmatmul.mubr.bf16.vlgmr.msra.gmra.mxu0 %v1505_v7 }
  0x80   : > { %936 = vmatmul.mubr.bf16.vlgmr.msra.gmra.mxu1 %v1508_v8 }
 0x13f   : > { %v894_v9 = vpop.f32.mrf.mxu0 }
 0x140   : > { %v937_v11 = vpop.f32.mrf.mxu1 }
 0x141   : > { %v938_v12 = vadd.f32 %v937_v11, %v894_v9  ;;  %v896_v13 = vpop.f32.mrf.mxu0 }
 0x142   : > { %v939_v15 = vpop.f32.mrf.mxu1 }
 0x143   : > { %v946_v16 = vadd.f32 %v938_v12, %v448_v10  ;;  %v940_v17 = vadd.f32 %v939_v15, %v896_v13  ;;  %v898_v18 = vpop.f32.mrf.mxu0 }
 0x144   : > { %v941_v20 = vpop.f32.mrf.mxu1 }
 0x145   : > { %950 = vst [vmem:[#allocation2 + $0x10] sm:$0xff] %v946_v16  ;;  %v947_v21 = vadd.f32 %v940_v17, %v449_v14  ;;  %v942_v22 = vadd.f32 %v941_v20, %v898_v18  ;;  %v900_v23 = vpop.f32.mrf.mxu0 }
 0x146   : > { %v943_v25 = vpop.f32.mrf.mxu1 }
 0x147   : > { %951 = vst [vmem:[#allocation2] sm:$0xff] %v947_v21  ;;  %v948_v26 = vadd.f32 %v942_v22, %v450_v19  ;;  %v944_v27 = vadd.f32 %v943_v25, %v900_v23  ;;  %957 = sbr.rel (%p1306_p6) target bundleno = 351 (0x15f), region = 71 }
 0x149   : > { %952 = vst [vmem:[#allocation2 + $0x18] sm:$0xff] %v948_v26  ;;  %v949_v28 = vadd.f32 %v944_v27, %v451_v24 }
 0x14b   : > { %953 = vst [vmem:[#allocation2 + $0x8] sm:$0xff] %v949_v28 }
 0x14c   : > { %v962_v29 = vld [vmem:[%s1930_s2] sm:$0x3]  ;;  %v965_v30 = vlaneseq  ;;  %v958_v37 = vld [vmem:[#allocation2 + $0x10] sm:$0xff]  ;;  %v988_v43 = vld [vmem:[%s1776_s16 + $0x8] sm:$0xff] }
 0x14d   : > { %v993_v31 = vld [vmem:[%s1766_s0] sm:$0x3]  ;;  %v963_v32 = vunpack.c.l.bf16 %v962_v29  ;;  %v991_v53 = vunpack.c.l.bf16 %v988_v43  ;;  %v992_v54 = vunpack.c.h.bf16 %v988_v43 }
 0x14e   : > { %v966_v33 = vshrl.u32 %v965_v30, 7  ;;  %v994_v34 = vunpack.c.l.bf16 %v993_v31  ;;  %v987_v40 = vld [vmem:[%s1776_s16] sm:$0xff] }
 0x14f   : > { %v959_v44 = vld [vmem:[#allocation2] sm:$0xff]  ;;  %v989_v51 = vunpack.c.l.bf16 %v987_v40  ;;  %v990_v52 = vunpack.c.h.bf16 %v987_v40 }
 0x150   : > { %v967_v35 = vsub.s32 0, %v966_v33  ;;  %v971_v36 = vsub.s32 2, %v966_v33  ;;  %v960_v45 = vld [vmem:[#allocation2 + $0x18] sm:$0xff] }
 0x152   : > { %v968_v38 = vrot.slane %v963_v32, %v967_v35  ;;  %v972_v39 = vrot.slane %v963_v32, %v971_v36  ;;  %v999_v41 = vrot.slane %v994_v34, %v967_v35  ;;  %v1003_v42 = vrot.slane %v994_v34, %v971_v36  ;;  %v961_v46 = vld [vmem:[#allocation2 + $0x8] sm:$0xff] }
 0x154   : > { %v978_v47 = vrot.slane %v968_v38, %v967_v35  ;;  %v982_v48 = vrot.slane %v972_v39, %v967_v35  ;;  %v1009_v49 = vrot.slane %v999_v41, %v967_v35  ;;  %v1013_v50 = vrot.slane %v1003_v42, %v967_v35 }
 0x156   : > { %v983_v55 = vadd.f32 %v978_v47, %v958_v37  ;;  %v984_v56 = vadd.f32 %v982_v48, %v959_v44  ;;  %v985_v57 = vadd.f32 %v978_v47, %v960_v45  ;;  %v986_v58 = vadd.f32 %v982_v48, %v961_v46 }
 0x158   : > { %v1014_v59 = vmul.f32 %v1009_v49, %v983_v55  ;;  %v1015_v60 = vmul.f32 %v1013_v50, %v984_v56  ;;  %v1016_v61 = vmul.f32 %v1009_v49, %v985_v57  ;;  %v1017_v62 = vmul.f32 %v1013_v50, %v986_v58 }
 0x15a   : > { %v1018_v63 = vadd.f32 %v1014_v59, %v989_v51  ;;  %v1019_v0 = vadd.f32 %v1015_v60, %v990_v52  ;;  %v1020_v1 = vadd.f32 %v1016_v61, %v991_v53  ;;  %v1021_v2 = vadd.f32 %v1017_v62, %v992_v54 }
 0x15c   : > { %v1316_v3 = vpack.c.bf16 %v1019_v0, %v1018_v63  ;;  %v1317_v4 = vpack.c.bf16 %v1021_v2, %v1020_v1 }
 0x15e   : > { %1034 = vst [vmem:[%s1780_s15] sm:$0xff] %v1316_v3  ;;  %1035 = vst [vmem:[%s1780_s15 + $0x8] sm:$0xff] %v1317_v4 }
 0x15f PF: > { %s1318_s0 = sshll.u32 %s1607_s24, 8  ;;  %s1055_s9 = sshll.u32 %s1780_s15, 4  ;;  %s1867_s9 = int_to_ptr.vmem [resolvable:$true] %s1055_s9 }
 0x160   : > { %s1864_s16 = scalar_lea.hbm %s1933_s5, %s1318_s0  ;;  %s1952_s17 = sand.u32 1, %s1587_s19  }
 0x161   : > { %s1871_s28 = scalar_lea.sflag [#allocation5], %s1952_s17  ;;  %s1511_s30 = scalar_lea.vmem %s1867_s9, 256 }
 0x162   : > { %p1512_p8 = scmp.ne.s32.totalorder %s1867_s9, %s1511_s30  ;;  %s1622_s24 = smov [#allocation4]  }
 0x163   : > { %s1515_s29 = sshll.u32 %s1622_s24, 4  ;;  %s1516_s29 = int_to_ptr.vmem [resolvable:$false] %s1515_s29 }
 0x164   : > { %p1513_p9 = pnand %p1512_p8, %p1727_p7  ;;  %s1517_s8 = scalar_lea.vmem %s1516_s29, 512 }
 0x165   : > { %p1518_p11 = scmp.lt.s32.totalorder %s1867_s9, %s1516_s29  ;;  %p1519_p13 = scmp.lt.s32.totalorder %s1517_s8, %s1511_s30 }
 0x166   : > { %p1514_p10 = pneg %p1513_p9 }
 0x167   : > { %p1520_p0 = por %p1519_p13, %p1518_p11 }
 0x169   : > { %p1521_p1 = pnand %p1520_p0, %p1514_p10 }
 0x16b   : > { %1524 = shalt.err (!%p1521_p1)
}
 0x16c   : > { %s1525_s15 = scalar_lea.hbm %s1864_s16, 256  ;;  %s1529_s10 = scalar_lea.hbm %s1933_s5, 512 }
 0x16d   : > { %p1526_p2 = scmp.ne.s32.totalorder %s1864_s16, %s1525_s15  ;;  %p1530_p5 = scmp.lt.s32.totalorder %s1864_s16, %s1933_s5 }
 0x16e   : > { %p1531_p6 = scmp.lt.s32.totalorder %s1529_s10, %s1525_s15 }
 0x16f   : > { %p1527_p3 = pnand %p1526_p2, %p1727_p7 }
 0x170   : > { %p1532_p8 = por %p1531_p6, %p1530_p5 }
 0x171   : > { %p1528_p4 = pneg %p1527_p3 }
 0x173   : > { %p1533_p9 = pnand %p1532_p8, %p1528_p4 }
 0x175   : > { %1536 = shalt.err (!%p1533_p9)
}
 0x176   : > { %s1623_s6 = smov 128   ;;  %s1624_s22 = smov 8  }
 0x177   : > { %1319 = dma.vmem_to_hbm [thread:$0]  (%p1727_p7), %s1867_s9, 256, %s1864_s16, %s1871_s28, %s1623_s6, %s1623_s6, %s1624_s22  }
 0x178 PF: > { %p1325_p10 = scmp.ge.s32.totalorder %s1619_s27, 2  ;;  %s1070_s25 = sand.u32 1, %s1583_s18  }
 0x179   : > { %s1071_s0 = scalar_lea.sflag [#allocation5], %s1070_s25 }
 0x17a   : > { %p1322_p11 = pnand %p1325_p10, %p1735_p12 }
 0x17c   : > { %p1323_p13 = pneg %p1322_p11 }
 0x17e   : > { %1578 = dma.done.wait (%p1323_p13), %s1071_s0, 256  }
 0x17f   : > { %1580 = vsyncadd (%p1323_p13), %s1071_s0, 4294967040  ;;  %s18_s27 = sadd.s32 1, %s1619_s27   ;;  %s1953_s23 = sld [smem:[#allocation12_spill]] }
 0x180   : > { %p15_p0 = scmp.ge.s32.totalorder %s18_s27, 6   ;;  %s1954_s21 = sld [smem:[#allocation7_spill]] }
 0x181   : > { %s1955_s22 = sld [smem:[#allocation13_spill]]  ;;  %s1960_s18 = smov %s1587_s19 }
 0x182   : > { %s1956_s11 = sld [smem:[#allocation8_spill]]  ;;  %s1961_s19 = smov %s1591_s20 }
 0x183   : > { %s1957_s24 = sld [smem:[#allocation9_spill]] }
 0x184   : > { %s1958_s25 = sld [smem:[#allocation10_spill]]  ;;  %17 = sbr.rel (!%p15_p0) target bundleno = 8 (0x8), region = 123 }
 0x185   : > { %s1959_s26 = sld [smem:[#allocation11_spill]]  ;;  %s1962_s20 = smov %s1953_s23 }
 0x188   : > { %s1963_s23 = smov %s1956_s11 }
 0x189   :  { %1076 = vsyncpa [#allocation5], 1 }
 0x18a   :  { %1078 = vsyncpa [#allocation5 + $0x1], 1 }

</bundles_post_ra>
